<compile_context>
chip_gen: v7x
topology: tpu7x:2x2x1
jax: 0.10.0
libtpu: 0.0.40
codegen_flags: <defaults>
</compile_context>

<pallas_src>
import re

import jax
import jax.numpy as jnp
from jax import lax
from jax.experimental import pallas as pl
from jax.experimental.pallas import tpu as pltpu

GAMMA = 5.0
ETA = 1.0
NU = 1.0
SIGMA = 0.1
_INV_SQRT3 = 1.0 / (3.0 ** 0.5)
_PROX_SCALE = 1.0 / (2.0 * SIGMA ** 2)


def _tpu_generation():
    """Best-effort TPU generation from device_kind; 0 if unknown / non-TPU."""
    try:
        kind = jax.devices()[0].device_kind  # e.g. "TPU v5 lite", "TPU v6e"
        m = re.search(r"(\d+)", kind)
        return int(m.group(1)) if m else 0
    except Exception:
        return 0


def _make_fpc_kernel(flow_tau, color_tau, prox_tau, *, eup_dtype,
                     approx_reciprocal):
    taus = (float(flow_tau), float(color_tau), float(prox_tau))
    eup = jnp.dtype(eup_dtype)
    # ETA == NU is a trace-time Python constant; if these ever become traced
    # values the shared-exp identity below must be disabled.
    share_exp = (ETA == NU)

    def gram(x):  # (Bt, N, K) -> (Bt, N, N); batched x @ x^T, f32 accumulate.
        return lax.dot_general(
            x, x, (((2,), (2,)), ((0,), (0,))),
            preferred_element_type=jnp.float32)

    def kernel(feat_ref, flow_ref, color_ref, coord_ref, loss_ref):
        feat = feat_ref[...].astype(jnp.float32)             # (Bt, N, D)

        # within_sample_contrastive_loss: L2-normalize feature rows (rsqrt).
        # TODO(synk): eps placement differs slightly from the reference
        # (1e-14 under rsqrt vs 1e-7 added to the norm); identical for
        # non-degenerate rows.
        featn = feat * lax.rsqrt(
            jnp.sum(feat * feat, axis=2, keepdims=True) + 1e-14)
        fs = gram(featn)                                      # (Bt,N,N) symmetric
        if share_exp:
            # exp(-NU*fs) is shared by all three loss types (ETA == NU).
            exp_neg_nufs = jnp.exp((-NU * fs).astype(eup))

        def pairwise_dist(x):
            # ||x_i - x_j|| from the f32 Gram; only the sqrt runs in `eup`.
            sq = jnp.sum(x * x, axis=2, keepdims=True)        # (Bt, N, 1)
            d2 = jnp.maximum(sq + jnp.swapaxes(sq, 1, 2) - 2.0 * gram(x), 0.0)
            # TODO(synk): forward-only; autodiff would need an eps inside the
            # sqrt (sqrt(0) on the diagonal has an infinite gradient).
            return jnp.sqrt(d2.astype(eup))

        # Similarities are built just-in-time so at most ~3 (Bt,N,N) arrays
        # are live at once (fs, exp_neg_nufs, the current sim).
        def flow_sim():
            # calculate_flow_similarity: cosine sim == Gram of normalized rows.
            fl = flow_ref[...].astype(jnp.float32)
            fln = fl * lax.rsqrt(
                jnp.sum(fl * fl, axis=2, keepdims=True) + 1e-12)
            return gram(fln)

        def color_sim():
            # calculate_color_similarity: 1 - cdist(color/255) / sqrt(3).
            co = color_ref[...].astype(jnp.float32) * (1.0 / 255.0)
            return 1.0 - pairwise_dist(co) * _INV_SQRT3

        def prox_sim():
            # calculate_proximity_similarity: exp(-cdist(coord)/(2*sigma^2)).
            pt = coord_ref[...].astype(jnp.float32)
            return jnp.exp((-pairwise_dist(pt) * _PROX_SCALE).astype(eup))

        def per_point_row(sim, tau):
            # One exp + one reciprocal per type; g_minus = 1 - g_plus exactly.
            z = jnp.exp((GAMMA * (tau - sim)).astype(eup))
            one_plus_z = (1.0 + z).astype(jnp.float32)
            if approx_reciprocal:
                # EUP vrcp shares the saturated EUP slot but is still the
                # cheapest correct option; exact fallback kept via the kwarg.
                g_plus = pl.reciprocal(one_plus_z, approx=True)
            else:
                g_plus = 1.0 / one_plus_z
            s_plus = fs * g_plus
            e_plus = jnp.exp((ETA * s_plus).astype(eup))
            if share_exp:
                # exp(-NU*(fs - s_plus)) == exp(NU*s_plus) * exp(-NU*fs),
                # and exp(NU*s_plus) == e_plus because ETA == NU.
                e_minus = e_plus * exp_neg_nufs
            else:
                e_minus = jnp.exp((-NU * (fs - s_plus)).astype(eup))
            # Matrices are symmetric, so the reference's dim=1 row-sum equals
            # this cross-sublane reduce -> lane-dense (Bt, 1, N) rows.
            # Sums and logs stay in f32 regardless of the EUP dtype.
            se_plus = jnp.sum(e_plus.astype(jnp.float32), axis=1, keepdims=True)
            se_minus = jnp.sum(e_minus.astype(jnp.float32), axis=1, keepdims=True)
            return (jnp.log(1.0 + se_plus) * (1.0 / ETA)
                    + jnp.log(1.0 + se_minus) * (1.0 / NU))

        rows = [per_point_row(make_sim(), tau)
                for make_sim, tau in ((flow_sim, taus[0]),
                                      (color_sim, taus[1]),
                                      (prox_sim, taus[2]))]
        loss_ref[...] = jnp.concatenate(rows, axis=1).astype(loss_ref.dtype)

    return kernel


def flow_point_contrast_loss(feat, flow, color, coord, *,
                             flow_tau=0.8, color_tau=0.7, prox_tau=0.5,
                             flow_weight=1.0, color_weight=1.0,
                             prox_weight=1.0, samples_per_step=None,
                             eup_dtype=None, core_parallel=None,
                             approx_reciprocal=True):
    """Pallas implementation of FlowPointContrast.forward (single device)."""
    B, N, D = feat.shape
    gen = _tpu_generation()

    # bf16 EUP transcendentals on v6e / v7x (packed 2x throughput on the
    # binding EUP slot); f32 on v5e and older / unknown chips.
    if eup_dtype is None:
        eup_dtype = jnp.bfloat16 if gen >= 6 else jnp.float32

    # Bt samples per grid step: amortizes the ~0.35 us/step fixed cost.
    # Bt <= 8 keeps live (Bt,N,N) intermediates comfortably inside v7x's
    # 64 MiB VMEM with the default scoped limit and Buffered(2) pipelining.
    if samples_per_step is None:
        samples_per_step = max(bt for bt in range(1, min(B, 8) + 1)
                               if B % bt == 0)
    Bt = int(samples_per_step)
    if B % Bt != 0:
        raise ValueError(f"samples_per_step={Bt} must divide batch size {B}")
    steps = B // Bt

    # v7x has 2 TensorCores/chip: shard the grid across cores when it splits
    # evenly; plain "parallel" everywhere else (no-op on 1-TC chips).
    if core_parallel is None:
        core_parallel = (gen >= 7) and (steps % 2 == 0)
    semantics = (pltpu.CORE_PARALLEL,) if core_parallel else ("parallel",)

    kernel = _make_fpc_kernel(flow_tau, color_tau, prox_tau,
                              eup_dtype=eup_dtype,
                              approx_reciprocal=approx_reciprocal)

    per_point = pl.pallas_call(
        kernel,
        out_shape=jax.ShapeDtypeStruct((B, 3, N), jnp.float32),
        grid_spec=pltpu.PrefetchScalarGridSpec(
            num_scalar_prefetch=0,
            grid=(steps,),
            in_specs=[pl.BlockSpec((Bt, N, D), lambda g: (g, 0, 0)),
                      pl.BlockSpec((Bt, N, 3), lambda g: (g, 0, 0)),
                      pl.BlockSpec((Bt, N, 3), lambda g: (g, 0, 0)),
                      pl.BlockSpec((Bt, N, 3), lambda g: (g, 0, 0))],
            out_specs=pl.BlockSpec((Bt, 3, N), lambda g: (g, 0, 0))),
        compiler_params=pltpu.CompilerParams(dimension_semantics=semantics),
    )(feat.astype(jnp.float32), flow.astype(jnp.float32),
      color.astype(jnp.float32), coord.astype(jnp.float32))

    per_sample = jnp.mean(per_point, axis=2)   # mean over points  -> (B, 3)
    per_type = -jnp.mean(per_sample, axis=0)   # -mean over batch  -> (3,)
    # get_world_size() == 1 here: no all_reduce, division by 1.
    return (flow_weight * per_type[0]
            + color_weight * per_type[1]
            + prox_weight * per_type[2])


def synthetic_backbone(coord, color, flow, W, b):
    # TODO(synk): stands in for build_model(backbone) -- a point-wise
    # linear + tanh with deterministic weights (no checkpoint load).
    x = jnp.concatenate([coord, color / 255.0, flow], axis=-1)   # (B, N, 9)
    return jnp.tanh(jnp.einsum("bnc,cd->bnd", x, W) + b)


def reference_loss(feat, flow, color, coord, *,
                   flow_tau=0.8, color_tau=0.7, prox_tau=0.5,
                   flow_weight=1.0, color_weight=1.0, prox_weight=1.0):
    """Pure-JAX reference mirroring the PyTorch math (for a sanity check)."""
    B = feat.shape[0]
    sums = jnp.zeros((3,), jnp.float32)
    for i in range(B):
        f, fl, co, pt = feat[i], flow[i], color[i] / 255.0, coord[i]
        fn = f / (jnp.linalg.norm(f, axis=1, keepdims=True) + 1e-7)
        fs = fn @ fn.T
        fnorm = jnp.linalg.norm(fl, axis=-1)
        flow_sim = (fl @ fl.T) / (fnorm[:, None] * fnorm[None, :] + 1e-8)
        cd = jnp.sqrt(jnp.sum((co[:, None, :] - co[None, :, :]) ** 2, -1))
        color_sim = 1.0 - cd / jnp.sqrt(3.0)
        pd = jnp.sqrt(jnp.sum((pt[:, None, :] - pt[None, :, :]) ** 2, -1))
        prox_sim = jnp.exp(-pd / (2.0 * SIGMA ** 2))

        def cl(sim, tau):
            gp = 1.0 / (1.0 + jnp.exp(GAMMA * (tau - sim)))
            gm = 1.0 / (1.0 + jnp.exp(GAMMA * (sim - tau)))
            sep = jnp.sum(jnp.exp(ETA * (fs * gp)), axis=1)
            sem = jnp.sum(jnp.exp(-NU * (fs * gm)), axis=1)
            return jnp.mean(jnp.log(1.0 + sep) / ETA + jnp.log(1.0 + sem) / NU)

        sums = sums + jnp.stack([cl(flow_sim, flow_tau),
                                 cl(color_sim, color_tau),
                                 cl(prox_sim, prox_tau)])
    per_type = -(sums / B)
    return (flow_weight * per_type[0] + color_weight * per_type[1]
            + prox_weight * per_type[2])


if __name__ == "__main__":
    key = jax.random.PRNGKey(0)
    B, N, D = 2, 128, 32          # 2 samples, 128 points each, 32-d features
    k1, k2, k3, k4, k5 = jax.random.split(key, 5)

    # data_dict analog (flat point lists + offsets, as in the PyTorch module)
    coord_flat = jax.random.normal(k1, (B * N, 3), jnp.float32)
    color_flat = jax.random.uniform(k2, (B * N, 3), jnp.float32,
                                    minval=0.0, maxval=255.0)
    flow_flat = jax.random.normal(k3, (B * N, 3), jnp.float32)
    offset = jnp.array([N, 2 * N], jnp.int32)  # noqa: F841

    # TODO(synk): ragged per-sample splits from `offset` are not supported in
    # the batched kernel; equal-size samples are assumed so split == reshape.
    coord = coord_flat.reshape(B, N, 3)
    color = color_flat.reshape(B, N, 3)
    flow = flow_flat.reshape(B, N, 3)

    # deterministic synthetic backbone parameters
    W = 0.1 * jax.random.normal(k4, (9, D), jnp.float32)
    bias = 0.01 * jax.random.normal(k5, (D,), jnp.float32)
    feat = synthetic_backbone(coord, color, flow, W, bias)

    ref = jax.block_until_ready(reference_loss(feat, flow, color, coord))

    # 1) Exact-transcendental path (f32 EUP, exact reciprocal): tight check.
    loss_exact = jax.block_until_ready(
        flow_point_contrast_loss(feat, flow, color, coord,
                                 eup_dtype=jnp.float32,
                                 approx_reciprocal=False))
    assert jnp.isfinite(loss_exact), "non-finite loss (exact path)"
    assert jnp.allclose(loss_exact, ref, rtol=1e-3, atol=1e-3), (loss_exact, ref)

    # 2) Default performance path (bf16 EUP on v6e/v7x + approx reciprocal):
    #    bf16-appropriate tolerance; if this chip's toolchain rejects bf16
    #    transcendentals, fall back to the f32 EUP path.
    try:
        loss = jax.block_until_ready(
            flow_point_contrast_loss(feat, flow, color, coord))
    except Exception:
        loss = jax.block_until_ready(
            flow_point_contrast_loss(feat, flow, color, coord,
                                     eup_dtype=jnp.float32))
    assert jnp.isfinite(loss), "non-finite loss (performance path)"
    assert jnp.allclose(loss, ref, rtol=5e-3, atol=5e-3), (loss, ref)

    print("KERNEL_OK")
</pallas_src>

<mosaic_0001>
module attributes {stable_mosaic.version = 11 : i64} {
  func.func @kernel(%arg0: i32, %arg1: memref<2x128x32xf32, #tpu.memory_space<vmem>>, %arg2: memref<2x128x3xf32, #tpu.memory_space<vmem>>, %arg3: memref<2x128x3xf32, #tpu.memory_space<vmem>>, %arg4: memref<2x128x3xf32, #tpu.memory_space<vmem>>, %arg5: memref<2x3x128xf32, #tpu.memory_space<vmem>>) attributes {dimension_semantics = [#tpu.dimension_semantics<parallel>], iteration_bounds = array<i64: 1>, scalar_prefetch = 0 : i64, scratch_operands = 0 : i64, tpu.core_type = #tpu.core_type<tc>, window_params = [{transform_indices = @transform_0, window_bounds = array<i64: 2, 128, 32>}, {transform_indices = @transform_1, window_bounds = array<i64: 2, 128, 3>}, {transform_indices = @transform_2, window_bounds = array<i64: 2, 128, 3>}, {transform_indices = @transform_3, window_bounds = array<i64: 2, 128, 3>}, {transform_indices = @transform_4, window_bounds = array<i64: 2, 3, 128>}]} {
    %c0 = arith.constant 0 : index
    %c0_0 = arith.constant 0 : index
    %c0_1 = arith.constant 0 : index
    %0 = vector.load %arg1[%c0, %c0_0, %c0_1] : memref<2x128x32xf32, #tpu.memory_space<vmem>>, vector<2x128x32xf32>
    %1 = arith.mulf %0, %0 : vector<2x128x32xf32>
    %cst = arith.constant dense<0.000000e+00> : vector<2x128xf32>
    %2 = vector.multi_reduction <add>, %1, %cst [2] : vector<2x128x32xf32> to vector<2x128xf32>
    %3 = vector.shape_cast %2 : vector<2x128xf32> to vector<2x128x1xf32>
    %cst_2 = arith.constant 9.99999982E-15 : f32
    %4 = vector.broadcast %cst_2 : f32 to vector<2x128x1xf32>
    %5 = arith.addf %3, %4 : vector<2x128x1xf32>
    %6 = math.rsqrt %5 : vector<2x128x1xf32>
    %7 = vector.broadcast %6 : vector<2x128x1xf32> to vector<2x128x32xf32>
    %8 = arith.mulf %0, %7 : vector<2x128x32xf32>
    %cst_3 = arith.constant dense<0.000000e+00> : vector<2x128x128xf32>
    %9 = tpu.matmul %8, %8, %cst_3 {dimension_numbers = #tpu.dot_dimension_numbers<[2], [2], [1], [1], [0, 0, 0, 1, 1, 1], [0], [0]>} : vector<2x128x32xf32>, vector<2x128x32xf32>, vector<2x128x128xf32> -> vector<2x128x128xf32>
    %cst_4 = arith.constant -1.000000e+00 : f32
    %10 = vector.broadcast %cst_4 : f32 to vector<2x128x128xf32>
    %11 = arith.mulf %10, %9 : vector<2x128x128xf32>
    %12 = math.exp %11 : vector<2x128x128xf32>
    %c0_5 = arith.constant 0 : index
    %c0_6 = arith.constant 0 : index
    %c0_7 = arith.constant 0 : index
    %13 = vector.load %arg2[%c0_5, %c0_6, %c0_7] : memref<2x128x3xf32, #tpu.memory_space<vmem>>, vector<2x128x3xf32>
    %14 = arith.mulf %13, %13 : vector<2x128x3xf32>
    %cst_8 = arith.constant dense<0.000000e+00> : vector<2x128xf32>
    %15 = vector.multi_reduction <add>, %14, %cst_8 [2] : vector<2x128x3xf32> to vector<2x128xf32>
    %16 = vector.shape_cast %15 : vector<2x128xf32> to vector<2x128x1xf32>
    %cst_9 = arith.constant 9.99999996E-13 : f32
    %17 = vector.broadcast %cst_9 : f32 to vector<2x128x1xf32>
    %18 = arith.addf %16, %17 : vector<2x128x1xf32>
    %19 = math.rsqrt %18 : vector<2x128x1xf32>
    %20 = vector.broadcast %19 : vector<2x128x1xf32> to vector<2x128x3xf32>
    %21 = arith.mulf %13, %20 : vector<2x128x3xf32>
    %cst_10 = arith.constant dense<0.000000e+00> : vector<2x128x128xf32>
    %22 = tpu.matmul %21, %21, %cst_10 {dimension_numbers = #tpu.dot_dimension_numbers<[2], [2], [1], [1], [0, 0, 0, 1, 1, 1], [0], [0]>} : vector<2x128x3xf32>, vector<2x128x3xf32>, vector<2x128x128xf32> -> vector<2x128x128xf32>
    %cst_11 = arith.constant 8.000000e-01 : f32
    %23 = vector.broadcast %cst_11 : f32 to vector<2x128x128xf32>
    %24 = arith.subf %23, %22 : vector<2x128x128xf32>
    %cst_12 = arith.constant 5.000000e+00 : f32
    %25 = vector.broadcast %cst_12 : f32 to vector<2x128x128xf32>
    %26 = arith.mulf %25, %24 : vector<2x128x128xf32>
    %27 = math.exp %26 : vector<2x128x128xf32>
    %cst_13 = arith.constant 1.000000e+00 : f32
    %28 = vector.broadcast %cst_13 : f32 to vector<2x128x128xf32>
    %29 = arith.addf %28, %27 : vector<2x128x128xf32>
    %cst_14 = arith.constant 1.000000e+00 : f32
    %30 = vector.broadcast %cst_14 : f32 to vector<2x128x128xf32>
    %31 = arith.divf %30, %29 : vector<2x128x128xf32>
    %32 = arith.mulf %9, %31 : vector<2x128x128xf32>
    %cst_15 = arith.constant 1.000000e+00 : f32
    %33 = vector.broadcast %cst_15 : f32 to vector<2x128x128xf32>
    %34 = arith.mulf %33, %32 : vector<2x128x128xf32>
    %35 = math.exp %34 : vector<2x128x128xf32>
    %36 = arith.mulf %35, %12 : vector<2x128x128xf32>
    %cst_16 = arith.constant dense<0.000000e+00> : vector<2x128xf32>
    %37 = vector.multi_reduction <add>, %35, %cst_16 [1] : vector<2x128x128xf32> to vector<2x128xf32>
    %38 = vector.shape_cast %37 : vector<2x128xf32> to vector<2x1x128xf32>
    %cst_17 = arith.constant dense<0.000000e+00> : vector<2x128xf32>
    %39 = vector.multi_reduction <add>, %36, %cst_17 [1] : vector<2x128x128xf32> to vector<2x128xf32>
    %40 = vector.shape_cast %39 : vector<2x128xf32> to vector<2x1x128xf32>
    %cst_18 = arith.constant 1.000000e+00 : f32
    %41 = vector.broadcast %cst_18 : f32 to vector<2x1x128xf32>
    %42 = arith.addf %41, %38 : vector<2x1x128xf32>
    %43 = math.log %42 : vector<2x1x128xf32>
    %cst_19 = arith.constant 1.000000e+00 : f32
    %44 = vector.broadcast %cst_19 : f32 to vector<2x1x128xf32>
    %45 = arith.mulf %43, %44 : vector<2x1x128xf32>
    %cst_20 = arith.constant 1.000000e+00 : f32
    %46 = vector.broadcast %cst_20 : f32 to vector<2x1x128xf32>
    %47 = arith.addf %46, %40 : vector<2x1x128xf32>
    %48 = math.log %47 : vector<2x1x128xf32>
    %cst_21 = arith.constant 1.000000e+00 : f32
    %49 = vector.broadcast %cst_21 : f32 to vector<2x1x128xf32>
    %50 = arith.mulf %48, %49 : vector<2x1x128xf32>
    %51 = arith.addf %45, %50 : vector<2x1x128xf32>
    %c0_22 = arith.constant 0 : index
    %c0_23 = arith.constant 0 : index
    %c0_24 = arith.constant 0 : index
    %52 = vector.load %arg3[%c0_22, %c0_23, %c0_24] : memref<2x128x3xf32, #tpu.memory_space<vmem>>, vector<2x128x3xf32>
    %cst_25 = arith.constant 0.00392156886 : f32
    %53 = vector.broadcast %cst_25 : f32 to vector<2x128x3xf32>
    %54 = arith.mulf %52, %53 : vector<2x128x3xf32>
    %55 = arith.mulf %54, %54 : vector<2x128x3xf32>
    %cst_26 = arith.constant dense<0.000000e+00> : vector<2x128xf32>
    %56 = vector.multi_reduction <add>, %55, %cst_26 [2] : vector<2x128x3xf32> to vector<2x128xf32>
    %57 = vector.shape_cast %56 : vector<2x128xf32> to vector<2x128x1xf32>
    %58 = tpu.transpose %57, [0, 2, 1] : vector<2x128x1xf32> -> vector<2x1x128xf32>
    %59 = vector.broadcast %57 : vector<2x128x1xf32> to vector<2x128x128xf32>
    %60 = vector.broadcast %58 : vector<2x1x128xf32> to vector<2x128x128xf32>
    %61 = arith.addf %59, %60 : vector<2x128x128xf32>
    %cst_27 = arith.constant dense<0.000000e+00> : vector<2x128x128xf32>
    %62 = tpu.matmul %54, %54, %cst_27 {dimension_numbers = #tpu.dot_dimension_numbers<[2], [2], [1], [1], [0, 0, 0, 1, 1, 1], [0], [0]>} : vector<2x128x3xf32>, vector<2x128x3xf32>, vector<2x128x128xf32> -> vector<2x128x128xf32>
    %cst_28 = arith.constant 2.000000e+00 : f32
    %63 = vector.broadcast %cst_28 : f32 to vector<2x128x128xf32>
    %64 = arith.mulf %63, %62 : vector<2x128x128xf32>
    %65 = arith.subf %61, %64 : vector<2x128x128xf32>
    %cst_29 = arith.constant 0.000000e+00 : f32
    %66 = vector.broadcast %cst_29 : f32 to vector<2x128x128xf32>
    %67 = arith.maximumf %65, %66 : vector<2x128x128xf32>
    %68 = math.sqrt %67 : vector<2x128x128xf32>
    %cst_30 = arith.constant 0.577350259 : f32
    %69 = vector.broadcast %cst_30 : f32 to vector<2x128x128xf32>
    %70 = arith.mulf %68, %69 : vector<2x128x128xf32>
    %cst_31 = arith.constant 1.000000e+00 : f32
    %71 = vector.broadcast %cst_31 : f32 to vector<2x128x128xf32>
    %72 = arith.subf %71, %70 : vector<2x128x128xf32>
    %cst_32 = arith.constant 0.699999988 : f32
    %73 = vector.broadcast %cst_32 : f32 to vector<2x128x128xf32>
    %74 = arith.subf %73, %72 : vector<2x128x128xf32>
    %cst_33 = arith.constant 5.000000e+00 : f32
    %75 = vector.broadcast %cst_33 : f32 to vector<2x128x128xf32>
    %76 = arith.mulf %75, %74 : vector<2x128x128xf32>
    %77 = math.exp %76 : vector<2x128x128xf32>
    %cst_34 = arith.constant 1.000000e+00 : f32
    %78 = vector.broadcast %cst_34 : f32 to vector<2x128x128xf32>
    %79 = arith.addf %78, %77 : vector<2x128x128xf32>
    %cst_35 = arith.constant 1.000000e+00 : f32
    %80 = vector.broadcast %cst_35 : f32 to vector<2x128x128xf32>
    %81 = arith.divf %80, %79 : vector<2x128x128xf32>
    %82 = arith.mulf %9, %81 : vector<2x128x128xf32>
    %cst_36 = arith.constant 1.000000e+00 : f32
    %83 = vector.broadcast %cst_36 : f32 to vector<2x128x128xf32>
    %84 = arith.mulf %83, %82 : vector<2x128x128xf32>
    %85 = math.exp %84 : vector<2x128x128xf32>
    %86 = arith.mulf %85, %12 : vector<2x128x128xf32>
    %cst_37 = arith.constant dense<0.000000e+00> : vector<2x128xf32>
    %87 = vector.multi_reduction <add>, %85, %cst_37 [1] : vector<2x128x128xf32> to vector<2x128xf32>
    %88 = vector.shape_cast %87 : vector<2x128xf32> to vector<2x1x128xf32>
    %cst_38 = arith.constant dense<0.000000e+00> : vector<2x128xf32>
    %89 = vector.multi_reduction <add>, %86, %cst_38 [1] : vector<2x128x128xf32> to vector<2x128xf32>
    %90 = vector.shape_cast %89 : vector<2x128xf32> to vector<2x1x128xf32>
    %cst_39 = arith.constant 1.000000e+00 : f32
    %91 = vector.broadcast %cst_39 : f32 to vector<2x1x128xf32>
    %92 = arith.addf %91, %88 : vector<2x1x128xf32>
    %93 = math.log %92 : vector<2x1x128xf32>
    %cst_40 = arith.constant 1.000000e+00 : f32
    %94 = vector.broadcast %cst_40 : f32 to vector<2x1x128xf32>
    %95 = arith.mulf %93, %94 : vector<2x1x128xf32>
    %cst_41 = arith.constant 1.000000e+00 : f32
    %96 = vector.broadcast %cst_41 : f32 to vector<2x1x128xf32>
    %97 = arith.addf %96, %90 : vector<2x1x128xf32>
    %98 = math.log %97 : vector<2x1x128xf32>
    %cst_42 = arith.constant 1.000000e+00 : f32
    %99 = vector.broadcast %cst_42 : f32 to vector<2x1x128xf32>
    %100 = arith.mulf %98, %99 : vector<2x1x128xf32>
    %101 = arith.addf %95, %100 : vector<2x1x128xf32>
    %c0_43 = arith.constant 0 : index
    %c0_44 = arith.constant 0 : index
    %c0_45 = arith.constant 0 : index
    %102 = vector.load %arg4[%c0_43, %c0_44, %c0_45] : memref<2x128x3xf32, #tpu.memory_space<vmem>>, vector<2x128x3xf32>
    %103 = arith.mulf %102, %102 : vector<2x128x3xf32>
    %cst_46 = arith.constant dense<0.000000e+00> : vector<2x128xf32>
    %104 = vector.multi_reduction <add>, %103, %cst_46 [2] : vector<2x128x3xf32> to vector<2x128xf32>
    %105 = vector.shape_cast %104 : vector<2x128xf32> to vector<2x128x1xf32>
    %106 = tpu.transpose %105, [0, 2, 1] : vector<2x128x1xf32> -> vector<2x1x128xf32>
    %107 = vector.broadcast %105 : vector<2x128x1xf32> to vector<2x128x128xf32>
    %108 = vector.broadcast %106 : vector<2x1x128xf32> to vector<2x128x128xf32>
    %109 = arith.addf %107, %108 : vector<2x128x128xf32>
    %cst_47 = arith.constant dense<0.000000e+00> : vector<2x128x128xf32>
    %110 = tpu.matmul %102, %102, %cst_47 {dimension_numbers = #tpu.dot_dimension_numbers<[2], [2], [1], [1], [0, 0, 0, 1, 1, 1], [0], [0]>} : vector<2x128x3xf32>, vector<2x128x3xf32>, vector<2x128x128xf32> -> vector<2x128x128xf32>
    %cst_48 = arith.constant 2.000000e+00 : f32
    %111 = vector.broadcast %cst_48 : f32 to vector<2x128x128xf32>
    %112 = arith.mulf %111, %110 : vector<2x128x128xf32>
    %113 = arith.subf %109, %112 : vector<2x128x128xf32>
    %cst_49 = arith.constant 0.000000e+00 : f32
    %114 = vector.broadcast %cst_49 : f32 to vector<2x128x128xf32>
    %115 = arith.maximumf %113, %114 : vector<2x128x128xf32>
    %116 = math.sqrt %115 : vector<2x128x128xf32>
    %cst_50 = arith.constant 0.000000e+00 : f32
    %117 = vector.broadcast %cst_50 : f32 to vector<2x128x128xf32>
    %118 = arith.subf %117, %116 : vector<2x128x128xf32>
    %cst_51 = arith.constant 5.000000e+01 : f32
    %119 = vector.broadcast %cst_51 : f32 to vector<2x128x128xf32>
    %120 = arith.mulf %118, %119 : vector<2x128x128xf32>
    %121 = math.exp %120 : vector<2x128x128xf32>
    %cst_52 = arith.constant 5.000000e-01 : f32
    %122 = vector.broadcast %cst_52 : f32 to vector<2x128x128xf32>
    %123 = arith.subf %122, %121 : vector<2x128x128xf32>
    %cst_53 = arith.constant 5.000000e+00 : f32
    %124 = vector.broadcast %cst_53 : f32 to vector<2x128x128xf32>
    %125 = arith.mulf %124, %123 : vector<2x128x128xf32>
    %126 = math.exp %125 : vector<2x128x128xf32>
    %cst_54 = arith.constant 1.000000e+00 : f32
    %127 = vector.broadcast %cst_54 : f32 to vector<2x128x128xf32>
    %128 = arith.addf %127, %126 : vector<2x128x128xf32>
    %cst_55 = arith.constant 1.000000e+00 : f32
    %129 = vector.broadcast %cst_55 : f32 to vector<2x128x128xf32>
    %130 = arith.divf %129, %128 : vector<2x128x128xf32>
    %131 = arith.mulf %9, %130 : vector<2x128x128xf32>
    %cst_56 = arith.constant 1.000000e+00 : f32
    %132 = vector.broadcast %cst_56 : f32 to vector<2x128x128xf32>
    %133 = arith.mulf %132, %131 : vector<2x128x128xf32>
    %134 = math.exp %133 : vector<2x128x128xf32>
    %135 = arith.mulf %134, %12 : vector<2x128x128xf32>
    %cst_57 = arith.constant dense<0.000000e+00> : vector<2x128xf32>
    %136 = vector.multi_reduction <add>, %134, %cst_57 [1] : vector<2x128x128xf32> to vector<2x128xf32>
    %137 = vector.shape_cast %136 : vector<2x128xf32> to vector<2x1x128xf32>
    %cst_58 = arith.constant dense<0.000000e+00> : vector<2x128xf32>
    %138 = vector.multi_reduction <add>, %135, %cst_58 [1] : vector<2x128x128xf32> to vector<2x128xf32>
    %139 = vector.shape_cast %138 : vector<2x128xf32> to vector<2x1x128xf32>
    %cst_59 = arith.constant 1.000000e+00 : f32
    %140 = vector.broadcast %cst_59 : f32 to vector<2x1x128xf32>
    %141 = arith.addf %140, %137 : vector<2x1x128xf32>
    %142 = math.log %141 : vector<2x1x128xf32>
    %cst_60 = arith.constant 1.000000e+00 : f32
    %143 = vector.broadcast %cst_60 : f32 to vector<2x1x128xf32>
    %144 = arith.mulf %142, %143 : vector<2x1x128xf32>
    %cst_61 = arith.constant 1.000000e+00 : f32
    %145 = vector.broadcast %cst_61 : f32 to vector<2x1x128xf32>
    %146 = arith.addf %145, %139 : vector<2x1x128xf32>
    %147 = math.log %146 : vector<2x1x128xf32>
    %cst_62 = arith.constant 1.000000e+00 : f32
    %148 = vector.broadcast %cst_62 : f32 to vector<2x1x128xf32>
    %149 = arith.mulf %147, %148 : vector<2x1x128xf32>
    %150 = arith.addf %144, %149 : vector<2x1x128xf32>
    %151 = tpu.concatenate %51, %101, %150 in 1 : vector<2x1x128xf32>, vector<2x1x128xf32>, vector<2x1x128xf32> -> vector<2x3x128xf32>
    %c0_63 = arith.constant 0 : index
    %c0_64 = arith.constant 0 : index
    %c0_65 = arith.constant 0 : index
    %152 = vector.load %arg5[%c0_63, %c0_64, %c0_65] : memref<2x3x128xf32, #tpu.memory_space<vmem>>, vector<2x3x128xf32>
    tpu.vector_store %arg5[%c0_63, %c0_64, %c0_65], %151 {strides = array<i32>} : memref<2x3x128xf32, #tpu.memory_space<vmem>>, vector<2x3x128xf32>,
    return
  }
  func.func @transform_0(%arg0: i32) -> (i32, i32, i32) {
    %c0_i32 = arith.constant 0 : i32
    %c0_i32_0 = arith.constant 0 : i32
    %c0_i32_1 = arith.constant 0 : i32
    return %arg0, %c0_i32, %c0_i32_0 : i32, i32, i32
  }
  func.func @transform_1(%arg0: i32) -> (i32, i32, i32) {
    %c0_i32 = arith.constant 0 : i32
    %c0_i32_0 = arith.constant 0 : i32
    %c0_i32_1 = arith.constant 0 : i32
    return %arg0, %c0_i32, %c0_i32_0 : i32, i32, i32
  }
  func.func @transform_2(%arg0: i32) -> (i32, i32, i32) {
    %c0_i32 = arith.constant 0 : i32
    %c0_i32_0 = arith.constant 0 : i32
    %c0_i32_1 = arith.constant 0 : i32
    return %arg0, %c0_i32, %c0_i32_0 : i32, i32, i32
  }
  func.func @transform_3(%arg0: i32) -> (i32, i32, i32) {
    %c0_i32 = arith.constant 0 : i32
    %c0_i32_0 = arith.constant 0 : i32
    %c0_i32_1 = arith.constant 0 : i32
    return %arg0, %c0_i32, %c0_i32_0 : i32, i32, i32
  }
  func.func @transform_4(%arg0: i32) -> (i32, i32, i32) {
    %c0_i32 = arith.constant 0 : i32
    %c0_i32_0 = arith.constant 0 : i32
    %c0_i32_1 = arith.constant 0 : i32
    return %arg0, %c0_i32, %c0_i32_0 : i32, i32, i32
  }
}

</mosaic_0001>

<bundles_post_ra>
// kernel: tpu_custom_call.1
= control target key start
LH: loop header
LB: loop body
LE: loop exit
PB: predicated region body
PF: predicated region fallthrough
CT: control target
= control target key end

     0   :  { %vm81_vm0 = vcmask 261120   ;;  %vm820_vm1 = vcmask 23552   ;;  %s11304_s0 = inlined_call_operand.vmem [shape: f32[2,128,32], index: 0, kind: input, shape index: {}]   ;;  %s11305_s1 = inlined_call_operand.vmem [shape: f32[2,128,3], index: 1, kind: input, shape index: {}]   ;;  %s11306_s2 = inlined_call_operand.vmem [shape: f32[2,128,3], index: 2, kind: input, shape index: {}]   ;;  %s11307_s3 = inlined_call_operand.vmem [shape: f32[2,128,3], index: 3, kind: input, shape index: {}]   ;;  %s11308_s4 = inlined_call_operand.vmem [shape: f32[2,3,128], index: 4, kind: output, shape index: {}]  }
   0x1   :  { %v7355_v0 = vld [vmem:[%s11304_s0 + $0x80] sm:$0xff]  ;;  %v7365_v2 = vld [vmem:[%s11304_s0 + $0x88] sm:$0xff]  ;;  %v7383_v8 = vld [vmem:[%s11304_s0 + $0x18] sm:$0xff] }
   0x2   :  { %v7360_v1 = vld [vmem:[%s11304_s0] sm:$0xff]  ;;  %v65_v3 = vmul.f32 %v7355_v0, %v7355_v0  ;;  %v66_v5 = vmul.f32 %v7365_v2, %v7365_v2  ;;  %v7376_v6 = vld [vmem:[%s11304_s0 + $0x8] sm:$0xff]  ;;  %v7388_v9 = vld [vmem:[%s11304_s0 + $0x10] sm:$0xff]  ;;  %v52_v14 = vmul.f32 %v7383_v8, %v7383_v8 }
   0x3   :  { %v49_v4 = vmul.f32 %v7360_v1, %v7360_v1  ;;  %v50_v7 = vmul.f32 %v7376_v6, %v7376_v6  ;;  %v51_v15 = vmul.f32 %v7388_v9, %v7388_v9  ;;  %v7401_v16 = vld [vmem:[%s11304_s0 + $0x98] sm:$0xff]  ;;  %v7406_v17 = vld [vmem:[%s11304_s0 + $0x90] sm:$0xff]  ;;  %v7417_v22 = vld [vmem:[%s11304_s0 + $0x28] sm:$0xff] }
   0x4   :  { %v130_v10 = vsel %vm81_vm0, %v65_v3, 0.0  ;;  %v133_v12 = vsel %vm81_vm0, %v66_v5, 0.0  ;;  %v91_v18 = vsel %vm81_vm0, %v52_v14, 0.0  ;;  %v68_v20 = vmul.f32 %v7401_v16, %v7401_v16  ;;  %v7422_v23 = vld [vmem:[%s11304_s0 + $0x20] sm:$0xff]  ;;  %v7433_v28 = vld [vmem:[%s11304_s0 + $0xa8] sm:$0xff]  ;;  %v7449_v34 = vld [vmem:[%s11304_s0 + $0x38] sm:$0xff] }
   0x5   :  { %v82_v11 = vsel %vm81_vm0, %v49_v4, 0.0  ;;  %131 = vadd.xlane.f32.xlu1 %v130_v10  ;;  %v85_v13 = vsel %vm81_vm0, %v50_v7, 0.0  ;;  %v88_v19 = vsel %vm81_vm0, %v51_v15, 0.0  ;;  %v67_v21 = vmul.f32 %v7406_v17, %v7406_v17  ;;  %v7438_v29 = vld [vmem:[%s11304_s0 + $0xa0] sm:$0xff]  ;;  %v7454_v35 = vld [vmem:[%s11304_s0 + $0x30] sm:$0xff]  ;;  %v7465_v40 = vld [vmem:[%s11304_s0 + $0xb8] sm:$0xff] }
   0x6   :  { %83 = vadd.xlane.f32.xlu0 %v82_v11  ;;  %v139_v24 = vsel %vm81_vm0, %v68_v20, 0.0  ;;  %v54_v26 = vmul.f32 %v7417_v22, %v7417_v22  ;;  %v53_v27 = vmul.f32 %v7422_v23, %v7422_v23  ;;  %v70_v32 = vmul.f32 %v7433_v28, %v7433_v28  ;;  %v7470_v41 = vld [vmem:[%s11304_s0 + $0xb0] sm:$0xff]  ;;  %v7481_v46 = vld [vmem:[%s11304_s0 + $0x48] sm:$0xff]  ;;  %v7486_v47 = vld [vmem:[%s11304_s0 + $0x40] sm:$0xff] }
   0x7   :  { %v136_v25 = vsel %vm81_vm0, %v67_v21, 0.0  ;;  %v69_v33 = vmul.f32 %v7438_v29, %v7438_v29  ;;  %v56_v38 = vmul.f32 %v7449_v34, %v7449_v34  ;;  %v55_v39 = vmul.f32 %v7454_v35, %v7454_v35  ;;  %v7497_v52 = vld [vmem:[%s11304_s0 + $0xc8] sm:$0xff]  ;;  %v7502_v53 = vld [vmem:[%s11304_s0 + $0xc0] sm:$0xff]  ;;  %v7513_v58 = vld [vmem:[%s11304_s0 + $0x58] sm:$0xff] }
   0x8   :  { %v97_v30 = vsel %vm81_vm0, %v54_v26, 0.0  ;;  %v94_v31 = vsel %vm81_vm0, %v53_v27, 0.0  ;;  %v145_v36 = vsel %vm81_vm0, %v70_v32, 0.0  ;;  %v72_v44 = vmul.f32 %v7465_v40, %v7465_v40  ;;  %v7518_v59 = vld [vmem:[%s11304_s0 + $0x50] sm:$0xff]  ;;  %v44_v3 = vld [vmem:[%s11304_s0 + $0xd8] sm:$0xff]  ;;  %v46_v20 = vld [vmem:[%s11304_s0 + $0xe8] sm:$0xff] }
   0x9   :  { %134 = vadd.xlane.f32.xlu1 %v133_v12  ;;  %v142_v37 = vsel %vm81_vm0, %v69_v33, 0.0  ;;  %v103_v42 = vsel %vm81_vm0, %v56_v38, 0.0  ;;  %v100_v43 = vsel %vm81_vm0, %v55_v39, 0.0  ;;  %v71_v45 = vmul.f32 %v7470_v41, %v7470_v41  ;;  %v43_v4 = vld [vmem:[%s11304_s0 + $0xd0] sm:$0xff]  ;;  %v30_v12 = vld [vmem:[%s11304_s0 + $0x68] sm:$0xff]  ;;  %v45_v21 = vld [vmem:[%s11304_s0 + $0xe0] sm:$0xff] }
   0xa   :  { %86 = vadd.xlane.f32.xlu0 %v85_v13  ;;  %v151_v48 = vsel %vm81_vm0, %v72_v44, 0.0  ;;  %v58_v50 = vmul.f32 %v7481_v46, %v7481_v46  ;;  %v57_v51 = vmul.f32 %v7486_v47, %v7486_v47  ;;  %v74_v56 = vmul.f32 %v7497_v52, %v7497_v52  ;;  %v29_v13 = vld [vmem:[%s11304_s0 + $0x60] sm:$0xff]  ;;  %v48_v38 = vld [vmem:[%s11304_s0 + $0xf8] sm:$0xff]  ;;  %v47_v39 = vld [vmem:[%s11304_s0 + $0xf0] sm:$0xff] }
   0xb   :  { %v148_v49 = vsel %vm81_vm0, %v71_v45, 0.0  ;;  %v73_v57 = vmul.f32 %v7502_v53, %v7502_v53  ;;  %v60_v62 = vmul.f32 %v7513_v58, %v7513_v58  ;;  %v59_v63 = vmul.f32 %v7518_v59, %v7518_v59  ;;  %vm7861_vm2 = vmpackc.low %vm81_vm0, %vm81_vm0 }
   0xc   :  { %v109_v54 = vsel %vm81_vm0, %v58_v50, 0.0  ;;  %v106_v55 = vsel %vm81_vm0, %v57_v51, 0.0  ;;  %v157_v60 = vsel %vm81_vm0, %v74_v56, 0.0  ;;  %v76_v10 = vmul.f32 %v44_v3, %v44_v3  ;;  %v773_v56 = vld [vmem:[%s11305_s1 + $0x88] sm:$0xff]  ;;  %v759_v3 = vld [vmem:[%s11305_s1 + $0x18] sm:$0xff]  ;;  %vm8220_vm3 = vmpackc.low %vm820_vm1, %vm820_vm1 }
   0xd   :  { %92 = vadd.xlane.f32.xlu1 %v91_v18  ;;  %v154_v61 = vsel %vm81_vm0, %v73_v57, 0.0  ;;  %v115_v5 = vsel %vm81_vm0, %v60_v62, 0.0  ;;  %v112_v7 = vsel %vm81_vm0, %v59_v63, 0.0  ;;  %v75_v11 = vmul.f32 %v43_v4, %v43_v4  ;;  %v772_v57 = vld [vmem:[%s11305_s1 + $0x80] sm:$0xff]  ;;  %v758_v4 = vld [vmem:[%s11305_s1 + $0x10] sm:$0xff] }
   0xe   :  { %89 = vadd.xlane.f32.xlu0 %v88_v19  ;;  %v163_v14 = vsel %vm81_vm0, %v76_v10, 0.0  ;;  %v62_v18 = vmul.f32 %v30_v12, %v30_v12  ;;  %v61_v19 = vmul.f32 %v29_v13, %v29_v13  ;;  %v78_v26 = vmul.f32 %v46_v20, %v46_v20  ;;  %v775_v12 = vld [vmem:[%s11305_s1 + $0x98] sm:$0xff]  ;;  %v774_v13 = vld [vmem:[%s11305_s1 + $0x90] sm:$0xff]  ;;  %v761_v20 = vld [vmem:[%s11305_s1 + $0x28] sm:$0xff] }
   0xf   :  { %v160_v15 = vsel %vm81_vm0, %v75_v11, 0.0  ;;  %v77_v27 = vmul.f32 %v45_v21, %v45_v21  ;;  %v80_v44 = vmul.f32 %v48_v38, %v48_v38  ;;  %v79_v45 = vmul.f32 %v47_v39, %v47_v39  ;;  %v760_v21 = vld [vmem:[%s11305_s1 + $0x20] sm:$0xff]  ;;  %v763_v38 = vld [vmem:[%s11305_s1 + $0x38] sm:$0xff]  ;;  %v762_v39 = vld [vmem:[%s11305_s1 + $0x30] sm:$0xff] }
  0x10   :  { %v169_v32 = vsel %vm81_vm0, %v78_v26, 0.0  ;;  %v805_v62 = vmul.f32 %v773_v56, %v773_v56  ;;  %v804_v63 = vmul.f32 %v772_v57, %v772_v57  ;;  %v791_v10 = vmul.f32 %v759_v3, %v759_v3  ;;  %v765_v56 = vld [vmem:[%s11305_s1 + $0x48] sm:$0xff]  ;;  %v764_v57 = vld [vmem:[%s11305_s1 + $0x40] sm:$0xff] }
  0x11   :  { %140 = vadd.xlane.f32.xlu1 %v139_v24  ;;  %v121_v24 = vsel %vm81_vm0, %v62_v18, 0.0  ;;  %v166_v33 = vsel %vm81_vm0, %v77_v27, 0.0  ;;  %v175_v50 = vsel %vm81_vm0, %v80_v44, 0.0  ;;  %v172_v51 = vsel %vm81_vm0, %v79_v45, 0.0  ;;  %v781_v3 = vld [vmem:[%s11305_s1 + $0xc8] sm:$0xff] }
  0x12   :  { %137 = vadd.xlane.f32.xlu0 %v136_v25  ;;  %v118_v25 = vsel %vm81_vm0, %v61_v19, 0.0  ;;  %v790_v11 = vmul.f32 %v758_v4, %v758_v4  ;;  %v807_v18 = vmul.f32 %v775_v12, %v775_v12  ;;  %v806_v19 = vmul.f32 %v774_v13, %v774_v13  ;;  %v780_v4 = vld [vmem:[%s11305_s1 + $0xc0] sm:$0xff]  ;;  %v767_v12 = vld [vmem:[%s11305_s1 + $0x58] sm:$0xff]  ;;  %v766_v13 = vld [vmem:[%s11305_s1 + $0x50] sm:$0xff] }
  0x13   :  { %v793_v26 = vmul.f32 %v761_v20, %v761_v20  ;;  %v792_v27 = vmul.f32 %v760_v21, %v760_v21  ;;  %v795_v44 = vmul.f32 %v763_v38, %v763_v38  ;;  %v794_v45 = vmul.f32 %v762_v39, %v762_v39  ;;  %v783_v20 = vld [vmem:[%s11305_s1 + $0xd8] sm:$0xff]  ;;  %v782_v21 = vld [vmem:[%s11305_s1 + $0xd0] sm:$0xff]  ;;  %v785_v38 = vld [vmem:[%s11305_s1 + $0xe8] sm:$0xff] }
  0x14   :  { %v784_v39 = vld [vmem:[%s11305_s1 + $0xe0] sm:$0xff] }
  0x15   :  { %98 = vadd.xlane.f32.xlu1 %v97_v30  ;;  %v32_v30 = vld [vmem:[%s11304_s0 + $0x78] sm:$0xff] }
  0x16   :  { %95 = vadd.xlane.f32.xlu0 %v94_v31  ;;  %v31_v31 = vld [vmem:[%s11304_s0 + $0x70] sm:$0xff] }
  0x19   :  { %146 = vadd.xlane.f32.xlu1 %v145_v36  ;;  %v64_v36 = vmul.f32 %v32_v30, %v32_v30  ;;  %v777_v30 = vld [vmem:[%s11305_s1 + $0xa8] sm:$0xff] }
  0x1a   :  { %143 = vadd.xlane.f32.xlu0 %v142_v37  ;;  %v63_v37 = vmul.f32 %v31_v31, %v31_v31  ;;  %v776_v31 = vld [vmem:[%s11305_s1 + $0xa0] sm:$0xff] }
  0x1d   :  { %104 = vadd.xlane.f32.xlu1 %v103_v42  ;;  %v127_v42 = vsel %vm81_vm0, %v64_v36, 0.0  ;;  %v809_v36 = vmul.f32 %v777_v30, %v777_v30  ;;  %v769_v30 = vld [vmem:[%s11305_s1 + $0x68] sm:$0xff] }
  0x1e   :  { %101 = vadd.xlane.f32.xlu0 %v100_v43  ;;  %v124_v43 = vsel %vm81_vm0, %v63_v37, 0.0  ;;  %v808_v37 = vmul.f32 %v776_v31, %v776_v31  ;;  %v768_v31 = vld [vmem:[%s11305_s1 + $0x60] sm:$0xff] }
  0x21   :  { %152 = vadd.xlane.f32.xlu1 %v151_v48  ;;  %v757_v48 = vld [vmem:[%s11305_s1 + $0x8] sm:$0xff] }
  0x22   :  { %149 = vadd.xlane.f32.xlu0 %v148_v49  ;;  %v756_v49 = vld [vmem:[%s11305_s1] sm:$0xff] }
  0x25   :  { %110 = vadd.xlane.f32.xlu1 %v109_v54  ;;  %v789_v54 = vmul.f32 %v757_v48, %v757_v48  ;;  %v779_v48 = vld [vmem:[%s11305_s1 + $0xb8] sm:$0xff] }
  0x26   :  { %107 = vadd.xlane.f32.xlu0 %v106_v55  ;;  %v788_v55 = vmul.f32 %v756_v49, %v756_v49  ;;  %v778_v49 = vld [vmem:[%s11305_s1 + $0xb0] sm:$0xff] }
  0x29   :  { %158 = vadd.xlane.f32.xlu1 %v157_v60  ;;  %v824_v60 = vsel %vm820_vm1, %v789_v54, 0.0  ;;  %v811_v54 = vmul.f32 %v779_v48, %v779_v48  ;;  %v771_v48 = vld [vmem:[%s11305_s1 + $0x78] sm:$0xff] }
  0x2a   :  { %155 = vadd.xlane.f32.xlu0 %v154_v61  ;;  %v821_v61 = vsel %vm820_vm1, %v788_v55, 0.0  ;;  %v810_v55 = vmul.f32 %v778_v49, %v778_v49  ;;  %v770_v49 = vld [vmem:[%s11305_s1 + $0x70] sm:$0xff] }
  0x2d   :  { %116 = vadd.xlane.f32.xlu1 %v115_v5  ;;  %v872_v5 = vsel %vm820_vm1, %v805_v62, 0.0  ;;  %v797_v62 = vmul.f32 %v765_v56, %v765_v56  ;;  %v787_v56 = vld [vmem:[%s11305_s1 + $0xf8] sm:$0xff] }
  0x2e   :  { %113 = vadd.xlane.f32.xlu0 %v112_v7  ;;  %v869_v7 = vsel %vm820_vm1, %v804_v63, 0.0  ;;  %v796_v63 = vmul.f32 %v764_v57, %v764_v57  ;;  %v786_v57 = vld [vmem:[%s11305_s1 + $0xf0] sm:$0xff] }
  0x31   :  { %164 = vadd.xlane.f32.xlu1 %v163_v14  ;;  %v830_v14 = vsel %vm820_vm1, %v791_v10, 0.0  ;;  %v813_v10 = vmul.f32 %v781_v3, %v781_v3 }
  0x32   :  { %161 = vadd.xlane.f32.xlu0 %v160_v15  ;;  %v827_v15 = vsel %vm820_vm1, %v790_v11, 0.0  ;;  %v812_v11 = vmul.f32 %v780_v4, %v780_v4 }
  0x35   :  { %122 = vadd.xlane.f32.xlu1 %v121_v24  ;;  %v878_v24 = vsel %vm820_vm1, %v807_v18, 0.0  ;;  %v799_v18 = vmul.f32 %v767_v12, %v767_v12 }
  0x36   :  { %119 = vadd.xlane.f32.xlu0 %v118_v25  ;;  %v875_v25 = vsel %vm820_vm1, %v806_v19, 0.0  ;;  %v798_v19 = vmul.f32 %v766_v13, %v766_v13 }
  0x39   :  { %170 = vadd.xlane.f32.xlu1 %v169_v32  ;;  %v836_v32 = vsel %vm820_vm1, %v793_v26, 0.0  ;;  %v815_v26 = vmul.f32 %v783_v20, %v783_v20  ;;  %v1853_v20 = vld [vmem:[%s11306_s2 + $0x20] sm:$0xff] }
  0x3a   :  { %167 = vadd.xlane.f32.xlu0 %v166_v33  ;;  %v833_v33 = vsel %vm820_vm1, %v792_v27, 0.0  ;;  %v814_v27 = vmul.f32 %v782_v21, %v782_v21  ;;  %v1854_v21 = vld [vmem:[%s11306_s2 + $0x28] sm:$0xff] }
  0x3d   :  { %128 = vadd.xlane.f32.xlu1 %v127_v42  ;;  %v884_v42 = vsel %vm820_vm1, %v809_v36, 0.0  ;;  %v801_v36 = vmul.f32 %v769_v30, %v769_v30 }
  0x3e   :  { %125 = vadd.xlane.f32.xlu0 %v124_v43  ;;  %v881_v43 = vsel %vm820_vm1, %v808_v37, 0.0  ;;  %v800_v37 = vmul.f32 %v768_v31, %v768_v31 }
  0x41   :  { %176 = vadd.xlane.f32.xlu1 %v175_v50  ;;  %v842_v50 = vsel %vm820_vm1, %v795_v44, 0.0  ;;  %v817_v44 = vmul.f32 %v785_v38, %v785_v38 }
  0x42   :  { %173 = vadd.xlane.f32.xlu0 %v172_v51  ;;  %v839_v51 = vsel %vm820_vm1, %v794_v45, 0.0  ;;  %v816_v45 = vmul.f32 %v784_v39, %v784_v39 }
  0x45   :  { %825 = vadd.xlane.f32.xlu1 %v824_v60  ;;  %v890_v60 = vsel %vm820_vm1, %v811_v54, 0.0  ;;  %v803_v54 = vmul.f32 %v771_v48, %v771_v48 }
  0x46   :  { %822 = vadd.xlane.f32.xlu0 %v821_v61  ;;  %v887_v61 = vsel %vm820_vm1, %v810_v55, 0.0  ;;  %v802_v55 = vmul.f32 %v770_v49, %v770_v49 }
  0x47   :  { %v866_v3 = vsel %vm820_vm1, %v803_v54, 0.0 }
  0x48   :  { %v863_v4 = vsel %vm820_vm1, %v802_v55, 0.0 }
  0x49   :  { %873 = vadd.xlane.f32.xlu1 %v872_v5  ;;  %v848_v5 = vsel %vm820_vm1, %v797_v62, 0.0  ;;  %v819_v62 = vmul.f32 %v787_v56, %v787_v56  ;;  %v1859_v56 = vld [vmem:[%s11306_s2 + $0x50] sm:$0xff] }
  0x4a   :  { %870 = vadd.xlane.f32.xlu0 %v869_v7  ;;  %v845_v7 = vsel %vm820_vm1, %v796_v63, 0.0  ;;  %v818_v63 = vmul.f32 %v786_v57, %v786_v57  ;;  %v1860_v57 = vld [vmem:[%s11306_s2 + $0x58] sm:$0xff] }
  0x4b   :  { %v914_v12 = vsel %vm820_vm1, %v819_v62, 0.0 }
  0x4c   :  { %v911_v13 = vsel %vm820_vm1, %v818_v63, 0.0 }
  0x4d   :  { %831 = vadd.xlane.f32.xlu1 %v830_v14  ;;  %v896_v14 = vsel %vm820_vm1, %v813_v10, 0.0  ;;  %v1851_v10 = vld [vmem:[%s11306_s2 + $0x10] sm:$0xff] }
  0x4e   :  { %828 = vadd.xlane.f32.xlu0 %v827_v15  ;;  %v893_v15 = vsel %vm820_vm1, %v812_v11, 0.0  ;;  %v1852_v11 = vld [vmem:[%s11306_s2 + $0x18] sm:$0xff] }
  0x51   :  { %879 = vadd.xlane.f32.xlu1 %v878_v24  ;;  %v854_v24 = vsel %vm820_vm1, %v799_v18, 0.0  ;;  %v7716_v18 = vmul.f32 0.003921569, %v1851_v10  ;;  %v1861_v10 = vld [vmem:[%s11306_s2 + $0x60] sm:$0xff] }
  0x52   :  { %876 = vadd.xlane.f32.xlu0 %v875_v25  ;;  %v851_v25 = vsel %vm820_vm1, %v798_v19, 0.0  ;;  %v7718_v19 = vmul.f32 0.003921569, %v1852_v11  ;;  %v1862_v11 = vld [vmem:[%s11306_s2 + $0x68] sm:$0xff] }
  0x53   :  { %v1915_v30 = vmul.f32 %v7716_v18, %v7716_v18 }
  0x54   :  { %11505 = vst [vmem:[#allocation3_spill] sm:$0xff] %v7718_v19  ;;  %v1916_v31 = vmul.f32 %v7718_v19, %v7718_v19 }
  0x55   :  { %837 = vadd.xlane.f32.xlu1 %v836_v32  ;;  %v902_v32 = vsel %vm820_vm1, %v815_v26, 0.0  ;;  %v1951_v38 = vsel %vm820_vm1, %v1915_v30, 0.0  ;;  %v1863_v30 = vld [vmem:[%s11306_s2 + $0x70] sm:$0xff] }
  0x56   :  { %834 = vadd.xlane.f32.xlu0 %v833_v33  ;;  %v899_v33 = vsel %vm820_vm1, %v814_v27, 0.0  ;;  %v1954_v39 = vsel %vm820_vm1, %v1916_v31, 0.0  ;;  %v1864_v31 = vld [vmem:[%s11306_s2 + $0x78] sm:$0xff] }
  0x59   :  { %885 = vadd.xlane.f32.xlu1 %v884_v42  ;;  %v860_v42 = vsel %vm820_vm1, %v801_v36, 0.0 }
  0x5a   :  { %882 = vadd.xlane.f32.xlu0 %v881_v43  ;;  %v857_v43 = vsel %vm820_vm1, %v800_v37, 0.0 }
  0x5d   :  { %843 = vadd.xlane.f32.xlu1 %v842_v50  ;;  %v908_v50 = vsel %vm820_vm1, %v817_v44, 0.0  ;;  %v1857_v44 = vld [vmem:[%s11306_s2 + $0x40] sm:$0xff] }
  0x5e   :  { %840 = vadd.xlane.f32.xlu0 %v839_v51  ;;  %v905_v51 = vsel %vm820_vm1, %v816_v45, 0.0  ;;  %v1858_v45 = vld [vmem:[%s11306_s2 + $0x48] sm:$0xff]  ;;  %v7764_v54 = vmul.f32 0.003921569, %v1857_v44 }
  0x5f   :  { %v7766_v55 = vmul.f32 0.003921569, %v1858_v45 }
  0x60   :  { %11508 = vst [vmem:[#allocation6_spill] sm:$0xff] %v7764_v54  ;;  %v1921_v62 = vmul.f32 %v7764_v54, %v7764_v54 }
  0x61   :  { %891 = vadd.xlane.f32.xlu1 %v890_v60  ;;  %v1849_v60 = vld [vmem:[%s11306_s2] sm:$0xff]  ;;  %11509 = vst [vmem:[#allocation7_spill] sm:$0xff] %v7766_v55  ;;  %v1922_v63 = vmul.f32 %v7766_v55, %v7766_v55 }
  0x62   :  { %888 = vadd.xlane.f32.xlu0 %v887_v61  ;;  %v1850_v61 = vld [vmem:[%s11306_s2 + $0x8] sm:$0xff] }
  0x65   :  { %849 = vadd.xlane.f32.xlu1 %v848_v5  ;;  %v7700_v5 = vmul.f32 0.003921569, %v1849_v60 }
  0x66   :  { %846 = vadd.xlane.f32.xlu0 %v845_v7  ;;  %v7702_v7 = vmul.f32 0.003921569, %v1850_v61 }
  0x68   :  { %11504 = vst [vmem:[#allocation2_spill] sm:$0xff] %v7702_v7 }
  0x69   :  { %897 = vadd.xlane.f32.xlu1 %v896_v14  ;;  %v1913_v14 = vmul.f32 %v7700_v5, %v7700_v5 }
  0x6a   :  { %894 = vadd.xlane.f32.xlu0 %v893_v15  ;;  %v1914_v15 = vmul.f32 %v7702_v7, %v7702_v7 }
  0x6b   :  { %v1945_v26 = vsel %vm820_vm1, %v1913_v14, 0.0 }
  0x6c   :  { %v1948_v27 = vsel %vm820_vm1, %v1914_v15, 0.0 }
  0x6d   :  { %855 = vadd.xlane.f32.xlu1 %v854_v24  ;;  %v7726_v24 = vmul.f32 0.003921569, %v1853_v20  ;;  %v1969_v20 = vsel %vm820_vm1, %v1921_v62, 0.0 }
  0x6e   :  { %852 = vadd.xlane.f32.xlu0 %v851_v25  ;;  %v7728_v25 = vmul.f32 0.003921569, %v1854_v21  ;;  %v1972_v21 = vsel %vm820_vm1, %v1922_v63, 0.0 }
  0x71   :  { %903 = vadd.xlane.f32.xlu1 %v902_v32  ;;  %v1855_v32 = vld [vmem:[%s11306_s2 + $0x30] sm:$0xff] }
  0x72   :  { %900 = vadd.xlane.f32.xlu0 %v899_v33  ;;  %v1856_v33 = vld [vmem:[%s11306_s2 + $0x38] sm:$0xff]  ;;  %v7742_v36 = vmul.f32 0.003921569, %v1855_v32 }
  0x73   :  { %v7744_v37 = vmul.f32 0.003921569, %v1856_v33 }
  0x74   :  { %11506 = vst [vmem:[#allocation4_spill] sm:$0xff] %v7742_v36  ;;  %v1919_v48 = vmul.f32 %v7742_v36, %v7742_v36 }
  0x75   :  { %861 = vadd.xlane.f32.xlu1 %v860_v42  ;;  %11507 = vst [vmem:[#allocation5_spill] sm:$0xff] %v7744_v37  ;;  %v1917_v42 = vmul.f32 %v7726_v24, %v7726_v24  ;;  %v1920_v49 = vmul.f32 %v7744_v37, %v7744_v37 }
  0x76   :  { %858 = vadd.xlane.f32.xlu0 %v857_v43  ;;  %v1918_v43 = vmul.f32 %v7728_v25, %v7728_v25  ;;  %v1963_v60 = vsel %vm820_vm1, %v1919_v48, 0.0 }
  0x77   :  { %v1966_v61 = vsel %vm820_vm1, %v1920_v49, 0.0 }
  0x79   :  { %909 = vadd.xlane.f32.xlu1 %v908_v50  ;;  %v1957_v50 = vsel %vm820_vm1, %v1917_v42, 0.0  ;;  %v7810_v42 = vmul.f32 0.003921569, %v1864_v31 }
  0x7a   :  { %906 = vadd.xlane.f32.xlu0 %v905_v51  ;;  %v1960_v51 = vsel %vm820_vm1, %v1918_v43, 0.0 }
  0x7b   :  { %11515 = vst [vmem:[#allocation13_spill] sm:$0xff] %v7810_v42  ;;  %v1928_v62 = vmul.f32 %v7810_v42, %v7810_v42 }
  0x7d   :  { %867 = vadd.xlane.f32.xlu1 %v866_v3  ;;  %v7780_v3 = vmul.f32 0.003921569, %v1859_v56  ;;  %v1865_v56 = vld [vmem:[%s11306_s2 + $0x80] sm:$0xff]  ;;  %v1990_v31 = vsel %vm820_vm1, %v1928_v62, 0.0 }
  0x7e   :  { %864 = vadd.xlane.f32.xlu0 %v863_v4  ;;  %v7782_v4 = vmul.f32 0.003921569, %v1860_v57  ;;  %v1866_v57 = vld [vmem:[%s11306_s2 + $0x88] sm:$0xff] }
  0x7f   :  { %11510 = vst [vmem:[#allocation8_spill] sm:$0xff] %v7780_v3 }
  0x80   :  { %11511 = vst [vmem:[#allocation9_spill] sm:$0xff] %v7782_v4 }
  0x81   :  { %915 = vadd.xlane.f32.xlu1 %v914_v12  ;;  %v7790_v12 = vmul.f32 0.003921569, %v1861_v10 }
  0x82   :  { %912 = vadd.xlane.f32.xlu0 %v911_v13  ;;  %v7792_v13 = vmul.f32 0.003921569, %v1862_v11 }
  0x83   :  { %11512 = vst [vmem:[#allocation10_spill] sm:$0xff] %v7790_v12 }
  0x84   :  { %11513 = vst [vmem:[#allocation11_spill] sm:$0xff] %v7792_v13  ;;  %v1926_v49 = vmul.f32 %v7792_v13, %v7792_v13 }
  0x85   :  { %1949 = vadd.xlane.f32.xlu1 %v1948_v27  ;;  %v1924_v27 = vmul.f32 %v7782_v4, %v7782_v4 }
  0x86   :  { %1946 = vadd.xlane.f32.xlu0 %v1945_v26  ;;  %v1923_v26 = vmul.f32 %v7780_v3, %v7780_v3  ;;  %v1984_v11 = vsel %vm820_vm1, %v1926_v49, 0.0  ;;  %v3365_v49 = vld [vmem:[%s11307_s3] sm:$0xff] }
  0x87   :  { %v1978_v48 = vsel %vm820_vm1, %v1924_v27, 0.0 }
  0x88   :  { %v1975_v45 = vsel %vm820_vm1, %v1923_v26, 0.0 }
  0x89   :  { %1955 = vadd.xlane.f32.xlu1 %v1954_v39  ;;  %v7808_v39 = vmul.f32 0.003921569, %v1863_v30 }
  0x8a   :  { %1952 = vadd.xlane.f32.xlu0 %v1951_v38  ;;  %v1925_v38 = vmul.f32 %v7790_v12, %v7790_v12 }
  0x8b   :  { %11514 = vst [vmem:[#allocation12_spill] sm:$0xff] %v7808_v39 }
  0x8d   :  { %1961 = vadd.xlane.f32.xlu1 %v1960_v51 }
  0x8e   :  { %1958 = vadd.xlane.f32.xlu0 %v1957_v50 }
  0x91   :  { %1967 = vadd.xlane.f32.xlu1 %v1966_v61  ;;  %v1927_v61 = vmul.f32 %v7808_v39, %v7808_v39 }
  0x92   :  { %1964 = vadd.xlane.f32.xlu0 %v1963_v60  ;;  %v132_v14 = vpop.xlane.xlu1 %131  ;;  %v1981_v60 = vsel %vm820_vm1, %v1925_v38, 0.0 }
  0x93   :  { %v84_v15 = vpop.xlane.xlu0 %83  ;;  %v194_v32 = vadd.f32 1e-14, %v132_v14  ;;  %v7828_v14 = vmul.f32 0.003921569, %v1865_v56  ;;  %v1987_v26 = vsel %vm820_vm1, %v1927_v61, 0.0 }
  0x94   :  { %v178_v33 = vadd.f32 1e-14, %v84_v15  ;;  %v7830_v15 = vmul.f32 0.003921569, %v1866_v57 }
  0x95   :  { %6269 = vrsqrt.f32 %v194_v32  ;;  %1973 = vadd.xlane.f32.xlu1 %v1972_v21  ;;  %v1929_v32 = vmul.f32 %v7828_v14, %v7828_v14 }
  0x96   :  { %1970 = vadd.xlane.f32.xlu0 %v1969_v20  ;;  %6271 = vrsqrt.f32 %v178_v33  ;;  %v135_v43 = vpop.xlane.xlu1 %134  ;;  %v1930_v33 = vmul.f32 %v7830_v15, %v7830_v15 }
  0x97   :  { %v87_v44 = vpop.xlane.xlu0 %86  ;;  %v195_v50 = vadd.f32 1e-14, %v135_v43 }
  0x98   :  { %v179_v51 = vadd.f32 1e-14, %v87_v44 }
  0x99   :  { %6273 = vrsqrt.f32 %v195_v50  ;;  %1979 = vadd.xlane.f32.xlu1 %v1978_v48 }
  0x9a   :  { %1976 = vadd.xlane.f32.xlu0 %v1975_v45  ;;  %6275 = vrsqrt.f32 %v179_v51  ;;  %v93_v63 = vpop.xlane.xlu1 %92  ;;  %v3381_v51 = vld [vmem:[%s11307_s3 + $0x80] sm:$0xff] }
  0x9b   :  { %v90_v10 = vpop.xlane.xlu0 %89  ;;  %v181_v20 = vadd.f32 1e-14, %v93_v63 }
  0x9c   :  { %v180_v21 = vadd.f32 1e-14, %v90_v10  ;;  %v3366_v10 = vld [vmem:[%s11307_s3 + $0x8] sm:$0xff] }
  0x9d   :  { %6277 = vrsqrt.f32 %v181_v20  ;;  %1985 = vadd.xlane.f32.xlu1 %v1984_v11 }
  0x9e   :  { %1982 = vadd.xlane.f32.xlu0 %v1981_v60  ;;  %6279 = vrsqrt.f32 %v180_v21  ;;  %v141_v27 = vpop.xlane.xlu1 %140  ;;  %v1996_v60 = vsel %vm820_vm1, %v1930_v33, 0.0  ;;  %v3413_v21 = vmul.f32 %v3381_v51, %v3381_v51  ;;  %v3398_v33 = vmul.f32 %v3366_v10, %v3366_v10 }
  0x9f   :  { %v138_v30 = vpop.xlane.xlu0 %137  ;;  %v6270_v38 = vpop.eup %6269  ;;  %v197_v43 = vadd.f32 1e-14, %v141_v27  ;;  %v3394_v27 = vld [vmem:[%s11307_s3 + $0xe8] sm:$0xff] }
  0xa0   :  { %v196_v44 = vadd.f32 1e-14, %v138_v30  ;;  %v6272_v45 = vpop.eup %6271  ;;  %v258_v48 = vmul.f32 %v6270_v38, %v7355_v0  ;;  %v1993_v0 = vsel %vm820_vm1, %v1929_v32, 0.0  ;;  %v3382_v30 = vld [vmem:[%s11307_s3 + $0x88] sm:$0xff]  ;;  %v3426_v36 = vmul.f32 %v3394_v27, %v3394_v27 }
  0xa1   :  { %6281 = vrsqrt.f32 %v197_v43  ;;  %v242_v50 = vmul.f32 %v6272_v45, %v7360_v1  ;;  %1991 = vadd.xlane.f32.xlu1 %v1990_v31  ;;  %v3397_v1 = vmul.f32 %v3365_v49, %v3365_v49  ;;  %v3367_v49 = vld [vmem:[%s11307_s3 + $0x10] sm:$0xff] }
  0xa2   :  { %1988 = vadd.xlane.f32.xlu0 %v1987_v26  ;;  %6283 = vrsqrt.f32 %v196_v44  ;;  %5525 = vmatprep.mubr.msk.f32.mxu1 %vm81_vm0, %v258_v48  ;;  %v99_v56 = vpop.xlane.xlu1 %98 }
  0xa3   :  { %v96_v57 = vpop.xlane.xlu0 %95  ;;  %v6274_v61 = vpop.eup %6273  ;;  %v183_v62 = vadd.f32 1e-14, %v99_v56  ;;  %5469 = vmatprep.mubr.msk.f32.mxu0 %vm81_vm0, %v242_v50  ;;  %v3429_v45 = vsel %vm820_vm1, %v3397_v1, 0.0 }
  0xa4   :  { %v182_v63 = vadd.f32 1e-14, %v96_v57  ;;  %v6276_v11 = vpop.eup %6275  ;;  %v7854_v20 = vmul.f32 %v6274_v61, %v7365_v2  ;;  %v3414_v57 = vmul.f32 %v3382_v30, %v3382_v30  ;;  %v3399_v61 = vmul.f32 %v3367_v49, %v3367_v49 }
  0xa5   :  { %6285 = vrsqrt.f32 %v183_v62  ;;  %v7857_v26 = vmul.f32 %v6276_v11, %v7376_v6  ;;  %1997 = vadd.xlane.f32.xlu1 %v1996_v60 }
  0xa6   :  { %1994 = vadd.xlane.f32.xlu0 %v1993_v0  ;;  %6287 = vrsqrt.f32 %v182_v63  ;;  %v147_v2 = vpop.xlane.xlu1 %146  ;;  %v5933_v32 = vpack.c.bf16 %v7854_v20, %v258_v48  ;;  %v3477_v48 = vsel %vm820_vm1, %v3413_v21, 0.0  ;;  %v3383_v0 = vld [vmem:[%s11307_s3 + $0x90] sm:$0xff]  ;;  %v3480_v30 = vsel %vm820_vm1, %v3414_v57, 0.0 }
  0xa7   :  { %v144_v31 = vpop.xlane.xlu0 %143  ;;  %v6278_v38 = vpop.eup %6277  ;;  %v199_v6 = vadd.f32 1e-14, %v147_v2  ;;  %v5885_v44 = vpack.c.bf16 %v7857_v26, %v242_v50  ;;  %v3415_v2 = vmul.f32 %v3383_v0, %v3383_v0 }
  0xa8   :  { %v198_v43 = vadd.f32 1e-14, %v144_v31  ;;  %v6280_v51 = vpop.eup %6279  ;;  %5935 = vmatprep.subr.msk.bf16.mxu1 %vm7861_vm2, %v5933_v32  ;;  %v7877_v56 = vmul.f32 %v6278_v38, %v7383_v8  ;;  %v3368_v31 = vld [vmem:[%s11307_s3 + $0x18] sm:$0xff] }
  0xa9   :  { %6289 = vrsqrt.f32 %v199_v6  ;;  %5887 = vmatprep.subr.msk.bf16.mxu0 %vm7861_vm2, %v5885_v44  ;;  %5938 = vmatpush3.bf16.xpose.msk.msra.mxu1 %vm7861_vm2, %v5933_v32  ;;  %v7885_v50 = vmul.f32 %v6280_v51, %v7388_v9  ;;  %v3432_v9 = vsel %vm820_vm1, %v3398_v33, 0.0  ;;  %v3384_v33 = vld [vmem:[%s11307_s3 + $0x98] sm:$0xff]  ;;  %v3435_v6 = vsel %vm820_vm1, %v3399_v61, 0.0  ;;  %v3385_v61 = vld [vmem:[%s11307_s3 + $0xa0] sm:$0xff] }
  0xaa   :  { %6291 = vrsqrt.f32 %v198_v43  ;;  %3430 = vadd.xlane.f32.xlu0 %v3429_v45  ;;  %5890 = vmatpush3.bf16.xpose.msk.msra.mxu0 %vm7861_vm2, %v5885_v44  ;;  %v105_v8 = vpop.xlane.xlu1 %104  ;;  %v3400_v51 = vmul.f32 %v3368_v31, %v3368_v31  ;;  %v3483_v0 = vsel %vm820_vm1, %v3415_v2, 0.0 }
  0xab   :  { %v102_v60 = vpop.xlane.xlu0 %101  ;;  %v6282_v62 = vpop.eup %6281  ;;  %v185_v63 = vadd.f32 1e-14, %v105_v8  ;;  %v5891_v10 = vpack.c.bf16 %v7877_v56, %v7885_v50  ;;  %3478 = vadd.xlane.f32.xlu1 %v3477_v48  ;;  %v3416_v8 = vmul.f32 %v3384_v33, %v3384_v33  ;;  %v3417_v33 = vmul.f32 %v3385_v61, %v3385_v61 }
  0xac   :  { %v184_v1 = vadd.f32 1e-14, %v102_v60  ;;  %v6284_v11 = vpop.eup %6283  ;;  %v7896_v21 = vmul.f32 %v6282_v62, %v7401_v16 }
  0xad   :  { %6293 = vrsqrt.f32 %v185_v63  ;;  %5893 = vmatprep.subr.msk.bf16.mxu0 %vm7861_vm2, %v5891_v10  ;;  %v7905_v32 = vmul.f32 %v6284_v11, %v7406_v17  ;;  %v3369_v17 = vld [vmem:[%s11307_s3 + $0x20] sm:$0xff]  ;;  %v3489_v61 = vsel %vm820_vm1, %v3417_v33, 0.0  ;;  %v3372_v33 = vld [vmem:[%s11307_s3 + $0x38] sm:$0xff] }
  0xae   :  { %6295 = vrsqrt.f32 %v184_v1  ;;  %3433 = vadd.xlane.f32.xlu0 %v3432_v9  ;;  %v153_v16 = vpop.xlane.xlu1 %152  ;;  %v3401_v63 = vmul.f32 %v3369_v17, %v3369_v17 }
  0xaf   :  { %v150_v38 = vpop.xlane.xlu0 %149  ;;  %v6286_v43 = vpop.eup %6285  ;;  %v201_v44 = vadd.f32 1e-14, %v153_v16  ;;  %v5939_v49 = vpack.c.bf16 %v7896_v21, %v7905_v32  ;;  %3481 = vadd.xlane.f32.xlu1 %v3480_v30  ;;  %v3438_v30 = vsel %vm820_vm1, %v3400_v51, 0.0  ;;  %v3370_v16 = vld [vmem:[%s11307_s3 + $0x28] sm:$0xff] }
  0xb0   :  { %v200_v45 = vadd.f32 1e-14, %v150_v38  ;;  %v6288_v48 = vpop.eup %6287  ;;  %v7917_v57 = vmul.f32 %v6286_v43, %v7417_v22 }
  0xb1   :  { %6297 = vrsqrt.f32 %v201_v44  ;;  %5941 = vmatprep.subr.msk.bf16.mxu1 %vm7861_vm2, %v5939_v49  ;;  %v7923_v60 = vmul.f32 %v6288_v48, %v7422_v23  ;;  %v3441_v44 = vsel %vm820_vm1, %v3401_v63, 0.0  ;;  %v3402_v48 = vmul.f32 %v3370_v16, %v3370_v16  ;;  %v3387_v63 = vld [vmem:[%s11307_s3 + $0xb0] sm:$0xff] }
  0xb2   :  { %6299 = vrsqrt.f32 %v200_v45  ;;  %3436 = vadd.xlane.f32.xlu0 %v3435_v6  ;;  %5896 = vmatpush3.bf16.xpose.msk.msra.mxu0 %vm7861_vm2, %v5891_v10  ;;  %v111_v22 = vpop.xlane.xlu1 %110  ;;  %v3486_v10 = vsel %vm820_vm1, %v3416_v8, 0.0  ;;  %v3386_v6 = vld [vmem:[%s11307_s3 + $0xa8] sm:$0xff] }
  0xb3   :  { %v108_v62 = vpop.xlane.xlu0 %107  ;;  %v6290_v1 = vpop.eup %6289  ;;  %5944 = vmatpush3.bf16.xpose.msk.msra.mxu1 %vm7861_vm2, %v5939_v49  ;;  %v187_v9 = vadd.f32 1e-14, %v111_v22  ;;  %v5897_v23 = vpack.c.bf16 %v7917_v57, %v7923_v60  ;;  %3484 = vadd.xlane.f32.xlu1 %v3483_v0  ;;  %v3418_v22 = vmul.f32 %v3386_v6, %v3386_v6 }
  0xb4   :  { %v186_v11 = vadd.f32 1e-14, %v108_v62  ;;  %v6292_v2 = vpop.eup %6291  ;;  %v7936_v31 = vmul.f32 %v6290_v1, %v7433_v28 }
  0xb5   :  { %6301 = vrsqrt.f32 %v187_v9  ;;  %5899 = vmatprep.subr.msk.bf16.mxu0 %vm7861_vm2, %v5897_v23  ;;  %v7945_v38 = vmul.f32 %v6292_v2, %v7438_v29  ;;  %v3371_v29 = vld [vmem:[%s11307_s3 + $0x30] sm:$0xff]  ;;  %v3492_v6 = vsel %vm820_vm1, %v3418_v22, 0.0 }
  0xb6   :  { %6303 = vrsqrt.f32 %v186_v11  ;;  %3439 = vadd.xlane.f32.xlu0 %v3438_v30  ;;  %v159_v28 = vpop.xlane.xlu1 %158  ;;  %v3403_v9 = vmul.f32 %v3371_v29, %v3371_v29 }
  0xb7   :  { %v156_v43 = vpop.xlane.xlu0 %155  ;;  %v6294_v45 = vpop.eup %6293  ;;  %v203_v49 = vadd.f32 1e-14, %v159_v28  ;;  %v5945_v17 = vpack.c.bf16 %v7936_v31, %v7945_v38  ;;  %3487 = vadd.xlane.f32.xlu1 %v3486_v10  ;;  %v3444_v10 = vsel %vm820_vm1, %v3402_v48, 0.0  ;;  %v3419_v28 = vmul.f32 %v3387_v63, %v3387_v63 }
  0xb8   :  { %v202_v51 = vadd.f32 1e-14, %v156_v43  ;;  %v6296_v0 = vpop.eup %6295  ;;  %v7957_v8 = vmul.f32 %v6294_v45, %v7449_v34  ;;  %v1867_v43 = vld [vmem:[%s11306_s2 + $0x90] sm:$0xff]  ;;  %v3388_v45 = vld [vmem:[%s11307_s3 + $0xb8] sm:$0xff] }
  0xb9   :  { %6305 = vrsqrt.f32 %v203_v49  ;;  %5947 = vmatprep.subr.msk.bf16.mxu1 %vm7861_vm2, %v5945_v17  ;;  %v7963_v62 = vmul.f32 %v6296_v0, %v7454_v35 }
  0xba   :  { %6307 = vrsqrt.f32 %v202_v51  ;;  %3442 = vadd.xlane.f32.xlu0 %v3441_v44  ;;  %5902 = vmatpush3.bf16.xpose.msk.msra.mxu0 %vm7861_vm2, %v5897_v23  ;;  %v117_v34 = vpop.xlane.xlu1 %116  ;;  %v3447_v51 = vsel %vm820_vm1, %v3403_v9, 0.0 }
  0xbb   :  { %v114_v1 = vpop.xlane.xlu0 %113  ;;  %v6298_v11 = vpop.eup %6297  ;;  %5950 = vmatpush3.bf16.xpose.msk.msra.mxu1 %vm7861_vm2, %v5945_v17  ;;  %v189_v30 = vadd.f32 1e-14, %v117_v34  ;;  %v5903_v35 = vpack.c.bf16 %v7957_v8, %v7963_v62  ;;  %3490 = vadd.xlane.f32.xlu1 %v3489_v61  ;;  %v3404_v17 = vmul.f32 %v3372_v33, %v3372_v33  ;;  %v3495_v34 = vsel %vm820_vm1, %v3419_v28, 0.0 }
  0xbc   :  { %v188_v2 = vadd.f32 1e-14, %v114_v1  ;;  %v6300_v23 = vpop.eup %6299  ;;  %v7979_v16 = vmul.f32 %v6298_v11, %v7465_v40  ;;  %v3420_v1 = vmul.f32 %v3388_v45, %v3388_v45  ;;  %v3373_v11 = vld [vmem:[%s11307_s3 + $0x40] sm:$0xff] }
  0xbd   :  { %6309 = vrsqrt.f32 %v189_v30  ;;  %5905 = vmatprep.subr.msk.bf16.mxu0 %vm7861_vm2, %v5903_v35  ;;  %v7988_v44 = vmul.f32 %v6300_v23, %v7470_v41  ;;  %v7996_v41 = vmul.f32 0.003921569, %v1867_v43  ;;  %v1868_v30 = vld [vmem:[%s11306_s2 + $0x98] sm:$0xff] }
  0xbe   :  { %6311 = vrsqrt.f32 %v188_v2  ;;  %3445 = vadd.xlane.f32.xlu0 %v3444_v10  ;;  %v165_v40 = vpop.xlane.xlu1 %164  ;;  %v3450_v10 = vsel %vm820_vm1, %v3404_v17, 0.0 }
  0xbf   :  { %v162_v49 = vpop.xlane.xlu0 %161  ;;  %v6302_v48 = vpop.eup %6301  ;;  %v205_v29 = vadd.f32 1e-14, %v165_v40  ;;  %v5951_v61 = vpack.c.bf16 %v7979_v16, %v7988_v44  ;;  %3493 = vadd.xlane.f32.xlu1 %v3492_v6  ;;  %v1931_v28 = vmul.f32 %v7996_v41, %v7996_v41  ;;  %v3498_v40 = vsel %vm820_vm1, %v3420_v1, 0.0 }
  0xc0   :  { %v204_v0 = vadd.f32 1e-14, %v162_v49  ;;  %v6304_v22 = vpop.eup %6303  ;;  %v7999_v63 = vmul.f32 %v6302_v48, %v7481_v46  ;;  %v3405_v49 = vmul.f32 %v3373_v11, %v3373_v11  ;;  %v3374_v11 = vld [vmem:[%s11307_s3 + $0x48] sm:$0xff] }
  0xc1   :  { %6313 = vrsqrt.f32 %v205_v29  ;;  %5953 = vmatprep.subr.msk.bf16.mxu1 %vm7861_vm2, %v5951_v61  ;;  %v8005_v9 = vmul.f32 %v6304_v22, %v7486_v47  ;;  %v1999_v1 = vsel %vm820_vm1, %v1931_v28, 0.0 }
  0xc2   :  { %6315 = vrsqrt.f32 %v204_v0  ;;  %3448 = vadd.xlane.f32.xlu0 %v3447_v51  ;;  %5908 = vmatpush3.bf16.xpose.msk.msra.mxu0 %vm7861_vm2, %v5903_v35  ;;  %v123_v46 = vpop.xlane.xlu1 %122  ;;  %v3389_v35 = vld [vmem:[%s11307_s3 + $0xc0] sm:$0xff]  ;;  %v8029_v51 = vmul.f32 0.003921569, %v1868_v30 }
  0xc3   :  { %v120_v2 = vpop.xlane.xlu0 %119  ;;  %v6306_v33 = vpop.eup %6305  ;;  %5956 = vmatpush3.bf16.xpose.msk.msra.mxu1 %vm7861_vm2, %v5951_v61  ;;  %v191_v47 = vadd.f32 1e-14, %v123_v46  ;;  %v5909_v6 = vpack.c.bf16 %v7999_v63, %v8005_v9  ;;  %3496 = vadd.xlane.f32.xlu1 %v3495_v34  ;;  %v3421_v0 = vmul.f32 %v3389_v35, %v3389_v35  ;;  %v3453_v46 = vsel %vm820_vm1, %v3405_v49, 0.0 }
  0xc4   :  { %v190_v23 = vadd.f32 1e-14, %v120_v2  ;;  %v6308_v43 = vpop.eup %6307  ;;  %v8026_v45 = vmul.f32 %v6306_v33, %v7497_v52  ;;  %v1932_v2 = vmul.f32 %v8029_v51, %v8029_v51  ;;  %v3406_v35 = vmul.f32 %v3374_v11, %v3374_v11  ;;  %v1870_v11 = vld [vmem:[%s11306_s2 + $0xa8] sm:$0xff] }
  0xc5   :  { %6317 = vrsqrt.f32 %v191_v47  ;;  %5911 = vmatprep.subr.msk.bf16.mxu0 %vm7861_vm2, %v5909_v6  ;;  %v8034_v17 = vmul.f32 %v6308_v43, %v7502_v53  ;;  %v3501_v28 = vsel %vm820_vm1, %v3421_v0, 0.0 }
  0xc6   :  { %6319 = vrsqrt.f32 %v190_v23  ;;  %3451 = vadd.xlane.f32.xlu0 %v3450_v10  ;;  %v171_v48 = vpop.xlane.xlu1 %170  ;;  %v1869_v10 = vld [vmem:[%s11306_s2 + $0xa0] sm:$0xff]  ;;  %v2002_v0 = vsel %vm820_vm1, %v1932_v2, 0.0  ;;  %v3456_v2 = vsel %vm820_vm1, %v3406_v35, 0.0 }
  0xc7   :  { %v168_v29 = vpop.xlane.xlu0 %167  ;;  %v6310_v61 = vpop.eup %6309  ;;  %v207_v52 = vadd.f32 1e-14, %v171_v48  ;;  %v5957_v34 = vpack.c.bf16 %v8026_v45, %v8034_v17  ;;  %3499 = vadd.xlane.f32.xlu1 %v3498_v40  ;;  %v8066_v48 = vmul.f32 0.003921569, %v1869_v10 }
  0xc8   :  { %v206_v22 = vadd.f32 1e-14, %v168_v29  ;;  %v6312_v53 = vpop.eup %6311  ;;  %v8043_v30 = vmul.f32 %v6310_v61, %v7513_v58  ;;  %v3390_v58 = vld [vmem:[%s11307_s3 + $0xc8] sm:$0xff] }
  0xc9   :  { %6321 = vrsqrt.f32 %v207_v52  ;;  %5959 = vmatprep.subr.msk.bf16.mxu1 %vm7861_vm2, %v5957_v34  ;;  %v8054_v33 = vmul.f32 %v6312_v53, %v7518_v59  ;;  %v3422_v52 = vmul.f32 %v3390_v58, %v3390_v58 }
  0xca   :  { %6323 = vrsqrt.f32 %v206_v22  ;;  %2000 = vadd.xlane.f32.xlu0 %v1999_v1  ;;  %5914 = vmatpush3.bf16.xpose.msk.msra.mxu0 %vm7861_vm2, %v5909_v6  ;;  %v129_v47 = vpop.xlane.xlu1 %128  ;;  %v7253_v6 = vld [vmem:[%s11304_s0 + $0xd8] sm:$0xff]  ;;  %v7254_v22 = vld [vmem:[%s11304_s0 + $0xd0] sm:$0xff] }
  0xcb   :  { %v126_v23 = vpop.xlane.xlu0 %125  ;;  %v6314_v43 = vpop.eup %6313  ;;  %5962 = vmatpush3.bf16.xpose.msk.msra.mxu1 %vm7861_vm2, %v5957_v34  ;;  %v193_v59 = vadd.f32 1e-14, %v129_v47  ;;  %v5915_v49 = vpack.c.bf16 %v8043_v30, %v8054_v33  ;;  %3454 = vadd.xlane.f32.xlu1 %v3453_v46  ;;  %v3375_v1 = vld [vmem:[%s11307_s3 + $0x50] sm:$0xff] }
  0xcc   :  { %v192_v40 = vadd.f32 1e-14, %v126_v23  ;;  %v6316_v29 = vpop.eup %6315  ;;  %v8071_v61 = vmul.f32 %v7253_v6, %v6314_v43  ;;  %v1933_v43 = vmul.f32 %v8066_v48, %v8066_v48  ;;  %v3407_v6 = vmul.f32 %v3375_v1, %v3375_v1 }
  0xcd   :  { %6325 = vrsqrt.f32 %v193_v59  ;;  %5917 = vmatprep.subr.msk.bf16.mxu0 %vm7861_vm2, %v5915_v49  ;;  %v8079_v34 = vmul.f32 %v7254_v22, %v6316_v29  ;;  %v3391_v59 = vld [vmem:[%s11307_s3 + $0xd0] sm:$0xff]  ;;  %v3504_v29 = vsel %vm820_vm1, %v3422_v52, 0.0  ;;  %v8101_v22 = vmul.f32 0.003921569, %v1870_v11 }
  0xce   :  { %6327 = vrsqrt.f32 %v192_v40  ;;  %3502 = vadd.xlane.f32.xlu0 %v3501_v28  ;;  %v177_v53 = vpop.xlane.xlu1 %176  ;;  %v7255_v28 = vld [vmem:[%s11304_s0 + $0x68] sm:$0xff]  ;;  %v3423_v1 = vmul.f32 %v3391_v59, %v3391_v59 }
  0xcf   :  { %v174_v46 = vpop.xlane.xlu0 %173  ;;  %v6318_v10 = vpop.eup %6317  ;;  %v209_v58 = vadd.f32 1e-14, %v177_v53  ;;  %v5963_v23 = vpack.c.bf16 %v8071_v61, %v8079_v34  ;;  %2003 = vadd.xlane.f32.xlu1 %v2002_v0  ;;  %11518 = vst [vmem:[#allocation14_spill] sm:$0xff] %v8101_v22  ;;  %v7256_v0 = vld [vmem:[%s11304_s0 + $0x60] sm:$0xff] }
  0xd0   :  { %v208_v47 = vadd.f32 1e-14, %v174_v46  ;;  %v6320_v40 = vpop.eup %6319  ;;  %v8098_v35 = vmul.f32 %v7255_v28, %v6318_v10 }
  0xd1   :  { %6329 = vrsqrt.f32 %v209_v58  ;;  %5965 = vmatprep.subr.msk.bf16.mxu1 %vm7861_vm2, %v5963_v23  ;;  %v8108_v53 = vmul.f32 %v7256_v0, %v6320_v40  ;;  %v2005_v40 = vsel %vm820_vm1, %v1933_v43, 0.0  ;;  %v1934_v0 = vmul.f32 %v8101_v22, %v8101_v22  ;;  %v3376_v43 = vld [vmem:[%s11307_s3 + $0x58] sm:$0xff]  ;;  %v8253_v22 = vld [vmem:[%s11307_s3 + $0x70] sm:$0xff] }
  0xd2   :  { %6331 = vrsqrt.f32 %v208_v47  ;;  %3457 = vadd.xlane.f32.xlu0 %v3456_v2  ;;  %5920 = vmatpush3.bf16.xpose.msk.msra.mxu0 %vm7861_vm2, %v5915_v49  ;;  %v826_v46 = vpop.xlane.xlu1 %825  ;;  %v1871_v2 = vld [vmem:[%s11306_s2 + $0xb0] sm:$0xff]  ;;  %v7257_v47 = vld [vmem:[%s11304_s0 + $0xe8] sm:$0xff]  ;;  %11523 = vst [vmem:[#allocation17_spill] sm:$0xff] %v8253_v22 }
  0xd3   :  { %v823_v52 = vpop.xlane.xlu0 %822  ;;  %v6322_v11 = vpop.eup %6321  ;;  %5968 = vmatpush3.bf16.xpose.msk.msra.mxu1 %vm7861_vm2, %v5963_v23  ;;  %v918_v10 = vadd.f32 1e-12, %v826_v46  ;;  %v5921_v28 = vpack.c.bf16 %v8098_v35, %v8108_v53  ;;  %3505 = vadd.xlane.f32.xlu1 %v3504_v29  ;;  %v3459_v23 = vsel %vm820_vm1, %v3407_v6, 0.0  ;;  %v7258_v29 = vld [vmem:[%s11304_s0 + $0xe0] sm:$0xff]  ;;  %v3392_v6 = vld [vmem:[%s11307_s3 + $0xd8] sm:$0xff]  ;;  %v2008_v4 = vsel %vm820_vm1, %v1934_v0, 0.0 }
  0xd4   :  { %v917_v58 = vadd.f32 1e-12, %v823_v52  ;;  %v6324_v49 = vpop.eup %6323  ;;  %v8123_v59 = vmul.f32 %v7257_v47, %v6322_v11  ;;  %v3507_v47 = vsel %vm820_vm1, %v3423_v1, 0.0  ;;  %v3424_v1 = vmul.f32 %v3392_v6, %v3392_v6 }
  0xd5   :  { %6333 = vrsqrt.f32 %v918_v10  ;;  %5923 = vmatprep.subr.msk.bf16.mxu0 %vm7861_vm2, %v5921_v28  ;;  %v8136_v46 = vmul.f32 %v7258_v29, %v6324_v49  ;;  %v8142_v10 = vmul.f32 0.003921569, %v1871_v2  ;;  %v3408_v49 = vmul.f32 %v3376_v43, %v3376_v43  ;;  %v7260_v2 = vld [vmem:[%s11304_s0 + $0x70] sm:$0xff]  ;;  %v3377_v43 = vld [vmem:[%s11307_s3 + $0x60] sm:$0xff] }
  0xd6   :  { %6335 = vrsqrt.f32 %v917_v58  ;;  %2006 = vadd.xlane.f32.xlu0 %v2005_v40  ;;  %v874_v52 = vpop.xlane.xlu1 %873  ;;  %v7259_v58 = vld [vmem:[%s11304_s0 + $0x78] sm:$0xff]  ;;  %v3510_v3 = vsel %vm820_vm1, %v3424_v1, 0.0  ;;  %v3409_v55 = vmul.f32 %v3377_v43, %v3377_v43 }
  0xd7   :  { %v871_v11 = vpop.xlane.xlu0 %870  ;;  %11519 = vst [vmem:[#allocation15_spill] sm:$0xff] %v8142_v10  ;;  %v6326_v42 = vpop.eup %6325  ;;  %v934_v39 = vadd.f32 1e-12, %v874_v52  ;;  %v5969_v12 = vpack.c.bf16 %v8123_v59, %v8136_v46  ;;  %3460 = vadd.xlane.f32.xlu1 %v3459_v23  ;;  %v1935_v6 = vmul.f32 %v8142_v10, %v8142_v10  ;;  %v3378_v10 = vld [vmem:[%s11307_s3 + $0x68] sm:$0xff] }
  0xd8   :  { %v933_v13 = vadd.f32 1e-12, %v871_v11  ;;  %v6328_v29 = vpop.eup %6327  ;;  %v8149_v40 = vmul.f32 %v7259_v58, %v6326_v42  ;;  %v1872_v42 = vld [vmem:[%s11306_s2 + $0xb8] sm:$0xff] }
  0xd9   :  { %6337 = vrsqrt.f32 %v934_v39  ;;  %5971 = vmatprep.subr.msk.bf16.mxu1 %vm7861_vm2, %v5969_v12  ;;  %v8157_v23 = vmul.f32 %v7260_v2, %v6328_v29 }
  0xda   :  { %6339 = vrsqrt.f32 %v933_v13  ;;  %3508 = vadd.xlane.f32.xlu0 %v3507_v47  ;;  %5926 = vmatpush3.bf16.xpose.msk.msra.mxu0 %vm7861_vm2, %v5921_v28  ;;  %v832_v39 = vpop.xlane.xlu1 %831  ;;  %v3462_v13 = vsel %vm820_vm1, %v3408_v49, 0.0  ;;  %v7261_v28 = vld [vmem:[%s11304_s0 + $0xf8] sm:$0xff] }
  0xdb   :  { %v829_v0 = vpop.xlane.xlu0 %828  ;;  %v6330_v52 = vpop.eup %6329  ;;  %5974 = vmatpush3.bf16.xpose.msk.msra.mxu1 %vm7861_vm2, %v5969_v12  ;;  %v920_v11 = vadd.f32 1e-12, %v832_v39  ;;  %v5927_v58 = vpack.c.bf16 %v8149_v40, %v8157_v23  ;;  %2009 = vadd.xlane.f32.xlu1 %v2008_v4  ;;  %v3393_v12 = vld [vmem:[%s11307_s3 + $0xe0] sm:$0xff]  ;;  %v8183_v39 = vmul.f32 0.003921569, %v1872_v42  ;;  %v7262_v4 = vld [vmem:[%s11304_s0 + $0xf0] sm:$0xff] }
  0xdc   :  { %v919_v29 = vadd.f32 1e-12, %v829_v0  ;;  %v6332_v47 = vpop.eup %6331  ;;  %v8177_v2 = vmul.f32 %v7261_v28, %v6330_v52  ;;  %v2011_v0 = vsel %vm820_vm1, %v1935_v6, 0.0  ;;  %v3425_v54 = vmul.f32 %v3393_v12, %v3393_v12 }
  0xdd   :  { %11520 = vst [vmem:[#allocation16_spill] sm:$0xff] %v8183_v39  ;;  %6341 = vrsqrt.f32 %v920_v11  ;;  %5929 = vmatprep.subr.msk.bf16.mxu0 %vm7861_vm2, %v5927_v58  ;;  %v8190_v49 = vmul.f32 %v7262_v4, %v6332_v47  ;;  %v3465_v6 = vsel %vm820_vm1, %v3409_v55, 0.0  ;;  %v1936_v4 = vmul.f32 %v8183_v39, %v8183_v39  ;;  %v7265_v39 = vld [vmem:[%s11305_s1 + $0x88] sm:$0xff] }
  0xde   :  { %6343 = vrsqrt.f32 %v919_v29  ;;  %3463 = vadd.xlane.f32.xlu0 %v3462_v13  ;;  %v880_v1 = vpop.xlane.xlu1 %879  ;;  %v7263_v29 = vld [vmem:[%s11305_s1 + $0x8] sm:$0xff] }
  0xdf   :  { %v877_v43 = vpop.xlane.xlu0 %876  ;;  %v6334_v52 = vpop.eup %6333  ;;  %v936_v28 = vadd.f32 1e-12, %v880_v1  ;;  %v5975_v11 = vpack.c.bf16 %v8177_v2, %v8190_v49  ;;  %3511 = vadd.xlane.f32.xlu1 %v3510_v3  ;;  %v7264_v3 = vld [vmem:[%s11305_s1] sm:$0xff] }
  0xe0   :  { %v935_v42 = vadd.f32 1e-12, %v877_v43  ;;  %v6336_v47 = vpop.eup %6335  ;;  %v8201_v13 = vmul.f32 %v7263_v29, %v6334_v52  ;;  %v1873_v1 = vld [vmem:[%s11306_s2 + $0xc0] sm:$0xff] }
  0xe1   :  { %6345 = vrsqrt.f32 %v936_v28  ;;  %5977 = vmatprep.subr.msk.bf16.mxu1 %vm7861_vm2, %v5975_v11  ;;  %v8211_v12 = vmul.f32 %v7264_v3, %v6336_v47  ;;  %v3410_v28 = vmul.f32 %v3378_v10, %v3378_v10  ;;  %v2014_v10 = vsel %vm820_vm1, %v1936_v4, 0.0 }
  0xe2   :  { %6347 = vrsqrt.f32 %v935_v42  ;;  %2012 = vadd.xlane.f32.xlu0 %v2011_v0  ;;  %5932 = vmatpush3.bf16.xpose.msk.msra.mxu0 %vm7861_vm2, %v5927_v58  ;;  %v838_v55 = vpop.xlane.xlu1 %837  ;;  %v3513_v58 = vsel %vm820_vm1, %v3425_v54, 0.0  ;;  %v7266_v54 = vld [vmem:[%s11305_s1 + $0x80] sm:$0xff] }
  0xe3   :  { %v835_v43 = vpop.xlane.xlu0 %834  ;;  %v6338_v47 = vpop.eup %6337  ;;  %5980 = vmatpush3.bf16.xpose.msk.msra.mxu1 %vm7861_vm2, %v5975_v11  ;;  %v922_v29 = vadd.f32 1e-12, %v838_v55  ;;  %v5981_v0 = vpack.c.bf16 %v8201_v13, %v8211_v12  ;;  %3466 = vadd.xlane.f32.xlu1 %v3465_v6  ;;  %v8238_v11 = vmul.f32 0.003921569, %v1873_v1  ;;  %v3468_v55 = vsel %vm820_vm1, %v3410_v28, 0.0 }
  0xe4   :  { %v921_v3 = vadd.f32 1e-12, %v835_v43  ;;  %v6340_v42 = vpop.eup %6339  ;;  %v8232_v37 = vmul.f32 %v7265_v39, %v6338_v47 }
  0xe5   :  { %6349 = vrsqrt.f32 %v922_v29  ;;  %5983 = vmatprep.subr.msk.bf16.mxu0 %vm8220_vm3, %v5981_v0  ;;  %v8245_v6 = vmul.f32 %v7266_v54, %v6340_v42  ;;  %v1937_v28 = vmul.f32 %v8238_v11, %v8238_v11  ;;  %v8274_v54 = vld [vmem:[%s11307_s3 + $0xf0] sm:$0xff] }
  0xe6   :  { %6351 = vrsqrt.f32 %v921_v3  ;;  %3514 = vadd.xlane.f32.xlu0 %v3513_v58  ;;  %v886_v39 = vpop.xlane.xlu1 %885  ;;  %v7267_v3 = vld [vmem:[%s11305_s1 + $0x18] sm:$0xff]  ;;  %11524 = vst [vmem:[#allocation18_spill] sm:$0xff] %v8274_v54 }
  0xe7   :  { %v883_v4 = vpop.xlane.xlu0 %882  ;;  %v6342_v43 = vpop.eup %6341  ;;  %v938_v47 = vadd.f32 1e-12, %v886_v39  ;;  %v6029_v29 = vpack.c.bf16 %v8232_v37, %v8245_v6  ;;  %2015 = vadd.xlane.f32.xlu1 %v2014_v10  ;;  %v7268_v10 = vld [vmem:[%s11305_s1 + $0x10] sm:$0xff] }
  0xe8   :  { %v937_v1 = vadd.f32 1e-12, %v883_v4  ;;  %v6344_v42 = vpop.eup %6343  ;;  %v8258_v58 = vmul.f32 %v7267_v3, %v6342_v43  ;;  %v3411_v4 = vmul.f32 %v8253_v22, %v8253_v22  ;;  %v1874_v43 = vld [vmem:[%s11306_s2 + $0xc8] sm:$0xff] }
  0xe9   :  { %6353 = vrsqrt.f32 %v938_v47  ;;  %5470 = vmatmul.mubr.msk.f32.vlgmr.msra.gmra.mrb[0].mxu0 %vm81_vm0, %v7857_v26  ;;  %6031 = vmatprep.subr.msk.bf16.mxu1 %vm8220_vm3, %v6029_v29  ;;  %v8269_v27 = vmul.f32 %v7268_v10, %v6344_v42  ;;  %v2017_v10 = vsel %vm820_vm1, %v1937_v28, 0.0  ;;  %v8317_v28 = vld [vmem:[%s11307_s3 + $0x78] sm:$0xff] }
  0xea   :  { %6355 = vrsqrt.f32 %v937_v1  ;;  %5526 = vmatmul.mubr.msk.f32.vlgmr.msra.gmra.mrb[0].mxu1 %vm81_vm0, %v7854_v20  ;;  %3469 = vadd.xlane.f32.xlu0 %v3468_v55  ;;  %v844_v26 = vpop.xlane.xlu1 %843  ;;  %v3516_v55 = vsel %vm820_vm1, %v3426_v36, 0.0  ;;  %v1875_v36 = vld [vmem:[%s11306_s2 + $0xd0] sm:$0xff]  ;;  %11525 = vst [vmem:[#allocation19_spill] sm:$0xff] %v8317_v28 }
  0xeb   :  { %v841_v39 = vpop.xlane.xlu0 %840  ;;  %v6346_v47 = vpop.eup %6345  ;;  %5472 = vmatprep.mubr.msk.f32.mxu0 %vm81_vm0, %v7885_v50  ;;  %5528 = vmatprep.mubr.msk.f32.mxu1 %vm81_vm0, %v7905_v32  ;;  %v924_v1 = vadd.f32 1e-12, %v844_v26  ;;  %v5987_v20 = vpack.c.bf16 %v8258_v58, %v8269_v27  ;;  %v7269_v50 = vld [vmem:[%s11305_s1 + $0x98] sm:$0xff]  ;;  %v3427_v26 = vmul.f32 %v8274_v54, %v8274_v54  ;;  %v8328_v54 = vmul.f32 0.003921569, %v1875_v36 }
  0xec   :  { %v923_v42 = vadd.f32 1e-12, %v841_v39  ;;  %v6348_v3 = vpop.eup %6347  ;;  %5986 = vmatpush3.bf16.xpose.msk.msra.mxu0 %vm8220_vm3, %v5981_v0  ;;  %6034 = vmatpush3.bf16.xpose.msk.msra.mxu1 %vm8220_vm3, %v6029_v29  ;;  %v8298_v32 = vmul.f32 %v7269_v50, %v6346_v47  ;;  %v7270_v0 = vld [vmem:[%s11305_s1 + $0x90] sm:$0xff]  ;;  %v8319_v39 = vmul.f32 0.003921569, %v1874_v43 }
  0xed   :  { %6357 = vrsqrt.f32 %v924_v1  ;;  %5473 = vmatmul.mubr.msk.f32.gmra.mrb[2].mxu0 %vm81_vm0, %v7877_v56  ;;  %5989 = vmatprep.subr.msk.bf16.mxu0 %vm8220_vm3, %v5987_v20  ;;  %v8312_v29 = vmul.f32 %v7270_v0, %v6348_v3  ;;  %v3471_v1 = vsel %vm820_vm1, %v3411_v4, 0.0  ;;  %v7271_v4 = vld [vmem:[%s11305_s1 + $0x28] sm:$0xff] }
  0xee   :  { %6359 = vrsqrt.f32 %v923_v42  ;;  %5529 = vmatmul.mubr.msk.f32.gmra.mrb[2].mxu1 %vm81_vm0, %v7896_v21  ;;  %3517 = vadd.xlane.f32.xlu1 %v3516_v55  ;;  %v892_v56 = vpop.xlane.xlu1 %891  ;;  %v3519_v21 = vsel %vm820_vm1, %v3427_v26, 0.0  ;;  %v1877_v26 = vld [vmem:[%s11306_s2 + $0xe0] sm:$0xff]  ;;  %v1938_v36 = vmul.f32 %v8319_v39, %v8319_v39 }
  0xef   :  { %v889_v47 = vpop.xlane.xlu0 %888  ;;  %v6350_v50 = vpop.eup %6349  ;;  %2018 = vadd.xlane.f32.xlu0 %v2017_v10  ;;  %5475 = vmatprep.mubr.msk.f32.mxu0 %vm81_vm0, %v7923_v60  ;;  %v940_v3 = vadd.f32 1e-12, %v892_v56  ;;  %v6035_v43 = vpack.c.bf16 %v8298_v32, %v8312_v29  ;;  %v3412_v60 = vmul.f32 %v8317_v28, %v8317_v28 }
  0xf0   :  { %v939_v0 = vadd.f32 1e-12, %v889_v47  ;;  %v6352_v42 = vpop.eup %6351  ;;  %5531 = vmatprep.mubr.msk.f32.mxu1 %vm81_vm0, %v7945_v38  ;;  %v8336_v55 = vmul.f32 %v7271_v4, %v6350_v50  ;;  %v7272_v38 = vld [vmem:[%s11305_s1 + $0x20] sm:$0xff]  ;;  %v8362_v50 = vld [vmem:[%s11307_s3 + $0xf8] sm:$0xff] }
  0xf1   :  { %6361 = vrsqrt.f32 %v940_v3  ;;  %5476 = vmatmul.mubr.msk.f32.gmra.mrb[4].mxu0 %vm81_vm0, %v7917_v57  ;;  %6037 = vmatprep.subr.msk.bf16.mxu1 %vm8220_vm3, %v6035_v43  ;;  %v8347_v10 = vmul.f32 %v7272_v38, %v6352_v42  ;;  %v1876_v57 = vld [vmem:[%s11306_s2 + $0xd8] sm:$0xff]  ;;  %11526 = vst [vmem:[#allocation20_spill] sm:$0xff] %v8362_v50 }
  0xf2   :  { %6363 = vrsqrt.f32 %v939_v0  ;;  %5532 = vmatmul.mubr.msk.f32.gmra.mrb[4].mxu1 %vm81_vm0, %v7936_v31  ;;  %3472 = vadd.xlane.f32.xlu1 %v3471_v1  ;;  %v850_v56 = vpop.xlane.xlu1 %849  ;;  %v1939_v31 = vmul.f32 %v8328_v54, %v8328_v54 }
  0xf3   :  { %v847_v47 = vpop.xlane.xlu0 %846  ;;  %v6354_v3 = vpop.eup %6353  ;;  %3520 = vadd.xlane.f32.xlu0 %v3519_v21  ;;  %5478 = vmatprep.mubr.msk.f32.mxu0 %vm81_vm0, %v7963_v62  ;;  %v926_v42 = vadd.f32 1e-12, %v850_v56  ;;  %v5993_v0 = vpack.c.bf16 %v8336_v55, %v8347_v10  ;;  %v3474_v21 = vsel %vm820_vm1, %v3412_v60, 0.0  ;;  %v7273_v62 = vld [vmem:[%s11305_s1 + $0xa8] sm:$0xff]  ;;  %v8380_v56 = vmul.f32 0.003921569, %v1877_v26 }
  0xf4   :  { %v925_v4 = vadd.f32 1e-12, %v847_v47  ;;  %v6356_v1 = vpop.eup %6355  ;;  %5534 = vmatprep.mubr.msk.f32.mxu1 %vm81_vm0, %v7988_v44  ;;  %5992 = vmatpush3.bf16.xpose.msk.msra.mxu0 %vm8220_vm3, %v5987_v20  ;;  %v8378_v38 = vmul.f32 %v7273_v62, %v6354_v3  ;;  %v8382_v47 = vmul.f32 0.003921569, %v1876_v57  ;;  %v7274_v44 = vld [vmem:[%s11305_s1 + $0xa0] sm:$0xff]  ;;  %v1879_v60 = vld [vmem:[%s11306_s2 + $0xf0] sm:$0xff]  ;;  %v3428_v57 = vmul.f32 %v8362_v50, %v8362_v50 }
  0xf5   :  { %6040 = vmatpush3.bf16.xpose.msk.msra.mxu1 %vm8220_vm3, %v6035_v43  ;;  %6365 = vrsqrt.f32 %v926_v42  ;;  %5479 = vmatmul.mubr.msk.f32.gmra.mrb[6].mxu0 %vm81_vm0, %v7957_v8  ;;  %v8391_v20 = vmul.f32 %v7274_v44, %v6356_v1  ;;  %v2020_v26 = vsel %vm820_vm1, %v1938_v36, 0.0  ;;  %v1878_v3 = vld [vmem:[%s11306_s2 + $0xe8] sm:$0xff]  ;;  %v7275_v44 = vld [vmem:[%s11305_s1 + $0x38] sm:$0xff] }
  0xf6   :  { %6367 = vrsqrt.f32 %v925_v4  ;;  %5535 = vmatmul.mubr.msk.f32.gmra.mrb[6].mxu1 %vm81_vm0, %v7979_v16  ;;  %5995 = vmatprep.subr.msk.bf16.mxu0 %vm8220_vm3, %v5993_v0  ;;  %v898_v8 = vpop.xlane.xlu1 %897  ;;  %v2023_v16 = vsel %vm820_vm1, %v1939_v31, 0.0 }
  0xf7   :  { %v895_v43 = vpop.xlane.xlu0 %894  ;;  %v6358_v42 = vpop.eup %6357  ;;  %3475 = vadd.xlane.f32.xlu0 %v3474_v21  ;;  %5481 = vmatprep.mubr.msk.f32.mxu0 %vm81_vm0, %v8005_v9  ;;  %v942_v36 = vadd.f32 1e-12, %v898_v8  ;;  %v6041_v4 = vpack.c.bf16 %v8378_v38, %v8391_v20  ;;  %v1941_v9 = vmul.f32 %v8380_v56, %v8380_v56  ;;  %v8420_v21 = vmul.f32 0.003921569, %v1879_v60 }
  0xf8   :  { %v941_v1 = vadd.f32 1e-12, %v895_v43  ;;  %v6360_v62 = vpop.eup %6359  ;;  %5537 = vmatprep.mubr.msk.f32.mxu1 %vm81_vm0, %v8034_v17  ;;  %v8416_v50 = vmul.f32 %v7275_v44, %v6358_v42  ;;  %2021 = vadd.xlane.f32.xlu1 %v2020_v26  ;;  %v1940_v8 = vmul.f32 %v8382_v47, %v8382_v47  ;;  %v7276_v17 = vld [vmem:[%s11305_s1 + $0x30] sm:$0xff]  ;;  %v3522_v60 = vsel %vm820_vm1, %v3428_v57, 0.0  ;;  %v1880_v42 = vld [vmem:[%s11306_s2 + $0xf8] sm:$0xff] }
  0xf9   :  { %11527 = vst [vmem:[#allocation21_spill] sm:$0xff] %v8420_v21  ;;  %6369 = vrsqrt.f32 %v942_v36  ;;  %5482 = vmatmul.mubr.msk.f32.gmra.mrb[8].mxu0 %vm81_vm0, %v7999_v63  ;;  %6043 = vmatprep.subr.msk.bf16.mxu1 %vm8220_vm3, %v6041_v4  ;;  %v8431_v31 = vmul.f32 %v7276_v17, %v6360_v62  ;;  %v8434_v43 = vmul.f32 0.003921569, %v1878_v3  ;;  %v7277_v62 = vld [vmem:[%s11305_s1 + $0xb8] sm:$0xff] }
  0xfa   :  { %6371 = vrsqrt.f32 %v941_v1  ;;  %5538 = vmatmul.mubr.msk.f32.gmra.mrb[8].mxu1 %vm81_vm0, %v8026_v45  ;;  %5484 = vmatprep.mubr.msk.f32.mxu0 %vm81_vm0, %v8054_v33  ;;  %v856_v63 = vpop.xlane.xlu1 %855  ;;  %v2029_v33 = vsel %vm820_vm1, %v1941_v9, 0.0 }
  0xfb   :  { %v853_v26 = vpop.xlane.xlu0 %852  ;;  %v6362_v36 = vpop.eup %6361  ;;  %2024 = vadd.xlane.f32.xlu0 %v2023_v16  ;;  %5540 = vmatprep.mubr.msk.f32.mxu1 %vm81_vm0, %v8079_v34  ;;  %v928_v57 = vadd.f32 1e-12, %v856_v63  ;;  %v5999_v1 = vpack.c.bf16 %v8416_v50, %v8431_v31  ;;  %v1943_v34 = vmul.f32 %v8420_v21, %v8420_v21  ;;  %v2026_v16 = vsel %vm820_vm1, %v1940_v8, 0.0 }
  0xfc   :  { %v927_v3 = vadd.f32 1e-12, %v853_v26  ;;  %v6364_v45 = vpop.eup %6363  ;;  %5998 = vmatpush3.bf16.xpose.msk.msra.mxu0 %vm8220_vm3, %v5993_v0  ;;  %v8453_v44 = vmul.f32 %v7277_v62, %v6362_v36  ;;  %3523 = vadd.xlane.f32.xlu1 %v3522_v60  ;;  %v7278_v0 = vld [vmem:[%s11305_s1 + $0xb0] sm:$0xff]  ;;  %v1942_v17 = vmul.f32 %v8434_v43, %v8434_v43  ;;  %v8469_v63 = vmul.f32 0.003921569, %v1880_v42 }
  0xfd   :  { %6046 = vmatpush3.bf16.xpose.msk.msra.mxu1 %vm8220_vm3, %v6041_v4  ;;  %6373 = vrsqrt.f32 %v928_v57  ;;  %5485 = vmatmul.mubr.msk.f32.gmra.mrb[10].mxu0 %vm81_vm0, %v8043_v30  ;;  %v8465_v9 = vmul.f32 %v7278_v0, %v6364_v45  ;;  %v7279_v57 = vld [vmem:[%s11305_s1 + $0x48] sm:$0xff] }
  0xfe   :  { %11528 = vst [vmem:[#allocation22_spill] sm:$0xff] %v8469_v63  ;;  %6375 = vrsqrt.f32 %v927_v3  ;;  %5541 = vmatmul.mubr.msk.f32.gmra.mrb[10].mxu1 %vm81_vm0, %v8071_v61  ;;  %6001 = vmatprep.subr.msk.bf16.mxu0 %vm8220_vm3, %v5999_v1  ;;  %v904_v4 = vpop.xlane.xlu1 %903  ;;  %v2035_v61 = vsel %vm820_vm1, %v1943_v34, 0.0  ;;  %v2032_v45 = vsel %vm820_vm1, %v1942_v17, 0.0 }
  0xff   :  { %v901_v30 = vpop.xlane.xlu0 %900  ;;  %v6366_v8 = vpop.eup %6365  ;;  %2030 = vadd.xlane.f32.xlu0 %v2029_v33  ;;  %5487 = vmatprep.mubr.msk.f32.mxu0 %vm81_vm0, %v8108_v53  ;;  %v944_v60 = vadd.f32 1e-12, %v904_v4  ;;  %v6047_v42 = vpack.c.bf16 %v8453_v44, %v8465_v9  ;;  %v7280_v53 = vld [vmem:[%s11305_s1 + $0x40] sm:$0xff]  ;;  %v1944_v33 = vmul.f32 %v8469_v63, %v8469_v63 }
 0x100   :  { %v943_v26 = vadd.f32 1e-12, %v901_v30  ;;  %v6368_v36 = vpop.eup %6367  ;;  %5543 = vmatprep.mubr.msk.f32.mxu1 %vm81_vm0, %v8136_v46  ;;  %v8485_v3 = vmul.f32 %v7279_v57, %v6366_v8  ;;  %2027 = vadd.xlane.f32.xlu1 %v2026_v16 }
 0x101   :  { %6377 = vrsqrt.f32 %v944_v60  ;;  %5488 = vmatmul.mubr.msk.f32.gmra.mrb[12].mxu0 %vm81_vm0, %v8098_v35  ;;  %6049 = vmatprep.subr.msk.bf16.mxu1 %vm8220_vm3, %v6047_v42  ;;  %v8494_v46 = vmul.f32 %v7280_v53, %v6368_v36 }
 0x102   :  { %6379 = vrsqrt.f32 %v943_v26  ;;  %5544 = vmatmul.mubr.msk.f32.gmra.mrb[12].mxu1 %vm81_vm0, %v8123_v59  ;;  %5490 = vmatprep.mubr.msk.f32.mxu0 %vm81_vm0, %v8157_v23  ;;  %v862_v35 = vpop.xlane.xlu1 %861  ;;  %v7281_v59 = vld [vmem:[%s11305_s1 + $0xc8] sm:$0xff] }
 0x103   :  { %v859_v62 = vpop.xlane.xlu0 %858  ;;  %v6370_v34 = vpop.eup %6369  ;;  %2036 = vadd.xlane.f32.xlu0 %v2035_v61  ;;  %5546 = vmatprep.mubr.msk.f32.mxu1 %vm81_vm0, %v8190_v49  ;;  %v930_v16 = vadd.f32 1e-12, %v862_v35  ;;  %v6005_v17 = vpack.c.bf16 %v8485_v3, %v8494_v46  ;;  %v7282_v49 = vld [vmem:[%s11305_s1 + $0xc0] sm:$0xff] }
 0x104   :  { %v929_v0 = vadd.f32 1e-12, %v859_v62  ;;  %v6372_v4 = vpop.eup %6371  ;;  %6004 = vmatpush3.bf16.xpose.msk.msra.mxu0 %vm8220_vm3, %v5999_v1  ;;  %v8512_v23 = vmul.f32 %v7281_v59, %v6370_v34  ;;  %2033 = vadd.xlane.f32.xlu1 %v2032_v45  ;;  %v2038_v1 = vsel %vm820_vm1, %v1944_v33, 0.0  ;;  %v7286_v59 = vld [vmem:[%s11305_s1 + $0xd0] sm:$0xff] }
 0x105   :  { %6052 = vmatpush3.bf16.xpose.msk.msra.mxu1 %vm8220_vm3, %v6047_v42  ;;  %6381 = vrsqrt.f32 %v930_v16  ;;  %5491 = vmatmul.mubr.msk.f32.gmra.mrb[14].mxu0 %vm81_vm0, %v8149_v40  ;;  %v8521_v30 = vmul.f32 %v7282_v49, %v6372_v4 }
 0x106   :  { %6383 = vrsqrt.f32 %v929_v0  ;;  %5547 = vmatmul.mubr.msk.f32.gmra.mrb[14].mxu1 %vm81_vm0, %v8177_v2  ;;  %6007 = vmatprep.subr.msk.bf16.mxu0 %vm8220_vm3, %v6005_v17  ;;  %v910_v8 = vpop.xlane.xlu1 %909  ;;  %v7283_v2 = vld [vmem:[%s11305_s1 + $0x58] sm:$0xff] }
 0x107   :  { %v907_v60 = vpop.xlane.xlu0 %906  ;;  %v6374_v26 = vpop.eup %6373  ;;  %5581 = vmatprep.mubr.msk.f32.mxu0 %vm820_vm1, %v8211_v12  ;;  %5637 = vmatprep.mubr.msk.f32.mxu1 %vm820_vm1, %v8245_v6  ;;  %v946_v40 = vadd.f32 1e-12, %v910_v8  ;;  %v6053_v36 = vpack.c.bf16 %v8512_v23, %v8521_v30  ;;  %v7284_v12 = vld [vmem:[%s11305_s1 + $0x50] sm:$0xff]  ;;  %v7285_v0 = vld [vmem:[%s11305_s1 + $0xd8] sm:$0xff] }
 0x108   :  { %v945_v42 = vadd.f32 1e-12, %v907_v60  ;;  %v6376_v61 = vpop.eup %6375  ;;  %v8537_v57 = vmul.f32 %v7283_v2, %v6374_v26  ;;  %2039 = vadd.xlane.f32.xlu1 %v2038_v1  ;;  %v7288_v2 = vld [vmem:[%s11305_s1 + $0x60] sm:$0xff] }
 0x109   :  { %6385 = vrsqrt.f32 %v946_v40  ;;  %6055 = vmatprep.subr.msk.bf16.mxu1 %vm8220_vm3, %v6053_v36  ;;  %v8544_v6 = vmul.f32 %v7284_v12, %v6376_v61 }
 0x10a   :  { %6387 = vrsqrt.f32 %v945_v42  ;;  %v868_v53 = vpop.xlane.xlu1 %867 }
 0x10b   :  { %v865_v45 = vpop.xlane.xlu0 %864  ;;  %v6378_v33 = vpop.eup %6377  ;;  %v932_v35 = vadd.f32 1e-12, %v868_v53  ;;  %v6011_v34 = vpack.c.bf16 %v8537_v57, %v8544_v6 }
 0x10c   :  { %v931_v62 = vadd.f32 1e-12, %v865_v45  ;;  %v6380_v16 = vpop.eup %6379  ;;  %6010 = vmatpush3.bf16.xpose.msk.msra.mxu0 %vm8220_vm3, %v6005_v17  ;;  %v8553_v4 = vmul.f32 %v7285_v0, %v6378_v33 }
 0x10d   :  { %6058 = vmatpush3.bf16.xpose.msk.msra.mxu1 %vm8220_vm3, %v6053_v36  ;;  %6389 = vrsqrt.f32 %v932_v35  ;;  %6013 = vmatprep.subr.msk.bf16.mxu0 %vm8220_vm3, %v6011_v34  ;;  %v8562_v49 = vmul.f32 %v7286_v59, %v6380_v16  ;;  %v7287_v36 = vld [vmem:[%s11305_s1 + $0x68] sm:$0xff]  ;;  %v7290_v59 = vld [vmem:[%s11305_s1 + $0xe0] sm:$0xff] }
 0x10e   :  { %6391 = vrsqrt.f32 %v931_v62  ;;  %v916_v17 = vpop.xlane.xlu1 %915  ;;  %v7289_v16 = vld [vmem:[%s11305_s1 + $0xe8] sm:$0xff] }
 0x10f   :  { %v913_v1 = vpop.xlane.xlu0 %912  ;;  %v6382_v8 = vpop.eup %6381  ;;  %v948_v60 = vadd.f32 1e-12, %v916_v17  ;;  %v6059_v40 = vpack.c.bf16 %v8553_v4, %v8562_v49 }
 0x110   :  { %v947_v26 = vadd.f32 1e-12, %v913_v1  ;;  %v6384_v42 = vpop.eup %6383  ;;  %v8569_v61 = vmul.f32 %v7287_v36, %v6382_v8  ;;  %v7292_v36 = vld [vmem:[%s11305_s1 + $0x70] sm:$0xff] }
 0x111   :  { %6393 = vrsqrt.f32 %v948_v60  ;;  %6061 = vmatprep.subr.msk.bf16.mxu1 %vm8220_vm3, %v6059_v40  ;;  %v8576_v12 = vmul.f32 %v7288_v2, %v6384_v42 }
 0x112   :  { %6395 = vrsqrt.f32 %v947_v26  ;;  %v8580_v45 = vpop.xlane.xlu1 %1949 }
 0x113   :  { %v8578_v53 = vpop.xlane.xlu0 %1946  ;;  %v6386_v33 = vpop.eup %6385  ;;  %v6017_v35 = vpack.c.bf16 %v8569_v61, %v8576_v12 }
 0x114   :  { %v6388_v62 = vpop.eup %6387  ;;  %6016 = vmatpush3.bf16.xpose.msk.msra.mxu0 %vm8220_vm3, %v6011_v34  ;;  %v8589_v0 = vmul.f32 %v7289_v16, %v6386_v33 }
 0x115   :  { %6064 = vmatpush3.bf16.xpose.msk.msra.mxu1 %vm8220_vm3, %v6059_v40  ;;  %6019 = vmatprep.subr.msk.bf16.mxu0 %vm8220_vm3, %v6017_v35  ;;  %v8598_v17 = vmul.f32 %v7290_v59, %v6388_v62  ;;  %v7291_v40 = vld [vmem:[%s11305_s1 + $0x78] sm:$0xff] }
 0x116   :  { %v8602_v34 = vpop.xlane.xlu1 %1955 }
 0x117   :  { %v8600_v1 = vpop.xlane.xlu0 %1952  ;;  %v6390_v8 = vpop.eup %6389  ;;  %v6065_v60 = vpack.c.bf16 %v8589_v0, %v8598_v17 }
 0x118   :  { %v6392_v26 = vpop.eup %6391  ;;  %v8609_v42 = vmul.f32 %v7291_v40, %v6390_v8  ;;  %v7293_v8 = vld [vmem:[%s11305_s1 + $0xf8] sm:$0xff] }
 0x119   :  { %6067 = vmatprep.subr.msk.bf16.mxu1 %vm8220_vm3, %v6065_v60  ;;  %v8616_v2 = vmul.f32 %v7292_v36, %v6392_v26  ;;  %v7294_v26 = vld [vmem:[%s11305_s1 + $0xf0] sm:$0xff] }
 0x11a   :  { %v8620_v62 = vpop.xlane.xlu1 %1961 }
 0x11b   :  { %v8618_v33 = vpop.xlane.xlu0 %1958  ;;  %11530 = vst [vmem:[#allocation24_spill] sm:$0xff] %v8620_v62  ;;  %v6394_v16 = vpop.eup %6393  ;;  %v6023_v59 = vpack.c.bf16 %v8609_v42, %v8616_v2 }
 0x11c   :  { %11529 = vst [vmem:[#allocation23_spill] sm:$0xff] %v8618_v33  ;;  %v6396_v28 = vpop.eup %6395  ;;  %6022 = vmatpush3.bf16.xpose.msk.msra.mxu0 %vm8220_vm3, %v6017_v35  ;;  %v8629_v40 = vmul.f32 %v7293_v8, %v6394_v16 }
 0x11d   :  { %6070 = vmatpush3.bf16.xpose.msk.msra.mxu1 %vm8220_vm3, %v6065_v60  ;;  %6025 = vmatprep.subr.msk.bf16.mxu0 %vm8220_vm3, %v6023_v59  ;;  %v8638_v36 = vmul.f32 %v7294_v26, %v6396_v28  ;;  %v6077_v60 = vpack.c.bf16 %v7702_v7, %v7700_v5  ;;  %v6125_v28 = vpack.c.bf16 %v7830_v15, %v7828_v14 }
 0x11e   :  { %v8642_v35 = vpop.xlane.xlu1 %1967 }
 0x11f   :  { %v8640_v22 = vpop.xlane.xlu0 %1964  ;;  %11532 = vst [vmem:[#allocation26_spill] sm:$0xff] %v8642_v35  ;;  %v6071_v16 = vpack.c.bf16 %v8629_v40, %v8638_v36 }
 0x120   :  { %11531 = vst [vmem:[#allocation25_spill] sm:$0xff] %v8640_v22 }
 0x121   :  { %6073 = vmatprep.subr.msk.bf16.mxu1 %vm8220_vm3, %v6071_v16 }
 0x122   :  { %v8652_v63 = vpop.xlane.xlu1 %1973 }
 0x123   :  { %v8650_v8 = vpop.xlane.xlu0 %1970  ;;  %11534 = vst [vmem:[#allocation28_spill] sm:$0xff] %v8652_v63 }
 0x124   :  { %11533 = vst [vmem:[#allocation27_spill] sm:$0xff] %v8650_v8  ;;  %6028 = vmatpush3.bf16.xpose.msk.msra.mxu0 %vm8220_vm3, %v6023_v59  ;;  %v6083_v59 = vpack.c.bf16 %v7718_v19, %v7716_v18 }
 0x125   :  { %6076 = vmatpush3.bf16.xpose.msk.msra.mxu1 %vm8220_vm3, %v6071_v16  ;;  %6079 = vmatprep.subr.msk.bf16.mxu0 %vm8220_vm3, %v6077_v60  ;;  %v6131_v16 = vpack.c.bf16 %v8029_v51, %v7996_v41 }
 0x126   :  { %6127 = vmatprep.subr.msk.bf16.mxu1 %vm8220_vm3, %v6125_v28  ;;  %v8666_v7 = vpop.xlane.xlu1 %1979 }
 0x127   :  { %v8662_v26 = vpop.xlane.xlu0 %1976  ;;  %11536 = vst [vmem:[#allocation30_spill] sm:$0xff] %v8666_v7 }
 0x128   :  { %11535 = vst [vmem:[#allocation29_spill] sm:$0xff] %v8662_v26 }
 0x12a   :  { %v8670_v63 = vpop.xlane.xlu1 %1985 }
 0x12b   :  { %v8668_v21 = vpop.xlane.xlu0 %1982  ;;  %11538 = vst [vmem:[#allocation32_spill] sm:$0xff] %v8670_v63  ;;  %5582 = vmatmul.mubr.msk.f32.vlgmr.msra.gmra.mrb[16].mxu0 %vm820_vm1, %v8201_v13 }
 0x12c   :  { %11537 = vst [vmem:[#allocation31_spill] sm:$0xff] %v8668_v21  ;;  %5638 = vmatmul.mubr.msk.f32.vlgmr.msra.gmra.mrb[16].mxu1 %vm820_vm1, %v8232_v37  ;;  %5584 = vmatprep.mubr.msk.f32.mxu0 %vm820_vm1, %v8269_v27 }
 0x12d   :  { %5640 = vmatprep.mubr.msk.f32.mxu1 %vm820_vm1, %v8312_v29  ;;  %6082 = vmatpush3.bf16.xpose.msk.msra.mxu0 %vm8220_vm3, %v6077_v60  ;;  %v6155_v60 = vpack.c.bf16 %v8382_v47, %v8328_v54 }
 0x12e   :  { %6130 = vmatpush3.bf16.xpose.msk.msra.mxu1 %vm8220_vm3, %v6125_v28  ;;  %6085 = vmatprep.subr.msk.bf16.mxu0 %vm8220_vm3, %v6083_v59  ;;  %v8692_v13 = vpop.xlane.xlu1 %1991 }
 0x12f   :  { %v8688_v19 = vpop.xlane.xlu0 %1988  ;;  %11540 = vst [vmem:[#allocation34_spill] sm:$0xff] %v8692_v13  ;;  %5585 = vmatmul.mubr.msk.f32.gmra.mrb[18].mxu0 %vm820_vm1, %v8258_v58  ;;  %6133 = vmatprep.subr.msk.bf16.mxu1 %vm8220_vm3, %v6131_v16  ;;  %v6089_v58 = vpack.c.bf16 %v7728_v25, %v7726_v24 }
 0x130   :  { %11539 = vst [vmem:[#allocation33_spill] sm:$0xff] %v8688_v19  ;;  %5641 = vmatmul.mubr.msk.f32.gmra.mrb[18].mxu1 %vm820_vm1, %v8298_v32  ;;  %5587 = vmatprep.mubr.msk.f32.mxu0 %vm820_vm1, %v8347_v10  ;;  %v11543_v32 = vld [vmem:[#allocation14_spill] sm:$0xff] }
 0x131   :  { %5643 = vmatprep.mubr.msk.f32.mxu1 %vm820_vm1, %v8391_v20  ;;  %2041 = vxpose.xlu0.b32.start [1/16] (narrow) %v8578_v53, 8  ;;  %v6137_v29 = vpack.c.bf16 %v11543_v32, %v8066_v48  ;;  %v11548_v20 = vld [vmem:[#allocation5_spill] sm:$0xff] }
 0x132   :  { %v8707_v27 = vpop.xlane.xlu1 %1997 }
 0x133   :  { %v8705_v37 = vpop.xlane.xlu0 %1994  ;;  %11542 = vst [vmem:[#allocation36_spill] sm:$0xff] %v8707_v27  ;;  %5588 = vmatmul.mubr.msk.f32.gmra.mrb[20].mxu0 %vm820_vm1, %v8336_v55 }
 0x134   :  { %11541 = vst [vmem:[#allocation35_spill] sm:$0xff] %v8705_v37  ;;  %5644 = vmatmul.mubr.msk.f32.gmra.mrb[20].mxu1 %vm820_vm1, %v8378_v38  ;;  %5590 = vmatprep.mubr.msk.f32.mxu0 %vm820_vm1, %v8431_v31  ;;  %v11547_v38 = vld [vmem:[#allocation4_spill] sm:$0xff] }
 0x135   :  { %5646 = vmatprep.mubr.msk.f32.mxu1 %vm820_vm1, %v8465_v9  ;;  %6088 = vmatpush3.bf16.xpose.msk.msra.mxu0 %vm8220_vm3, %v6083_v59  ;;  %v6095_v31 = vpack.c.bf16 %v11548_v20, %v11547_v38  ;;  %v11550_v9 = vld [vmem:[#allocation15_spill] sm:$0xff] }
 0x136   :  { %6136 = vmatpush3.bf16.xpose.msk.msra.mxu1 %vm8220_vm3, %v6131_v16  ;;  %2042 = vxpose.xlu0.b32.cont [2/16] (narrow) %v8580_v45, 8  ;;  %v11567_v16 = vld [vmem:[#allocation10_spill] sm:$0xff] }
 0x137   :  { %5591 = vmatmul.mubr.msk.f32.gmra.mrb[22].mxu0 %vm820_vm1, %v8416_v50  ;;  %v8728_v55 = vpop.xlane.xlu0 %3430  ;;  %6091 = vmatprep.subr.msk.bf16.mxu0 %vm8220_vm3, %v6089_v58 }
 0x138   :  { %11544 = vst [vmem:[#allocation14_spill] sm:$0xff] %v8728_v55  ;;  %5647 = vmatmul.mubr.msk.f32.gmra.mrb[22].mxu1 %vm820_vm1, %v8453_v44  ;;  %5593 = vmatprep.mubr.msk.f32.mxu0 %vm820_vm1, %v8494_v46  ;;  %v8736_v10 = vpop.xlane.xlu1 %3478 }
 0x139   :  { %11545 = vst [vmem:[#allocation37_spill] sm:$0xff] %v8736_v10  ;;  %5649 = vmatprep.mubr.msk.f32.mxu1 %vm820_vm1, %v8521_v30  ;;  %6139 = vmatprep.subr.msk.bf16.mxu1 %vm8220_vm3, %v6137_v29 }
 0x13a   :  { %2043 = vxpose.xlu0.b32.cont [3/16] (narrow) %v8600_v1, 8 }
 0x13b   :  { %5594 = vmatmul.mubr.msk.f32.gmra.mrb[24].mxu0 %vm820_vm1, %v8485_v3  ;;  %v8745_v50 = vpop.xlane.xlu0 %3433  ;;  %3525 = vxpose.xlu1.b32.start [1/16] (narrow) %v8728_v55, 8  ;;  %v11551_v3 = vld [vmem:[#allocation16_spill] sm:$0xff]  ;;  %v11577_v55 = vld [vmem:[#allocation22_spill] sm:$0xff] }
 0x13c   :  { %11546 = vst [vmem:[#allocation38_spill] sm:$0xff] %v8745_v50  ;;  %5650 = vmatmul.mubr.msk.f32.gmra.mrb[24].mxu1 %vm820_vm1, %v8512_v23  ;;  %5596 = vmatprep.mubr.msk.f32.mxu0 %vm820_vm1, %v8544_v6  ;;  %v8754_v44 = vpop.xlane.xlu1 %3481  ;;  %v6143_v46 = vpack.c.bf16 %v11551_v3, %v11550_v9  ;;  %v11555_v6 = vld [vmem:[#allocation6_spill] sm:$0xff] }
 0x13d   :  { %11549 = vst [vmem:[#allocation4_spill] sm:$0xff] %v8754_v44  ;;  %5652 = vmatprep.mubr.msk.f32.mxu1 %vm820_vm1, %v8562_v49  ;;  %6094 = vmatpush3.bf16.xpose.msk.msra.mxu0 %vm8220_vm3, %v6089_v58  ;;  %v11568_v58 = vld [vmem:[#allocation11_spill] sm:$0xff] }
 0x13e   :  { %6142 = vmatpush3.bf16.xpose.msk.msra.mxu1 %vm8220_vm3, %v6137_v29  ;;  %2044 = vxpose.xlu0.b32.cont [4/16] (narrow) %v8602_v34, 8  ;;  %v6113_v29 = vpack.c.bf16 %v11568_v58, %v11567_v16 }
 0x13f   :  { %5597 = vmatmul.mubr.msk.f32.gmra.mrb[26].mxu0 %vm820_vm1, %v8537_v57  ;;  %v8767_v23 = vpop.xlane.xlu0 %3436  ;;  %6097 = vmatprep.subr.msk.bf16.mxu0 %vm8220_vm3, %v6095_v31 }
 0x140   :  { %11552 = vst [vmem:[#allocation5_spill] sm:$0xff] %v8767_v23  ;;  %5653 = vmatmul.mubr.msk.f32.gmra.mrb[26].mxu1 %vm820_vm1, %v8553_v4  ;;  %5599 = vmatprep.mubr.msk.f32.mxu0 %vm820_vm1, %v8576_v12  ;;  %v8775_v30 = vpop.xlane.xlu1 %3484  ;;  %v11556_v4 = vld [vmem:[#allocation7_spill] sm:$0xff] }
 0x141   :  { %11553 = vst [vmem:[#allocation15_spill] sm:$0xff] %v8775_v30  ;;  %5655 = vmatprep.mubr.msk.f32.mxu1 %vm820_vm1, %v8598_v17  ;;  %6145 = vmatprep.subr.msk.bf16.mxu1 %vm8220_vm3, %v6143_v46  ;;  %v6101_v49 = vpack.c.bf16 %v11556_v4, %v11555_v6  ;;  %v6149_v17 = vpack.c.bf16 %v8319_v39, %v8238_v11 }
 0x142   :  { %2045 = vxpose.xlu0.b32.cont [5/16] (narrow) %v8618_v33, 8  ;;  %3526 = vxpose.xlu1.b32.cont [2/16] (narrow) %v8745_v50, 8 }
 0x143   :  { %5600 = vmatmul.mubr.msk.f32.gmra.mrb[28].mxu0 %vm820_vm1, %v8569_v61  ;;  %v8785_v57 = vpop.xlane.xlu0 %3439 }
 0x144   :  { %11554 = vst [vmem:[#allocation16_spill] sm:$0xff] %v8785_v57  ;;  %5656 = vmatmul.mubr.msk.f32.gmra.mrb[28].mxu1 %vm820_vm1, %v8589_v0  ;;  %5602 = vmatprep.mubr.msk.f32.mxu0 %vm820_vm1, %v8616_v2  ;;  %v8793_v12 = vpop.xlane.xlu1 %3487  ;;  %v11561_v2 = vld [vmem:[#allocation8_spill] sm:$0xff] }
 0x145   :  { %11557 = vst [vmem:[#allocation6_spill] sm:$0xff] %v8793_v12  ;;  %5658 = vmatprep.mubr.msk.f32.mxu1 %vm820_vm1, %v8638_v36  ;;  %6100 = vmatpush3.bf16.xpose.msk.msra.mxu0 %vm8220_vm3, %v6095_v31  ;;  %v11562_v36 = vld [vmem:[#allocation9_spill] sm:$0xff]  ;;  %v6161_v31 = vpack.c.bf16 %v8434_v43, %v8380_v56 }
 0x146   :  { %6148 = vmatpush3.bf16.xpose.msk.msra.mxu1 %vm8220_vm3, %v6143_v46  ;;  %2046 = vxpose.xlu0.b32.cont [6/16] (narrow) %v8620_v62, 8  ;;  %v11586_v62 = vld [vmem:[#allocation2_spill] sm:$0xff] }
 0x147   :  { %5603 = vmatmul.mubr.msk.f32.gmra.mrb[30].mxu0 %vm820_vm1, %v8609_v42  ;;  %v8806_v61 = vpop.xlane.xlu0 %3442  ;;  %6103 = vmatprep.subr.msk.bf16.mxu0 %vm8220_vm3, %v6101_v49 }
 0x148   :  { %11558 = vst [vmem:[#allocation7_spill] sm:$0xff] %v8806_v61  ;;  %5659 = vmatmul.mubr.msk.f32.gmra.mrb[30].mxu1 %vm820_vm1, %v8629_v40  ;;  %6151 = vmatprep.subr.msk.bf16.mxu1 %vm8220_vm3, %v6149_v17  ;;  %v8814_v0 = vpop.xlane.xlu1 %3490  ;;  %v6107_v40 = vpack.c.bf16 %v11562_v36, %v11561_v2 }
 0x149   :  { %11559 = vst [vmem:[#allocation39_spill] sm:$0xff] %v8814_v0  ;;  %3527 = vxpose.xlu1.b32.cont [3/16] (narrow) %v8767_v23, 8  ;;  %5693 = vmatprep.mubr.msk.f32.mxu0 %vm820_vm1, %v7700_v5 }
 0x14a   :  { %2047 = vxpose.xlu0.b32.cont [7/16] (narrow) %v8640_v22, 8  ;;  %5749 = vmatprep.mubr.msk.f32.mxu1 %vm820_vm1, %v7828_v14 }
 0x14b   :  { %v8822_v42 = vpop.xlane.xlu0 %3445 }
 0x14c   :  { %11560 = vst [vmem:[#allocation40_spill] sm:$0xff] %v8822_v42  ;;  %v8828_v28 = vpop.xlane.xlu1 %3493 }
 0x14d   :  { %11563 = vst [vmem:[#allocation8_spill] sm:$0xff] %v8828_v28  ;;  %6106 = vmatpush3.bf16.xpose.msk.msra.mxu0 %vm8220_vm3, %v6101_v49  ;;  %3528 = vxpose.xlu1.b32.cont [4/16] (narrow) %v8785_v57, 8  ;;  %v11570_v49 = vld [vmem:[#allocation28_spill] sm:$0xff]  ;;  %v11576_v57 = vld [vmem:[#allocation21_spill] sm:$0xff] }
 0x14e   :  { %6154 = vmatpush3.bf16.xpose.msk.msra.mxu1 %vm8220_vm3, %v6149_v17  ;;  %2048 = vxpose.xlu0.b32.cont [8/16] (narrow) %v8642_v35, 8  ;;  %v6167_v50 = vpack.c.bf16 %v11577_v55, %v11576_v57 }
 0x14f   :  { %v8836_v5 = vpop.xlane.xlu0 %3448  ;;  %6109 = vmatprep.subr.msk.bf16.mxu0 %vm8220_vm3, %v6107_v40  ;;  %6157 = vmatprep.subr.msk.bf16.mxu1 %vm8220_vm3, %v6155_v60 }
 0x150   :  { %11564 = vst [vmem:[#allocation9_spill] sm:$0xff] %v8836_v5  ;;  %v8842_v14 = vpop.xlane.xlu1 %3496 }
 0x151   :  { %11565 = vst [vmem:[#allocation41_spill] sm:$0xff] %v8842_v14  ;;  %3529 = vxpose.xlu1.b32.cont [5/16] (narrow) %v8806_v61, 8 }
 0x152   :  { %2049 = vxpose.xlu0.b32.cont [9/16] (narrow) %v8650_v8, 8 }
 0x153   :  { %v8846_v59 = vpop.xlane.xlu0 %3451 }
 0x154   :  { %11566 = vst [vmem:[#allocation42_spill] sm:$0xff] %v8846_v59  ;;  %v8852_v46 = vpop.xlane.xlu1 %3499 }
 0x155   :  { %11569 = vst [vmem:[#allocation10_spill] sm:$0xff] %v8852_v46  ;;  %6112 = vmatpush3.bf16.xpose.msk.msra.mxu0 %vm8220_vm3, %v6107_v40  ;;  %3530 = vxpose.xlu1.b32.cont [6/16] (narrow) %v8822_v42, 8  ;;  %v11574_v42 = vld [vmem:[#allocation12_spill] sm:$0xff] }
 0x156   :  { %6160 = vmatpush3.bf16.xpose.msk.msra.mxu1 %vm8220_vm3, %v6155_v60  ;;  %2050 = vxpose.xlu0.b32.cont [10/16] (narrow) %v11570_v49, 8  ;;  %v11575_v60 = vld [vmem:[#allocation13_spill] sm:$0xff] }
 0x157   :  { %v8860_v17 = vpop.xlane.xlu0 %2000  ;;  %6115 = vmatprep.subr.msk.bf16.mxu0 %vm8220_vm3, %v6113_v29  ;;  %6163 = vmatprep.subr.msk.bf16.mxu1 %vm8220_vm3, %v6161_v31  ;;  %v6119_v23 = vpack.c.bf16 %v11575_v60, %v11574_v42 }
 0x158   :  { %11571 = vst [vmem:[#allocation11_spill] sm:$0xff] %v8860_v17  ;;  %v8866_v61 = vpop.xlane.xlu1 %3454 }
 0x159   :  { %11572 = vst [vmem:[#allocation43_spill] sm:$0xff] %v8866_v61  ;;  %3531 = vxpose.xlu1.b32.cont [7/16] (narrow) %v8836_v5, 8 }
 0x15a   :  { %2051 = vxpose.xlu0.b32.cont [11/16] (narrow) %v8662_v26, 8 }
 0x15b   :  { %v8870_v40 = vpop.xlane.xlu0 %3502 }
 0x15c   :  { %11573 = vst [vmem:[#allocation44_spill] sm:$0xff] %v8870_v40  ;;  %v8876_v8 = vpop.xlane.xlu1 %2003 }
 0x15d   :  { %11578 = vst [vmem:[#allocation12_spill] sm:$0xff] %v8876_v8  ;;  %6118 = vmatpush3.bf16.xpose.msk.msra.mxu0 %vm8220_vm3, %v6113_v29  ;;  %3532 = vxpose.xlu1.b32.cont [8/16] (narrow) %v8846_v59, 8  ;;  %v8897_v29 = vld [vmem:[%s11307_s3] sm:$0xff] }
 0x15e   :  { %6166 = vmatpush3.bf16.xpose.msk.msra.mxu1 %vm8220_vm3, %v6161_v31  ;;  %2052 = vxpose.xlu0.b32.cont [12/16] (narrow) %v8666_v7, 8  ;;  %v8902_v31 = vld [vmem:[%s11307_s3 + $0x8] sm:$0xff]  ;;  %v8909_v7 = vld [vmem:[%s11307_s3 + $0x80] sm:$0xff] }
 0x15f   :  { %v8884_v5 = vpop.xlane.xlu0 %3457  ;;  %6121 = vmatprep.subr.msk.bf16.mxu0 %vm8220_vm3, %v6119_v23  ;;  %6169 = vmatprep.subr.msk.bf16.mxu1 %vm8220_vm3, %v6167_v50  ;;  %v6173_v59 = vpack.c.bf16 %v8902_v31, %v8897_v29 }
 0x160   :  { %11579 = vst [vmem:[#allocation13_spill] sm:$0xff] %v8884_v5  ;;  %v8890_v26 = vpop.xlane.xlu1 %3505 }
 0x161   :  { %11580 = vst [vmem:[#allocation21_spill] sm:$0xff] %v8890_v26  ;;  %3533 = vxpose.xlu1.b32.cont [9/16] (narrow) %v8866_v61, 8  ;;  %v8914_v61 = vld [vmem:[%s11307_s3 + $0x88] sm:$0xff] }
 0x162   :  { %2053 = vxpose.xlu0.b32.cont [13/16] (narrow) %v8668_v21, 8  ;;  %v6221_v21 = vpack.c.bf16 %v8914_v61, %v8909_v7 }
 0x163   :  { %v8918_v49 = vpop.xlane.xlu0 %2006 }
 0x164   :  { %11581 = vst [vmem:[#allocation22_spill] sm:$0xff] %v8918_v49  ;;  %v8920_v22 = vpop.xlane.xlu1 %3460 }
 0x165   :  { %11582 = vst [vmem:[#allocation45_spill] sm:$0xff] %v8920_v22  ;;  %6124 = vmatpush3.bf16.xpose.msk.msra.mxu0 %vm8220_vm3, %v6119_v23  ;;  %3534 = vxpose.xlu1.b32.cont [10/16] (narrow) %v8884_v5, 8  ;;  %v8948_v5 = vld [vmem:[%s11307_s3 + $0x18] sm:$0xff] }
 0x166   :  { %6172 = vmatpush3.bf16.xpose.msk.msra.mxu1 %vm8220_vm3, %v6167_v50  ;;  %2054 = vxpose.xlu0.b32.cont [14/16] (narrow) %v8670_v63, 8  ;;  %v8943_v50 = vld [vmem:[%s11307_s3 + $0x10] sm:$0xff] }
 0x167   :  { %v8928_v35 = vpop.xlane.xlu0 %3508  ;;  %6175 = vmatprep.subr.msk.bf16.mxu0 %vm8220_vm3, %v6173_v59  ;;  %6223 = vmatprep.subr.msk.bf16.mxu1 %vm8220_vm3, %v6221_v21  ;;  %v6179_v63 = vpack.c.bf16 %v8948_v5, %v8943_v50 }
 0x168   :  { %11583 = vst [vmem:[#allocation46_spill] sm:$0xff] %v8928_v35  ;;  %v8934_v33 = vpop.xlane.xlu1 %2009 }
 0x169   :  { %11584 = vst [vmem:[#allocation47_spill] sm:$0xff] %v8934_v33  ;;  %3535 = vxpose.xlu1.b32.cont [11/16] (narrow) %v8920_v22, 8 }
 0x16a   :  { %2055 = vxpose.xlu0.b32.cont [15/16] (narrow) %v8688_v19, 8  ;;  %v8966_v19 = vld [vmem:[%s11307_s3 + $0x90] sm:$0xff] }
 0x16b   :  { %v8938_v23 = vpop.xlane.xlu0 %3463 }
 0x16c   :  { %11585 = vst [vmem:[#allocation48_spill] sm:$0xff] %v8938_v23  ;;  %5694 = vmatmul.mubr.msk.f32.vlgmr.msra.gmra.mrb[32].mxu0 %vm820_vm1, %v11586_v62  ;;  %v8954_v22 = vpop.xlane.xlu1 %3511  ;;  %v8971_v62 = vld [vmem:[%s11307_s3 + $0x98] sm:$0xff] }
 0x16d   :  { %11587 = vst [vmem:[#allocation2_spill] sm:$0xff] %v8954_v22  ;;  %5750 = vmatmul.mubr.msk.f32.vlgmr.msra.gmra.mrb[32].mxu1 %vm820_vm1, %v7830_v15  ;;  %6178 = vmatpush3.bf16.xpose.msk.msra.mxu0 %vm8220_vm3, %v6173_v59  ;;  %v6227_v15 = vpack.c.bf16 %v8971_v62, %v8966_v19  ;;  %v11589_v59 = vld [vmem:[#allocation3_spill] sm:$0xff] }
 0x16e   :  { %6226 = vmatpush3.bf16.xpose.msk.msra.mxu1 %vm8220_vm3, %v6221_v21  ;;  %2056 = vxpose.xlu0.b32.end [16/16] (narrow) %v8692_v13, 8 }
 0x16f   :  { %5696 = vmatprep.mubr.msk.f32.mxu0 %vm820_vm1, %v7716_v18  ;;  %5752 = vmatprep.mubr.msk.f32.mxu1 %vm820_vm1, %v7996_v41  ;;  %v8979_v21 = vpop.xlane.xlu0 %2012  ;;  %v9013_v41 = vld [vmem:[%s11307_s3 + $0x20] sm:$0xff] }
 0x170   :  { %11588 = vst [vmem:[#allocation49_spill] sm:$0xff] %v8979_v21  ;;  %5697 = vmatmul.mubr.msk.f32.gmra.mrb[34].mxu0 %vm820_vm1, %v11589_v59  ;;  %6181 = vmatprep.subr.msk.bf16.mxu0 %vm8220_vm3, %v6179_v63  ;;  %v8985_v13 = vpop.xlane.xlu1 %3466 }
 0x171   :  { %11590 = vst [vmem:[#allocation3_spill] sm:$0xff] %v8985_v13  ;;  %5753 = vmatmul.mubr.msk.f32.gmra.mrb[34].mxu1 %vm820_vm1, %v8029_v51  ;;  %5699 = vmatprep.mubr.msk.f32.mxu0 %vm820_vm1, %v7726_v24 }
 0x172   :  { %3557 = vxpose.xlu0.b32.start [1/16] (narrow) %v8736_v10, 8  ;;  %5755 = vmatprep.mubr.msk.f32.mxu1 %vm820_vm1, %v8066_v48  ;;  %v9025_v48 = vld [vmem:[%s11307_s3 + $0xa0] sm:$0xff] }
 0x173   :  { %6229 = vmatprep.subr.msk.bf16.mxu1 %vm8220_vm3, %v6227_v15  ;;  %v8996_v18 = vpop.xlane.xlu0 %3514  ;;  %3536 = vxpose.xlu1.b32.cont [12/16] (narrow) %v8938_v23, 8 }
 0x174   :  { %11591 = vst [vmem:[#allocation50_spill] sm:$0xff] %v8996_v18  ;;  %5700 = vmatmul.mubr.msk.f32.gmra.mrb[36].mxu0 %vm820_vm1, %v7728_v25  ;;  %v9005_v24 = vpop.xlane.xlu1 %2015  ;;  %v9018_v25 = vld [vmem:[%s11307_s3 + $0x28] sm:$0xff] }
 0x175   :  { %5756 = vmatmul.mubr.msk.f32.gmra.mrb[36].mxu1 %vm820_vm1, %v11543_v32  ;;  %6184 = vmatpush3.bf16.xpose.msk.msra.mxu0 %vm8220_vm3, %v6179_v63  ;;  %11592 = vst [vmem:[#allocation51_spill] sm:$0xff] %v9005_v24  ;;  %v6185_v51 = vpack.c.bf16 %v9018_v25, %v9013_v41  ;;  %v9030_v63 = vld [vmem:[%s11307_s3 + $0xa8] sm:$0xff] }
 0x176   :  { %6232 = vmatpush3.bf16.xpose.msk.msra.mxu1 %vm8220_vm3, %v6227_v15  ;;  %3558 = vxpose.xlu0.b32.cont [2/16] (narrow) %v8754_v44, 8  ;;  %v6233_v32 = vpack.c.bf16 %v9030_v63, %v9025_v48 }
 0x177   :  { %5702 = vmatprep.mubr.msk.f32.mxu0 %vm820_vm1, %v11547_v38  ;;  %5758 = vmatprep.mubr.msk.f32.mxu1 %vm820_vm1, %v11550_v9  ;;  %v9038_v15 = vpop.xlane.xlu0 %3469  ;;  %v9076_v9 = vld [vmem:[%s11307_s3 + $0x38] sm:$0xff] }
 0x178   :  { %11593 = vst [vmem:[#allocation52_spill] sm:$0xff] %v9038_v15  ;;  %5703 = vmatmul.mubr.msk.f32.gmra.mrb[38].mxu0 %vm820_vm1, %v11548_v20  ;;  %3537 = vxpose.xlu1.b32.cont [13/16] (narrow) %v8985_v13, 8 }
 0x179   :  { %5759 = vmatmul.mubr.msk.f32.gmra.mrb[38].mxu1 %vm820_vm1, %v11551_v3  ;;  %5705 = vmatprep.mubr.msk.f32.mxu0 %vm820_vm1, %v11555_v6  ;;  %v9083_v3 = vld [vmem:[%s11307_s3 + $0xb0] sm:$0xff]  ;;  %v9088_v6 = vld [vmem:[%s11307_s3 + $0xb8] sm:$0xff] }
 0x17a   :  { %3559 = vxpose.xlu0.b32.cont [3/16] (narrow) %v8775_v30, 8  ;;  %5761 = vmatprep.mubr.msk.f32.mxu1 %vm820_vm1, %v8238_v11  ;;  %v9071_v11 = vld [vmem:[%s11307_s3 + $0x30] sm:$0xff] }
 0x17b   :  { %6187 = vmatprep.subr.msk.bf16.mxu0 %vm8220_vm3, %v6185_v51  ;;  %6235 = vmatprep.subr.msk.bf16.mxu1 %vm8220_vm3, %v6233_v32  ;;  %v9054_v38 = vpop.xlane.xlu1 %3517 }
 0x17c   :  { %11594 = vst [vmem:[#allocation53_spill] sm:$0xff] %v9054_v38  ;;  %5706 = vmatmul.mubr.msk.f32.gmra.mrb[40].mxu0 %vm820_vm1, %v11556_v4  ;;  %v9058_v20 = vpop.xlane.xlu0 %2018  ;;  %3538 = vxpose.xlu1.b32.cont [14/16] (narrow) %v9038_v15, 8  ;;  %v6239_v4 = vpack.c.bf16 %v9088_v6, %v9083_v3  ;;  %v11601_v15 = vld [vmem:[#allocation18_spill] sm:$0xff] }
 0x17d   :  { %11595 = vst [vmem:[#allocation54_spill] sm:$0xff] %v9058_v20  ;;  %5762 = vmatmul.mubr.msk.f32.gmra.mrb[40].mxu1 %vm820_vm1, %v8319_v39  ;;  %6190 = vmatpush3.bf16.xpose.msk.msra.mxu0 %vm8220_vm3, %v6185_v51  ;;  %v6191_v39 = vpack.c.bf16 %v9076_v9, %v9071_v11 }
 0x17e   :  { %6238 = vmatpush3.bf16.xpose.msk.msra.mxu1 %vm8220_vm3, %v6233_v32  ;;  %3560 = vxpose.xlu0.b32.cont [4/16] (narrow) %v8793_v12, 8 }
 0x17f   :  { %5708 = vmatprep.mubr.msk.f32.mxu0 %vm820_vm1, %v11561_v2  ;;  %5764 = vmatprep.mubr.msk.f32.mxu1 %vm820_vm1, %v8328_v54  ;;  %v9096_v59 = vpop.xlane.xlu1 %3472 }
 0x180   :  { %11596 = vst [vmem:[#allocation55_spill] sm:$0xff] %v9096_v59  ;;  %5709 = vmatmul.mubr.msk.f32.gmra.mrb[42].mxu0 %vm820_vm1, %v11562_v36  ;;  %v9100_v51 = vpop.xlane.xlu0 %3520  ;;  %3539 = vxpose.xlu1.b32.cont [15/16] (narrow) %v9096_v59, 8  ;;  %v9145_v36 = vld [vmem:[%s11307_s3 + $0xc8] sm:$0xff]  ;;  %v11599_v59 = vld [vmem:[#allocation17_spill] sm:$0xff] }
 0x181   :  { %11597 = vst [vmem:[#allocation56_spill] sm:$0xff] %v9100_v51  ;;  %5765 = vmatmul.mubr.msk.f32.gmra.mrb[42].mxu1 %vm820_vm1, %v8382_v47  ;;  %5711 = vmatprep.mubr.msk.f32.mxu0 %vm820_vm1, %v11567_v16  ;;  %v9130_v47 = vld [vmem:[%s11307_s3 + $0x48] sm:$0xff] }
 0x182   :  { %3561 = vxpose.xlu0.b32.cont [5/16] (narrow) %v8814_v0, 8  ;;  %5767 = vmatprep.mubr.msk.f32.mxu1 %vm820_vm1, %v8380_v56  ;;  %v9125_v56 = vld [vmem:[%s11307_s3 + $0x40] sm:$0xff] }
 0x183   :  { %6193 = vmatprep.subr.msk.bf16.mxu0 %vm8220_vm3, %v6191_v39  ;;  %6241 = vmatprep.subr.msk.bf16.mxu1 %vm8220_vm3, %v6239_v4  ;;  %v6197_v2 = vpack.c.bf16 %v9130_v47, %v9125_v56 }
 0x184   :  { %5712 = vmatmul.mubr.msk.f32.gmra.mrb[44].mxu0 %vm820_vm1, %v11568_v58  ;;  %v9120_v54 = vpop.xlane.xlu0 %3475  ;;  %v9178_v58 = vld [vmem:[%s11307_s3 + $0xd0] sm:$0xff] }
 0x185   :  { %5768 = vmatmul.mubr.msk.f32.gmra.mrb[44].mxu1 %vm820_vm1, %v8434_v43  ;;  %6196 = vmatpush3.bf16.xpose.msk.msra.mxu0 %vm8220_vm3, %v6191_v39  ;;  %11598 = vst [vmem:[#allocation57_spill] sm:$0xff] %v9120_v54  ;;  %v9140_v43 = vld [vmem:[%s11307_s3 + $0xc0] sm:$0xff] }
 0x186   :  { %6244 = vmatpush3.bf16.xpose.msk.msra.mxu1 %vm8220_vm3, %v6239_v4  ;;  %3562 = vxpose.xlu0.b32.cont [6/16] (narrow) %v8828_v28, 8  ;;  %v6245_v16 = vpack.c.bf16 %v9145_v36, %v9140_v43  ;;  %v9218_v4 = vld [vmem:[%s11307_s3 + $0xe0] sm:$0xff] }
 0x187   :  { %5714 = vmatprep.mubr.msk.f32.mxu0 %vm820_vm1, %v11574_v42  ;;  %5770 = vmatprep.mubr.msk.f32.mxu1 %vm820_vm1, %v11576_v57  ;;  %v9166_v57 = vld [vmem:[%s11307_s3 + $0x50] sm:$0xff]  ;;  %v9171_v42 = vld [vmem:[%s11307_s3 + $0x58] sm:$0xff] }
 0x188   :  { %3540 = vxpose.xlu1.b32.end [16/16] (narrow) %v9120_v54, 8  ;;  %5715 = vmatmul.mubr.msk.f32.gmra.mrb[46].mxu0 %vm820_vm1, %v11575_v60  ;;  %v9183_v60 = vld [vmem:[%s11307_s3 + $0xd8] sm:$0xff]  ;;  %v11600_v54 = vld [vmem:[#allocation19_spill] sm:$0xff]  ;;  %v9286_v52 = vpop.xlane.xlu0 %2024 }
 0x189   :  { %5771 = vmatmul.mubr.msk.f32.gmra.mrb[46].mxu1 %vm820_vm1, %v11577_v55  ;;  %6199 = vmatprep.subr.msk.bf16.mxu0 %vm8220_vm3, %v6197_v2  ;;  %v6203_v55 = vpack.c.bf16 %v9171_v42, %v9166_v57  ;;  %v6251_v32 = vpack.c.bf16 %v9183_v60, %v9178_v58  ;;  %v6215_v13 = vpack.c.bf16 %v11600_v54, %v11599_v59 }
 0x18a   :  { %3563 = vxpose.xlu0.b32.cont [7/16] (narrow) %v8842_v14, 8  ;;  %6247 = vmatprep.subr.msk.bf16.mxu1 %vm8220_vm3, %v6245_v16  ;;  %11605 = vst [vmem:[#allocation18_spill] sm:$0xff] %v9286_v52 }
 0x18b   :  { %5805 = vmatprep.mubr.msk.f32.mxu0 %vm820_vm1, %v8897_v29  ;;  %5861 = vmatprep.mubr.msk.f32.mxu1 %vm820_vm1, %v8909_v7  ;;  %v9206_v7 = vld [vmem:[%s11307_s3 + $0x60] sm:$0xff]  ;;  %v9211_v29 = vld [vmem:[%s11307_s3 + $0x68] sm:$0xff] }
 0x18c   :  { %2073 = vxpose.xlu1.b32.start [1/16] (narrow) %v8705_v37, 8  ;;  %v6209_v39 = vpack.c.bf16 %v9211_v29, %v9206_v7 }
 0x18d   :  { %6202 = vmatpush3.bf16.xpose.msk.msra.mxu0 %vm8220_vm3, %v6197_v2  ;;  %v9223_v2 = vld [vmem:[%s11307_s3 + $0xe8] sm:$0xff] }
 0x18e   :  { %6250 = vmatpush3.bf16.xpose.msk.msra.mxu1 %vm8220_vm3, %v6245_v16  ;;  %3564 = vxpose.xlu0.b32.cont [8/16] (narrow) %v8852_v46, 8  ;;  %v6257_v16 = vpack.c.bf16 %v9223_v2, %v9218_v4 }
 0x18f   :  { %6205 = vmatprep.subr.msk.bf16.mxu0 %vm8220_vm3, %v6203_v55  ;;  %6253 = vmatprep.subr.msk.bf16.mxu1 %vm8220_vm3, %v6251_v32 }
 0x190   :  { %2074 = vxpose.xlu1.b32.cont [2/16] (narrow) %v8707_v27, 8 }
 0x192   :  { %3565 = vxpose.xlu0.b32.cont [9/16] (narrow) %v8870_v40, 8 }
 0x194   :  { %2075 = vxpose.xlu1.b32.cont [3/16] (narrow) %v8860_v17, 8 }
 0x195   :  { %6208 = vmatpush3.bf16.xpose.msk.msra.mxu0 %vm8220_vm3, %v6203_v55  ;;  %v11602_v55 = vld [vmem:[#allocation20_spill] sm:$0xff] }
 0x196   :  { %6256 = vmatpush3.bf16.xpose.msk.msra.mxu1 %vm8220_vm3, %v6251_v32  ;;  %3566 = vxpose.xlu0.b32.cont [10/16] (narrow) %v8890_v26, 8  ;;  %v6263_v23 = vpack.c.bf16 %v11602_v55, %v11601_v15  ;;  %v9258_v15 = vpop.xlane.xlu1 %2021 }
 0x197   :  { %6211 = vmatprep.subr.msk.bf16.mxu0 %vm8220_vm3, %v6209_v39  ;;  %6259 = vmatprep.subr.msk.bf16.mxu1 %vm8220_vm3, %v6257_v16  ;;  %11603 = vst [vmem:[#allocation17_spill] sm:$0xff] %v9258_v15 }
 0x198   :  { %2076 = vxpose.xlu1.b32.cont [4/16] (narrow) %v8876_v8, 8 }
 0x19a   :  { %3567 = vxpose.xlu0.b32.cont [11/16] (narrow) %v8928_v35, 8  ;;  %v9265_v59 = vpop.xlane.xlu1 %3523 }
 0x19b   :  { %11604 = vst [vmem:[#allocation19_spill] sm:$0xff] %v9265_v59 }
 0x19c   :  { %2077 = vxpose.xlu1.b32.cont [5/16] (narrow) %v8918_v49, 8 }
 0x19d   :  { %6214 = vmatpush3.bf16.xpose.msk.msra.mxu0 %vm8220_vm3, %v6209_v39 }
 0x19e   :  { %6262 = vmatpush3.bf16.xpose.msk.msra.mxu1 %vm8220_vm3, %v6257_v16  ;;  %3568 = vxpose.xlu0.b32.cont [12/16] (narrow) %v8954_v22, 8 }
 0x19f   :  { %6217 = vmatprep.subr.msk.bf16.mxu0 %vm8220_vm3, %v6215_v13  ;;  %6265 = vmatprep.subr.msk.bf16.mxu1 %vm8220_vm3, %v6263_v23 }
 0x1a0   :  { %2078 = vxpose.xlu1.b32.cont [6/16] (narrow) %v8934_v33, 8 }
 0x1a2   :  { %3569 = vxpose.xlu0.b32.cont [13/16] (narrow) %v8996_v18, 8 }
 0x1a4   :  { %2079 = vxpose.xlu1.b32.cont [7/16] (narrow) %v8979_v21, 8 }
 0x1a5   :  { %6220 = vmatpush3.bf16.xpose.msk.msra.mxu0 %vm8220_vm3, %v6215_v13  ;;  %v9308_v13 = vpop.xlane.xlu0 %2030 }
 0x1a6   :  { %6268 = vmatpush3.bf16.xpose.msk.msra.mxu1 %vm8220_vm3, %v6263_v23  ;;  %3570 = vxpose.xlu0.b32.cont [14/16] (narrow) %v9054_v38, 8  ;;  %11607 = vst [vmem:[#allocation58_spill] sm:$0xff] %v9308_v13 }
 0x1a8   :  { %2080 = vxpose.xlu1.b32.cont [8/16] (narrow) %v9005_v24, 8 }
 0x1aa   :  { %3571 = vxpose.xlu0.b32.cont [15/16] (narrow) %v9100_v51, 8 }
 0x1ac   :  { %2081 = vxpose.xlu1.b32.cont [9/16] (narrow) %v9058_v20, 8  ;;  %5806 = vmatmul.mubr.msk.f32.vlgmr.msra.gmra.mrb[48].mxu0 %vm820_vm1, %v8902_v31 }
 0x1ad   :  { %5862 = vmatmul.mubr.msk.f32.vlgmr.msra.gmra.mrb[48].mxu1 %vm820_vm1, %v8914_v61  ;;  %5808 = vmatprep.mubr.msk.f32.mxu0 %vm820_vm1, %v8943_v50 }
 0x1ae   :  { %3572 = vxpose.xlu0.b32.end [16/16] (narrow) %v9265_v59, 8  ;;  %5864 = vmatprep.mubr.msk.f32.mxu1 %vm820_vm1, %v8966_v19  ;;  %v9293_v19 = vpop.xlane.xlu1 %2027 }
 0x1af   :  { %11606 = vst [vmem:[#allocation20_spill] sm:$0xff] %v9293_v19 }
 0x1b0   :  { %2082 = vxpose.xlu1.b32.cont [10/16] (narrow) %v9258_v15, 8  ;;  %5809 = vmatmul.mubr.msk.f32.gmra.mrb[50].mxu0 %vm820_vm1, %v8948_v5 }
 0x1b1   :  { %5865 = vmatmul.mubr.msk.f32.gmra.mrb[50].mxu1 %vm820_vm1, %v8971_v62  ;;  %5811 = vmatprep.mubr.msk.f32.mxu0 %vm820_vm1, %v9013_v41 }
 0x1b2   :  { %5867 = vmatprep.mubr.msk.f32.mxu1 %vm820_vm1, %v9025_v48  ;;  %v9313_v61 = vpop.xlane.xlu1 %2033 }
 0x1b3   :  { %11608 = vst [vmem:[#allocation59_spill] sm:$0xff] %v9313_v61 }
 0x1b4   :  { %2083 = vxpose.xlu1.b32.cont [11/16] (narrow) %v9286_v52, 8  ;;  %5812 = vmatmul.mubr.msk.f32.gmra.mrb[52].mxu0 %vm820_vm1, %v9018_v25 }
 0x1b5   :  { %5868 = vmatmul.mubr.msk.f32.gmra.mrb[52].mxu1 %vm820_vm1, %v9030_v63  ;;  %5814 = vmatprep.mubr.msk.f32.mxu0 %vm820_vm1, %v9071_v11  ;;  %v9346_v63 = vpop.xlane.xlu0 %2036 }
 0x1b6   :  { %5870 = vmatprep.mubr.msk.f32.mxu1 %vm820_vm1, %v9083_v3  ;;  %11615 = vst [vmem:[#allocation66_spill] sm:$0xff] %v9346_v63  ;;  %v9351_v11 = vpop.xlane.xlu1 %2039 }
 0x1b7   :  { %11616 = vst [vmem:[#allocation67_spill] sm:$0xff] %v9351_v11 }
 0x1b8   :  { %2084 = vxpose.xlu1.b32.cont [12/16] (narrow) %v9293_v19, 8  ;;  %5815 = vmatmul.mubr.msk.f32.gmra.mrb[54].mxu0 %vm820_vm1, %v9076_v9 }
 0x1b9   :  { %5871 = vmatmul.mubr.msk.f32.gmra.mrb[54].mxu1 %vm820_vm1, %v9088_v6  ;;  %5817 = vmatprep.mubr.msk.f32.mxu0 %vm820_vm1, %v9125_v56  ;;  %v7323_v6 = vld [vmem:[%s11307_s3 + $0x70] sm:$0xff] }
 0x1ba   :  { %5873 = vmatprep.mubr.msk.f32.mxu1 %vm820_vm1, %v9140_v43  ;;  %v7324_v56 = vld [vmem:[%s11307_s3 + $0xf0] sm:$0xff]  ;;  %v7325_v43 = vld [vmem:[%s11307_s3 + $0x78] sm:$0xff] }
 0x1bc   :  { %2085 = vxpose.xlu1.b32.cont [13/16] (narrow) %v9308_v13, 8  ;;  %5818 = vmatmul.mubr.msk.f32.gmra.mrb[56].mxu0 %vm820_vm1, %v9130_v47  ;;  %v9315_v5 = vpop.f32.mrb[0].mxu0 }
 0x1bd   :  { %11609 = vst [vmem:[#allocation60_spill] sm:$0xff] %v9315_v5  ;;  %5874 = vmatmul.mubr.msk.f32.gmra.mrb[56].mxu1 %vm820_vm1, %v9145_v36  ;;  %v9319_v31 = vpop.f32.mrb[0].mxu1  ;;  %5820 = vmatprep.mubr.msk.f32.mxu0 %vm820_vm1, %v9166_v57  ;;  %v9323_v23 = vpop.f32.mrb[1].mxu0  ;;  %v7326_v57 = vld [vmem:[%s11307_s3 + $0xf8] sm:$0xff]  ;;  %v661_v35 = vmul.f32 -1.0, %v9315_v5 }
 0x1be   :  { %11610 = vst [vmem:[#allocation61_spill] sm:$0xff] %v9319_v31  ;;  %11611 = vst [vmem:[#allocation62_spill] sm:$0xff] %v9323_v23  ;;  %5876 = vmatprep.mubr.msk.f32.mxu1 %vm820_vm1, %v9178_v58  ;;  %v9327_v50 = vpop.f32.mrb[1].mxu1  ;;  %v677_v22 = vmul.f32 -1.0, %v9319_v31  ;;  %v660_v40 = vmul.f32 -1.0, %v9323_v23 }
 0x1bf   :  { %v676_v26 = vmul.f32 -1.0, %v9327_v50  ;;  %v694_v14 = vmul.f32 1.442695, %v661_v35 }
 0x1c0   :  { %2086 = vxpose.xlu1.b32.cont [14/16] (narrow) %v9313_v61, 8  ;;  %5821 = vmatmul.mubr.msk.f32.gmra.mrb[58].mxu0 %vm820_vm1, %v9171_v42  ;;  %v9332_v62 = vpop.f32.mrb[2].mxu0  ;;  %v726_v0 = vmul.f32 1.442695, %v677_v22  ;;  %v692_v30 = vmul.f32 1.442695, %v660_v40 }
 0x1c1   :  { %5877 = vmatmul.mubr.msk.f32.gmra.mrb[58].mxu1 %vm820_vm1, %v9183_v60  ;;  %v9336_v41 = vpop.f32.mrb[2].mxu1  ;;  %5823 = vmatprep.mubr.msk.f32.mxu0 %vm820_vm1, %v9206_v7  ;;  %v9340_v25 = vpop.f32.mrb[3].mxu0  ;;  %v663_v46 = vmul.f32 -1.0, %v9332_v62  ;;  %v724_v10 = vmul.f32 1.442695, %v676_v26  ;;  %6397 = vpow2.f32 %v694_v14 }
 0x1c2   :  { %11612 = vst [vmem:[#allocation63_spill] sm:$0xff] %v9336_v41  ;;  %11613 = vst [vmem:[#allocation64_spill] sm:$0xff] %v9340_v25  ;;  %5879 = vmatprep.mubr.msk.f32.mxu1 %vm820_vm1, %v9218_v4  ;;  %v9344_v48 = vpop.f32.mrb[3].mxu1  ;;  %v679_v28 = vmul.f32 -1.0, %v9336_v41  ;;  %v662_v12 = vmul.f32 -1.0, %v9340_v25  ;;  %6399 = vpow2.f32 %v726_v0 }
 0x1c3   :  { %11614 = vst [vmem:[#allocation65_spill] sm:$0xff] %v9344_v48  ;;  %v678_v44 = vmul.f32 -1.0, %v9344_v48  ;;  %6401 = vpow2.f32 %v692_v30 }
 0x1c4   :  { %2087 = vxpose.xlu1.b32.cont [15/16] (narrow) %v9346_v63, 8  ;;  %5824 = vmatmul.mubr.msk.f32.gmra.mrb[60].mxu0 %vm820_vm1, %v9211_v29  ;;  %v9353_v9 = vpop.f32.mrb[4].mxu0  ;;  %v698_v63 = vmul.f32 1.442695, %v663_v46  ;;  %v730_v13 = vmul.f32 1.442695, %v679_v28  ;;  %6403 = vpow2.f32 %v724_v10 }
 0x1c5   :  { %11617 = vst [vmem:[#allocation68_spill] sm:$0xff] %v9353_v9  ;;  %5880 = vmatmul.mubr.msk.f32.gmra.mrb[60].mxu1 %vm820_vm1, %v9223_v2  ;;  %v9357_v3 = vpop.f32.mrb[4].mxu1  ;;  %5826 = vmatprep.mubr.msk.f32.mxu0 %vm820_vm1, %v7323_v6  ;;  %v9363_v54 = vpop.f32.mrb[5].mxu0  ;;  %v696_v35 = vmul.f32 1.442695, %v662_v12 }
 0x1c6   :  { %11618 = vst [vmem:[#allocation69_spill] sm:$0xff] %v9357_v3  ;;  %11619 = vst [vmem:[#allocation70_spill] sm:$0xff] %v9363_v54  ;;  %5882 = vmatprep.mubr.msk.f32.mxu1 %vm820_vm1, %v7324_v56  ;;  %v9369_v47 = vpop.f32.mrb[5].mxu1  ;;  %v681_v61 = vmul.f32 -1.0, %v9357_v3  ;;  %v664_v22 = vmul.f32 -1.0, %v9363_v54  ;;  %6405 = vpow2.f32 %v698_v63 }
 0x1c7   :  { %11620 = vst [vmem:[#allocation71_spill] sm:$0xff] %v9369_v47  ;;  %v728_v52 = vmul.f32 1.442695, %v678_v44  ;;  %v680_v40 = vmul.f32 -1.0, %v9369_v47  ;;  %6407 = vpow2.f32 %v730_v13 }
 0x1c8   :  { %2088 = vxpose.xlu1.b32.end [16/16] (narrow) %v9351_v11, 8  ;;  %5827 = vmatmul.mubr.msk.f32.gmra.mrb[62].mxu0 %vm820_vm1, %v7325_v43  ;;  %v9376_v36 = vpop.f32.mrb[6].mxu0  ;;  %v665_v11 = vmul.f32 -1.0, %v9353_v9  ;;  %v734_v14 = vmul.f32 1.442695, %v681_v61  ;;  %6409 = vpow2.f32 %v696_v35 }
 0x1c9   :  { %11621 = vst [vmem:[#allocation72_spill] sm:$0xff] %v9376_v36  ;;  %5883 = vmatmul.mubr.msk.f32.gmra.mrb[62].mxu1 %vm820_vm1, %v7326_v57  ;;  %v9382_v42 = vpop.f32.mrb[6].mxu1  ;;  %v9384_v58 = vpop.f32.mrb[7].mxu0  ;;  %v667_v19 = vmul.f32 -1.0, %v9376_v36  ;;  %v700_v0 = vmul.f32 1.442695, %v664_v22  ;;  %6411 = vpow2.f32 %v728_v52 }
 0x1ca   :  { %11622 = vst [vmem:[#allocation73_spill] sm:$0xff] %v9382_v42  ;;  %11623 = vst [vmem:[#allocation74_spill] sm:$0xff] %v9384_v58  ;;  %v9386_v60 = vpop.f32.mrb[7].mxu1  ;;  %v702_v26 = vmul.f32 1.442695, %v665_v11  ;;  %v683_v46 = vmul.f32 -1.0, %v9382_v42 }
 0x1cb   :  { %11624 = vst [vmem:[#allocation75_spill] sm:$0xff] %v9386_v60  ;;  %v666_v28 = vmul.f32 -1.0, %v9384_v58  ;;  %v732_v30 = vmul.f32 1.442695, %v680_v40  ;;  %v682_v12 = vmul.f32 -1.0, %v9386_v60  ;;  %v9438_v13 = vpop.eup %6397 }
 0x1cc   :  { %v9388_v32 = vpop.f32.mrb[8].mxu0  ;;  %6413 = vpow2.f32 %v702_v26  ;;  %v706_v10 = vmul.f32 1.442695, %v667_v19  ;;  %v738_v63 = vmul.f32 1.442695, %v683_v46  ;;  %v9441_v22 = vpop.eup %6399 }
 0x1cd   :  { %11625 = vst [vmem:[#allocation76_spill] sm:$0xff] %v9388_v32  ;;  %v9390_v7 = vpop.f32.mrb[8].mxu1  ;;  %v9392_v29 = vpop.f32.mrb[9].mxu0  ;;  %v669_v44 = vmul.f32 -1.0, %v9388_v32  ;;  %6415 = vpow2.f32 %v734_v14  ;;  %v704_v61 = vmul.f32 1.442695, %v666_v28 }
 0x1ce   :  { %11626 = vst [vmem:[#allocation77_spill] sm:$0xff] %v9390_v7  ;;  %11627 = vst [vmem:[#allocation78_spill] sm:$0xff] %v9392_v29  ;;  %v9394_v39 = vpop.f32.mrb[9].mxu1  ;;  %v685_v11 = vmul.f32 -1.0, %v9390_v7  ;;  %6417 = vpow2.f32 %v700_v0  ;;  %v668_v35 = vmul.f32 -1.0, %v9392_v29  ;;  %v9444_v26 = vpop.eup %6401 }
 0x1cf   :  { %11628 = vst [vmem:[#allocation79_spill] sm:$0xff] %v9394_v39  ;;  %6419 = vpow2.f32 %v732_v30  ;;  %v736_v52 = vmul.f32 1.442695, %v682_v12  ;;  %v684_v40 = vmul.f32 -1.0, %v9394_v39  ;;  %v710_v19 = vmul.f32 1.442695, %v669_v44  ;;  %v9447_v46 = vpop.eup %6403 }
 0x1d0   :  { %v9396_v4 = vpop.f32.mrb[10].mxu0  ;;  %6421 = vpow2.f32 %v706_v10  ;;  %v742_v20 = vmul.f32 1.442695, %v685_v11  ;;  %v9450_v28 = vpop.eup %6405  ;;  %v708_v15 = vmul.f32 1.442695, %v668_v35 }
 0x1d1   :  { %11629 = vst [vmem:[#allocation80_spill] sm:$0xff] %v9396_v4  ;;  %v9398_v2 = vpop.f32.mrb[10].mxu1  ;;  %v9400_v16 = vpop.f32.mrb[11].mxu0  ;;  %v671_v14 = vmul.f32 -1.0, %v9396_v4  ;;  %6423 = vpow2.f32 %v738_v63  ;;  %11641 = vst [vmem:[#allocation92_spill] sm:$0xff] %v9450_v28 }
 0x1d2   :  { %11630 = vst [vmem:[#allocation81_spill] sm:$0xff] %v9398_v2  ;;  %11631 = vst [vmem:[#allocation82_spill] sm:$0xff] %v9400_v16  ;;  %v9402_v55 = vpop.f32.mrb[11].mxu1  ;;  %v687_v0 = vmul.f32 -1.0, %v9398_v2  ;;  %6425 = vpow2.f32 %v704_v61  ;;  %v670_v30 = vmul.f32 -1.0, %v9400_v16  ;;  %v9453_v12 = vpop.eup %6407 }
 0x1d3   :  { %11632 = vst [vmem:[#allocation83_spill] sm:$0xff] %v9402_v55  ;;  %11642 = vst [vmem:[#allocation93_spill] sm:$0xff] %v9453_v12  ;;  %6427 = vpow2.f32 %v736_v52  ;;  %v740_v21 = vmul.f32 1.442695, %v684_v40  ;;  %v686_v10 = vmul.f32 -1.0, %v9402_v55  ;;  %v9456_v44 = vpop.eup %6409 }
 0x1d4   :  { %v9404_v6 = vpop.f32.mrb[12].mxu0  ;;  %11643 = vst [vmem:[#allocation94_spill] sm:$0xff] %v9456_v44  ;;  %6429 = vpow2.f32 %v710_v19  ;;  %v714_v24 = vmul.f32 1.442695, %v671_v14  ;;  %v9459_v11 = vpop.eup %6411  ;;  %v746_v49 = vmul.f32 1.442695, %v687_v0 }
 0x1d5   :  { %11633 = vst [vmem:[#allocation84_spill] sm:$0xff] %v9404_v6  ;;  %v9406_v56 = vpop.f32.mrb[12].mxu1  ;;  %v9408_v43 = vpop.f32.mrb[13].mxu0  ;;  %v673_v63 = vmul.f32 -1.0, %v9404_v6  ;;  %11644 = vst [vmem:[#allocation95_spill] sm:$0xff] %v9459_v11  ;;  %6431 = vpow2.f32 %v742_v20 }
 0x1d6   :  { %11634 = vst [vmem:[#allocation85_spill] sm:$0xff] %v9406_v56  ;;  %11635 = vst [vmem:[#allocation86_spill] sm:$0xff] %v9408_v43  ;;  %v9410_v57 = vpop.f32.mrb[13].mxu1  ;;  %v689_v61 = vmul.f32 -1.0, %v9406_v56  ;;  %v9462_v35 = vpop.eup %6413  ;;  %6433 = vpow2.f32 %v708_v15  ;;  %v712_v33 = vmul.f32 1.442695, %v670_v30 }
 0x1d7   :  { %11636 = vst [vmem:[#allocation87_spill] sm:$0xff] %v9410_v57  ;;  %11645 = vst [vmem:[#allocation96_spill] sm:$0xff] %v9462_v35  ;;  %v672_v52 = vmul.f32 -1.0, %v9408_v43  ;;  %v9465_v40 = vpop.eup %6415  ;;  %6435 = vpow2.f32 %v740_v21  ;;  %v744_v55 = vmul.f32 1.442695, %v686_v10  ;;  %v688_v19 = vmul.f32 -1.0, %v9410_v57 }
 0x1d8   :  { %v9412_v51 = vpop.f32.mrb[14].mxu0  ;;  %11646 = vst [vmem:[#allocation97_spill] sm:$0xff] %v9465_v40  ;;  %v9468_v14 = vpop.eup %6417  ;;  %6437 = vpow2.f32 %v714_v24  ;;  %v718_v6 = vmul.f32 1.442695, %v673_v63  ;;  %v750_v15 = vmul.f32 1.442695, %v689_v61 }
 0x1d9   :  { %11637 = vst [vmem:[#allocation88_spill] sm:$0xff] %v9412_v51  ;;  %v9414_v59 = vpop.f32.mrb[14].mxu1  ;;  %v9416_v18 = vpop.f32.mrb[15].mxu0  ;;  %11647 = vst [vmem:[#allocation98_spill] sm:$0xff] %v9468_v14  ;;  %v675_v20 = vmul.f32 -1.0, %v9412_v51  ;;  %6439 = vpow2.f32 %v746_v49 }
 0x1da   :  { %11638 = vst [vmem:[#allocation89_spill] sm:$0xff] %v9414_v59  ;;  %11639 = vst [vmem:[#allocation90_spill] sm:$0xff] %v9416_v18  ;;  %v9418_v38 = vpop.f32.mrb[15].mxu1  ;;  %v691_v0 = vmul.f32 -1.0, %v9414_v59  ;;  %v9472_v56 = vpop.eup %6419  ;;  %v674_v30 = vmul.f32 -1.0, %v9416_v18  ;;  %6441 = vpow2.f32 %v712_v33 }
 0x1db   :  { %11640 = vst [vmem:[#allocation91_spill] sm:$0xff] %v9418_v38  ;;  %11648 = vst [vmem:[#allocation99_spill] sm:$0xff] %v9472_v56  ;;  %v9475_v43 = vpop.eup %6421  ;;  %v716_v21 = vmul.f32 1.442695, %v672_v52  ;;  %6443 = vpow2.f32 %v744_v55  ;;  %v748_v57 = vmul.f32 1.442695, %v688_v19 }
 0x1dc   :  { %11649 = vst [vmem:[#allocation100_spill] sm:$0xff] %v9475_v43  ;;  %v9477_v10 = vpop.eup %6423  ;;  %6445 = vpow2.f32 %v718_v6  ;;  %v722_v63 = vmul.f32 1.442695, %v675_v20  ;;  %v754_v51 = vmul.f32 1.442695, %v691_v0  ;;  %v690_v59 = vmul.f32 -1.0, %v9418_v38 }
 0x1dd   :  { %11650 = vst [vmem:[#allocation101_spill] sm:$0xff] %v9477_v10  ;;  %v9479_v24 = vpop.eup %6425  ;;  %6447 = vpow2.f32 %v750_v15  ;;  %v720_v61 = vmul.f32 1.442695, %v674_v30  ;;  %v2105_v6 = vlaneseq }
 0x1de   :  { %11651 = vst [vmem:[#allocation102_spill] sm:$0xff] %v9479_v24  ;;  %v9482_v49 = vpop.eup %6427  ;;  %6449 = vpow2.f32 %v716_v21  ;;  %v752_v15 = vmul.f32 1.442695, %v690_v59 }
 0x1df   :  { %11652 = vst [vmem:[#allocation103_spill] sm:$0xff] %v9482_v49  ;;  %v9484_v52 = vpop.eup %6429  ;;  %6451 = vpow2.f32 %v748_v57 }
 0x1e0   :  { %11653 = vst [vmem:[#allocation104_spill] sm:$0xff] %v9484_v52  ;;  %v9486_v39 = vpop.eup %6431  ;;  %6453 = vpow2.f32 %v722_v63  ;;  %v2106_v63 = vshrl.u32 %v2105_v6, 7 }
 0x1e1   :  { %11654 = vst [vmem:[#allocation105_spill] sm:$0xff] %v9486_v39  ;;  %v9488_v38 = vpop.eup %6433  ;;  %6455 = vpow2.f32 %v754_v51 }
 0x1e2   :  { %11655 = vst [vmem:[#allocation106_spill] sm:$0xff] %v9488_v38  ;;  %v9490_v29 = vpop.eup %6435  ;;  %6457 = vpow2.f32 %v720_v61 }
 0x1e3   :  { %11656 = vst [vmem:[#allocation107_spill] sm:$0xff] %v9490_v29  ;;  %v9492_v7 = vpop.eup %6437 }
 0x1e4   :  { %11657 = vst [vmem:[#allocation108_spill] sm:$0xff] %v9492_v7  ;;  %v9494_v39 = vpop.eup %6439 }
 0x1e5   :  { %11658 = vst [vmem:[#allocation109_spill] sm:$0xff] %v9494_v39  ;;  %v9496_v29 = vpop.eup %6441 }
 0x1e6   :  { %11659 = vst [vmem:[#allocation110_spill] sm:$0xff] %v9496_v29  ;;  %v9498_v7 = vpop.eup %6443 }
 0x1e7   :  { %11660 = vst [vmem:[#allocation111_spill] sm:$0xff] %v9498_v7  ;;  %v9500_v6 = vpop.eup %6445 }
 0x1e8   :  { %11661 = vst [vmem:[#allocation112_spill] sm:$0xff] %v9500_v6  ;;  %v9502_v29 = vpop.eup %6447 }
 0x1e9   :  { %11662 = vst [vmem:[#allocation113_spill] sm:$0xff] %v9502_v29 }
 0x1fe   :  { %v5583_v16 = vpop.f32.mrb[16].mxu0 }
 0x1ff   :  { %v1400_v18 = vsub.f32 0.8, %v5583_v16  ;;  %v5639_v2 = vpop.f32.mrb[16].mxu1  ;;  %v1127_v33 = vpop.f32.mrb[17].mxu0 }
 0x200   :  { %v1416_v55 = vsub.f32 0.8, %v5639_v2  ;;  %v1399_v19 = vsub.f32 0.8, %v1127_v33  ;;  %v1320_v4 = vpop.f32.mrb[17].mxu1 }
 0x201   :  { %v1432_v20 = vmul.f32 5.0, %v1400_v18  ;;  %v1415_v0 = vsub.f32 0.8, %v1320_v4 }
 0x202   :  { %v1448_v30 = vmul.f32 5.0, %v1416_v55  ;;  %v1431_v16 = vmul.f32 5.0, %v1399_v19  ;;  %v5586_v49 = vpop.f32.mrb[18].mxu0 }
 0x203   :  { %v1465_v21 = vmul.f32 1.442695, %v1432_v20  ;;  %v1447_v2 = vmul.f32 5.0, %v1415_v0  ;;  %v1402_v33 = vsub.f32 0.8, %v5586_v49  ;;  %v5642_v52 = vpop.f32.mrb[18].mxu1 }
 0x204   :  { %v1497_v57 = vmul.f32 1.442695, %v1448_v30  ;;  %v1463_v18 = vmul.f32 1.442695, %v1431_v16  ;;  %v1418_v4 = vsub.f32 0.8, %v5642_v52 }
 0x205   :  { %6459 = vpow2.f32 %v1465_v21  ;;  %v1495_v59 = vmul.f32 1.442695, %v1447_v2  ;;  %v1434_v55 = vmul.f32 5.0, %v1402_v33  ;;  %v1137_v19 = vpop.f32.mrb[19].mxu0  ;;  %v1330_v38 = vpop.f32.mrb[19].mxu1 }
 0x206   :  { %6461 = vpow2.f32 %v1497_v57  ;;  %v1450_v51 = vmul.f32 5.0, %v1418_v4  ;;  %v1401_v49 = vsub.f32 0.8, %v1137_v19  ;;  %v1417_v20 = vsub.f32 0.8, %v1330_v38  ;;  %v5589_v0 = vpop.f32.mrb[20].mxu0  ;;  %v9504_v19 = vpop.eup %6449 }
 0x207   :  { %6463 = vpow2.f32 %v1463_v18  ;;  %v1469_v61 = vmul.f32 1.442695, %v1434_v55  ;;  %v1404_v52 = vsub.f32 0.8, %v5589_v0  ;;  %v5645_v30 = vpop.f32.mrb[20].mxu1  ;;  %v1147_v16 = vpop.f32.mrb[21].mxu0 }
 0x208   :  { %6465 = vpow2.f32 %v1495_v59  ;;  %v1501_v21 = vmul.f32 1.442695, %v1450_v51  ;;  %v1433_v2 = vmul.f32 5.0, %v1401_v49  ;;  %v1449_v33 = vmul.f32 5.0, %v1417_v20  ;;  %v1340_v39 = vpop.f32.mrb[21].mxu1  ;;  %11663 = vst [vmem:[#allocation114_spill] sm:$0xff] %v9504_v19  ;;  %v9506_v7 = vpop.eup %6451 }
 0x209   :  { %6467 = vpow2.f32 %v1469_v61  ;;  %v1436_v57 = vmul.f32 5.0, %v1404_v52  ;;  %v1420_v38 = vsub.f32 0.8, %v5645_v30  ;;  %v1403_v4 = vsub.f32 0.8, %v1147_v16  ;;  %11664 = vst [vmem:[#allocation115_spill] sm:$0xff] %v9506_v7  ;;  %v9508_v32 = vpop.eup %6453 }
 0x20a   :  { %6469 = vpow2.f32 %v1501_v21  ;;  %v1467_v18 = vmul.f32 1.442695, %v1433_v2  ;;  %v1499_v55 = vmul.f32 1.442695, %v1449_v33  ;;  %v1419_v0 = vsub.f32 0.8, %v1340_v39  ;;  %v9512_v21 = vpop.eup %6455  ;;  %v2057_v2 = vpop.trf.xlu0 }
 0x20b   :  { %6471 = vpow2.f32 %v752_v15  ;;  %v1473_v59 = vmul.f32 1.442695, %v1436_v57  ;;  %v1452_v51 = vmul.f32 5.0, %v1420_v38  ;;  %v1435_v49 = vmul.f32 5.0, %v1403_v4  ;;  %v5592_v20 = vpop.f32.mrb[22].mxu0  ;;  %v5648_v6 = vpop.f32.mrb[22].mxu1 }
 0x20c   :  { %11665 = vst [vmem:[#allocation116_spill] sm:$0xff] %v9508_v32  ;;  %v9510_v61 = vsub.s32 0, %v2106_v63  ;;  %6473 = vpow2.f32 %v1467_v18  ;;  %v1451_v52 = vmul.f32 5.0, %v1419_v0  ;;  %v1406_v30 = vsub.f32 0.8, %v5592_v20  ;;  %v1157_v16 = vpop.f32.mrb[23].mxu0  ;;  %v9514_v57 = vpop.eup %6457 }
 0x20d   :  { %11667 = vst [vmem:[#allocation118_spill] sm:$0xff] %v9512_v21  ;;  %6475 = vpow2.f32 %v1499_v55  ;;  %v1505_v39 = vmul.f32 1.442695, %v1452_v51  ;;  %v1471_v33 = vmul.f32 1.442695, %v1435_v49  ;;  %v1350_v15 = vpop.f32.mrb[23].mxu1 }
 0x20e   :  { %11666 = vst [vmem:[#allocation117_spill] sm:$0xff] %v9510_v61  ;;  %11668 = vst [vmem:[#allocation119_spill] sm:$0xff] %v9514_v57  ;;  %6477 = vpow2.f32 %v1473_v59  ;;  %v1503_v38 = vmul.f32 1.442695, %v1451_v52  ;;  %v5595_v4 = vpop.f32.mrb[24].mxu0  ;;  %v9517_v18 = vrot.slane %v2057_v2, %v9510_v61  ;;  %v1438_v20 = vmul.f32 5.0, %v1406_v30 }
 0x20f   :  { %v6460_v7 = vpop.eup %6459  ;;  %6479 = vpow2.f32 %v1505_v39  ;;  %v5651_v21 = vpop.f32.mrb[24].mxu1  ;;  %v1422_v51 = vsub.f32 0.8, %v5648_v6 }
 0x210   :  { %v6462_v63 = vpop.eup %6461  ;;  %v1528_v0 = vadd.f32 1.0, %v6460_v7  ;;  %6481 = vpow2.f32 %v1471_v33  ;;  %v9519_v49 = vpop.f32.mrb[25].mxu0  ;;  %v1405_v7 = vsub.f32 0.8, %v1157_v16  ;;  %v1421_v33 = vsub.f32 0.8, %v1350_v15 }
 0x211   :  { %v6464_v32 = vpop.eup %6463  ;;  %v1544_v55 = vadd.f32 1.0, %v6462_v63  ;;  %6483 = vpow2.f32 %v1503_v38  ;;  %v9521_v57 = vpop.f32.mrb[25].mxu1  ;;  %v1477_v6 = vmul.f32 1.442695, %v1438_v20  ;;  %v1454_v16 = vmul.f32 5.0, %v1422_v51 }
 0x212   :  { %v6466_v59 = vpop.eup %6465  ;;  %6485 = vrcp.f32 %v1528_v0  ;;  %v1527_v52 = vadd.f32 1.0, %v6464_v32  ;;  %v9523_v39 = vpop.f32.mrb[26].mxu0  ;;  %v9533_v32 = vadd.f32 %v9517_v18, %v8580_v45  ;;  %v1408_v15 = vsub.f32 0.8, %v5595_v4 }
 0x213   :  { %v6468_v19 = vpop.eup %6467  ;;  %6487 = vrcp.f32 %v1544_v55  ;;  %v1543_v2 = vadd.f32 1.0, %v6466_v59  ;;  %v9525_v30 = vpop.f32.mrb[26].mxu1  ;;  %v1424_v24 = vsub.f32 0.8, %v5651_v21  ;;  %v9543_v20 = vadd.f32 %v9517_v18, %v8602_v34 }
 0x214   :  { %v6470_v29 = vpop.eup %6469  ;;  %6489 = vrcp.f32 %v1527_v52  ;;  %v1530_v38 = vadd.f32 1.0, %v6468_v19  ;;  %v9527_v63 = vpop.f32.mrb[27].mxu0  ;;  %11669 = vst [vmem:[#allocation120_spill] sm:$0xff] %v9533_v32  ;;  %v9539_v19 = vadd.f32 %v9517_v18, %v8578_v53  ;;  %v1437_v32 = vmul.f32 5.0, %v1405_v7 }
 0x215   :  { %v9529_v60 = vpop.f32.mrb[27].mxu1  ;;  %v9535_v0 = vpop.eup %6471  ;;  %6491 = vrcp.f32 %v1543_v2  ;;  %v1546_v55 = vadd.f32 1.0, %v6470_v29  ;;  %11672 = vst [vmem:[#allocation123_spill] sm:$0xff] %v9543_v20  ;;  %v9551_v4 = vadd.f32 %v9517_v18, %v8600_v1  ;;  %v1453_v53 = vmul.f32 5.0, %v1421_v33 }
 0x216   :  { %11670 = vst [vmem:[#allocation121_spill] sm:$0xff] %v9535_v0  ;;  %v6474_v59 = vpop.eup %6473  ;;  %6493 = vrcp.f32 %v1530_v38  ;;  %11671 = vst [vmem:[#allocation122_spill] sm:$0xff] %v9539_v19  ;;  %v9545_v0 = vpop.f32.mrb[28].mxu0  ;;  %v11674_v38 = vld [vmem:[#allocation24_spill] sm:$0xff]  ;;  %v1509_v20 = vmul.f32 1.442695, %v1454_v16 }
 0x217   :  { %v6476_v52 = vpop.eup %6475  ;;  %6495 = vrcp.f32 %v1546_v55  ;;  %v1529_v45 = vadd.f32 1.0, %v6474_v59  ;;  %v9547_v29 = vpop.f32.mrb[28].mxu1  ;;  %11673 = vst [vmem:[#allocation124_spill] sm:$0xff] %v9551_v4  ;;  %v9559_v55 = vadd.f32 %v9517_v18, %v11674_v38  ;;  %v1440_v19 = vmul.f32 5.0, %v1408_v15 }
 0x218   :  { %v6478_v21 = vpop.eup %6477  ;;  %v1545_v51 = vadd.f32 1.0, %v6476_v52  ;;  %6497 = vpow2.f32 %v1477_v6  ;;  %v9553_v2 = vpop.f32.mrb[29].mxu0  ;;  %v1456_v4 = vmul.f32 5.0, %v1424_v24  ;;  %v1407_v6 = vsub.f32 0.8, %v9519_v49 }
 0x219   :  { %v9555_v34 = vpop.f32.mrb[29].mxu1  ;;  %11675 = vst [vmem:[#allocation24_spill] sm:$0xff] %v9559_v55  ;;  %v6480_v7 = vpop.eup %6479  ;;  %6499 = vrcp.f32 %v1529_v45  ;;  %v1532_v59 = vadd.f32 1.0, %v6478_v21  ;;  %v1475_v8 = vmul.f32 1.442695, %v1437_v32 }
 0x21a   :  { %v6482_v17 = vpop.eup %6481  ;;  %6501 = vrcp.f32 %v1545_v51  ;;  %v1548_v1 = vadd.f32 1.0, %v6480_v7  ;;  %v9562_v33 = vpop.f32.mrb[30].mxu0  ;;  %v1423_v38 = vsub.f32 0.8, %v9521_v57  ;;  %v9567_v15 = vmul.f32 1.442695, %v1453_v53 }
 0x21b   :  { %v6484_v52 = vpop.eup %6483  ;;  %6503 = vrcp.f32 %v1532_v59  ;;  %v1531_v10 = vadd.f32 1.0, %v6482_v17  ;;  %v9565_v55 = vpop.f32.mrb[30].mxu1  ;;  %v1410_v21 = vsub.f32 0.8, %v9523_v39  ;;  %v9573_v7 = vmul.f32 1.442695, %v1440_v19 }
 0x21c   :  { %v6486_v45 = vpop.eup %6485  ;;  %6505 = vrcp.f32 %v1548_v1  ;;  %v1547_v16 = vadd.f32 1.0, %v6484_v52  ;;  %v9570_v24 = vpop.f32.mrb[31].mxu0  ;;  %v1426_v17 = vsub.f32 0.8, %v9525_v30  ;;  %v9579_v53 = vmul.f32 1.442695, %v1456_v4 }
 0x21d   :  { %v6488_v49 = vpop.eup %6487  ;;  %v1624_v51 = vmul.f32 %v6486_v45, %v9315_v5  ;;  %6507 = vrcp.f32 %v1531_v10  ;;  %v9576_v57 = vpop.f32.mrb[31].mxu1  ;;  %v1439_v1 = vmul.f32 5.0, %v1407_v6  ;;  %v1455_v45 = vmul.f32 5.0, %v1423_v38 }
 0x21e   :  { %v6490_v32 = vpop.eup %6489  ;;  %v1640_v59 = vmul.f32 %v6488_v49, %v9319_v31  ;;  %6509 = vrcp.f32 %v1547_v16  ;;  %v1442_v30 = vmul.f32 5.0, %v1410_v21  ;;  %v1458_v4 = vmul.f32 5.0, %v1426_v17 }
 0x21f   :  { %v6492_v39 = vpop.eup %6491  ;;  %v1657_v52 = vmul.f32 1.442695, %v1624_v51  ;;  %v1623_v37 = vmul.f32 %v6490_v32, %v9323_v23  ;;  %6511 = vpow2.f32 %v1509_v20  ;;  %v9585_v32 = vmul.f32 1.442695, %v1439_v1 }
 0x220   :  { %v6494_v10 = vpop.eup %6493  ;;  %v1689_v19 = vmul.f32 1.442695, %v1640_v59  ;;  %v1639_v5 = vmul.f32 %v6492_v39, %v9327_v50  ;;  %6513 = vpow2.f32 %v1475_v8  ;;  %v9587_v39 = vmul.f32 1.442695, %v1455_v45 }
 0x221   :  { %v6496_v27 = vpop.eup %6495  ;;  %6515 = vpow2.f32 %v1657_v52  ;;  %v1655_v43 = vmul.f32 1.442695, %v1623_v37  ;;  %v1626_v16 = vmul.f32 %v6494_v10, %v9332_v62  ;;  %v1409_v17 = vsub.f32 0.8, %v9527_v63 }
 0x222   :  { %v6498_v49 = vpop.eup %6497  ;;  %6517 = vpow2.f32 %v1689_v19  ;;  %v1687_v6 = vmul.f32 1.442695, %v1639_v5  ;;  %v1642_v51 = vmul.f32 %v6496_v27, %v9336_v41  ;;  %v9592_v27 = vmul.f32 1.442695, %v1442_v30 }
 0x223   :  { %v6500_v20 = vpop.eup %6499  ;;  %6519 = vpow2.f32 %v1655_v43  ;;  %v1661_v38 = vmul.f32 1.442695, %v1626_v16  ;;  %v1534_v59 = vadd.f32 1.0, %v6498_v49  ;;  %v1425_v1 = vsub.f32 0.8, %v9529_v60 }
 0x224   :  { %v6502_v8 = vpop.eup %6501  ;;  %6521 = vpow2.f32 %v1687_v6  ;;  %v1693_v21 = vmul.f32 1.442695, %v1642_v51  ;;  %v1625_v37 = vmul.f32 %v6500_v20, %v9340_v25  ;;  %v1412_v19 = vsub.f32 0.8, %v9545_v0 }
 0x225   :  { %v6504_v52 = vpop.eup %6503  ;;  %6523 = vpow2.f32 %v1661_v38  ;;  %v1641_v5 = vmul.f32 %v6502_v8, %v9344_v48  ;;  %v1428_v63 = vsub.f32 0.8, %v9547_v29  ;;  %v1441_v60 = vmul.f32 5.0, %v1409_v17 }
 0x226   :  { %v6506_v43 = vpop.eup %6505  ;;  %6525 = vpow2.f32 %v1693_v21  ;;  %v1659_v10 = vmul.f32 1.442695, %v1625_v37  ;;  %v1628_v45 = vmul.f32 %v6504_v52, %v9353_v9  ;;  %v1457_v37 = vmul.f32 5.0, %v1425_v1 }
 0x227   :  { %v6508_v16 = vpop.eup %6507  ;;  %v1691_v49 = vmul.f32 1.442695, %v1641_v5  ;;  %v1644_v6 = vmul.f32 %v6506_v43, %v9357_v3  ;;  %6527 = vrcp.f32 %v1534_v59  ;;  %v1411_v59 = vsub.f32 0.8, %v9553_v2 }
 0x228   :  { %v6510_v51 = vpop.eup %6509  ;;  %6529 = vpow2.f32 %v1659_v10  ;;  %v1665_v30 = vmul.f32 1.442695, %v1628_v45  ;;  %v1627_v20 = vmul.f32 %v6508_v16, %v9363_v54  ;;  %v1444_v45 = vmul.f32 5.0, %v1412_v19 }
 0x229   :  { %v6512_v38 = vpop.eup %6511  ;;  %6531 = vpow2.f32 %v1691_v49  ;;  %v1697_v8 = vmul.f32 1.442695, %v1644_v6  ;;  %v1643_v21 = vmul.f32 %v6510_v51, %v9369_v47  ;;  %v1517_v16 = vmul.f32 1.442695, %v1458_v4 }
 0x22a   :  { %v6514_v0 = vpop.eup %6513  ;;  %6533 = vpow2.f32 %v1665_v30  ;;  %v1663_v52 = vmul.f32 1.442695, %v1627_v20  ;;  %v1550_v5 = vadd.f32 1.0, %v6512_v38  ;;  %v1460_v49 = vmul.f32 5.0, %v1428_v63 }
 0x22b   :  { %v6516_v43 = vpop.eup %6515  ;;  %6535 = vpow2.f32 %v1697_v8  ;;  %v1695_v29 = vmul.f32 1.442695, %v1643_v21  ;;  %v1533_v10 = vadd.f32 1.0, %v6514_v0  ;;  %v1483_v51 = vmul.f32 1.442695, %v1441_v60 }
 0x22c   :  { %v6518_v3 = vpop.eup %6517  ;;  %v1720_v17 = vmul.f32 %v6516_v43, %v9438_v13  ;;  %6537 = vpow2.f32 %v1663_v52  ;;  %v1515_v30 = vmul.f32 1.442695, %v1457_v37  ;;  %v1443_v8 = vmul.f32 5.0, %v1411_v59 }
 0x22d   :  { %v6520_v6 = vpop.eup %6519  ;;  %v1736_v1 = vmul.f32 %v6518_v3, %v9441_v22  ;;  %6539 = vpow2.f32 %v1695_v29  ;;  %v1489_v52 = vmul.f32 1.442695, %v1444_v45  ;;  %v1521_v60 = vmul.f32 1.442695, %v1460_v49 }
 0x22e   :  { %v6522_v20 = vpop.eup %6521  ;;  %v1719_v2 = vmul.f32 %v6520_v6, %v9444_v26  ;;  %v1751_v38 = vadd.f32 %v6520_v6, %v6516_v43  ;;  %6541 = vrcp.f32 %v1550_v5  ;;  %v1427_v5 = vsub.f32 0.8, %v9555_v34 }
 0x22f   :  { %v6524_v21 = vpop.eup %6523  ;;  %v1735_v19 = vmul.f32 %v6522_v20, %v9447_v46  ;;  %v1772_v0 = vadd.f32 %v6522_v20, %v6518_v3  ;;  %6543 = vrcp.f32 %v1533_v10  ;;  %v1487_v43 = vmul.f32 1.442695, %v1443_v8 }
 0x230   :  { %v6526_v4 = vpop.eup %6525  ;;  %v1793_v63 = vadd.f32 %v1720_v17, %v1719_v2  ;;  %v1722_v47 = vmul.f32 %v6524_v21, %v9450_v28  ;;  %6545 = vpow2.f32 %v9567_v15 }
 0x231   :  { %v6528_v37 = vpop.eup %6527  ;;  %v1814_v29 = vadd.f32 %v1736_v1, %v1735_v19  ;;  %v1738_v54 = vmul.f32 %v6526_v4, %v9453_v12  ;;  %6547 = vpow2.f32 %v9573_v7 }
 0x232   :  { %v6530_v59 = vpop.eup %6529  ;;  %v1630_v3 = vmul.f32 %v6528_v37, %v9376_v36  ;;  %6549 = vpow2.f32 %v9579_v53 }
 0x233   :  { %v6532_v45 = vpop.eup %6531  ;;  %v1721_v15 = vmul.f32 %v6530_v59, %v9456_v44  ;;  %v1752_v17 = vadd.f32 %v6530_v59, %v1751_v38  ;;  %6551 = vpow2.f32 %v9585_v32 }
 0x234   :  { %v6534_v6 = vpop.eup %6533  ;;  %v1737_v7 = vmul.f32 %v6532_v45, %v9459_v11  ;;  %v1773_v1 = vadd.f32 %v6532_v45, %v1772_v0  ;;  %v1669_v20 = vmul.f32 1.442695, %v1630_v3  ;;  %6553 = vpow2.f32 %v9587_v39 }
 0x235   :  { %v6536_v2 = vpop.eup %6535  ;;  %v1794_v53 = vadd.f32 %v1793_v63, %v1721_v15  ;;  %v1724_v8 = vmul.f32 %v6534_v6, %v9462_v35  ;;  %v1753_v19 = vadd.f32 %v6524_v21, %v1752_v17  ;;  %6555 = vpow2.f32 %v9592_v27  ;;  %v9624_v27 = vpop.trf.xlu1 }
 0x236   :  { %v6538_v37 = vpop.eup %6537  ;;  %v1815_v38 = vadd.f32 %v1814_v29, %v1737_v7  ;;  %v1740_v32 = vmul.f32 %v6536_v2, %v9465_v40  ;;  %v1774_v59 = vadd.f32 %v6526_v4, %v1773_v1  ;;  %6557 = vpow2.f32 %v1669_v20  ;;  %11676 = vst [vmem:[#allocation125_spill] sm:$0xff] %v9624_v27 }
 0x237   :  { %v6540_v49 = vpop.eup %6539  ;;  %v1723_v10 = vmul.f32 %v6538_v37, %v9468_v14  ;;  %v1754_v0 = vadd.f32 %v6538_v37, %v1753_v19  ;;  %v1795_v3 = vadd.f32 %v1794_v53, %v1722_v47  ;;  %6559 = vpow2.f32 %v1517_v16  ;;  %v11691_v14 = vld [vmem:[#allocation120_spill] sm:$0xff] }
 0x238   :  { %v6542_v39 = vpop.eup %6541  ;;  %v1739_v63 = vmul.f32 %v6540_v49, %v9472_v56  ;;  %v1775_v45 = vadd.f32 %v6540_v49, %v1774_v59  ;;  %v1816_v15 = vadd.f32 %v1815_v38, %v1738_v54  ;;  %6561 = vpow2.f32 %v1483_v51  ;;  %v11677_v59 = vld [vmem:[#allocation23_spill] sm:$0xff]  ;;  %v11690_v56 = vld [vmem:[#allocation102_spill] sm:$0xff] }
 0x239   :  { %v6544_v21 = vpop.eup %6543  ;;  %v1796_v29 = vadd.f32 %v1795_v3, %v1723_v10  ;;  %v1646_v17 = vmul.f32 %v6542_v39, %v9382_v42  ;;  %v9627_v4 = vadd.f32 %v6534_v6, %v1754_v0  ;;  %6563 = vpow2.f32 %v1515_v30  ;;  %v2089_v37 = vpop.trf.xlu1  ;;  %v11678_v3 = vld [vmem:[#allocation26_spill] sm:$0xff] }
 0x23a   :  { %v6546_v7 = vpop.eup %6545  ;;  %v1817_v1 = vadd.f32 %v1816_v15, %v1739_v63  ;;  %v1629_v47 = vmul.f32 %v6544_v21, %v9384_v58  ;;  %v9630_v16 = vadd.f32 %v6536_v2, %v1775_v45  ;;  %6565 = vpow2.f32 %v1489_v52  ;;  %v11686_v58 = vld [vmem:[#allocation35_spill] sm:$0xff] }
 0x23b   :  { %v6548_v20 = vpop.eup %6547  ;;  %v1701_v49 = vmul.f32 1.442695, %v1646_v17  ;;  %v9632_v54 = vadd.f32 %v1796_v29, %v1724_v8  ;;  %v1549_v51 = vadd.f32 1.0, %v6546_v7  ;;  %6567 = vpow2.f32 %v1521_v60 }
 0x23c   :  { %v6550_v53 = vpop.eup %6549  ;;  %v1667_v10 = vmul.f32 1.442695, %v1629_v47  ;;  %v9634_v19 = vadd.f32 %v1817_v1, %v1740_v32  ;;  %v1536_v6 = vadd.f32 1.0, %v6548_v20  ;;  %6569 = vpow2.f32 %v1487_v43 }
 0x23d   :  { %v6552_v30 = vpop.eup %6551  ;;  %6571 = vpow2.f32 %v1701_v49  ;;  %v1552_v38 = vadd.f32 1.0, %v6550_v53  ;;  %v1413_v2 = vsub.f32 0.8, %v9570_v24  ;;  %v9639_v52 = vadd.f32 %v9517_v18, %v11677_v59  ;;  %v11681_v49 = vld [vmem:[#allocation100_spill] sm:$0xff] }
 0x23e   :  { %v6554_v8 = vpop.eup %6553  ;;  %6573 = vpow2.f32 %v1667_v10  ;;  %v1535_v0 = vadd.f32 1.0, %v6552_v30  ;;  %v1429_v60 = vsub.f32 0.8, %v9576_v57  ;;  %v9644_v32 = vadd.f32 %v9517_v18, %v11678_v3 }
 0x23f   :  { %v6556_v43 = vpop.eup %6555  ;;  %6575 = vrcp.f32 %v1549_v51  ;;  %v1551_v39 = vadd.f32 1.0, %v6554_v8  ;;  %v1459_v63 = vmul.f32 5.0, %v1427_v5  ;;  %v11679_v24 = vsub.f32 0.8, %v9562_v33  ;;  %v5695_v15 = vpop.f32.mrb[32].mxu0  ;;  %v11682_v51 = vld [vmem:[#allocation25_spill] sm:$0xff] }
 0x240   :  { %v9650_v21 = vpop.eup %6557  ;;  %v9653_v29 = vrot.slane %v2089_v37, %v9510_v61  ;;  %6577 = vrcp.f32 %v1536_v6  ;;  %v1538_v57 = vadd.f32 1.0, %v6556_v43  ;;  %v11680_v17 = vsub.f32 0.8, %v9565_v55  ;;  %v5751_v1 = vpop.f32.mrb[32].mxu1  ;;  %v11683_v55 = vld [vmem:[#allocation28_spill] sm:$0xff] }
 0x241   :  { %v1446_v45 = vmul.f32 5.0, %v11679_v24  ;;  %v2259_v47 = vpop.f32.mrb[33].mxu0  ;;  %v6560_v20 = vpop.eup %6559  ;;  %v9659_v34 = vmul.f32 %v9650_v21, %v11681_v49  ;;  %6579 = vrcp.f32 %v1552_v38  ;;  %v1445_v33 = vmul.f32 5.0, %v1413_v2 }
 0x242   :  { %v1462_v7 = vmul.f32 5.0, %v11680_v17  ;;  %v2452_v5 = vpop.f32.mrb[33].mxu1  ;;  %v9663_v53 = vadd.f32 %v9517_v18, %v11682_v51  ;;  %v6562_v10 = vpop.eup %6561  ;;  %6581 = vrcp.f32 %v1535_v0  ;;  %v1554_v6 = vadd.f32 1.0, %v6560_v20  ;;  %v11685_v51 = vld [vmem:[#allocation36_spill] sm:$0xff] }
 0x243   :  { %v1461_v30 = vmul.f32 5.0, %v1429_v60  ;;  %v9667_v37 = vadd.f32 %v9517_v18, %v11683_v55  ;;  %v6564_v59 = vpop.eup %6563  ;;  %6583 = vrcp.f32 %v1551_v39  ;;  %v1537_v8 = vadd.f32 1.0, %v6562_v10  ;;  %v9669_v38 = vpop.f32.mrb[34].mxu0 }
 0x244   :  { %v1519_v3 = vmul.f32 1.442695, %v1459_v63  ;;  %v1493_v43 = vmul.f32 1.442695, %v1446_v45  ;;  %v6566_v2 = vpop.eup %6565  ;;  %6585 = vrcp.f32 %v1538_v57  ;;  %v1553_v24 = vadd.f32 1.0, %v6564_v59  ;;  %v9675_v60 = vpop.f32.mrb[34].mxu1 }
 0x245   :  { %11684 = vst [vmem:[#allocation23_spill] sm:$0xff] %v9667_v37  ;;  %v1525_v17 = vmul.f32 1.442695, %v1462_v7  ;;  %v9673_v0 = vadd.f32 %v9653_v29, %v11685_v51  ;;  %v9677_v20 = vpop.f32.mrb[35].mxu0  ;;  %v6568_v55 = vpop.eup %6567  ;;  %6587 = vrcp.f32 %v1554_v6  ;;  %v1540_v39 = vadd.f32 1.0, %v6566_v2  ;;  %v11687_v6 = vld [vmem:[#allocation12_spill] sm:$0xff] }
 0x246   :  { %v9679_v10 = vmul.f32 1.442695, %v1445_v33  ;;  %v2532_v63 = vmul.f32 2.0, %v5695_v15  ;;  %v9681_v45 = vpop.f32.mrb[35].mxu1  ;;  %v6570_v27 = vpop.eup %6569  ;;  %6589 = vrcp.f32 %v1537_v8  ;;  %v1556_v57 = vadd.f32 1.0, %v6568_v55  ;;  %v11688_v8 = vld [vmem:[#allocation101_spill] sm:$0xff] }
 0x247   :  { %v9683_v7 = vmul.f32 1.442695, %v1461_v30  ;;  %v2548_v59 = vmul.f32 2.0, %v5751_v1  ;;  %v9685_v51 = vpop.eup %6571  ;;  %6591 = vrcp.f32 %v1553_v24  ;;  %v1539_v61 = vadd.f32 1.0, %v6570_v27  ;;  %v9695_v15 = vpop.f32.mrb[36].mxu0  ;;  %v11689_v24 = vld [vmem:[#allocation11_spill] sm:$0xff] }
 0x248   :  { %v9689_v49 = vadd.f32 %v9653_v29, %v11686_v58  ;;  %v9693_v33 = vadd.f32 %v9653_v29, %v11687_v6  ;;  %v6574_v2 = vpop.eup %6573  ;;  %v9699_v30 = vmul.f32 %v9685_v51, %v11688_v8  ;;  %6593 = vrcp.f32 %v1540_v39  ;;  %v9707_v58 = vpop.f32.mrb[36].mxu1  ;;  %v11692_v39 = vld [vmem:[#allocation75_spill] sm:$0xff]  ;;  %v11693_v37 = vld [vmem:[#allocation76_spill] sm:$0xff] }
 0x249   :  { %v9701_v1 = vmul.f32 2.0, %v2259_v47  ;;  %v9705_v27 = vadd.f32 %v9653_v29, %v11689_v24  ;;  %v9709_v55 = vpop.f32.mrb[37].mxu0  ;;  %v6576_v6 = vpop.eup %6575  ;;  %v1725_v42 = vmul.f32 %v6574_v2, %v11690_v56  ;;  %v1756_v36 = vadd.f32 %v6574_v2, %v9627_v4 }
 0x24a   :  { %6595 = vrcp.f32 %v1556_v57  ;;  %v2564_v8 = vsub.f32 %v11691_v14, %v2532_v63  ;;  %v9714_v40 = vpop.f32.mrb[37].mxu1  ;;  %v6578_v47 = vpop.eup %6577  ;;  %v1645_v35 = vmul.f32 %v6576_v6, %v11692_v39  ;;  %v2580_v24 = vsub.f32 %v9673_v0, %v2548_v59  ;;  %v11694_v57 = vld [vmem:[#allocation77_spill] sm:$0xff]  ;;  %v11696_v6 = vld [vmem:[#allocation78_spill] sm:$0xff] }
 0x24b   :  { %6597 = vrcp.f32 %v1539_v61  ;;  %v2547_v11 = vmul.f32 2.0, %v2452_v5  ;;  %v6580_v9 = vpop.eup %6579  ;;  %v1798_v44 = vadd.f32 %v9632_v54, %v1725_v42  ;;  %v1632_v48 = vmul.f32 %v6578_v47, %v11693_v37  ;;  %v9723_v4 = vpop.f32.mrb[38].mxu0  ;;  %v11695_v61 = vld [vmem:[#allocation122_spill] sm:$0xff]  ;;  %v11698_v37 = vld [vmem:[#allocation80_spill] sm:$0xff] }
 0x24c   :  { %v9721_v56 = vadd.f32 %v9650_v21, %v1756_v36  ;;  %6599 = vpow2.f32 %v1519_v3  ;;  %v6582_v14 = vpop.eup %6581  ;;  %v1699_v63 = vmul.f32 1.442695, %v1645_v35  ;;  %v1648_v2 = vmul.f32 %v6580_v9, %v11694_v57  ;;  %v9728_v5 = vpop.f32.mrb[38].mxu1 }
 0x24d   :  { %6601 = vpow2.f32 %v1493_v43  ;;  %v2563_v0 = vsub.f32 %v11695_v61, %v9701_v1  ;;  %v9730_v59 = vpop.f32.mrb[39].mxu0  ;;  %v6584_v42 = vpop.eup %6583  ;;  %v1673_v54 = vmul.f32 1.442695, %v1632_v48  ;;  %v1631_v36 = vmul.f32 %v6582_v14, %v11696_v6  ;;  %v11697_v43 = vld [vmem:[#allocation79_spill] sm:$0xff] }
 0x24e   :  { %v9734_v21 = vadd.f32 %v1798_v44, %v9659_v34  ;;  %6603 = vpow2.f32 %v1525_v17  ;;  %v9736_v3 = vpop.f32.mrb[39].mxu1  ;;  %v6586_v35 = vpop.eup %6585  ;;  %v1705_v9 = vmul.f32 1.442695, %v1648_v2  ;;  %v1647_v47 = vmul.f32 %v6584_v42, %v11697_v43  ;;  %v11699_v17 = vld [vmem:[#allocation81_spill] sm:$0xff] }
 0x24f   :  { %6605 = vpow2.f32 %v1699_v63  ;;  %v9739_v1 = vmax.f32 %v2564_v8, 0.0  ;;  %v6588_v61 = vpop.eup %6587  ;;  %v1671_v57 = vmul.f32 1.442695, %v1631_v36  ;;  %v1634_v48 = vmul.f32 %v6586_v35, %v11698_v37  ;;  %v9743_v6 = vpop.f32.mrb[40].mxu0  ;;  %v11702_v36 = vld [vmem:[#allocation82_spill] sm:$0xff] }
 0x250   :  { %6607 = vpow2.f32 %v1673_v54  ;;  %v2579_v14 = vsub.f32 %v9689_v49, %v2547_v11  ;;  %v6590_v44 = vpop.eup %6589  ;;  %v1703_v34 = vmul.f32 1.442695, %v1647_v47  ;;  %v1650_v39 = vmul.f32 %v6588_v61, %v11699_v17  ;;  %v9748_v2 = vpop.f32.mrb[40].mxu1  ;;  %v11704_v47 = vld [vmem:[#allocation83_spill] sm:$0xff] }
 0x251   :  { %6609 = vpow2.f32 %v1705_v9  ;;  %v9746_v63 = vmax.f32 %v2580_v24, 0.0  ;;  %11700 = vst [vmem:[#allocation26_spill] sm:$0xff] %v9748_v2  ;;  %v9750_v8 = vpop.f32.mrb[41].mxu0  ;;  %v6592_v42 = vpop.eup %6591  ;;  %v1677_v54 = vmul.f32 1.442695, %v1634_v48  ;;  %v1633_v35 = vmul.f32 %v6590_v44, %v11702_v36  ;;  %v11707_v36 = vld [vmem:[#allocation85_spill] sm:$0xff] }
 0x252   :  { %11701 = vst [vmem:[#allocation25_spill] sm:$0xff] %v9750_v8  ;;  %6611 = vpow2.f32 %v1671_v57  ;;  %v2534_v11 = vmul.f32 2.0, %v9669_v38  ;;  %v9754_v49 = vpop.f32.mrb[41].mxu1  ;;  %v6594_v37 = vpop.eup %6593  ;;  %v1709_v9 = vmul.f32 1.442695, %v1650_v39  ;;  %v1649_v61 = vmul.f32 %v6592_v42, %v11704_v47  ;;  %v11705_v8 = vld [vmem:[#allocation84_spill] sm:$0xff] }
 0x253   :  { %11703 = vst [vmem:[#allocation28_spill] sm:$0xff] %v9754_v49  ;;  %6613 = vpow2.f32 %v1703_v34  ;;  %v2550_v24 = vmul.f32 2.0, %v9675_v60  ;;  %v1675_v43 = vmul.f32 1.442695, %v1633_v35  ;;  %v1636_v2 = vmul.f32 %v6594_v37, %v11705_v8  ;;  %v9761_v48 = vpop.f32.mrb[42].mxu0  ;;  %v11708_v60 = vld [vmem:[#allocation86_spill] sm:$0xff] }
 0x254   :  { %v6596_v17 = vpop.eup %6595  ;;  %6615 = vpow2.f32 %v1677_v54  ;;  %v9759_v57 = vmax.f32 %v2563_v0, 0.0  ;;  %11706 = vst [vmem:[#allocation36_spill] sm:$0xff] %v9761_v48  ;;  %v1707_v38 = vmul.f32 1.442695, %v1649_v61  ;;  %v9764_v34 = vmax.f32 %v2579_v14, 0.0  ;;  %v11709_v54 = vld [vmem:[#allocation123_spill] sm:$0xff] }
 0x255   :  { %v6598_v44 = vpop.eup %6597  ;;  %6617 = vpow2.f32 %v1709_v9  ;;  %v1652_v49 = vmul.f32 %v6596_v17, %v11707_v36  ;;  %v1681_v42 = vmul.f32 1.442695, %v1636_v2  ;;  %v2566_v35 = vsub.f32 %v11709_v54, %v2534_v11  ;;  %v11710_v54 = vld [vmem:[#allocation103_spill] sm:$0xff] }
 0x256   :  { %v6600_v39 = vpop.eup %6599  ;;  %6619 = vpow2.f32 %v1675_v43  ;;  %v1635_v47 = vmul.f32 %v6598_v44, %v11708_v60  ;;  %v2582_v8 = vsub.f32 %v9693_v33, %v2550_v24  ;;  %v11712_v44 = vld [vmem:[#allocation105_spill] sm:$0xff]  ;;  %vm2636_vm4 = vcmp.eq.f32.partialorder %v9739_v1, inf }
 0x257   :  { %v6602_v25 = vpop.eup %6601  ;;  %6621 = vpow2.f32 %v1707_v38  ;;  %v1713_v37 = vmul.f32 1.442695, %v1652_v49  ;;  %v1555_v0 = vadd.f32 1.0, %v6600_v39  ;;  %v9776_v39 = vmax.f32 %v2566_v35, 0.0 }
 0x258   :  { %v6604_v48 = vpop.eup %6603  ;;  %6623 = vpow2.f32 %v1681_v42  ;;  %v1679_v9 = vmul.f32 1.442695, %v1635_v47  ;;  %v1542_v61 = vadd.f32 1.0, %v6602_v25  ;;  %v11711_v47 = vld [vmem:[#allocation104_spill] sm:$0xff]  ;;  %v9778_v42 = vmax.f32 %v2582_v8, 0.0  ;;  %v11714_v8 = vld [vmem:[#allocation107_spill] sm:$0xff] }
 0x259   :  { %v6606_v17 = vpop.eup %6605  ;;  %6625 = vpow2.f32 %v1713_v37  ;;  %v1558_v43 = vadd.f32 1.0, %v6604_v48  ;;  %vm2638_vm5 = vcmp.eq.f32.partialorder %v9739_v1, 0.0  ;;  %vm2748_vm6 = vcmp.eq.f32.partialorder %v9746_v63, inf }
 0x25a   :  { %v6608_v11 = vpop.eup %6607  ;;  %v1741_v38 = vmul.f32 %v6606_v17, %v11710_v54  ;;  %v1777_v49 = vadd.f32 %v6606_v17, %v9630_v16  ;;  %6627 = vpow2.f32 %v1679_v9  ;;  %v11713_v9 = vld [vmem:[#allocation106_spill] sm:$0xff]  ;;  %vm2750_vm7 = vcmp.eq.f32.partialorder %v9746_v63, 0.0 }
 0x25b   :  { %v6610_v24 = vpop.eup %6609  ;;  %v1728_v25 = vmul.f32 %v6608_v11, %v11711_v47  ;;  %6629 = vrcp.f32 %v1555_v0  ;;  %v9786_v0 = vmul.f32 2.0, %v9677_v20  ;;  %v11716_v20 = vld [vmem:[#allocation109_spill] sm:$0xff]  ;;  %vm2629_vm8 = vcmp.eq.f32.partialorder %v9759_v57, inf }
 0x25c   :  { %v6612_v48 = vpop.eup %6611  ;;  %v1819_v37 = vadd.f32 %v9634_v19, %v1741_v38  ;;  %v1744_v2 = vmul.f32 %v6610_v24, %v11712_v44  ;;  %v1778_v14 = vadd.f32 %v9685_v51, %v1777_v49  ;;  %6631 = vrcp.f32 %v1542_v61  ;;  %v11715_v61 = vld [vmem:[#allocation108_spill] sm:$0xff] }
 0x25d   :  { %v6614_v16 = vpop.eup %6613  ;;  %v1727_v17 = vmul.f32 %v6612_v48, %v11713_v9  ;;  %v1758_v33 = vadd.f32 %v6612_v48, %v9721_v56  ;;  %6633 = vrcp.f32 %v1558_v43  ;;  %vm2631_vm9 = vcmp.eq.f32.partialorder %v9759_v57, 0.0 }
 0x25e   :  { %v6616_v35 = vpop.eup %6615  ;;  %v1743_v60 = vmul.f32 %v6614_v16, %v11714_v8  ;;  %v1779_v36 = vadd.f32 %v6614_v16, %v1778_v14  ;;  %v1820_v19 = vadd.f32 %v1819_v37, %v9699_v30  ;;  %6635 = vpow2.f32 %v9679_v10  ;;  %v11717_v16 = vld [vmem:[#allocation110_spill] sm:$0xff] }
 0x25f   :  { %v6618_v38 = vpop.eup %6617  ;;  %v1800_v51 = vadd.f32 %v9734_v21, %v1727_v17  ;;  %v1730_v49 = vmul.f32 %v6616_v35, %v11715_v61  ;;  %v1759_v9 = vadd.f32 %v6608_v11, %v1758_v33  ;;  %6637 = vpow2.f32 %v9683_v7  ;;  %v11718_v17 = vld [vmem:[#allocation111_spill] sm:$0xff] }
 0x260   :  { %v6620_v56 = vpop.eup %6619  ;;  %v1821_v43 = vadd.f32 %v1820_v19, %v1743_v60  ;;  %v1746_v48 = vmul.f32 %v6618_v38, %v11716_v20  ;;  %v1780_v44 = vadd.f32 %v6610_v24, %v1779_v36  ;;  %6639 = vrsqrt.f32 %v9739_v1  ;;  %v11719_v36 = vld [vmem:[#allocation112_spill] sm:$0xff] }
 0x261   :  { %v6622_v14 = vpop.eup %6621  ;;  %v1729_v30 = vmul.f32 %v6620_v56, %v11717_v16  ;;  %v1760_v37 = vadd.f32 %v6620_v56, %v1759_v9  ;;  %v1801_v10 = vadd.f32 %v1800_v51, %v1728_v25  ;;  %6641 = vrsqrt.f32 %v9746_v63  ;;  %v11720_v25 = vld [vmem:[#allocation113_spill] sm:$0xff] }
 0x262   :  { %v6624_v21 = vpop.eup %6623  ;;  %v1745_v61 = vmul.f32 %v6622_v14, %v11718_v17  ;;  %v1781_v11 = vadd.f32 %v6622_v14, %v1780_v44  ;;  %v1822_v33 = vadd.f32 %v1821_v43, %v1744_v2  ;;  %6643 = vrsqrt.f32 %v9759_v57  ;;  %v11721_v44 = vld [vmem:[#allocation114_spill] sm:$0xff] }
 0x263   :  { %v9800_v7 = vpop.eup %6625  ;;  %v1802_v60 = vadd.f32 %v1801_v10, %v1729_v30  ;;  %v1732_v24 = vmul.f32 %v6624_v21, %v11719_v36  ;;  %v1761_v19 = vadd.f32 %v6616_v35, %v1760_v37  ;;  %6645 = vrsqrt.f32 %v9764_v34 }
 0x264   :  { %v6628_v16 = vpop.eup %6627  ;;  %v1823_v9 = vadd.f32 %v1822_v33, %v1745_v61  ;;  %v9806_v51 = vmul.f32 %v9800_v7, %v11720_v25  ;;  %v9808_v56 = vadd.f32 %v6618_v38, %v1781_v11  ;;  %6647 = vrsqrt.f32 %v9776_v39  ;;  %v11722_v61 = vld [vmem:[#allocation87_spill] sm:$0xff]  ;;  %v11723_v33 = vld [vmem:[#allocation88_spill] sm:$0xff] }
 0x265   :  { %v6630_v2 = vpop.eup %6629  ;;  %v1731_v43 = vmul.f32 %v6628_v16, %v11721_v44  ;;  %v1762_v14 = vadd.f32 %v6628_v16, %v1761_v19  ;;  %v1803_v30 = vadd.f32 %v1802_v60, %v1730_v49  ;;  %6649 = vrsqrt.f32 %v9778_v42 }
 0x266   :  { %v6632_v35 = vpop.eup %6631  ;;  %v1651_v37 = vmul.f32 %v6630_v2, %v11722_v61  ;;  %v9817_v38 = vadd.f32 %v1823_v9, %v1746_v48  ;;  %v2653_v10 = vand.u32 2147483648, %v9776_v39  ;;  %v2549_v16 = vmul.f32 2.0, %v9681_v45  ;;  %v11724_v48 = vld [vmem:[#allocation124_spill] sm:$0xff]  ;;  %v11725_v61 = vld [vmem:[#allocation89_spill] sm:$0xff] }
 0x267   :  { %v6634_v49 = vpop.eup %6633  ;;  %v1804_v11 = vadd.f32 %v1803_v30, %v1731_v43  ;;  %v1638_v60 = vmul.f32 %v6632_v35, %v11723_v33  ;;  %v9824_v19 = vadd.f32 %v6624_v21, %v1762_v14  ;;  %vm2741_vm10 = vcmp.eq.f32.partialorder %v9764_v34, inf }
 0x268   :  { %v2565_v9 = vsub.f32 %v11724_v48, %v9786_v0  ;;  %v6636_v2 = vpop.eup %6635  ;;  %v1711_v44 = vmul.f32 1.442695, %v1651_v37  ;;  %v1654_v25 = vmul.f32 %v6634_v49, %v11725_v61  ;;  %vm2743_vm11 = vcmp.eq.f32.partialorder %v9764_v34, 0.0 }
 0x269   :  { %vm2650_vm12 = vcmp.eq.f32.partialorder %v9776_v39, inf  ;;  %v2581_v45 = vsub.f32 %v9705_v27, %v2549_v16  ;;  %v9835_v21 = vmul.f32 2.0, %v9695_v15  ;;  %v6638_v43 = vpop.eup %6637  ;;  %v1685_v14 = vmul.f32 1.442695, %v1638_v60 }
 0x26a   :  { %v1541_v30 = vadd.f32 1.0, %v6636_v2  ;;  %v9837_v35 = vadd.f32 %v1804_v11, %v1732_v24  ;;  %vm2652_vm13 = vcmp.eq.f32.partialorder %v9776_v39, 0.0  ;;  %vm2762_vm14 = vcmp.eq.f32.partialorder %v9778_v42, inf  ;;  %v6640_v0 = vpop.eup %6639 }
 0x26b   :  { %6651 = vpow2.f32 %v1711_v44  ;;  %v1717_v37 = vmul.f32 1.442695, %v1654_v25  ;;  %v1557_v49 = vadd.f32 1.0, %v6638_v43  ;;  %vm2764_vm15 = vcmp.eq.f32.partialorder %v9778_v42, 0.0  ;;  %v6642_v48 = vpop.eup %6641  ;;  %v11726_v44 = vld [vmem:[#allocation24_spill] sm:$0xff] }
 0x26c   :  { %6653 = vpow2.f32 %v1685_v14  ;;  %v2635_v15 = vmul.f32 %v6640_v0, %v9739_v1  ;;  %v2765_v27 = vand.u32 2147483648, %v9778_v42  ;;  %v9844_v16 = vmax.f32 %v2565_v9, 0.0  ;;  %v6644_v24 = vpop.eup %6643 }
 0x26d   :  { %6655 = vpow2.f32 %v1717_v37  ;;  %v2747_v11 = vmul.f32 %v6642_v48, %v9746_v63  ;;  %v9847_v60 = vmax.f32 %v2581_v45, 0.0  ;;  %v6646_v2 = vpop.eup %6645  ;;  %v2628_v14 = vmul.f32 %v6644_v24, %v9759_v57 }
 0x26e   :  { %6657 = vrcp.f32 %v1541_v30  ;;  %v2637_v43 = vsel %vm2636_vm4, %v9739_v1, %v2635_v15  ;;  %v9856_v9 = vmul.f32 2.0, %v9707_v58  ;;  %v6648_v0 = vpop.eup %6647  ;;  %v11727_v37 = vand.u32 2147483648, %v9739_v1 }
 0x26f   :  { %6659 = vrcp.f32 %v1557_v49  ;;  %v2749_v30 = vsel %vm2748_vm6, %v9746_v63, %v2747_v11  ;;  %v2740_v48 = vmul.f32 %v6646_v2, %v9764_v34  ;;  %v6650_v25 = vpop.eup %6649  ;;  %v11728_v24 = vand.u32 2147483648, %v9746_v63 }
 0x270   :  { %v2640_v45 = vsel %vm2638_vm5, %v11727_v37, %v2637_v43  ;;  %v2630_v49 = vsel %vm2629_vm8, %v9759_v57, %v2628_v14  ;;  %v2649_v1 = vmul.f32 %v6648_v0, %v9776_v39  ;;  %v11729_v37 = vand.u32 2147483648, %v9759_v57 }
 0x271   :  { %v2852_v15 = vmul.f32 0.57735026, %v2640_v45  ;;  %v2752_v58 = vsel %vm2750_vm7, %v11728_v24, %v2749_v30  ;;  %v2742_v2 = vsel %vm2741_vm10, %v9764_v34, %v2740_v48  ;;  %v2761_v45 = vmul.f32 %v6650_v25, %v9778_v42 }
 0x272   :  { %v2868_v43 = vmul.f32 0.57735026, %v2752_v58  ;;  %v2633_v11 = vsel %vm2631_vm9, %v11729_v37, %v2630_v49  ;;  %v11730_v24 = vand.u32 2147483648, %v9764_v34  ;;  %v2651_v0 = vsel %vm2650_vm12, %v9776_v39, %v2649_v1  ;;  %v11731_v39 = vld [vmem:[#allocation115_spill] sm:$0xff] }
 0x273   :  { %v2884_v63 = vsub.f32 1.0, %v2852_v15  ;;  %v2851_v30 = vmul.f32 0.57735026, %v2633_v11  ;;  %v2654_v48 = vsel %vm2652_vm13, %v2653_v10, %v2651_v0  ;;  %v2763_v25 = vsel %vm2762_vm14, %v9778_v42, %v2761_v45 }
 0x274   :  { %v2745_v14 = vsel %vm2743_vm11, %v11730_v24, %v2742_v2  ;;  %v2900_v58 = vsub.f32 1.0, %v2868_v43  ;;  %v2854_v37 = vmul.f32 0.57735026, %v2654_v48  ;;  %v2766_v34 = vsel %vm2764_vm15, %v2765_v27, %v2763_v25 }
 0x275   :  { %v2867_v57 = vmul.f32 0.57735026, %v2745_v14  ;;  %v2916_v15 = vsub.f32 0.7, %v2884_v63  ;;  %v2883_v49 = vsub.f32 1.0, %v2851_v30  ;;  %v6652_v11 = vpop.eup %6651  ;;  %6661 = vrsqrt.f32 %v9844_v16  ;;  %v11732_v30 = vld [vmem:[#allocation116_spill] sm:$0xff] }
 0x276   :  { %v2932_v2 = vsub.f32 0.7, %v2900_v58  ;;  %v2870_v43 = vmul.f32 0.57735026, %v2766_v34  ;;  %v9899_v24 = vpop.eup %6653  ;;  %v1747_v10 = vmul.f32 %v6652_v11, %v11731_v39  ;;  %v1783_v14 = vadd.f32 %v6652_v11, %v9808_v56  ;;  %v11733_v34 = vld [vmem:[#allocation118_spill] sm:$0xff] }
 0x277   :  { %v2899_v1 = vsub.f32 1.0, %v2867_v57  ;;  %v2948_v0 = vmul.f32 5.0, %v2916_v15  ;;  %v2915_v45 = vsub.f32 0.7, %v2883_v49  ;;  %v9903_v63 = vpop.eup %6655  ;;  %v9907_v42 = vmul.f32 %v9899_v24, %v11732_v30  ;;  %v11734_v11 = vld [vmem:[#allocation90_spill] sm:$0xff] }
 0x278   :  { %v2964_v27 = vmul.f32 5.0, %v2932_v2  ;;  %v2886_v57 = vsub.f32 1.0, %v2854_v37  ;;  %v6658_v48 = vpop.eup %6657  ;;  %v1825_v25 = vadd.f32 %v9817_v38, %v1747_v10  ;;  %v9912_v61 = vmul.f32 %v9903_v63, %v11733_v34  ;;  %v11735_v2 = vld [vmem:[#allocation91_spill] sm:$0xff] }
 0x279   :  { %v2931_v58 = vsub.f32 0.7, %v2899_v1  ;;  %v9915_v56 = vadd.f32 %v9800_v7, %v1783_v14  ;;  %v2981_v15 = vmul.f32 1.442695, %v2948_v0  ;;  %v6660_v49 = vpop.eup %6659  ;;  %v1637_v39 = vmul.f32 %v6658_v48, %v11734_v11 }
 0x27a   :  { %v3013_v33 = vmul.f32 1.442695, %v2964_v27  ;;  %v2947_v30 = vmul.f32 5.0, %v2915_v45  ;;  %v1653_v1 = vmul.f32 %v6660_v49, %v11735_v2  ;;  %v9920_v37 = vadd.f32 %v1825_v25, %v9806_v51  ;;  %v11736_v27 = vld [vmem:[#allocation47_spill] sm:$0xff]  ;;  %v11738_v51 = vld [vmem:[#allocation30_spill] sm:$0xff]  ;;  %v9940_v25 = vpop.f32.mrb[43].mxu0 }
 0x27b   :  { %v2963_v36 = vmul.f32 5.0, %v2931_v58  ;;  %6663 = vpow2.f32 %v2981_v15  ;;  %v2918_v38 = vsub.f32 0.7, %v2886_v57  ;;  %v1683_v10 = vmul.f32 1.442695, %v1637_v39  ;;  %v11737_v58 = vld [vmem:[#allocation27_spill] sm:$0xff] }
 0x27c   :  { %6665 = vpow2.f32 %v3013_v33  ;;  %v2979_v34 = vmul.f32 1.442695, %v2947_v30  ;;  %v1715_v7 = vmul.f32 1.442695, %v1653_v1  ;;  %v2902_v0 = vsub.f32 1.0, %v2870_v43  ;;  %v9933_v33 = vpop.f32.mrb[42].mxu1 }
 0x27d   :  { %v3011_v17 = vmul.f32 1.442695, %v2963_v36  ;;  %v2950_v14 = vmul.f32 5.0, %v2918_v38  ;;  %6667 = vrsqrt.f32 %v9847_v60  ;;  %v2134_v45 = vadd.f32 %v9653_v29, %v11736_v27  ;;  %v11740_v1 = vld [vmem:[#allocation29_spill] sm:$0xff] }
 0x27e   :  { %6669 = vpow2.f32 %v1683_v10  ;;  %v9927_v48 = vadd.f32 %v9517_v18, %v11737_v58  ;;  %v9931_v57 = vadd.f32 %v9517_v18, %v11738_v51  ;;  %v2934_v39 = vsub.f32 0.7, %v2902_v0  ;;  %v11741_v51 = vld [vmem:[#allocation22_spill] sm:$0xff] }
 0x27f   :  { %6671 = vpow2.f32 %v1715_v7  ;;  %v2985_v36 = vmul.f32 1.442695, %v2950_v14  ;;  %v11739_v43 = vsub.f32 %v11726_v44, %v9835_v21  ;;  %v6662_v15 = vpop.eup %6661  ;;  %vm2643_vm0 = vcmp.eq.f32.partialorder %v9844_v16, inf }
 0x280   :  { %6673 = vpow2.f32 %v2979_v34  ;;  %v2584_v49 = vsub.f32 %v2134_v45, %v9856_v9  ;;  %v9946_v38 = vadd.f32 %v9517_v18, %v11740_v1  ;;  %v2966_v10 = vmul.f32 5.0, %v2934_v39 }
 0x281   :  { %v9938_v30 = vmax.f32 %v11739_v43, 0.0  ;;  %6675 = vpow2.f32 %v3011_v17  ;;  %v2642_v7 = vmul.f32 %v6662_v15, %v9844_v16  ;;  %v2535_v21 = vmul.f32 2.0, %v9709_v55 }
 0x282   :  { %6677 = vpow2.f32 %v2985_v36  ;;  %vm2645_vm1 = vcmp.eq.f32.partialorder %v9844_v16, 0.0  ;;  %v2646_v44 = vand.u32 2147483648, %v9844_v16  ;;  %v9952_v34 = vmax.f32 %v2584_v49, 0.0 }
 0x283   :  { %v3017_v14 = vmul.f32 1.442695, %v2966_v10  ;;  %v2644_v9 = vsel %vm2643_vm0, %v9844_v16, %v2642_v7  ;;  %6679 = vrsqrt.f32 %v9938_v30  ;;  %v2567_v0 = vsub.f32 %v9639_v52, %v2535_v21 }
 0x284   :  { %v2647_v17 = vsel %vm2645_vm1, %v2646_v44, %v2644_v9  ;;  %6681 = vrsqrt.f32 %v9952_v34  ;;  %v9959_v27 = vmul.f32 2.0, %v9714_v40  ;;  %v9962_v55 = vmul.f32 2.0, %v9723_v4  ;;  %v11742_v9 = vld [vmem:[#allocation119_spill] sm:$0xff] }
 0x285   :  { %v6664_v45 = vpop.eup %6663  ;;  %6683 = vpow2.f32 %v3017_v14  ;;  %v2853_v58 = vmul.f32 0.57735026, %v2647_v17  ;;  %vm2755_vm2 = vcmp.eq.f32.partialorder %v9847_v60, inf  ;;  %v9967_v16 = vadd.f32 %v9653_v29, %v11741_v51  ;;  %v11743_v51 = vld [vmem:[#allocation121_spill] sm:$0xff] }
 0x286   :  { %v6666_v36 = vpop.eup %6665  ;;  %v3044_v52 = vadd.f32 1.0, %v6664_v45  ;;  %vm2757_vm3 = vcmp.eq.f32.partialorder %v9847_v60, 0.0  ;;  %v2758_v39 = vand.u32 2147483648, %v9847_v60  ;;  %v9971_v40 = vmax.f32 %v2567_v0, 0.0 }
 0x287   :  { %v6668_v43 = vpop.eup %6667  ;;  %v3060_v4 = vadd.f32 1.0, %v6666_v36  ;;  %v2885_v15 = vsub.f32 1.0, %v2853_v58  ;;  %vm2664_vm4 = vcmp.eq.f32.partialorder %v9938_v30, inf  ;;  %vm2666_vm5 = vcmp.eq.f32.partialorder %v9938_v30, 0.0 }
 0x288   :  { %v6670_v10 = vpop.eup %6669  ;;  %6685 = vrcp.f32 %v3044_v52  ;;  %v2754_v7 = vmul.f32 %v6668_v43, %v9847_v60  ;;  %vm2776_vm6 = vcmp.eq.f32.partialorder %v9952_v34, inf  ;;  %vm2778_vm7 = vcmp.eq.f32.partialorder %v9952_v34, 0.0 }
 0x289   :  { %v6672_v14 = vpop.eup %6671  ;;  %v1733_v0 = vmul.f32 %v6670_v10, %v11742_v9  ;;  %v1764_v17 = vadd.f32 %v6670_v10, %v9824_v19  ;;  %6687 = vrcp.f32 %v3060_v4  ;;  %v2917_v45 = vsub.f32 0.7, %v2885_v15 }
 0x28a   :  { %v6674_v58 = vpop.eup %6673  ;;  %v1749_v36 = vmul.f32 %v6672_v14, %v11743_v51  ;;  %v1785_v52 = vadd.f32 %v6672_v14, %v9915_v56  ;;  %v2756_v43 = vsel %vm2755_vm2, %v9847_v60, %v2754_v7  ;;  %6689 = vrsqrt.f32 %v9971_v40 }
 0x28b   :  { %v6676_v21 = vpop.eup %6675  ;;  %v1765_v44 = vadd.f32 %v9899_v24, %v1764_v17  ;;  %v1806_v1 = vadd.f32 %v9837_v35, %v1733_v0  ;;  %v3043_v49 = vadd.f32 1.0, %v6674_v58  ;;  %v2949_v19 = vmul.f32 5.0, %v2917_v45 }
 0x28c   :  { %v6678_v4 = vpop.eup %6677  ;;  %v1786_v15 = vadd.f32 %v9903_v63, %v1785_v52  ;;  %v1827_v56 = vadd.f32 %v9920_v37, %v1749_v36  ;;  %v3059_v10 = vadd.f32 1.0, %v6676_v21  ;;  %v2759_v7 = vsel %vm2757_vm3, %v2758_v39, %v2756_v43 }
 0x28d   :  { %v6680_v14 = vpop.eup %6679  ;;  %v1766_v51 = vrot.slane %v1765_v44, 4  ;;  %v1807_v9 = vadd.f32 %v1806_v1, %v9907_v42  ;;  %6691 = vrcp.f32 %v3043_v49  ;;  %v3046_v24 = vadd.f32 1.0, %v6678_v4 }
 0x28e   :  { %v6682_v35 = vpop.eup %6681  ;;  %v1787_v0 = vrot.slane %v1786_v15, 4  ;;  %v1828_v17 = vadd.f32 %v1827_v56, %v9912_v61  ;;  %6693 = vrcp.f32 %v3059_v10  ;;  %v2983_v63 = vmul.f32 1.442695, %v2949_v19  ;;  %v11744_v56 = vld [vmem:[#allocation60_spill] sm:$0xff] }
 0x28f   :  { %v6684_v45 = vpop.eup %6683  ;;  %v1767_v37 = vadd.f32 %v1766_v51, %v1765_v44  ;;  %v1808_v21 = vrot.slane %v1807_v9, 4  ;;  %6695 = vrcp.f32 %v3046_v24  ;;  %v2869_v60 = vmul.f32 0.57735026, %v2759_v7 }
 0x290   :  { %v1788_v39 = vadd.f32 %v1787_v0, %v1786_v15  ;;  %v1829_v58 = vrot.slane %v1828_v17, 4  ;;  %v3062_v36 = vadd.f32 1.0, %v6684_v45  ;;  %6697 = vpow2.f32 %v2983_v63 }
 0x291   :  { %v1768_v42 = vrot.slane %v1767_v37, 2  ;;  %v1809_v49 = vadd.f32 %v1808_v21, %v1807_v9  ;;  %v2901_v1 = vsub.f32 1.0, %v2869_v60  ;;  %v2663_v52 = vmul.f32 %v6680_v14, %v9938_v30 }
 0x292   :  { %v6686_v43 = vpop.eup %6685  ;;  %v1789_v4 = vrot.slane %v1788_v39, 2  ;;  %v1830_v2 = vadd.f32 %v1829_v58, %v1828_v17  ;;  %6699 = vrcp.f32 %v3062_v36  ;;  %v2775_v61 = vmul.f32 %v6682_v35, %v9952_v34  ;;  %v10006_v17 = vpop.f32.mrb[43].mxu1 }
 0x293   :  { %v6688_v19 = vpop.eup %6687  ;;  %v1769_v44 = vadd.f32 %v1768_v42, %v1767_v37  ;;  %v1810_v51 = vrot.slane %v1809_v49, 2  ;;  %v3140_v10 = vmul.f32 %v6686_v43, %v11744_v56  ;;  %v2933_v15 = vsub.f32 0.7, %v2901_v1 }
 0x294   :  { %v6690_v7 = vpop.eup %6689  ;;  %v1790_v24 = vadd.f32 %v1789_v4, %v1788_v39  ;;  %v1831_v0 = vrot.slane %v1830_v2, 2  ;;  %v3156_v9 = vmul.f32 %v6688_v19, %v9319_v31  ;;  %v2665_v14 = vsel %vm2664_vm4, %v9938_v30, %v2663_v52  ;;  %v10017_v4 = vpop.f32.mrb[44].mxu1 }
 0x295   :  { %v1770_v35 = vrot.slane %v1769_v44, 1  ;;  %v1811_v63 = vadd.f32 %v1810_v51, %v1809_v49  ;;  %v3173_v45 = vmul.f32 1.442695, %v3140_v10  ;;  %v2965_v37 = vmul.f32 5.0, %v2933_v15  ;;  %v10015_v49 = vpop.f32.mrb[44].mxu0 }
 0x296   :  { %v1791_v21 = vrot.slane %v1790_v24, 1  ;;  %v1832_v60 = vadd.f32 %v1831_v0, %v1830_v2  ;;  %v3205_v39 = vmul.f32 1.442695, %v3156_v9  ;;  %v11745_v58 = vand.u32 2147483648, %v9938_v30  ;;  %v10020_v10 = vpop.f32.mrb[45].mxu0 }
 0x297   :  { %vm2657_vm8 = vcmp.eq.f32.partialorder %v9971_v40, inf  ;;  %v6692_v42 = vpop.eup %6691  ;;  %v1771_v1 = vadd.f32 %v1770_v35, %v1769_v44  ;;  %v1812_v52 = vrot.slane %v1811_v63, 1  ;;  %6701 = vpow2.f32 %v3173_v45 }
 0x298   :  { %v2668_v36 = vsel %vm2666_vm5, %v11745_v58, %v2665_v14  ;;  %v3015_v43 = vmul.f32 1.442695, %v2965_v37  ;;  %vm2659_vm9 = vcmp.eq.f32.partialorder %v9971_v40, 0.0  ;;  %v6694_v2 = vpop.eup %6693  ;;  %v1792_v19 = vadd.f32 %v1791_v21, %v1790_v24 }
 0x299   :  { %v1833_v51 = vrot.slane %v1832_v60, 1  ;;  %6703 = vpow2.f32 %v3205_v39  ;;  %v3139_v30 = vmul.f32 %v6692_v42, %v9323_v23  ;;  %v6696_v15 = vpop.eup %6695  ;;  %v1813_v0 = vadd.f32 %v1812_v52, %v1811_v63 }
 0x29a   :  { %v1835_v44 = vadd.f32 1.0, %v1771_v1  ;;  %v3155_v9 = vmul.f32 %v6694_v2, %v9327_v50  ;;  %6705 = vpow2.f32 %v3015_v43  ;;  %v6698_v14 = vpop.eup %6697  ;;  %v1836_v45 = vadd.f32 1.0, %v1792_v19 }
 0x29b   :  { %v1834_v35 = vadd.f32 %v1833_v51, %v1832_v60  ;;  %v3142_v37 = vmul.f32 %v6696_v15, %v9332_v62  ;;  %v2660_v58 = vand.u32 2147483648, %v9971_v40  ;;  %v1841_v24 = vadd.f32 1.0, %v1813_v0 }
 0x29c   :  { %6707 = vlog2.f32 %v1835_v44  ;;  %v3171_v21 = vmul.f32 1.442695, %v3139_v30  ;;  %v3203_v39 = vmul.f32 1.442695, %v3155_v9  ;;  %v6700_v42 = vpop.eup %6699  ;;  %v2856_v63 = vmul.f32 0.57735026, %v2668_v36 }
 0x29d   :  { %6709 = vlog2.f32 %v1836_v45  ;;  %v1842_v23 = vadd.f32 1.0, %v1834_v35  ;;  %v3177_v31 = vmul.f32 1.442695, %v3142_v37  ;;  %v3158_v1 = vmul.f32 %v6700_v42, %v9336_v41 }
 0x29e   :  { %6711 = vlog2.f32 %v1841_v24  ;;  %v2777_v60 = vsel %vm2776_vm6, %v9952_v34, %v2775_v61  ;;  %v2656_v52 = vmul.f32 %v6690_v7, %v9971_v40  ;;  %v3045_v43 = vadd.f32 1.0, %v6698_v14 }
 0x29f   :  { %6713 = vlog2.f32 %v1842_v23  ;;  %v2888_v2 = vsub.f32 1.0, %v2856_v63  ;;  %v11746_v19 = vand.u32 2147483648, %v9952_v34  ;;  %v3209_v30 = vmul.f32 1.442695, %v3158_v1 }
 0x2a0   :  { %6715 = vpow2.f32 %v3171_v21  ;;  %v2658_v15 = vsel %vm2657_vm8, %v9971_v40, %v2656_v52  ;;  %v11747_v23 = vsub.f32 %v9967_v16, %v9959_v27  ;;  %v2554_v14 = vmul.f32 2.0, %v9728_v5  ;;  %v11749_v5 = vld [vmem:[#allocation51_spill] sm:$0xff] }
 0x2a1   :  { %v2780_v51 = vsel %vm2778_vm7, %v11746_v19, %v2777_v60  ;;  %6717 = vpow2.f32 %v3203_v39  ;;  %v2920_v0 = vsub.f32 0.7, %v2888_v2  ;;  %v2661_v61 = vsel %vm2659_vm9, %v2660_v58, %v2658_v15  ;;  %v6702_v44 = vpop.eup %6701  ;;  %v11751_v2 = vld [vmem:[#allocation17_spill] sm:$0xff] }
 0x2a2   :  { %v2872_v36 = vmul.f32 0.57735026, %v2780_v51  ;;  %v10042_v7 = vmax.f32 %v11747_v23, 0.0  ;;  %6719 = vpow2.f32 %v3177_v31  ;;  %v2855_v9 = vmul.f32 0.57735026, %v2661_v61  ;;  %v11752_v51 = vld [vmem:[#allocation54_spill] sm:$0xff] }
 0x2a3   :  { %v6704_v35 = vpop.eup %6703  ;;  %v3236_v45 = vmul.f32 %v6702_v44, %v9438_v13  ;;  %6721 = vpow2.f32 %v3209_v30  ;;  %v2952_v37 = vmul.f32 5.0, %v2920_v0  ;;  %v11748_v40 = vsub.f32 %v9644_v32, %v9962_v55  ;;  %v11750_v32 = vld [vmem:[#allocation49_spill] sm:$0xff]  ;;  %v10068_v23 = vpop.f32.mrb[45].mxu1 }
 0x2a4   :  { %v2904_v34 = vsub.f32 1.0, %v2872_v36  ;;  %v6706_v24 = vpop.eup %6705  ;;  %v3252_v27 = vmul.f32 %v6704_v35, %v9441_v22  ;;  %6723 = vrcp.f32 %v3045_v43  ;;  %v2887_v31 = vsub.f32 1.0, %v2855_v9 }
 0x2a5   :  { %v10049_v58 = vmax.f32 %v11748_v40, 0.0  ;;  %v3061_v21 = vadd.f32 1.0, %v6706_v24  ;;  %v2989_v39 = vmul.f32 1.442695, %v2952_v37  ;;  %6725 = vrsqrt.f32 %v10042_v7 }
 0x2a6   :  { %v2936_v16 = vsub.f32 0.7, %v2904_v34  ;;  %v2136_v42 = vadd.f32 %v9653_v29, %v11749_v5  ;;  %v6708_v63 = vpop.eup %6707  ;;  %v2919_v60 = vsub.f32 0.7, %v2887_v31  ;;  %v10058_v55 = vadd.f32 %v9653_v29, %v11750_v32 }
 0x2a7   :  { %6727 = vrsqrt.f32 %v10049_v58  ;;  %v6710_v52 = vpop.eup %6709  ;;  %v10062_v19 = vadd.f32 %v9653_v29, %v11751_v2  ;;  %v10066_v30 = vadd.f32 %v9653_v29, %v11752_v51  ;;  %v1838_v15 = vmul.f32 0.6931472, %v6708_v63 }
 0x2a8   :  { %v2968_v1 = vmul.f32 5.0, %v2936_v16  ;;  %6729 = vrcp.f32 %v3061_v21  ;;  %v2586_v43 = vsub.f32 %v2136_v42, %v2554_v14  ;;  %v6712_v36 = vpop.eup %6711  ;;  %v2951_v61 = vmul.f32 5.0, %v2919_v60 }
 0x2a9   :  { %6731 = vpow2.f32 %v2989_v39  ;;  %v6714_v34 = vpop.eup %6713  ;;  %v1844_v9 = vmul.f32 0.6931472, %v6712_v36  ;;  %v1840_v37 = vmul.f32 0.6931472, %v6710_v52  ;;  %v2537_v14 = vmul.f32 2.0, %v9730_v59 }
 0x2aa   :  { %v3021_v0 = vmul.f32 1.442695, %v2968_v1  ;;  %v10070_v40 = vmax.f32 %v2586_v43, 0.0  ;;  %v6716_v24 = vpop.eup %6715  ;;  %v1846_v16 = vmul.f32 0.6931472, %v6714_v34  ;;  %v2553_v21 = vmul.f32 2.0, %v9736_v3 }
 0x2ab   :  { %v2987_v31 = vmul.f32 1.442695, %v2951_v61  ;;  %v6718_v5 = vpop.eup %6717  ;;  %v10074_v42 = vadd.f32 %v1844_v9, %v1838_v15  ;;  %v3235_v39 = vmul.f32 %v6716_v24, %v9444_v26  ;;  %v10077_v63 = vadd.f32 %v6716_v24, %v6702_v44  ;;  %v10080_v1 = vpop.f32.mrb[46].mxu0 }
 0x2ac   :  { %6733 = vpow2.f32 %v3021_v0  ;;  %v10082_v60 = vpop.eup %6719  ;;  %v10084_v59 = vadd.f32 %v1846_v16, %v1840_v37  ;;  %v3251_v32 = vmul.f32 %v6718_v5, %v9447_v46  ;;  %v10087_v52 = vadd.f32 %v6718_v5, %v6704_v35  ;;  %v11753_v0 = vld [vmem:[#allocation64_spill] sm:$0xff] }
 0x2ad   :  { %6735 = vrsqrt.f32 %v10070_v40  ;;  %v10089_v3 = vpop.eup %6721  ;;  %v10091_v43 = vadd.f32 %v3236_v45, %v3235_v39  ;;  %v10095_v44 = vmul.f32 %v10082_v60, %v9450_v28  ;;  %vm2769_vm10 = vcmp.eq.f32.partialorder %v10042_v7, inf  ;;  %v11754_v39 = vld [vmem:[#allocation65_spill] sm:$0xff] }
 0x2ae   :  { %6737 = vpow2.f32 %v2987_v31  ;;  %vm2771_vm11 = vcmp.eq.f32.partialorder %v10042_v7, 0.0  ;;  %v6724_v2 = vpop.eup %6723  ;;  %v10099_v51 = vadd.f32 %v3252_v27, %v3251_v32  ;;  %v10103_v35 = vmul.f32 %v10089_v3, %v9453_v12 }
 0x2af   :  { %v2569_v36 = vsub.f32 %v9663_v53, %v2537_v14  ;;  %v2540_v45 = vmul.f32 2.0, %v9743_v6  ;;  %v6726_v15 = vpop.eup %6725  ;;  %v3141_v61 = vmul.f32 %v6724_v2, %v11753_v0  ;;  %v2772_v34 = vand.u32 2147483648, %v10042_v7 }
 0x2b0   :  { %vm2678_vm12 = vcmp.eq.f32.partialorder %v10049_v58, inf  ;;  %vm2680_vm13 = vcmp.eq.f32.partialorder %v10049_v58, 0.0  ;;  %v2768_v27 = vmul.f32 %v6726_v15, %v10042_v7  ;;  %v2681_v37 = vand.u32 2147483648, %v10049_v58 }
 0x2b1   :  { %v6728_v9 = vpop.eup %6727  ;;  %v10113_v24 = vmax.f32 %v2569_v36, 0.0  ;;  %v2585_v53 = vsub.f32 %v10058_v55, %v2553_v21  ;;  %v3175_v6 = vmul.f32 1.442695, %v3141_v61  ;;  %vm2790_vm14 = vcmp.eq.f32.partialorder %v10070_v40, inf  ;;  %v11755_v36 = vld [vmem:[#allocation23_spill] sm:$0xff]  ;;  %v10125_v55 = vpop.f32.mrb[46].mxu1 }
 0x2b2   :  { %v6730_v14 = vpop.eup %6729  ;;  %v2677_v16 = vmul.f32 %v6728_v9, %v10049_v58  ;;  %v2793_v31 = vand.u32 2147483648, %v10070_v40  ;;  %v2770_v2 = vsel %vm2769_vm10, %v10042_v7, %v2768_v27  ;;  %v2572_v15 = vsub.f32 %v11755_v36, %v2540_v45  ;;  %v11756_v7 = vld [vmem:[#allocation26_spill] sm:$0xff] }
 0x2b3   :  { %v6732_v5 = vpop.eup %6731  ;;  %v3157_v32 = vmul.f32 %v6730_v14, %v11754_v39  ;;  %6739 = vrsqrt.f32 %v10113_v24  ;;  %v2773_v61 = vsel %vm2771_vm11, %v2772_v34, %v2770_v2  ;;  %v10132_v14 = vpop.f32.mrb[47].mxu0  ;;  %v10136_v45 = vmax.f32 %v2585_v53, 0.0 }
 0x2b4   :  { %6741 = vpow2.f32 %v3175_v6  ;;  %v3048_v21 = vadd.f32 1.0, %v6732_v5  ;;  %v2679_v9 = vsel %vm2678_vm12, %v10049_v58, %v2677_v16  ;;  %v2871_v27 = vmul.f32 0.57735026, %v2773_v61  ;;  %v11757_v58 = vld [vmem:[#allocation25_spill] sm:$0xff] }
 0x2b5   :  { %v3207_v28 = vmul.f32 1.442695, %v3157_v32  ;;  %v2682_v39 = vsel %vm2680_vm13, %v2681_v37, %v2679_v9  ;;  %v2556_v34 = vmul.f32 2.0, %v11756_v7  ;;  %v10140_v41 = vmax.f32 %v2572_v15, 0.0 }
 0x2b6   :  { %v6734_v12 = vpop.eup %6733  ;;  %6743 = vrcp.f32 %v3048_v21  ;;  %v2858_v5 = vmul.f32 0.57735026, %v2682_v39  ;;  %v2903_v0 = vsub.f32 1.0, %v2871_v27  ;;  %v2539_v37 = vmul.f32 2.0, %v11757_v58  ;;  %v11758_v21 = vld [vmem:[#allocation28_spill] sm:$0xff] }
 0x2b7   :  { %v6736_v36 = vpop.eup %6735  ;;  %v3064_v6 = vadd.f32 1.0, %v6734_v12  ;;  %6745 = vpow2.f32 %v3207_v28  ;;  %vm2792_vm15 = vcmp.eq.f32.partialorder %v10070_v40, 0.0  ;;  %v10149_v15 = vmul.f32 2.0, %v11758_v21 }
 0x2b8   :  { %v6738_v2 = vpop.eup %6737  ;;  %v2789_v16 = vmul.f32 %v6736_v36, %v10070_v40  ;;  %v2890_v61 = vsub.f32 1.0, %v2858_v5  ;;  %v2935_v53 = vsub.f32 0.7, %v2903_v0  ;;  %vm2671_vm0 = vcmp.eq.f32.partialorder %v10113_v24, inf }
 0x2b9   :  { %6747 = vrcp.f32 %v3064_v6  ;;  %v3047_v32 = vadd.f32 1.0, %v6738_v2  ;;  %vm2673_vm1 = vcmp.eq.f32.partialorder %v10113_v24, 0.0  ;;  %v2588_v36 = vsub.f32 %v10062_v19, %v2556_v34  ;;  %v11759_v19 = vld [vmem:[#allocation94_spill] sm:$0xff] }
 0x2ba   :  { %v2791_v12 = vsel %vm2790_vm14, %v10070_v40, %v2789_v16  ;;  %6749 = vrsqrt.f32 %v10136_v45  ;;  %v2922_v28 = vsub.f32 0.7, %v2890_v61  ;;  %v2967_v9 = vmul.f32 5.0, %v2935_v53 }
 0x2bb   :  { %6751 = vrcp.f32 %v3047_v32  ;;  %v2794_v39 = vsel %vm2792_vm15, %v2793_v31, %v2791_v12  ;;  %v2571_v40 = vsub.f32 %v9927_v48, %v2539_v37  ;;  %v2674_v31 = vand.u32 2147483648, %v10113_v24 }
 0x2bc   :  { %v2874_v27 = vmul.f32 0.57735026, %v2794_v39  ;;  %6753 = vrsqrt.f32 %v10140_v41  ;;  %v2954_v0 = vmul.f32 5.0, %v2922_v28  ;;  %v3019_v5 = vmul.f32 1.442695, %v2967_v9 }
 0x2bd   :  { %v6740_v6 = vpop.eup %6739  ;;  %vm2783_vm2 = vcmp.eq.f32.partialorder %v10136_v45, inf  ;;  %vm2785_vm3 = vcmp.eq.f32.partialorder %v10136_v45, 0.0  ;;  %v2786_v61 = vand.u32 2147483648, %v10136_v45  ;;  %v10161_v58 = vmax.f32 %v2588_v36, 0.0 }
 0x2be   :  { %v2906_v7 = vsub.f32 1.0, %v2874_v27  ;;  %v6742_v2 = vpop.eup %6741  ;;  %v2993_v16 = vmul.f32 1.442695, %v2954_v0  ;;  %v2670_v32 = vmul.f32 %v6740_v6, %v10113_v24  ;;  %6755 = vpow2.f32 %v3019_v5  ;;  %v11760_v27 = vld [vmem:[#allocation68_spill] sm:$0xff]  ;;  %v11761_v5 = vld [vmem:[#allocation95_spill] sm:$0xff] }
 0x2bf   :  { %v3237_v34 = vmul.f32 %v6742_v2, %v11759_v19  ;;  %v3268_v48 = vadd.f32 %v6742_v2, %v10077_v63  ;;  %vm2692_vm4 = vcmp.eq.f32.partialorder %v10140_v41, inf  ;;  %v10169_v28 = vmax.f32 %v2571_v40, 0.0 }
 0x2c0   :  { %v2938_v37 = vsub.f32 0.7, %v2906_v7  ;;  %v6744_v53 = vpop.eup %6743  ;;  %6757 = vpow2.f32 %v2993_v16  ;;  %v2672_v12 = vsel %vm2671_vm0, %v10113_v24, %v2670_v32  ;;  %v2587_v39 = vsub.f32 %v10066_v30, %v10149_v15  ;;  %v11762_v16 = vld [vmem:[#allocation69_spill] sm:$0xff] }
 0x2c1   :  { %v6746_v21 = vpop.eup %6745  ;;  %v3310_v9 = vadd.f32 %v10091_v43, %v3237_v34  ;;  %v3144_v63 = vmul.f32 %v6744_v53, %v11760_v27  ;;  %v10176_v0 = vadd.f32 %v10082_v60, %v3268_v48  ;;  %v2675_v40 = vsel %vm2673_vm1, %v2674_v31, %v2672_v12  ;;  %v11763_v12 = vld [vmem:[#allocation70_spill] sm:$0xff] }
 0x2c2   :  { %v2970_v36 = vmul.f32 5.0, %v2938_v37  ;;  %v3253_v7 = vmul.f32 %v6746_v21, %v11761_v5  ;;  %v3289_v2 = vadd.f32 %v6746_v21, %v10087_v52  ;;  %6759 = vrsqrt.f32 %v10161_v58 }
 0x2c3   :  { %v6748_v6 = vpop.eup %6747  ;;  %v3181_v15 = vmul.f32 1.442695, %v3144_v63  ;;  %v10185_v32 = vadd.f32 %v3310_v9, %v10095_v44  ;;  %v2857_v52 = vmul.f32 0.57735026, %v2675_v40  ;;  %v11764_v63 = vld [vmem:[#allocation36_spill] sm:$0xff]  ;;  %vm2694_vm5 = vcmp.eq.f32.partialorder %v10140_v41, 0.0 }
 0x2c4   :  { %v6750_v30 = vpop.eup %6749  ;;  %v3160_v43 = vmul.f32 %v6748_v6, %v11762_v16  ;;  %v3025_v60 = vmul.f32 1.442695, %v2970_v36  ;;  %v3331_v48 = vadd.f32 %v10099_v51, %v3253_v7  ;;  %v10189_v37 = vadd.f32 %v10089_v3, %v3289_v2 }
 0x2c5   :  { %v6752_v34 = vpop.eup %6751  ;;  %v2782_v24 = vmul.f32 %v6750_v30, %v10136_v45  ;;  %6761 = vpow2.f32 %v3181_v15  ;;  %v2542_v6 = vmul.f32 2.0, %v11764_v63  ;;  %v2889_v9 = vsub.f32 1.0, %v2857_v52 }
 0x2c6   :  { %v6754_v31 = vpop.eup %6753  ;;  %v3213_v53 = vmul.f32 1.442695, %v3160_v43  ;;  %v3143_v21 = vmul.f32 %v6752_v34, %v11763_v12  ;;  %v10195_v44 = vadd.f32 %v3331_v48, %v10103_v35  ;;  %6763 = vpow2.f32 %v3025_v60 }
 0x2c7   :  { %v2784_v3 = vsel %vm2783_vm2, %v10136_v45, %v2782_v24  ;;  %v2691_v7 = vmul.f32 %v6754_v31, %v10140_v41  ;;  %v2921_v2 = vsub.f32 0.7, %v2889_v9  ;;  %v2695_v30 = vand.u32 2147483648, %v10140_v41 }
 0x2c8   :  { %6765 = vpow2.f32 %v3213_v53  ;;  %v3179_v51 = vmul.f32 1.442695, %v3143_v21  ;;  %v2787_v36 = vsel %vm2785_vm3, %v2786_v61, %v2784_v3  ;;  %v6756_v35 = vpop.eup %6755  ;;  %vm2804_vm6 = vcmp.eq.f32.partialorder %v10161_v58, inf }
 0x2c9   :  { %v2873_v40 = vmul.f32 0.57735026, %v2787_v36  ;;  %6767 = vrsqrt.f32 %v10169_v28  ;;  %v2693_v15 = vsel %vm2692_vm4, %v10140_v41, %v2691_v7  ;;  %v3063_v61 = vadd.f32 1.0, %v6756_v35 }
 0x2ca   :  { %6769 = vpow2.f32 %v3179_v51  ;;  %v6758_v45 = vpop.eup %6757  ;;  %v2953_v43 = vmul.f32 5.0, %v2921_v2  ;;  %v2696_v34 = vsel %vm2694_vm5, %v2695_v30, %v2693_v15  ;;  %v10210_v24 = vmax.f32 %v2587_v39, 0.0  ;;  %v10216_v51 = vpop.f32.mrb[47].mxu1 }
 0x2cb   :  { %v2905_v60 = vsub.f32 1.0, %v2873_v40  ;;  %v3050_v48 = vadd.f32 1.0, %v6758_v45  ;;  %v2860_v52 = vmul.f32 0.57735026, %v2696_v34  ;;  %v2574_v31 = vsub.f32 %v9931_v57, %v2542_v6  ;;  %v11765_v40 = vld [vmem:[#allocation96_spill] sm:$0xff] }
 0x2cc   :  { %v6760_v53 = vpop.eup %6759  ;;  %6771 = vrcp.f32 %v3063_v61  ;;  %v2991_v21 = vmul.f32 1.442695, %v2953_v43  ;;  %vm2806_vm7 = vcmp.eq.f32.partialorder %v10161_v58, 0.0  ;;  %v2807_v3 = vand.u32 2147483648, %v10161_v58 }
 0x2cd   :  { %v2937_v63 = vsub.f32 0.7, %v2905_v60  ;;  %6773 = vrcp.f32 %v3050_v48  ;;  %v2892_v41 = vsub.f32 1.0, %v2860_v52  ;;  %v2803_v9 = vmul.f32 %v6760_v53, %v10161_v58  ;;  %v11766_v52 = vld [vmem:[#allocation97_spill] sm:$0xff] }
 0x2ce   :  { %6775 = vpow2.f32 %v2991_v21  ;;  %vm2685_vm8 = vcmp.eq.f32.partialorder %v10169_v28, inf  ;;  %vm2687_vm9 = vcmp.eq.f32.partialorder %v10169_v28, 0.0  ;;  %v10224_v7 = vmax.f32 %v2574_v31, 0.0  ;;  %v11767_v21 = vld [vmem:[#allocation20_spill] sm:$0xff] }
 0x2cf   :  { %v2969_v36 = vmul.f32 5.0, %v2937_v63  ;;  %v6762_v57 = vpop.eup %6761  ;;  %v2924_v39 = vsub.f32 0.7, %v2892_v41  ;;  %v2805_v6 = vsel %vm2804_vm6, %v10161_v58, %v2803_v9  ;;  %6777 = vrsqrt.f32 %v10210_v24 }
 0x2d0   :  { %v6764_v2 = vpop.eup %6763  ;;  %v3240_v30 = vmul.f32 %v6762_v57, %v11765_v40  ;;  %v2808_v15 = vsel %vm2806_vm7, %v2807_v3, %v2805_v6  ;;  %v2558_v45 = vmul.f32 2.0, %v9933_v33  ;;  %6779 = vrsqrt.f32 %v10224_v7  ;;  %v11768_v3 = vld [vmem:[#allocation98_spill] sm:$0xff] }
 0x2d1   :  { %v3023_v35 = vmul.f32 1.442695, %v2969_v36  ;;  %v3066_v43 = vadd.f32 1.0, %v6764_v2  ;;  %v2956_v60 = vmul.f32 5.0, %v2924_v39  ;;  %v2876_v34 = vmul.f32 0.57735026, %v2808_v15 }
 0x2d2   :  { %v10230_v61 = vpop.eup %6765  ;;  %v2688_v53 = vand.u32 2147483648, %v10169_v28  ;;  %v2140_v58 = vadd.f32 %v9653_v29, %v11767_v21  ;;  %vm2797_vm10 = vcmp.eq.f32.partialorder %v10210_v24, inf  ;;  %vm2799_vm11 = vcmp.eq.f32.partialorder %v10210_v24, 0.0 }
 0x2d3   :  { %v6768_v48 = vpop.eup %6767  ;;  %v10235_v31 = vmul.f32 %v10230_v61, %v11766_v52  ;;  %6781 = vpow2.f32 %v3023_v35  ;;  %v2997_v33 = vmul.f32 1.442695, %v2956_v60  ;;  %v2908_v41 = vsub.f32 1.0, %v2876_v34 }
 0x2d4   :  { %v6770_v63 = vpop.eup %6769  ;;  %6783 = vrcp.f32 %v3066_v43  ;;  %v2684_v9 = vmul.f32 %v6768_v48, %v10169_v28  ;;  %v2590_v6 = vsub.f32 %v2140_v58, %v2558_v45  ;;  %v2541_v15 = vmul.f32 2.0, %v9940_v25  ;;  %v11769_v45 = vld [vmem:[#allocation71_spill] sm:$0xff] }
 0x2d5   :  { %v3239_v36 = vmul.f32 %v6770_v63, %v11768_v3  ;;  %v3270_v39 = vadd.f32 %v6770_v63, %v10176_v0  ;;  %6785 = vpow2.f32 %v2997_v33  ;;  %v2940_v2 = vsub.f32 0.7, %v2908_v41  ;;  %v11770_v3 = vld [vmem:[#allocation72_spill] sm:$0xff] }
 0x2d6   :  { %v2686_v35 = vsel %vm2685_vm8, %v10169_v28, %v2684_v9  ;;  %v6772_v43 = vpop.eup %6771  ;;  %v10254_v0 = vmax.f32 %v2590_v6, 0.0  ;;  %v2573_v41 = vsub.f32 %v9946_v38, %v2541_v15  ;;  %vm2706_vm12 = vcmp.eq.f32.partialorder %v10224_v7, inf }
 0x2d7   :  { %v3312_v60 = vadd.f32 %v10185_v32, %v3239_v36  ;;  %v10250_v34 = vadd.f32 %v6762_v57, %v3270_v39  ;;  %v2689_v48 = vsel %vm2687_vm9, %v2688_v53, %v2686_v35  ;;  %v6774_v21 = vpop.eup %6773  ;;  %v3159_v58 = vmul.f32 %v6772_v43, %v11769_v45 }
 0x2d8   :  { %v2972_v63 = vmul.f32 5.0, %v2940_v2  ;;  %v2859_v33 = vmul.f32 0.57735026, %v2689_v48  ;;  %v6776_v9 = vpop.eup %6775  ;;  %v3146_v25 = vmul.f32 %v6774_v21, %v11770_v3  ;;  %v2800_v32 = vand.u32 2147483648, %v10210_v24 }
 0x2d9   :  { %v10259_v52 = vadd.f32 %v3312_v60, %v3240_v30  ;;  %6787 = vrsqrt.f32 %v10254_v0  ;;  %v6778_v28 = vpop.eup %6777  ;;  %v3211_v57 = vmul.f32 1.442695, %v3159_v58  ;;  %v3049_v53 = vadd.f32 1.0, %v6776_v9 }
 0x2da   :  { %v2891_v36 = vsub.f32 1.0, %v2859_v33  ;;  %v3185_v39 = vmul.f32 1.442695, %v3146_v25  ;;  %v3029_v6 = vmul.f32 1.442695, %v2972_v63  ;;  %v2796_v2 = vmul.f32 %v6778_v28, %v10210_v24  ;;  %v6780_v38 = vpop.eup %6779  ;;  %v11771_v25 = vld [vmem:[#allocation73_spill] sm:$0xff] }
 0x2db   :  { %vm2708_vm13 = vcmp.eq.f32.partialorder %v10224_v7, 0.0  ;;  %6789 = vpow2.f32 %v3211_v57  ;;  %v2709_v35 = vand.u32 2147483648, %v10224_v7  ;;  %v10267_v15 = vmax.f32 %v2573_v41, 0.0 }
 0x2dc   :  { %v2923_v30 = vsub.f32 0.7, %v2891_v36  ;;  %6791 = vpow2.f32 %v3185_v39  ;;  %v2798_v60 = vsel %vm2797_vm10, %v10210_v24, %v2796_v2  ;;  %v2705_v48 = vmul.f32 %v6780_v38, %v10224_v7 }
 0x2dd   :  { %v6782_v43 = vpop.eup %6781  ;;  %v2557_v21 = vmul.f32 2.0, %v10006_v17  ;;  %6793 = vrcp.f32 %v3049_v53  ;;  %v2801_v9 = vsel %vm2799_vm11, %v2800_v32, %v2798_v60  ;;  %v11772_v53 = vld [vmem:[#allocation18_spill] sm:$0xff]  ;;  %vm2818_vm14 = vcmp.eq.f32.partialorder %v10254_v0, inf }
 0x2de   :  { %v6784_v58 = vpop.eup %6783  ;;  %v3065_v63 = vadd.f32 1.0, %v6782_v43  ;;  %v2955_v33 = vmul.f32 5.0, %v2923_v30  ;;  %6795 = vpow2.f32 %v3029_v6  ;;  %v2875_v28 = vmul.f32 0.57735026, %v2801_v9  ;;  %v11773_v43 = vld [vmem:[#allocation32_spill] sm:$0xff] }
 0x2df   :  { %v3162_v41 = vmul.f32 %v6784_v58, %v11771_v25  ;;  %v2707_v57 = vsel %vm2706_vm12, %v10224_v7, %v2705_v48  ;;  %v6786_v36 = vpop.eup %6785  ;;  %v2139_v2 = vadd.f32 %v9653_v29, %v11772_v53  ;;  %v2126_v60 = vadd.f32 %v9517_v18, %v11773_v43  ;;  %v11774_v58 = vld [vmem:[#allocation31_spill] sm:$0xff] }
 0x2e0   :  { %6797 = vrcp.f32 %v3065_v63  ;;  %v2995_v39 = vmul.f32 1.442695, %v2955_v33  ;;  %v2710_v17 = vsel %vm2708_vm13, %v2709_v35, %v2707_v57  ;;  %v3052_v24 = vadd.f32 1.0, %v6786_v36  ;;  %v11775_v53 = vld [vmem:[#allocation99_spill] sm:$0xff] }
 0x2e1   :  { %v3217_v38 = vmul.f32 1.442695, %v3162_v41  ;;  %v2907_v32 = vsub.f32 1.0, %v2875_v28  ;;  %v2862_v30 = vmul.f32 0.57735026, %v2710_v17  ;;  %v2589_v6 = vsub.f32 %v2139_v2, %v2557_v21 }
 0x2e2   :  { %6799 = vpow2.f32 %v2995_v39  ;;  %v10288_v48 = vadd.f32 %v9517_v18, %v11774_v58  ;;  %v2544_v33 = vmul.f32 2.0, %v10015_v49  ;;  %vm2820_vm15 = vcmp.eq.f32.partialorder %v10254_v0, 0.0 }
 0x2e3   :  { %v6788_v63 = vpop.eup %6787  ;;  %6801 = vpow2.f32 %v3217_v38  ;;  %v2939_v7 = vsub.f32 0.7, %v2907_v32  ;;  %v2894_v35 = vsub.f32 1.0, %v2862_v30  ;;  %v10293_v41 = vmax.f32 %v2589_v6, 0.0  ;;  %v11776_v6 = vld [vmem:[#allocation100_spill] sm:$0xff] }
 0x2e4   :  { %6803 = vrcp.f32 %v3052_v24  ;;  %v2817_v9 = vmul.f32 %v6788_v63, %v10254_v0  ;;  %v2576_v57 = vsub.f32 %v2126_v60, %v2544_v33  ;;  %v2821_v17 = vand.u32 2147483648, %v10254_v0  ;;  %v11777_v63 = vld [vmem:[#allocation34_spill] sm:$0xff] }
 0x2e5   :  { %v2971_v21 = vmul.f32 5.0, %v2939_v7  ;;  %v2926_v28 = vsub.f32 0.7, %v2894_v35  ;;  %6805 = vrsqrt.f32 %v10267_v15  ;;  %v6790_v36 = vpop.eup %6789  ;;  %v11778_v33 = vld [vmem:[#allocation74_spill] sm:$0xff]  ;;  %vm2699_vm0 = vcmp.eq.f32.partialorder %v10267_v15, inf }
 0x2e6   :  { %v2819_v39 = vsel %vm2818_vm14, %v10254_v0, %v2817_v9  ;;  %6807 = vrsqrt.f32 %v10293_v41  ;;  %v10300_v49 = vpop.eup %6791  ;;  %v3255_v2 = vmul.f32 %v6790_v36, %v11775_v53  ;;  %v3291_v38 = vadd.f32 %v6790_v36, %v10189_v37 }
 0x2e7   :  { %v3027_v24 = vmul.f32 1.442695, %v2971_v21  ;;  %v2958_v32 = vmul.f32 5.0, %v2926_v28  ;;  %v6794_v30 = vpop.eup %6793  ;;  %v10306_v43 = vmul.f32 %v10300_v49, %v11776_v6  ;;  %v2822_v60 = vsel %vm2820_vm15, %v2821_v17, %v2819_v39  ;;  %v11779_v17 = vld [vmem:[#allocation75_spill] sm:$0xff]  ;;  %v11782_v6 = vld [vmem:[#allocation76_spill] sm:$0xff] }
 0x2e8   :  { %v10308_v58 = vmax.f32 %v2576_v57, 0.0  ;;  %v10312_v0 = vadd.f32 %v9517_v18, %v11777_v63  ;;  %v6796_v7 = vpop.eup %6795  ;;  %v3333_v35 = vadd.f32 %v10195_v44, %v3255_v2  ;;  %v3145_v9 = vmul.f32 %v6794_v30, %v11778_v33 }
 0x2e9   :  { %v10317_v37 = vadd.f32 %v10230_v61, %v3291_v38  ;;  %6809 = vpow2.f32 %v3027_v24  ;;  %v3068_v28 = vadd.f32 1.0, %v6796_v7  ;;  %v3001_v36 = vmul.f32 1.442695, %v2958_v32  ;;  %v11780_v24 = vld [vmem:[#allocation59_spill] sm:$0xff] }
 0x2ea   :  { %v6798_v21 = vpop.eup %6797  ;;  %v2878_v57 = vmul.f32 0.57735026, %v2822_v60  ;;  %vm2701_vm1 = vcmp.eq.f32.partialorder %v10267_v15, 0.0  ;;  %6811 = vrsqrt.f32 %v10308_v58  ;;  %v3183_v39 = vmul.f32 1.442695, %v3145_v9 }
 0x2eb   :  { %v3161_v63 = vmul.f32 %v6798_v21, %v11779_v17  ;;  %v10324_v44 = vadd.f32 %v3333_v35, %v10235_v31  ;;  %v2702_v61 = vand.u32 2147483648, %v10267_v15  ;;  %6813 = vrcp.f32 %v3068_v28  ;;  %v11781_v31 = vld [vmem:[#allocation101_spill] sm:$0xff] }
 0x2ec   :  { %v6800_v2 = vpop.eup %6799  ;;  %v2910_v38 = vsub.f32 1.0, %v2878_v57  ;;  %vm2811_vm2 = vcmp.eq.f32.partialorder %v10293_v41, inf  ;;  %v2142_v32 = vadd.f32 %v9653_v29, %v11780_v24  ;;  %6815 = vpow2.f32 %v3183_v39 }
 0x2ed   :  { %v10330_v30 = vpop.eup %6801  ;;  %v3215_v60 = vmul.f32 1.442695, %v3161_v63  ;;  %v3051_v7 = vadd.f32 1.0, %v6800_v2  ;;  %v2560_v9 = vmul.f32 2.0, %v10017_v4  ;;  %6817 = vpow2.f32 %v3001_v36 }
 0x2ee   :  { %v6804_v21 = vpop.eup %6803  ;;  %v10335_v35 = vmul.f32 %v10330_v30, %v11781_v31  ;;  %v2942_v28 = vsub.f32 0.7, %v2910_v38  ;;  %v2543_v57 = vmul.f32 2.0, %v10020_v10  ;;  %vm2813_vm3 = vcmp.eq.f32.partialorder %v10293_v41, 0.0 }
 0x2ef   :  { %v6806_v17 = vpop.eup %6805  ;;  %6819 = vpow2.f32 %v3215_v60  ;;  %v3148_v24 = vmul.f32 %v6804_v21, %v11782_v6  ;;  %v2592_v39 = vsub.f32 %v2142_v32, %v2560_v9  ;;  %v2814_v38 = vand.u32 2147483648, %v10293_v41 }
 0x2f0   :  { %v6808_v63 = vpop.eup %6807  ;;  %6821 = vrcp.f32 %v3051_v7  ;;  %v2974_v2 = vmul.f32 5.0, %v2942_v28  ;;  %v2698_v4 = vmul.f32 %v6806_v17, %v10267_v15  ;;  %v2575_v33 = vsub.f32 %v10288_v48, %v2543_v57 }
 0x2f1   :  { %v3189_v31 = vmul.f32 1.442695, %v3148_v24  ;;  %v2810_v36 = vmul.f32 %v6808_v63, %v10293_v41  ;;  %v10344_v10 = vmax.f32 %v2592_v39, 0.0  ;;  %vm2720_vm4 = vcmp.eq.f32.partialorder %v10308_v58, inf }
 0x2f2   :  { %v3033_v60 = vmul.f32 1.442695, %v2974_v2  ;;  %v2700_v21 = vsel %vm2699_vm0, %v10267_v15, %v2698_v4  ;;  %vm2722_vm5 = vcmp.eq.f32.partialorder %v10308_v58, 0.0  ;;  %v10356_v7 = vmax.f32 %v2575_v33, 0.0  ;;  %v11783_v2 = vld [vmem:[#allocation58_spill] sm:$0xff] }
 0x2f3   :  { %v6810_v32 = vpop.eup %6809  ;;  %6823 = vpow2.f32 %v3189_v31  ;;  %v2703_v48 = vsel %vm2701_vm1, %v2702_v61, %v2700_v21  ;;  %v2812_v17 = vsel %vm2811_vm2, %v10293_v41, %v2810_v36  ;;  %v2723_v31 = vand.u32 2147483648, %v10308_v58 }
 0x2f4   :  { %v6812_v9 = vpop.eup %6811  ;;  %v3067_v28 = vadd.f32 1.0, %v6810_v32  ;;  %6825 = vpow2.f32 %v3033_v60  ;;  %v2861_v57 = vmul.f32 0.57735026, %v2703_v48  ;;  %v2815_v24 = vsel %vm2813_vm3, %v2814_v38, %v2812_v17  ;;  %v11784_v60 = vld [vmem:[#allocation77_spill] sm:$0xff]  ;;  %v11785_v48 = vld [vmem:[#allocation102_spill] sm:$0xff] }
 0x2f5   :  { %v2877_v39 = vmul.f32 0.57735026, %v2815_v24  ;;  %v2719_v63 = vmul.f32 %v6812_v9, %v10308_v58  ;;  %6827 = vrsqrt.f32 %v10344_v10  ;;  %v6814_v15 = vpop.eup %6813  ;;  %v2141_v33 = vadd.f32 %v9653_v29, %v11783_v2 }
 0x2f6   :  { %6829 = vrcp.f32 %v3067_v28  ;;  %v2893_v61 = vsub.f32 1.0, %v2861_v57  ;;  %v2559_v4 = vmul.f32 2.0, %v10068_v23  ;;  %v6816_v36 = vpop.eup %6815  ;;  %v3164_v21 = vmul.f32 %v6814_v15, %v11784_v60 }
 0x2f7   :  { %v2909_v41 = vsub.f32 1.0, %v2877_v39  ;;  %v2721_v38 = vsel %vm2720_vm4, %v10308_v58, %v2719_v63  ;;  %6831 = vrsqrt.f32 %v10356_v7  ;;  %v6818_v32 = vpop.eup %6817  ;;  %v3241_v17 = vmul.f32 %v6816_v36, %v11785_v48 }
 0x2f8   :  { %v3272_v9 = vadd.f32 %v6816_v36, %v10250_v34  ;;  %v2925_v28 = vsub.f32 0.7, %v2893_v61  ;;  %v2546_v57 = vmul.f32 2.0, %v10080_v1  ;;  %v3221_v23 = vmul.f32 1.442695, %v3164_v21  ;;  %v11786_v1 = vld [vmem:[#allocation78_spill] sm:$0xff] }
 0x2f9   :  { %v6820_v24 = vpop.eup %6819  ;;  %v3054_v2 = vadd.f32 1.0, %v6818_v32  ;;  %v2941_v6 = vsub.f32 0.7, %v2909_v41  ;;  %v2724_v39 = vsel %vm2722_vm5, %v2723_v31, %v2721_v38  ;;  %vm2832_vm6 = vcmp.eq.f32.partialorder %v10344_v10, inf }
 0x2fa   :  { %v6822_v63 = vpop.eup %6821  ;;  %v3314_v15 = vadd.f32 %v10259_v52, %v3241_v17  ;;  %v3257_v60 = vmul.f32 %v6820_v24, %v11710_v54  ;;  %v3293_v48 = vadd.f32 %v6820_v24, %v10317_v37  ;;  %v10381_v34 = vadd.f32 %v10300_v49, %v3272_v9 }
 0x2fb   :  { %6833 = vpow2.f32 %v3221_v23  ;;  %v3147_v61 = vmul.f32 %v6822_v63, %v11786_v1  ;;  %v2957_v36 = vmul.f32 5.0, %v2925_v28  ;;  %v2973_v21 = vmul.f32 5.0, %v2941_v6 }
 0x2fc   :  { %v3335_v58 = vadd.f32 %v10324_v44, %v3257_v60  ;;  %v10386_v31 = vadd.f32 %v3314_v15, %v10306_v43  ;;  %v10389_v41 = vadd.f32 %v10330_v30, %v3293_v48  ;;  %6835 = vrcp.f32 %v3054_v2  ;;  %v11787_v2 = vld [vmem:[#allocation79_spill] sm:$0xff] }
 0x2fd   :  { %v10391_v52 = vpop.eup %6823  ;;  %v3187_v37 = vmul.f32 1.442695, %v3147_v61  ;;  %v2999_v38 = vmul.f32 1.442695, %v2957_v36  ;;  %vm2834_vm7 = vcmp.eq.f32.partialorder %v10344_v10, 0.0  ;;  %v2591_v49 = vsub.f32 %v2141_v33, %v2559_v4 }
 0x2fe   :  { %v6826_v32 = vpop.eup %6825  ;;  %v10396_v6 = vmul.f32 %v10391_v52, %v11711_v47  ;;  %v10399_v44 = vadd.f32 %v3335_v58, %v10335_v35  ;;  %v3031_v43 = vmul.f32 1.442695, %v2973_v21  ;;  %v2864_v60 = vmul.f32 0.57735026, %v2724_v39 }
 0x2ff   :  { %v6828_v30 = vpop.eup %6827  ;;  %6837 = vpow2.f32 %v3187_v37  ;;  %v3070_v48 = vadd.f32 1.0, %v6826_v32  ;;  %v2835_v17 = vand.u32 2147483648, %v10344_v10  ;;  %v10402_v9 = vmax.f32 %v2591_v49, 0.0 }
 0x300   :  { %v6830_v28 = vpop.eup %6829  ;;  %6839 = vpow2.f32 %v2999_v38  ;;  %v2896_v33 = vsub.f32 1.0, %v2864_v60  ;;  %v2831_v4 = vmul.f32 %v6828_v30, %v10344_v10  ;;  %v2578_v24 = vsub.f32 %v10312_v0, %v2546_v57 }
 0x301   :  { %v6832_v23 = vpop.eup %6831  ;;  %v3163_v35 = vmul.f32 %v6830_v28, %v11787_v2  ;;  %6841 = vrcp.f32 %v3070_v48  ;;  %vm2713_vm8 = vcmp.eq.f32.partialorder %v10356_v7, inf  ;;  %vm2715_vm9 = vcmp.eq.f32.partialorder %v10356_v7, 0.0  ;;  %v11789_v28 = vld [vmem:[#allocation80_spill] sm:$0xff] }
 0x302   :  { %6843 = vpow2.f32 %v3031_v43  ;;  %v2928_v39 = vsub.f32 0.7, %v2896_v33  ;;  %v2833_v63 = vsel %vm2832_vm6, %v10344_v10, %v2831_v4  ;;  %v2712_v15 = vmul.f32 %v6832_v23, %v10356_v7  ;;  %v11788_v43 = vld [vmem:[#allocation105_spill] sm:$0xff] }
 0x303   :  { %v3219_v61 = vmul.f32 1.442695, %v3163_v35  ;;  %v2836_v0 = vsel %vm2834_vm7, %v2835_v17, %v2833_v63  ;;  %v2716_v57 = vand.u32 2147483648, %v10356_v7  ;;  %6845 = vrsqrt.f32 %v10402_v9  ;;  %v10426_v17 = vpop.f32.mrb[48].mxu0  ;;  %v11790_v63 = vld [vmem:[#allocation33_spill] sm:$0xff] }
 0x304   :  { %v2960_v36 = vmul.f32 5.0, %v2928_v39  ;;  %v2880_v21 = vmul.f32 0.57735026, %v2836_v0  ;;  %v2714_v58 = vsel %vm2713_vm8, %v10356_v7, %v2712_v15  ;;  %v10418_v37 = vmax.f32 %v2578_v24, 0.0  ;;  %v10432_v24 = vpop.f32.mrb[48].mxu1  ;;  %v10434_v23 = vpop.f32.mrb[49].mxu0 }
 0x305   :  { %v10420_v38 = vpop.eup %6833  ;;  %6847 = vpow2.f32 %v3219_v61  ;;  %v2717_v49 = vsel %vm2715_vm9, %v2716_v57, %v2714_v58  ;;  %v2562_v7 = vmul.f32 2.0, %v10125_v55  ;;  %v2545_v4 = vmul.f32 2.0, %v10132_v14  ;;  %v10438_v61 = vpop.f32.mrb[49].mxu1  ;;  %v11791_v55 = vld [vmem:[#allocation67_spill] sm:$0xff]  ;;  %v11792_v58 = vld [vmem:[#allocation106_spill] sm:$0xff] }
 0x306   :  { %v6836_v32 = vpop.eup %6835  ;;  %v10424_v60 = vmul.f32 %v10420_v38, %v11788_v43  ;;  %v3005_v10 = vmul.f32 1.442695, %v2960_v36  ;;  %v2912_v30 = vsub.f32 1.0, %v2880_v21  ;;  %v2863_v48 = vmul.f32 0.57735026, %v2717_v49  ;;  %v10440_v0 = vpop.f32.mrb[50].mxu0 }
 0x307   :  { %v3150_v33 = vmul.f32 %v6836_v32, %v11789_v28  ;;  %6849 = vrsqrt.f32 %v10418_v37  ;;  %v2127_v15 = vadd.f32 %v9517_v18, %v11790_v63  ;;  %vm2825_vm10 = vcmp.eq.f32.partialorder %v10402_v9, inf  ;;  %v11793_v43 = vld [vmem:[#allocation81_spill] sm:$0xff] }
 0x308   :  { %6851 = vpow2.f32 %v3005_v10  ;;  %v2944_v35 = vsub.f32 0.7, %v2912_v30  ;;  %v2895_v39 = vsub.f32 1.0, %v2863_v48  ;;  %vm2827_vm11 = vcmp.eq.f32.partialorder %v10402_v9, 0.0 }
 0x309   :  { %v6838_v57 = vpop.eup %6837  ;;  %v3193_v36 = vmul.f32 1.442695, %v3150_v33  ;;  %v2144_v14 = vadd.f32 %v9653_v29, %v11791_v55  ;;  %v2577_v28 = vsub.f32 %v2127_v15, %v2545_v4  ;;  %vm2734_vm12 = vcmp.eq.f32.partialorder %v10418_v37, inf }
 0x30a   :  { %v6840_v21 = vpop.eup %6839  ;;  %v3243_v49 = vmul.f32 %v6838_v57, %v11792_v58  ;;  %v3274_v32 = vadd.f32 %v6838_v57, %v10381_v34  ;;  %v2976_v10 = vmul.f32 5.0, %v2944_v35  ;;  %v2927_v18 = vsub.f32 0.7, %v2895_v39 }
 0x30b   :  { %v6842_v30 = vpop.eup %6841  ;;  %6853 = vpow2.f32 %v3193_v36  ;;  %v3053_v48 = vadd.f32 1.0, %v6840_v21  ;;  %v2594_v63 = vsub.f32 %v2144_v14, %v2562_v7  ;;  %v2828_v35 = vand.u32 2147483648, %v10402_v9  ;;  %v11795_v21 = vld [vmem:[#allocation125_spill] sm:$0xff] }
 0x30c   :  { %v6844_v33 = vpop.eup %6843  ;;  %v3316_v2 = vadd.f32 %v10386_v31, %v3243_v49  ;;  %v3166_v47 = vmul.f32 %v6842_v30, %v11793_v43  ;;  %v10451_v1 = vadd.f32 %v10391_v52, %v3274_v32  ;;  %v3037_v55 = vmul.f32 1.442695, %v2976_v10  ;;  %v3573_v49 = vpop.trf.xlu0 }
 0x30d   :  { %v6846_v54 = vpop.eup %6845  ;;  %6855 = vrcp.f32 %v3053_v48  ;;  %v3069_v58 = vadd.f32 1.0, %v6844_v33  ;;  %v2959_v34 = vmul.f32 5.0, %v2927_v18  ;;  %v10458_v15 = vmax.f32 %v2594_v63, 0.0 }
 0x30e   :  { %v3225_v39 = vmul.f32 1.442695, %v3166_v47  ;;  %v10455_v57 = vadd.f32 %v3316_v2, %v10396_v6  ;;  %6857 = vpow2.f32 %v3037_v55  ;;  %v2824_v7 = vmul.f32 %v6846_v54, %v10402_v9  ;;  %v11794_v2 = vld [vmem:[#allocation117_spill] sm:$0xff] }
 0x30f   :  { %v6848_v31 = vpop.eup %6847  ;;  %6859 = vrcp.f32 %v3069_v58  ;;  %v3003_v4 = vmul.f32 1.442695, %v2959_v34  ;;  %v10460_v52 = vmax.f32 %v2577_v28, 0.0  ;;  %v10469_v54 = vrot.slane %v11795_v21, %v11794_v2 }
 0x310   :  { %v3259_v36 = vmul.f32 %v6848_v31, %v11714_v8  ;;  %v3295_v14 = vadd.f32 %v6848_v31, %v10389_v41  ;;  %6861 = vpow2.f32 %v3225_v39  ;;  %v2826_v47 = vsel %vm2825_vm10, %v10402_v9, %v2824_v7  ;;  %v11796_v39 = vld [vmem:[#allocation108_spill] sm:$0xff] }
 0x311   :  { %v6850_v6 = vpop.eup %6849  ;;  %6863 = vpow2.f32 %v3003_v4  ;;  %v2829_v58 = vsel %vm2827_vm11, %v2828_v35, %v2826_v47  ;;  %vm2736_vm13 = vcmp.eq.f32.partialorder %v10418_v37, 0.0  ;;  %v2737_v48 = vand.u32 2147483648, %v10418_v37  ;;  %v10500_v4 = vpop.f32.mrb[51].mxu0 }
 0x312   :  { %v6852_v28 = vpop.eup %6851  ;;  %v3337_v41 = vadd.f32 %v10399_v44, %v3259_v36  ;;  %v10476_v32 = vadd.f32 %v10420_v38, %v3295_v14  ;;  %v2879_v10 = vmul.f32 0.57735026, %v2829_v58  ;;  %v2733_v18 = vmul.f32 %v6850_v6, %v10418_v37  ;;  %v10487_v44 = vpop.f32.mrb[50].mxu1  ;;  %v11797_v14 = vld [vmem:[#allocation66_spill] sm:$0xff] }
 0x313   :  { %v3056_v30 = vadd.f32 1.0, %v6852_v28  ;;  %6865 = vrsqrt.f32 %v10458_v15  ;;  %v10492_v55 = vrot.slane %v3573_v49, %v11794_v2  ;;  %v2561_v35 = vmul.f32 2.0, %v10216_v51  ;;  %v11798_v6 = vld [vmem:[#allocation38_spill] sm:$0xff] }
 0x314   :  { %v10483_v9 = vadd.f32 %v3337_v41, %v10424_v60  ;;  %v2911_v63 = vsub.f32 1.0, %v2879_v10  ;;  %v2735_v33 = vsel %vm2734_vm12, %v10418_v37, %v2733_v18  ;;  %6867 = vrsqrt.f32 %v10460_v52  ;;  %v11799_v58 = vld [vmem:[#allocation82_spill] sm:$0xff] }
 0x315   :  { %v10489_v38 = vpop.eup %6853  ;;  %6869 = vrcp.f32 %v3056_v30  ;;  %v2738_v34 = vsel %vm2736_vm13, %v2737_v48, %v2735_v33  ;;  %v4016_v37 = vmul.f32 2.0, %v10426_v17  ;;  %vm2846_vm14 = vcmp.eq.f32.partialorder %v10458_v15, inf  ;;  %v10513_v33 = vpop.f32.mrb[51].mxu1 }
 0x316   :  { %v10497_v60 = vmul.f32 %v10489_v38, %v11796_v39  ;;  %v2943_v7 = vsub.f32 0.7, %v2911_v63  ;;  %v2866_v31 = vmul.f32 0.57735026, %v2738_v34  ;;  %v2143_v47 = vadd.f32 %v9653_v29, %v11797_v14  ;;  %v11800_v63 = vld [vmem:[#allocation4_spill] sm:$0xff]  ;;  %v11801_v14 = vld [vmem:[#allocation83_spill] sm:$0xff] }
 0x317   :  { %v6856_v36 = vpop.eup %6855  ;;  %v3598_v2 = vadd.f32 %v10469_v54, %v11798_v6  ;;  %v4032_v51 = vmul.f32 2.0, %v10432_v24  ;;  %vm2848_vm15 = vcmp.eq.f32.partialorder %v10458_v15, 0.0  ;;  %v2849_v17 = vand.u32 2147483648, %v10458_v15  ;;  %v10574_v8 = vpop.f32.mrb[52].mxu1 }
 0x318   :  { %v6858_v21 = vpop.eup %6857  ;;  %v3149_v28 = vmul.f32 %v6856_v36, %v11799_v58  ;;  %v2975_v49 = vmul.f32 5.0, %v2943_v7  ;;  %v2898_v41 = vsub.f32 1.0, %v2866_v31  ;;  %v2593_v30 = vsub.f32 %v2143_v47, %v2561_v35  ;;  %v10523_v47 = vpop.f32.mrb[52].mxu0 }
 0x319   :  { %v6860_v10 = vpop.eup %6859  ;;  %v3072_v18 = vadd.f32 1.0, %v6858_v21  ;;  %v4048_v48 = vsub.f32 %v3598_v2, %v4016_v37  ;;  %v3614_v29 = vadd.f32 %v10492_v55, %v11800_v63  ;;  %v4015_v37 = vmul.f32 2.0, %v10434_v23  ;;  %v10577_v43 = vpop.f32.mrb[53].mxu0 }
 0x31a   :  { %v10515_v34 = vpop.eup %6861  ;;  %v3191_v24 = vmul.f32 1.442695, %v3149_v28  ;;  %v3165_v36 = vmul.f32 %v6860_v10, %v11801_v14  ;;  %v3035_v7 = vmul.f32 1.442695, %v2975_v49  ;;  %v2930_v31 = vsub.f32 0.7, %v2898_v41 }
 0x31b   :  { %v6864_v6 = vpop.eup %6863  ;;  %v10520_v39 = vmul.f32 %v10515_v34, %v11716_v20  ;;  %6871 = vrcp.f32 %v3072_v18  ;;  %v4064_v35 = vsub.f32 %v3614_v29, %v4032_v51  ;;  %vm2727_vm0 = vcmp.eq.f32.partialorder %v10460_v52, inf  ;;  %v11802_v41 = vld [vmem:[#allocation14_spill] sm:$0xff] }
 0x31c   :  { %6873 = vpow2.f32 %v3191_v24  ;;  %v3223_v2 = vmul.f32 1.442695, %v3165_v36  ;;  %v3055_v21 = vadd.f32 1.0, %v6864_v6  ;;  %v2962_v63 = vmul.f32 5.0, %v2930_v31 }
 0x31d   :  { %v6866_v28 = vpop.eup %6865  ;;  %6875 = vpow2.f32 %v3035_v7  ;;  %v10526_v49 = vmax.f32 %v2593_v30, 0.0  ;;  %v3597_v10 = vadd.f32 %v10469_v54, %v11802_v41  ;;  %v10531_v18 = vmax.f32 %v4048_v48, 0.0  ;;  %v11803_v30 = vld [vmem:[#allocation84_spill] sm:$0xff] }
 0x31e   :  { %v6868_v20 = vpop.eup %6867  ;;  %6877 = vpow2.f32 %v3223_v2  ;;  %v3009_v51 = vmul.f32 1.442695, %v2962_v63  ;;  %v2845_v23 = vmul.f32 %v6866_v28, %v10458_v15  ;;  %v2730_v36 = vand.u32 2147483648, %v10460_v52 }
 0x31f   :  { %v6870_v29 = vpop.eup %6869  ;;  %6879 = vrcp.f32 %v3055_v21  ;;  %v2726_v24 = vmul.f32 %v6868_v20, %v10460_v52  ;;  %v10535_v7 = vmax.f32 %v4064_v35, 0.0  ;;  %v4047_v2 = vsub.f32 %v3597_v10, %v4015_v37 }
 0x320   :  { %v3152_v31 = vmul.f32 %v6870_v29, %v11803_v30  ;;  %6881 = vpow2.f32 %v3009_v51  ;;  %v2847_v6 = vsel %vm2846_vm14, %v10458_v15, %v2845_v23  ;;  %vm2729_vm1 = vcmp.eq.f32.partialorder %v10460_v52, 0.0  ;;  %v11804_v23 = vld [vmem:[#allocation85_spill] sm:$0xff] }
 0x321   :  { %v2850_v48 = vsel %vm2848_vm15, %v2849_v17, %v2847_v6  ;;  %v2728_v21 = vsel %vm2727_vm0, %v10460_v52, %v2726_v24  ;;  %6883 = vrsqrt.f32 %v10526_v49  ;;  %v10550_v15 = vmax.f32 %v4047_v2, 0.0  ;;  %v11805_v6 = vld [vmem:[#allocation110_spill] sm:$0xff] }
 0x322   :  { %v3197_v20 = vmul.f32 1.442695, %v3152_v31  ;;  %v2882_v35 = vmul.f32 0.57735026, %v2850_v48  ;;  %v2731_v63 = vsel %vm2729_vm1, %v2730_v36, %v2728_v21  ;;  %6885 = vrsqrt.f32 %v10531_v18 }
 0x323   :  { %v2865_v28 = vmul.f32 0.57735026, %v2731_v63  ;;  %6887 = vrsqrt.f32 %v10535_v7  ;;  %v2842_v10 = vand.u32 2147483648, %v10526_v49  ;;  %v4123_v52 = vand.u32 2147483648, %v10531_v18 }
 0x324   :  { %6889 = vpow2.f32 %v3197_v20  ;;  %v2914_v37 = vsub.f32 1.0, %v2882_v35  ;;  %vm2839_vm2 = vcmp.eq.f32.partialorder %v10526_v49, inf  ;;  %vm4120_vm3 = vcmp.eq.f32.partialorder %v10531_v18, inf  ;;  %v11806_v20 = vld [vmem:[#allocation37_spill] sm:$0xff] }
 0x325   :  { %v6872_v17 = vpop.eup %6871  ;;  %v2897_v41 = vsub.f32 1.0, %v2865_v28  ;;  %v4235_v36 = vand.u32 2147483648, %v10535_v7  ;;  %6891 = vrsqrt.f32 %v10550_v15  ;;  %vm2841_vm4 = vcmp.eq.f32.partialorder %v10526_v49, 0.0 }
 0x326   :  { %v6874_v51 = vpop.eup %6873  ;;  %v3168_v29 = vmul.f32 %v6872_v17, %v11804_v23  ;;  %v2946_v24 = vsub.f32 0.7, %v2914_v37  ;;  %vm4122_vm5 = vcmp.eq.f32.partialorder %v10531_v18, 0.0  ;;  %vm4232_vm6 = vcmp.eq.f32.partialorder %v10535_v7, inf }
 0x327   :  { %v6876_v31 = vpop.eup %6875  ;;  %v3245_v2 = vmul.f32 %v6874_v51, %v11805_v6  ;;  %v3276_v48 = vadd.f32 %v6874_v51, %v10451_v1  ;;  %v2929_v21 = vsub.f32 0.7, %v2897_v41  ;;  %v3613_v35 = vadd.f32 %v10492_v55, %v11806_v20  ;;  %v11807_v41 = vld [vmem:[#allocation111_spill] sm:$0xff] }
 0x328   :  { %v6878_v63 = vpop.eup %6877  ;;  %v3229_v28 = vmul.f32 1.442695, %v3168_v29  ;;  %v3071_v37 = vadd.f32 1.0, %v6876_v31  ;;  %v2978_v17 = vmul.f32 5.0, %v2946_v24  ;;  %vm4234_vm7 = vcmp.eq.f32.partialorder %v10535_v7, 0.0  ;;  %v11808_v29 = vld [vmem:[#allocation86_spill] sm:$0xff] }
 0x329   :  { %v4031_v23 = vmul.f32 2.0, %v10438_v61  ;;  %v6880_v30 = vpop.eup %6879  ;;  %v3318_v1 = vadd.f32 %v10455_v57, %v3245_v2  ;;  %v3261_v51 = vmul.f32 %v6878_v63, %v11807_v41  ;;  %v3297_v6 = vadd.f32 %v6878_v63, %v10476_v32 }
 0x32a   :  { %v10572_v14 = vadd.f32 %v10489_v38, %v3276_v48  ;;  %v6882_v20 = vpop.eup %6881  ;;  %6893 = vpow2.f32 %v3229_v28  ;;  %v3151_v24 = vmul.f32 %v6880_v30, %v11808_v29  ;;  %v3041_v31 = vmul.f32 1.442695, %v2978_v17 }
 0x32b   :  { %v2961_v58 = vmul.f32 5.0, %v2929_v21  ;;  %v6884_v61 = vpop.eup %6883  ;;  %v3339_v57 = vadd.f32 %v10483_v9, %v3261_v51  ;;  %v10581_v2 = vadd.f32 %v3318_v1, %v10497_v60  ;;  %6895 = vrcp.f32 %v3071_v37  ;;  %v11809_v51 = vld [vmem:[#allocation16_spill] sm:$0xff] }
 0x32c   :  { %v10584_v32 = vadd.f32 %v10515_v34, %v3297_v6  ;;  %v6886_v38 = vpop.eup %6885  ;;  %v3195_v48 = vmul.f32 1.442695, %v3151_v24  ;;  %v3058_v63 = vadd.f32 1.0, %v6882_v20  ;;  %6897 = vpow2.f32 %v3041_v31  ;;  %v11810_v20 = vld [vmem:[#allocation112_spill] sm:$0xff] }
 0x32d   :  { %v3007_v28 = vmul.f32 1.442695, %v2961_v58  ;;  %v6888_v30 = vpop.eup %6887  ;;  %v10587_v21 = vadd.f32 %v3339_v57, %v10520_v39  ;;  %v2838_v17 = vmul.f32 %v6884_v61, %v10526_v49  ;;  %v4119_v9 = vmul.f32 %v6886_v38, %v10531_v18 }
 0x32e   :  { %v3600_v60 = vadd.f32 %v10469_v54, %v11809_v51  ;;  %v6890_v37 = vpop.eup %6889  ;;  %6899 = vpow2.f32 %v3195_v48  ;;  %v4231_v34 = vmul.f32 %v6888_v30, %v10535_v7  ;;  %v4063_v6 = vsub.f32 %v3613_v35, %v4031_v23  ;;  %v10611_v35 = vpop.f32.mrb[53].mxu1 }
 0x32f   :  { %v4018_v1 = vmul.f32 2.0, %v10440_v0  ;;  %v10596_v58 = vmul.f32 %v6890_v37, %v11810_v20  ;;  %6901 = vrcp.f32 %v3058_v63  ;;  %v2840_v39 = vsel %vm2839_vm2, %v10526_v49, %v2838_v17  ;;  %v6892_v31 = vpop.eup %6891 }
 0x330   :  { %v4121_v24 = vsel %vm4120_vm3, %v10531_v18, %v4119_v9  ;;  %6903 = vpow2.f32 %v3007_v28  ;;  %v2843_v61 = vsel %vm2841_vm4, %v2842_v10, %v2840_v39  ;;  %v4233_v23 = vsel %vm4232_vm6, %v10535_v7, %v4231_v34  ;;  %v11811_v34 = vld [vmem:[#allocation113_spill] sm:$0xff] }
 0x331   :  { %v4124_v0 = vsel %vm4122_vm5, %v4123_v52, %v4121_v24  ;;  %v2881_v57 = vmul.f32 0.57735026, %v2843_v61  ;;  %v4236_v48 = vsel %vm4234_vm7, %v4235_v36, %v4233_v23  ;;  %v4112_v63 = vmul.f32 %v6892_v31, %v10550_v15 }
 0x332   :  { %v4336_v38 = vsub.f32 0.0, %v4124_v0  ;;  %v4352_v28 = vsub.f32 0.0, %v4236_v48  ;;  %vm4113_vm8 = vcmp.eq.f32.partialorder %v10550_v15, inf  ;;  %v4116_v49 = vand.u32 2147483648, %v10550_v15  ;;  %v11812_v0 = vld [vmem:[#allocation87_spill] sm:$0xff] }
 0x333   :  { %v10618_v18 = vmax.f32 %v4063_v6, 0.0  ;;  %v2913_v10 = vsub.f32 1.0, %v2881_v57  ;;  %v4114_v30 = vsel %vm4113_vm8, %v10550_v15, %v4112_v63  ;;  %vm4115_vm9 = vcmp.eq.f32.partialorder %v10550_v15, 0.0  ;;  %v11813_v15 = vld [vmem:[#allocation6_spill] sm:$0xff] }
 0x334   :  { %v4368_v52 = vmul.f32 50.0, %v4336_v38  ;;  %v10622_v17 = vpop.eup %6893  ;;  %v4384_v9 = vmul.f32 50.0, %v4352_v28  ;;  %v4117_v7 = vsel %vm4115_vm9, %v4116_v49, %v4114_v30  ;;  %v4050_v36 = vsub.f32 %v3600_v60, %v4018_v1  ;;  %v11814_v30 = vld [vmem:[#allocation114_spill] sm:$0xff] }
 0x335   :  { %6905 = vrsqrt.f32 %v10618_v18  ;;  %v6896_v51 = vpop.eup %6895  ;;  %v10627_v39 = vmul.f32 %v10622_v17, %v11811_v34  ;;  %v2945_v6 = vsub.f32 0.7, %v2913_v10  ;;  %v4335_v31 = vsub.f32 0.0, %v4117_v7 }
 0x336   :  { %v4401_v24 = vmul.f32 1.442695, %v4368_v52  ;;  %v6898_v61 = vpop.eup %6897  ;;  %v3167_v23 = vmul.f32 %v6896_v51, %v11812_v0  ;;  %v4433_v57 = vmul.f32 1.442695, %v4384_v9  ;;  %v3616_v38 = vadd.f32 %v10492_v55, %v11813_v15 }
 0x337   :  { %v3074_v48 = vadd.f32 1.0, %v6898_v61  ;;  %v2977_v63 = vmul.f32 5.0, %v2945_v6  ;;  %v4367_v28 = vmul.f32 50.0, %v4335_v31  ;;  %v10632_v49 = vmax.f32 %v4050_v36, 0.0  ;;  %v11815_v61 = vld [vmem:[#allocation88_spill] sm:$0xff]  ;;  %v11816_v31 = vld [vmem:[#allocation5_spill] sm:$0xff] }
 0x338   :  { %6907 = vpow2.f32 %v4401_v24  ;;  %v6900_v60 = vpop.eup %6899  ;;  %v3227_v1 = vmul.f32 1.442695, %v3167_v23  ;;  %v4034_v10 = vmul.f32 2.0, %v10487_v44  ;;  %v3599_v23 = vadd.f32 %v10469_v54, %v11816_v31 }
 0x339   :  { %6909 = vpow2.f32 %v4433_v57  ;;  %v6902_v52 = vpop.eup %6901  ;;  %v3247_v7 = vmul.f32 %v6900_v60, %v11814_v30  ;;  %v3278_v51 = vadd.f32 %v6900_v60, %v10572_v14  ;;  %v3039_v9 = vmul.f32 1.442695, %v2977_v63  ;;  %v11817_v63 = vld [vmem:[#allocation15_spill] sm:$0xff] }
 0x33a   :  { %6911 = vrcp.f32 %v3074_v48  ;;  %v6904_v34 = vpop.eup %6903  ;;  %v3154_v6 = vmul.f32 %v6902_v52, %v11815_v61  ;;  %v4399_v24 = vmul.f32 1.442695, %v4367_v28  ;;  %v4066_v30 = vsub.f32 %v3616_v38, %v4034_v10  ;;  %v11827_v61 = vld [vmem:[#allocation119_spill] sm:$0xff] }
 0x33b   :  { %6913 = vpow2.f32 %v3227_v1  ;;  %v3320_v36 = vadd.f32 %v10581_v2, %v3247_v7  ;;  %v3057_v57 = vadd.f32 1.0, %v6904_v34  ;;  %v10641_v15 = vadd.f32 %v6890_v37, %v3278_v51 }
 0x33c   :  { %6915 = vpow2.f32 %v3039_v9  ;;  %v3201_v44 = vmul.f32 1.442695, %v3154_v6  ;;  %v4017_v14 = vmul.f32 2.0, %v10500_v4  ;;  %v3615_v28 = vadd.f32 %v10492_v55, %v11817_v63 }
 0x33d   :  { %6917 = vpow2.f32 %v4399_v24  ;;  %v10645_v48 = vadd.f32 %v3320_v36, %v10596_v58  ;;  %v4033_v60 = vmul.f32 2.0, %v10513_v33  ;;  %v10650_v2 = vmax.f32 %v4066_v30, 0.0  ;;  %v11818_v24 = vld [vmem:[#allocation40_spill] sm:$0xff] }
 0x33e   :  { %6919 = vrcp.f32 %v3057_v57  ;;  %v4049_v37 = vsub.f32 %v3599_v23, %v4017_v14  ;;  %vm4225_vm10 = vcmp.eq.f32.partialorder %v10618_v18, inf  ;;  %v4228_v4 = vand.u32 2147483648, %v10618_v18  ;;  %v10669_v23 = vpop.f32.mrb[54].mxu0  ;;  %v11819_v14 = vld [vmem:[#allocation89_spill] sm:$0xff] }
 0x33f   :  { %v6906_v1 = vpop.eup %6905  ;;  %6921 = vpow2.f32 %v3201_v44  ;;  %v4065_v38 = vsub.f32 %v3615_v28, %v4033_v60  ;;  %v10658_v58 = vmul.f32 2.0, %v10523_v47  ;;  %vm4227_vm11 = vcmp.eq.f32.partialorder %v10618_v18, 0.0 }
 0x340   :  { %v4224_v34 = vmul.f32 %v6906_v1, %v10618_v18  ;;  %6923 = vrsqrt.f32 %v10632_v49  ;;  %v10663_v30 = vmax.f32 %v4049_v37, 0.0  ;;  %v3602_v31 = vadd.f32 %v10469_v54, %v11818_v24  ;;  %v11820_v1 = vld [vmem:[#allocation8_spill] sm:$0xff] }
 0x341   :  { %6925 = vrsqrt.f32 %v10650_v2  ;;  %v10665_v6 = vmax.f32 %v4065_v38, 0.0  ;;  %vm4134_vm12 = vcmp.eq.f32.partialorder %v10632_v49, inf  ;;  %vm4136_vm13 = vcmp.eq.f32.partialorder %v10632_v49, 0.0  ;;  %v11821_v38 = vld [vmem:[#allocation115_spill] sm:$0xff] }
 0x342   :  { %v6908_v33 = vpop.eup %6907  ;;  %v4226_v10 = vsel %vm4225_vm10, %v10618_v18, %v4224_v34  ;;  %v4249_v18 = vand.u32 2147483648, %v10650_v2  ;;  %6927 = vrsqrt.f32 %v10663_v30  ;;  %vm4246_vm14 = vcmp.eq.f32.partialorder %v10650_v2, inf }
 0x343   :  { %v6910_v7 = vpop.eup %6909  ;;  %v4464_v51 = vsub.f32 0.5, %v6908_v33  ;;  %v4229_v9 = vsel %vm4227_vm11, %v4228_v4, %v4226_v10  ;;  %v4052_v60 = vsub.f32 %v3602_v31, %v10658_v58  ;;  %v3618_v37 = vadd.f32 %v10492_v55, %v11820_v1 }
 0x344   :  { %v6912_v47 = vpop.eup %6911  ;;  %v4480_v36 = vsub.f32 0.5, %v6910_v7  ;;  %v4351_v57 = vsub.f32 0.0, %v4229_v9  ;;  %vm4248_vm15 = vcmp.eq.f32.partialorder %v10650_v2, 0.0  ;;  %6929 = vrsqrt.f32 %v10665_v6 }
 0x345   :  { %v6914_v44 = vpop.eup %6913  ;;  %v3170_v63 = vmul.f32 %v6912_v47, %v11819_v14  ;;  %v4496_v28 = vmul.f32 5.0, %v4464_v51  ;;  %vm4127_vm0 = vcmp.eq.f32.partialorder %v10663_v30, inf  ;;  %vm4129_vm1 = vcmp.eq.f32.partialorder %v10663_v30, 0.0 }
 0x346   :  { %v6916_v34 = vpop.eup %6915  ;;  %v3263_v4 = vmul.f32 %v6914_v44, %v11821_v38  ;;  %v3299_v33 = vadd.f32 %v6914_v44, %v10584_v32  ;;  %v4512_v10 = vmul.f32 5.0, %v4480_v36  ;;  %v4383_v7 = vmul.f32 50.0, %v4351_v57  ;;  %v10688_v38 = vpop.f32.mrb[54].mxu1 }
 0x347   :  { %v6918_v9 = vpop.eup %6917  ;;  %v3233_v51 = vmul.f32 1.442695, %v3170_v63  ;;  %v3073_v24 = vadd.f32 1.0, %v6916_v34  ;;  %v4529_v47 = vmul.f32 1.442695, %v4496_v28  ;;  %v4036_v57 = vmul.f32 2.0, %v10574_v8 }
 0x348   :  { %v6920_v52 = vpop.eup %6919  ;;  %v3341_v58 = vadd.f32 %v10587_v21, %v3263_v4  ;;  %v10686_v31 = vadd.f32 %v10622_v17, %v3299_v33  ;;  %v4561_v1 = vmul.f32 1.442695, %v4512_v10  ;;  %v4463_v14 = vsub.f32 0.5, %v6918_v9  ;;  %v11822_v63 = vld [vmem:[#allocation116_spill] sm:$0xff] }
 0x349   :  { %v10690_v32 = vpop.eup %6921  ;;  %6931 = vpow2.f32 %v3233_v51  ;;  %v3153_v36 = vmul.f32 %v6920_v52, %v11734_v11  ;;  %v4431_v33 = vmul.f32 1.442695, %v4383_v7  ;;  %v11823_v7 = vand.u32 2147483648, %v10632_v49 }
 0x34a   :  { %v6924_v44 = vpop.eup %6923  ;;  %v10697_v21 = vmul.f32 %v10690_v32, %v11822_v63  ;;  %6933 = vrcp.f32 %v3073_v24  ;;  %v10700_v17 = vadd.f32 %v3341_v58, %v10627_v39  ;;  %v4495_v28 = vmul.f32 5.0, %v4463_v14 }
 0x34b   :  { %v6926_v34 = vpop.eup %6925  ;;  %v3199_v4 = vmul.f32 1.442695, %v3153_v36  ;;  %6935 = vpow2.f32 %v4529_v47  ;;  %v4133_v52 = vmul.f32 %v6924_v44, %v10632_v49  ;;  %v10708_v39 = vmax.f32 %v4052_v60, 0.0  ;;  %v10721_v36 = vpop.f32.mrb[55].mxu0 }
 0x34c   :  { %6937 = vpow2.f32 %v4561_v1  ;;  %v4527_v10 = vmul.f32 1.442695, %v4495_v28  ;;  %v4245_v8 = vmul.f32 %v6926_v34, %v10650_v2  ;;  %v4068_v14 = vsub.f32 %v3618_v37, %v4036_v57  ;;  %v6928_v51 = vpop.eup %6927 }
 0x34d   :  { %6939 = vpow2.f32 %v3199_v4  ;;  %v4135_v9 = vsel %vm4134_vm12, %v10632_v49, %v4133_v52  ;;  %v4130_v58 = vand.u32 2147483648, %v10663_v30  ;;  %v4126_v37 = vmul.f32 %v6928_v51, %v10663_v30  ;;  %v11824_v52 = vld [vmem:[#allocation7_spill] sm:$0xff] }
 0x34e   :  { %6941 = vpow2.f32 %v4527_v10  ;;  %v4138_v24 = vsel %vm4136_vm13, %v11823_v7, %v4135_v9  ;;  %v4247_v47 = vsel %vm4246_vm14, %v10650_v2, %v4245_v8  ;;  %vm4239_vm2 = vcmp.eq.f32.partialorder %v10665_v6, inf  ;;  %v6930_v49 = vpop.eup %6929 }
 0x34f   :  { %6943 = vpow2.f32 %v4431_v33  ;;  %v4338_v1 = vsub.f32 0.0, %v4138_v24  ;;  %v4250_v60 = vsel %vm4248_vm15, %v4249_v18, %v4247_v47  ;;  %vm4241_vm3 = vcmp.eq.f32.partialorder %v10665_v6, 0.0  ;;  %v10741_v24 = vpop.f32.mrb[55].mxu1  ;;  %v11825_v47 = vld [vmem:[#allocation118_spill] sm:$0xff] }
 0x350   :  { %v4354_v57 = vsub.f32 0.0, %v4250_v60  ;;  %6945 = vrsqrt.f32 %v10708_v39  ;;  %v4128_v28 = vsel %vm4127_vm0, %v10663_v30, %v4126_v37  ;;  %v4242_v2 = vand.u32 2147483648, %v10665_v6  ;;  %v11826_v37 = vld [vmem:[#allocation91_spill] sm:$0xff] }
 0x351   :  { %v4370_v44 = vmul.f32 50.0, %v4338_v1  ;;  %v10730_v18 = vmax.f32 %v4068_v14, 0.0  ;;  %v4131_v4 = vsel %vm4129_vm1, %v4130_v58, %v4128_v28  ;;  %v4238_v33 = vmul.f32 %v6930_v49, %v10665_v6 }
 0x352   :  { %v4386_v34 = vmul.f32 50.0, %v4354_v57  ;;  %v3601_v10 = vadd.f32 %v10469_v54, %v11824_v52  ;;  %v4337_v51 = vsub.f32 0.0, %v4131_v4  ;;  %v4019_v7 = vmul.f32 2.0, %v10577_v43 }
 0x353   :  { %v10737_v8 = vpop.eup %6931  ;;  %v4405_v9 = vmul.f32 1.442695, %v4370_v44  ;;  %6947 = vrsqrt.f32 %v10730_v18  ;;  %v4240_v1 = vsel %vm4239_vm2, %v10665_v6, %v4238_v33  ;;  %vm4148_vm4 = vcmp.eq.f32.partialorder %v10708_v39, inf }
 0x354   :  { %v6934_v14 = vpop.eup %6933  ;;  %v10745_v30 = vmul.f32 %v10737_v8, %v11825_v47  ;;  %v4437_v58 = vmul.f32 1.442695, %v4386_v34  ;;  %v4369_v49 = vmul.f32 50.0, %v4337_v51  ;;  %v4243_v43 = vsel %vm4241_vm3, %v4242_v2, %v4240_v1 }
 0x355   :  { %v6936_v60 = vpop.eup %6935  ;;  %v3169_v57 = vmul.f32 %v6934_v14, %v11826_v37  ;;  %6949 = vpow2.f32 %v4405_v9  ;;  %v4353_v4 = vsub.f32 0.0, %v4243_v43  ;;  %vm4150_vm5 = vcmp.eq.f32.partialorder %v10708_v39, 0.0 }
 0x356   :  { %v6938_v44 = vpop.eup %6937  ;;  %v4592_v28 = vadd.f32 1.0, %v6936_v60  ;;  %6951 = vpow2.f32 %v4437_v58  ;;  %v4403_v33 = vmul.f32 1.442695, %v4369_v49  ;;  %v4051_v63 = vsub.f32 %v3601_v10, %v4019_v7 }
 0x357   :  { %v6940_v34 = vpop.eup %6939  ;;  %v3231_v52 = vmul.f32 1.442695, %v3169_v57  ;;  %v4608_v47 = vadd.f32 1.0, %v6938_v44  ;;  %v4385_v51 = vmul.f32 50.0, %v4353_v4  ;;  %v4151_v14 = vand.u32 2147483648, %v10708_v39  ;;  %v10765_v44 = vpop.f32.mrb[56].mxu0 }
 0x358   :  { %v6942_v11 = vpop.eup %6941  ;;  %v3249_v0 = vmul.f32 %v6940_v34, %v11827_v61  ;;  %v3280_v9 = vadd.f32 %v6940_v34, %v10641_v15  ;;  %6953 = vrcp.f32 %v4592_v28  ;;  %vm4260_vm6 = vcmp.eq.f32.partialorder %v10730_v18, inf }
 0x359   :  { %v6944_v6 = vpop.eup %6943  ;;  %6955 = vpow2.f32 %v3231_v52  ;;  %v4591_v2 = vadd.f32 1.0, %v6942_v11  ;;  %v4435_v7 = vmul.f32 1.442695, %v4385_v51  ;;  %v10762_v57 = vmax.f32 %v4051_v63, 0.0 }
 0x35a   :  { %v6946_v58 = vpop.eup %6945  ;;  %v3281_v1 = vadd.f32 %v10690_v32, %v3280_v9  ;;  %v3322_v60 = vadd.f32 %v10645_v48, %v3249_v0  ;;  %6957 = vrcp.f32 %v4608_v47  ;;  %v4479_v10 = vsub.f32 0.5, %v6944_v6 }
 0x35b   :  { %6959 = vrcp.f32 %v4591_v2  ;;  %v4147_v15 = vmul.f32 %v6946_v58, %v10708_v39  ;;  %vm4262_vm7 = vcmp.eq.f32.partialorder %v10730_v18, 0.0  ;;  %v4263_v48 = vand.u32 2147483648, %v10730_v18 }
 0x35c   :  { %v3282_v49 = vrot.slane %v3281_v1, 4  ;;  %v3323_v11 = vadd.f32 %v3322_v60, %v10697_v21  ;;  %v4511_v43 = vmul.f32 5.0, %v4479_v10  ;;  %6961 = vpow2.f32 %v4403_v33 }
 0x35d   :  { %v6948_v28 = vpop.eup %6947  ;;  %6963 = vpow2.f32 %v4435_v7  ;;  %v4149_v0 = vsel %vm4148_vm4, %v10708_v39, %v4147_v15  ;;  %v10777_v33 = vmul.f32 2.0, %v10611_v35  ;;  %vm4141_vm8 = vcmp.eq.f32.partialorder %v10762_v57, inf }
 0x35e   :  { %v3283_v32 = vadd.f32 %v3282_v49, %v3281_v1  ;;  %v3324_v63 = vrot.slane %v3323_v11, 4  ;;  %v4559_v47 = vmul.f32 1.442695, %v4511_v43  ;;  %v4152_v21 = vsel %vm4150_vm5, %v4151_v14, %v4149_v0  ;;  %v11828_v14 = vld [vmem:[#allocation39_spill] sm:$0xff] }
 0x35f   :  { %v6950_v4 = vpop.eup %6949  ;;  %v4340_v34 = vsub.f32 0.0, %v4152_v21  ;;  %v4259_v52 = vmul.f32 %v6948_v28, %v10730_v18  ;;  %6965 = vrsqrt.f32 %v10762_v57  ;;  %v10786_v60 = vadd.f32 %v10492_v55, %v11828_v14 }
 0x360   :  { %v6952_v9 = vpop.eup %6951  ;;  %v3284_v51 = vrot.slane %v3283_v32, 2  ;;  %v3325_v6 = vadd.f32 %v3324_v63, %v3323_v11  ;;  %6967 = vpow2.f32 %v4559_v47  ;;  %v4466_v2 = vsub.f32 0.5, %v6950_v4  ;;  %v10790_v11 = vpop.f32.mrb[56].mxu1 }
 0x361   :  { %v4482_v58 = vsub.f32 0.5, %v6952_v9  ;;  %v10779_v1 = vmul.f32 50.0, %v4340_v34  ;;  %v4261_v39 = vsel %vm4260_vm6, %v10730_v18, %v4259_v52  ;;  %v4067_v47 = vsub.f32 %v10786_v60, %v10777_v33  ;;  %v11829_v52 = vld [vmem:[#allocation121_spill] sm:$0xff] }
 0x362   :  { %v6954_v10 = vpop.eup %6953  ;;  %v3285_v7 = vadd.f32 %v3284_v51, %v3283_v32  ;;  %v3326_v35 = vrot.slane %v3325_v6, 2  ;;  %v4498_v15 = vmul.f32 5.0, %v4466_v2  ;;  %v4264_v49 = vsel %vm4262_vm7, %v4263_v48, %v4261_v39  ;;  %v11830_v48 = vld [vmem:[#allocation61_spill] sm:$0xff] }
 0x363   :  { %v6956_v43 = vpop.eup %6955  ;;  %v4688_v28 = vmul.f32 %v6954_v10, %v11744_v56  ;;  %v4514_v0 = vmul.f32 5.0, %v4482_v58  ;;  %v4356_v63 = vsub.f32 0.0, %v4264_v49  ;;  %vm4143_vm9 = vcmp.eq.f32.partialorder %v10762_v57, 0.0 }
 0x364   :  { %v6958_v21 = vpop.eup %6957  ;;  %v3286_v4 = vrot.slane %v3285_v7, 1  ;;  %v3327_v34 = vadd.f32 %v3326_v35, %v3325_v6  ;;  %v3265_v32 = vmul.f32 %v6956_v43, %v11829_v52  ;;  %v3301_v9 = vadd.f32 %v6956_v43, %v10686_v31  ;;  %v11831_v35 = vld [vmem:[#allocation62_spill] sm:$0xff] }
 0x365   :  { %v6960_v51 = vpop.eup %6959  ;;  %v4721_v18 = vmul.f32 1.442695, %v4688_v28  ;;  %v4704_v2 = vmul.f32 %v6958_v21, %v11830_v48  ;;  %v4533_v39 = vmul.f32 1.442695, %v4498_v15  ;;  %v4565_v14 = vmul.f32 1.442695, %v4514_v0 }
 0x366   :  { %v6962_v61 = vpop.eup %6961  ;;  %v3287_v56 = vadd.f32 %v3286_v4, %v3285_v7  ;;  %v3328_v58 = vrot.slane %v3327_v34, 1  ;;  %v3302_v10 = vadd.f32 %v10737_v8, %v3301_v9  ;;  %v3343_v33 = vadd.f32 %v10700_v17, %v3265_v32  ;;  %v10804_v0 = vpop.f32.mrb[57].mxu0 }
 0x367   :  { %v6964_v6 = vpop.eup %6963  ;;  %6969 = vpow2.f32 %v4721_v18  ;;  %v4753_v60 = vmul.f32 1.442695, %v4704_v2  ;;  %v4687_v31 = vmul.f32 %v6960_v51, %v11831_v35  ;;  %v4465_v49 = vsub.f32 0.5, %v6962_v61 }
 0x368   :  { %v3329_v43 = vadd.f32 %v3328_v58, %v3327_v34  ;;  %v3351_v15 = vadd.f32 1.0, %v3287_v56  ;;  %v3303_v28 = vrot.slane %v3302_v10, 4  ;;  %v3344_v7 = vadd.f32 %v3343_v33, %v10745_v30 }
 0x369   :  { %v6966_v8 = vpop.eup %6965  ;;  %6971 = vpow2.f32 %v4753_v60  ;;  %v4719_v17 = vmul.f32 1.442695, %v4687_v31  ;;  %v4497_v21 = vmul.f32 5.0, %v4465_v49  ;;  %v4481_v4 = vsub.f32 0.5, %v6964_v6 }
 0x36a   :  { %v6968_v32 = vpop.eup %6967  ;;  %6973 = vlog2.f32 %v3351_v15  ;;  %v3357_v9 = vadd.f32 1.0, %v3329_v43  ;;  %v3304_v18 = vadd.f32 %v3303_v28, %v3302_v10  ;;  %v3345_v51 = vrot.slane %v3344_v7, 4 }
 0x36b   :  { %6975 = vpow2.f32 %v4719_v17  ;;  %v4607_v61 = vadd.f32 1.0, %v6968_v32  ;;  %v4531_v48 = vmul.f32 1.442695, %v4497_v21  ;;  %v4513_v34 = vmul.f32 5.0, %v4481_v4  ;;  %v10817_v17 = vpop.f32.mrb[57].mxu1  ;;  %v11832_v4 = vld [vmem:[#allocation42_spill] sm:$0xff] }
 0x36c   :  { %6977 = vlog2.f32 %v3357_v9  ;;  %v3305_v2 = vrot.slane %v3304_v18, 2  ;;  %v3346_v56 = vadd.f32 %v3345_v51, %v3344_v7  ;;  %v4388_v30 = vmul.f32 50.0, %v4356_v63 }
 0x36d   :  { %6979 = vrcp.f32 %v4607_v61  ;;  %v4563_v58 = vmul.f32 1.442695, %v4513_v34  ;;  %v4140_v33 = vmul.f32 %v6966_v8, %v10762_v57  ;;  %v4144_v60 = vand.u32 2147483648, %v10762_v57 }
 0x36e   :  { %v3306_v6 = vadd.f32 %v3305_v2, %v3304_v18  ;;  %v3347_v35 = vrot.slane %v3346_v56, 2  ;;  %6981 = vpow2.f32 %v4533_v39  ;;  %v4409_v10 = vmul.f32 1.442695, %v10779_v1  ;;  %v11833_v2 = vld [vmem:[#allocation10_spill] sm:$0xff] }
 0x36f   :  { %6983 = vpow2.f32 %v4565_v14  ;;  %v4441_v31 = vmul.f32 1.442695, %v4388_v30  ;;  %v4142_v49 = vsel %vm4141_vm8, %v10762_v57, %v4140_v33  ;;  %v10812_v43 = vmax.f32 %v4067_v47, 0.0 }
 0x370   :  { %v3307_v63 = vrot.slane %v3306_v6, 1  ;;  %v3348_v15 = vadd.f32 %v3347_v35, %v3346_v56  ;;  %6985 = vpow2.f32 %v4531_v48  ;;  %v4145_v28 = vsel %vm4143_vm9, %v4144_v60, %v4142_v49 }
 0x371   :  { %v6970_v7 = vpop.eup %6969  ;;  %vm4913_vm10 = vcmask 1040384   ;;  %6987 = vpow2.f32 %v4563_v58  ;;  %v4339_v39 = vsub.f32 0.0, %v4145_v28  ;;  %v3604_v32 = vadd.f32 %v10469_v54, %v11832_v4 }
 0x372   :  { %v3308_v8 = vadd.f32 %v3307_v63, %v3306_v6  ;;  %v3349_v1 = vrot.slane %v3348_v15, 1  ;;  %v4784_v14 = vmul.f32 %v6970_v7, %v9438_v13  ;;  %6989 = vpow2.f32 %v4409_v10 }
 0x373   :  { %v10819_v21 = vpop.eup %6971  ;;  %6991 = vpow2.f32 %v4441_v31  ;;  %v4371_v47 = vmul.f32 50.0, %v4339_v39  ;;  %v4022_v57 = vmul.f32 2.0, %v10669_v23  ;;  %v3620_v56 = vadd.f32 %v10492_v55, %v11833_v2 }
 0x374   :  { %v6974_v9 = vpop.eup %6973  ;;  %v3350_v18 = vadd.f32 %v3349_v1, %v3348_v15  ;;  %v3352_v51 = vadd.f32 1.0, %v3308_v8  ;;  %v10826_v61 = vmul.f32 %v10819_v21, %v9441_v22  ;;  %6993 = vrsqrt.f32 %v10812_v43 }
 0x375   :  { %v6976_v13 = vpop.eup %6975  ;;  %v4407_v48 = vmul.f32 1.442695, %v4371_v47  ;;  %v4054_v34 = vsub.f32 %v3604_v32, %v4022_v57  ;;  %v4038_v30 = vmul.f32 2.0, %v10688_v38  ;;  %v3354_v22 = vmul.f32 0.6931472, %v6974_v9  ;;  %v11834_v47 = vld [vmem:[#allocation9_spill] sm:$0xff] }
 0x376   :  { %v6978_v58 = vpop.eup %6977  ;;  %6995 = vlog2.f32 %v3352_v51  ;;  %v3358_v23 = vadd.f32 1.0, %v3350_v18  ;;  %v4783_v33 = vmul.f32 %v6976_v13, %v9444_v26  ;;  %v10833_v60 = vadd.f32 %v6976_v13, %v6970_v7  ;;  %v10852_v51 = vpop.f32.mrb[58].mxu0 }
 0x377   :  { %v6980_v6 = vpop.eup %6979  ;;  %v3360_v35 = vmul.f32 0.6931472, %v6978_v58  ;;  %6997 = vpow2.f32 %v4407_v48  ;;  %v10835_v10 = vmax.f32 %v4054_v34, 0.0  ;;  %v4070_v38 = vsub.f32 %v3620_v56, %v4038_v30  ;;  %v10854_v13 = vpop.f32.mrb[58].mxu1  ;;  %v11835_v58 = vld [vmem:[#allocation41_spill] sm:$0xff] }
 0x378   :  { %v6982_v31 = vpop.eup %6981  ;;  %6999 = vlog2.f32 %v3358_v23  ;;  %v10837_v49 = vadd.f32 %v4784_v14, %v4783_v33  ;;  %v4703_v63 = vmul.f32 %v6980_v6, %v9327_v50  ;;  %vm4253_vm11 = vcmp.eq.f32.partialorder %v10812_v43, inf }
 0x379   :  { %v6984_v15 = vpop.eup %6983  ;;  %v3363_v28 = vadd.f32 %v3360_v35, %v3354_v22  ;;  %v4594_v39 = vadd.f32 1.0, %v6982_v31  ;;  %7001 = vrsqrt.f32 %v10835_v10  ;;  %vm4255_vm12 = vcmp.eq.f32.partialorder %v10812_v43, 0.0 }
 0x37a   :  { %v6986_v26 = vpop.eup %6985  ;;  %v4751_v7 = vmul.f32 1.442695, %v4703_v63  ;;  %v4610_v8 = vadd.f32 1.0, %v6984_v15  ;;  %v3603_v4 = vadd.f32 %v10469_v54, %v11834_v47  ;;  %v10849_v9 = vmax.f32 %v4070_v38, 0.0  ;;  %v10866_v63 = vpop.f32.mrb[59].mxu0 }
 0x37b   :  { %v6988_v1 = vpop.eup %6987  ;;  %v10845_v14 = vsel %vm4913_vm10, %v10074_v42, %v3363_v28  ;;  %7003 = vrcp.f32 %v4594_v39  ;;  %v4593_v50 = vadd.f32 1.0, %v6986_v26  ;;  %v4021_v18 = vmul.f32 2.0, %v10721_v36 }
 0x37c   :  { %v6990_v32 = vpop.eup %6989  ;;  %7005 = vpow2.f32 %v4751_v7  ;;  %v4609_v57 = vadd.f32 1.0, %v6988_v1  ;;  %v4256_v34 = vand.u32 2147483648, %v10812_v43  ;;  %vm4162_vm13 = vcmp.eq.f32.partialorder %v10835_v10, inf }
 0x37d   :  { %v6992_v48 = vpop.eup %6991  ;;  %7007 = vrcp.f32 %v4610_v8  ;;  %v4468_v42 = vsub.f32 0.5, %v6990_v32  ;;  %v4053_v30 = vsub.f32 %v3603_v4, %v4021_v18  ;;  %v3619_v23 = vadd.f32 %v10492_v55, %v11835_v58 }
 0x37e   :  { %v6994_v2 = vpop.eup %6993  ;;  %7009 = vrcp.f32 %v4593_v50  ;;  %v4484_v56 = vsub.f32 0.5, %v6992_v48  ;;  %v4037_v6 = vmul.f32 2.0, %v10741_v24  ;;  %vm4164_vm14 = vcmp.eq.f32.partialorder %v10835_v10, 0.0 }
 0x37f   :  { %7011 = vrcp.f32 %v4609_v57  ;;  %v4500_v36 = vmul.f32 5.0, %v4468_v42  ;;  %v4252_v33 = vmul.f32 %v6994_v2, %v10812_v43  ;;  %v10864_v31 = vmax.f32 %v4053_v30, 0.0  ;;  %v10881_v30 = vpop.f32.mrb[59].mxu1 }
 0x380   :  { %v6996_v22 = vpop.eup %6995  ;;  %v4516_v35 = vmul.f32 5.0, %v4484_v56  ;;  %7013 = vrsqrt.f32 %v10849_v9  ;;  %v4165_v39 = vand.u32 2147483648, %v10835_v10  ;;  %v4069_v26 = vsub.f32 %v3619_v23, %v4037_v6 }
 0x381   :  { %v6998_v38 = vpop.eup %6997  ;;  %v4537_v15 = vmul.f32 1.442695, %v4500_v36  ;;  %v4254_v28 = vsel %vm4253_vm11, %v10812_v43, %v4252_v33  ;;  %7015 = vrsqrt.f32 %v10864_v31  ;;  %v3356_v47 = vmul.f32 0.6931472, %v6996_v22 }
 0x382   :  { %v7000_v24 = vpop.eup %6999  ;;  %v4569_v7 = vmul.f32 1.442695, %v4516_v35  ;;  %v4467_v8 = vsub.f32 0.5, %v6998_v38  ;;  %v4257_v1 = vsel %vm4255_vm12, %v4256_v34, %v4254_v28  ;;  %vm4274_vm15 = vcmp.eq.f32.partialorder %v10849_v9, inf  ;;  %v11836_v34 = vld [vmem:[#allocation13_spill] sm:$0xff] }
 0x383   :  { %v7002_v50 = vpop.eup %7001  ;;  %v3362_v4 = vmul.f32 0.6931472, %v7000_v24  ;;  %7017 = vpow2.f32 %v4537_v15  ;;  %v4355_v32 = vsub.f32 0.0, %v4257_v1  ;;  %vm4276_vm0 = vcmp.eq.f32.partialorder %v10849_v9, 0.0 }
 0x384   :  { %7019 = vpow2.f32 %v4569_v7  ;;  %v4499_v57 = vmul.f32 5.0, %v4467_v8  ;;  %v4161_v18 = vmul.f32 %v7002_v50, %v10835_v10  ;;  %v4277_v43 = vand.u32 2147483648, %v10849_v9  ;;  %v11837_v7 = vld [vmem:[#allocation63_spill] sm:$0xff] }
 0x385   :  { %v7004_v48 = vpop.eup %7003  ;;  %v3364_v42 = vadd.f32 %v3362_v4, %v3356_v47  ;;  %v4387_v2 = vmul.f32 50.0, %v4355_v32  ;;  %v3606_v56 = vadd.f32 %v10469_v54, %v11836_v34  ;;  %vm4155_vm1 = vcmp.eq.f32.partialorder %v10864_v31, inf  ;;  %v11839_v32 = vld [vmem:[#allocation65_spill] sm:$0xff] }
 0x386   :  { %v7006_v58 = vpop.eup %7005  ;;  %v4690_v23 = vmul.f32 %v7004_v48, %v9332_v62  ;;  %v4535_v36 = vmul.f32 1.442695, %v4499_v57  ;;  %v4163_v33 = vsel %vm4162_vm13, %v10835_v10, %v4161_v18  ;;  %v10888_v6 = vmax.f32 %v4069_v26, 0.0 }
 0x387   :  { %v7008_v22 = vpop.eup %7007  ;;  %v10892_v35 = vsel %vm4913_vm10, %v10084_v59, %v3364_v42  ;;  %v4799_v38 = vmul.f32 %v7006_v58, %v9447_v46  ;;  %v10896_v15 = vadd.f32 %v7006_v58, %v10819_v21  ;;  %v4439_v62 = vmul.f32 1.442695, %v4387_v2  ;;  %v11838_v59 = vld [vmem:[#allocation64_spill] sm:$0xff] }
 0x388   :  { %v7010_v28 = vpop.eup %7009  ;;  %v4725_v24 = vmul.f32 1.442695, %v4690_v23  ;;  %v4706_v8 = vmul.f32 %v7008_v22, %v11837_v7  ;;  %7021 = vpow2.f32 %v4535_v36  ;;  %v4166_v26 = vsel %vm4164_vm14, %v4165_v39, %v4163_v33  ;;  %v10915_v36 = vpop.f32.mrb[60].mxu0 }
 0x389   :  { %v7012_v1 = vpop.eup %7011  ;;  %v10902_v50 = vadd.f32 %v10826_v61, %v4799_v38  ;;  %v4689_v47 = vmul.f32 %v7010_v28, %v11838_v59  ;;  %7023 = vpow2.f32 %v4439_v62  ;;  %v4342_v46 = vsub.f32 0.0, %v4166_v26 }
 0x38a   :  { %v7014_v4 = vpop.eup %7013  ;;  %7025 = vpow2.f32 %v4725_v24  ;;  %v4757_v21 = vmul.f32 1.442695, %v4706_v8  ;;  %v4705_v57 = vmul.f32 %v7012_v1, %v11839_v32  ;;  %v4024_v18 = vmul.f32 2.0, %v10765_v44  ;;  %v11840_v1 = vld [vmem:[#allocation21_spill] sm:$0xff] }
 0x38b   :  { %v4723_v48 = vmul.f32 1.442695, %v4689_v47  ;;  %v4374_v42 = vmul.f32 50.0, %v4342_v46  ;;  %v4273_v10 = vmul.f32 %v7014_v4, %v10849_v9  ;;  %7027 = vrsqrt.f32 %v10888_v6  ;;  %v7016_v39 = vpop.eup %7015 }
 0x38c   :  { %7029 = vpow2.f32 %v4757_v21  ;;  %v4755_v61 = vmul.f32 1.442695, %v4705_v57  ;;  %vm4157_vm2 = vcmp.eq.f32.partialorder %v10864_v31, 0.0  ;;  %v4158_v2 = vand.u32 2147483648, %v10864_v31 }
 0x38d   :  { %v7018_v34 = vpop.eup %7017  ;;  %7031 = vpow2.f32 %v4723_v48  ;;  %v4413_v58 = vmul.f32 1.442695, %v4374_v42  ;;  %v4275_v44 = vsel %vm4274_vm15, %v10849_v9, %v4273_v10  ;;  %v4154_v23 = vmul.f32 %v7016_v39, %v10864_v31  ;;  %v11841_v48 = vld [vmem:[#allocation43_spill] sm:$0xff]  ;;  %v11842_v39 = vld [vmem:[#allocation92_spill] sm:$0xff] }
 0x38e   :  { %v7020_v33 = vpop.eup %7019  ;;  %7033 = vpow2.f32 %v4755_v61  ;;  %v4596_v22 = vadd.f32 1.0, %v7018_v34  ;;  %v4278_v38 = vsel %vm4276_vm0, %v4277_v43, %v4275_v44  ;;  %v4056_v62 = vsub.f32 %v3606_v56, %v4024_v18 }
 0x38f   :  { %v4612_v28 = vadd.f32 1.0, %v7020_v33  ;;  %7035 = vpow2.f32 %v4413_v58  ;;  %v4358_v24 = vsub.f32 0.0, %v4278_v38  ;;  %v4156_v7 = vsel %vm4155_vm1, %v10864_v31, %v4154_v23  ;;  %v11843_v38 = vld [vmem:[#allocation93_spill] sm:$0xff] }
 0x390   :  { %7037 = vrcp.f32 %v4596_v22  ;;  %v4159_v8 = vsel %vm4157_vm2, %v4158_v2, %v4156_v7  ;;  %v10924_v26 = vmax.f32 %v4056_v62, 0.0  ;;  %v3622_v59 = vadd.f32 %v10492_v55, %v11840_v1 }
 0x391   :  { %7039 = vrcp.f32 %v4612_v28  ;;  %v4390_v9 = vmul.f32 50.0, %v4358_v24  ;;  %v4341_v43 = vsub.f32 0.0, %v4159_v8  ;;  %v4040_v56 = vmul.f32 2.0, %v10790_v11 }
 0x392   :  { %v7022_v47 = vpop.eup %7021  ;;  %vm4267_vm3 = vcmp.eq.f32.partialorder %v10888_v6, inf  ;;  %7041 = vrsqrt.f32 %v10924_v26  ;;  %vm4269_vm4 = vcmp.eq.f32.partialorder %v10888_v6, 0.0  ;;  %v3605_v42 = vadd.f32 %v10469_v54, %v11841_v48 }
 0x393   :  { %v7024_v46 = vpop.eup %7023  ;;  %v4595_v4 = vadd.f32 1.0, %v7022_v47  ;;  %v4445_v21 = vmul.f32 1.442695, %v4390_v9  ;;  %v4373_v31 = vmul.f32 50.0, %v4341_v43  ;;  %v4072_v32 = vsub.f32 %v3622_v59, %v4040_v56  ;;  %v10952_v47 = vpop.f32.mrb[60].mxu1 }
 0x394   :  { %v7026_v57 = vpop.eup %7025  ;;  %v4483_v18 = vsub.f32 0.5, %v7024_v46  ;;  %v4023_v10 = vmul.f32 2.0, %v10804_v0  ;;  %v4270_v33 = vand.u32 2147483648, %v10888_v6  ;;  %vm4176_vm5 = vcmp.eq.f32.partialorder %v10924_v26, inf }
 0x395   :  { %v7028_v11 = vpop.eup %7027  ;;  %v4786_v61 = vmul.f32 %v7026_v57, %v11842_v39  ;;  %7043 = vrcp.f32 %v4595_v4  ;;  %v4411_v2 = vmul.f32 1.442695, %v4373_v31  ;;  %v10936_v34 = vmax.f32 %v4072_v32, 0.0  ;;  %v10961_v32 = vpop.f32.mrb[61].mxu0 }
 0x396   :  { %v7030_v58 = vpop.eup %7029  ;;  %v4515_v44 = vmul.f32 5.0, %v4483_v18  ;;  %7045 = vpow2.f32 %v4445_v21  ;;  %v4266_v23 = vmul.f32 %v7028_v11, %v10888_v6  ;;  %v4055_v0 = vsub.f32 %v3605_v42, %v4023_v10 }
 0x397   :  { %v7032_v22 = vpop.eup %7031  ;;  %v4802_v62 = vmul.f32 %v7030_v58, %v11843_v38  ;;  %7047 = vpow2.f32 %v4411_v2  ;;  %vm4178_vm6 = vcmp.eq.f32.partialorder %v10924_v26, 0.0  ;;  %v4179_v2 = vand.u32 2147483648, %v10924_v26 }
 0x398   :  { %v7034_v28 = vpop.eup %7033  ;;  %v4785_v24 = vmul.f32 %v7032_v22, %v11759_v19  ;;  %v4816_v7 = vadd.f32 %v7032_v22, %v10833_v60  ;;  %v4567_v8 = vmul.f32 1.442695, %v4515_v44  ;;  %v4268_v1 = vsel %vm4267_vm3, %v10888_v6, %v4266_v23 }
 0x399   :  { %v7036_v59 = vpop.eup %7035  ;;  %v4801_v9 = vmul.f32 %v7034_v28, %v11761_v5  ;;  %v4837_v43 = vadd.f32 %v7034_v28, %v10896_v15  ;;  %v4271_v56 = vsel %vm4269_vm4, %v4270_v33, %v4268_v1  ;;  %7049 = vrsqrt.f32 %v10936_v34 }
 0x39a   :  { %v7038_v19 = vpop.eup %7037  ;;  %v4858_v60 = vadd.f32 %v10837_v49, %v4785_v24  ;;  %v10955_v46 = vadd.f32 %v7026_v57, %v4816_v7  ;;  %7051 = vpow2.f32 %v4567_v8  ;;  %v4470_v4 = vsub.f32 0.5, %v7036_v59 }
 0x39b   :  { %v7040_v21 = vpop.eup %7039  ;;  %v4879_v31 = vadd.f32 %v10902_v50, %v4801_v9  ;;  %v4692_v5 = vmul.f32 %v7038_v19, %v11760_v27  ;;  %v10959_v15 = vadd.f32 %v7030_v58, %v4837_v43  ;;  %v4357_v6 = vsub.f32 0.0, %v4271_v56  ;;  %v10985_v9 = vpop.f32.mrb[61].mxu1 }
 0x39c   :  { %v7042_v18 = vpop.eup %7041  ;;  %v4708_v48 = vmul.f32 %v7040_v21, %v11762_v16  ;;  %v10964_v42 = vadd.f32 %v4858_v60, %v4786_v61  ;;  %v4502_v49 = vmul.f32 5.0, %v4470_v4  ;;  %v10971_v58 = vmax.f32 %v4055_v0, 0.0 }
 0x39d   :  { %v4729_v57 = vmul.f32 1.442695, %v4692_v5  ;;  %v10967_v10 = vadd.f32 %v4879_v31, %v4802_v62  ;;  %v4389_v11 = vmul.f32 50.0, %v4357_v6  ;;  %v4175_v50 = vmul.f32 %v7042_v18, %v10924_v26  ;;  %v11844_v62 = vld [vmem:[#allocation44_spill] sm:$0xff] }
 0x39e   :  { %v4761_v27 = vmul.f32 1.442695, %v4708_v48  ;;  %v4541_v39 = vmul.f32 1.442695, %v4502_v49  ;;  %v4039_v23 = vmul.f32 2.0, %v10817_v17  ;;  %v3621_v0 = vadd.f32 %v10492_v55, %v11844_v62  ;;  %v11845_v17 = vld [vmem:[#allocation48_spill] sm:$0xff] }
 0x39f   :  { %v7044_v44 = vpop.eup %7043  ;;  %7053 = vpow2.f32 %v4729_v57  ;;  %v4443_v16 = vmul.f32 1.442695, %v4389_v11  ;;  %v4177_v61 = vsel %vm4176_vm5, %v10924_v26, %v4175_v50  ;;  %vm4288_vm7 = vcmp.eq.f32.partialorder %v10936_v34, inf }
 0x3a0   :  { %v7046_v33 = vpop.eup %7045  ;;  %7055 = vpow2.f32 %v4761_v27  ;;  %v4691_v22 = vmul.f32 %v7044_v44, %v11763_v12  ;;  %v4180_v38 = vsel %vm4178_vm6, %v4179_v2, %v4177_v61  ;;  %v3608_v59 = vadd.f32 %v10469_v54, %v11845_v17 }
 0x3a1   :  { %v7048_v28 = vpop.eup %7047  ;;  %7057 = vpow2.f32 %v4541_v39  ;;  %v4486_v24 = vsub.f32 0.5, %v7046_v33  ;;  %v4344_v7 = vsub.f32 0.0, %v4180_v38  ;;  %v4071_v56 = vsub.f32 %v3621_v0, %v4039_v23  ;;  %v11846_v23 = vld [vmem:[#allocation2_spill] sm:$0xff]  ;;  %v11847_v38 = vld [vmem:[#allocation97_spill] sm:$0xff]  ;;  %v11015_v0 = vpop.f32.mrb[62].mxu0 }
 0x3a2   :  { %v4727_v8 = vmul.f32 1.442695, %v4691_v22  ;;  %v4469_v1 = vsub.f32 0.5, %v7048_v28  ;;  %7059 = vpow2.f32 %v4443_v16  ;;  %v4026_v21 = vmul.f32 2.0, %v10852_v51 }
 0x3a3   :  { %v7050_v12 = vpop.eup %7049  ;;  %v4518_v26 = vmul.f32 5.0, %v4486_v24  ;;  %v4376_v43 = vmul.f32 50.0, %v4344_v7  ;;  %7061 = vrsqrt.f32 %v10971_v58  ;;  %vm4290_vm8 = vcmp.eq.f32.partialorder %v10936_v34, 0.0 }
 0x3a4   :  { %v7052_v19 = vpop.eup %7051  ;;  %7063 = vpow2.f32 %v4727_v8  ;;  %v4501_v60 = vmul.f32 5.0, %v4469_v1  ;;  %v4287_v4 = vmul.f32 %v7050_v12, %v10936_v34  ;;  %v4291_v6 = vand.u32 2147483648, %v10936_v34 }
 0x3a5   :  { %v4611_v31 = vadd.f32 1.0, %v7052_v19  ;;  %v4573_v5 = vmul.f32 1.442695, %v4518_v26  ;;  %v4417_v48 = vmul.f32 1.442695, %v4376_v43  ;;  %v4058_v57 = vsub.f32 %v3608_v59, %v4026_v21 }
 0x3a6   :  { %v4539_v18 = vmul.f32 1.442695, %v4501_v60  ;;  %v4289_v49 = vsel %vm4288_vm7, %v10936_v34, %v4287_v4  ;;  %v10995_v50 = vmax.f32 %v4071_v56, 0.0  ;;  %vm4169_vm9 = vcmp.eq.f32.partialorder %v10971_v58, inf  ;;  %v11849_v60 = vld [vmem:[#allocation98_spill] sm:$0xff] }
 0x3a7   :  { %7065 = vrcp.f32 %v4611_v31  ;;  %v4292_v11 = vsel %vm4290_vm8, %v4291_v6, %v4289_v49  ;;  %v10997_v51 = vmax.f32 %v4058_v57, 0.0  ;;  %v4042_v2 = vmul.f32 2.0, %v10854_v13  ;;  %v11848_v13 = vld [vmem:[#allocation45_spill] sm:$0xff]  ;;  %v11850_v6 = vld [vmem:[#allocation46_spill] sm:$0xff] }
 0x3a8   :  { %7067 = vpow2.f32 %v4573_v5  ;;  %v4360_v27 = vsub.f32 0.0, %v4292_v11  ;;  %v4025_v44 = vmul.f32 2.0, %v10866_v63  ;;  %v3624_v33 = vadd.f32 %v10492_v55, %v11846_v23 }
 0x3a9   :  { %v7054_v39 = vpop.eup %7053  ;;  %7069 = vpow2.f32 %v4539_v18  ;;  %vm4171_vm10 = vcmp.eq.f32.partialorder %v10971_v58, 0.0  ;;  %v3607_v63 = vadd.f32 %v10469_v54, %v11848_v13  ;;  %v4172_v17 = vand.u32 2147483648, %v10971_v58 }
 0x3aa   :  { %v11002_v16 = vpop.eup %7055  ;;  %v4788_v34 = vmul.f32 %v7054_v39, %v11765_v40  ;;  %7071 = vpow2.f32 %v4417_v48  ;;  %v4392_v61 = vmul.f32 50.0, %v4360_v27  ;;  %v4074_v7 = vsub.f32 %v3624_v33, %v4042_v2 }
 0x3ab   :  { %v7058_v22 = vpop.eup %7057  ;;  %v11009_v62 = vmul.f32 %v11002_v16, %v11847_v38  ;;  %7073 = vrsqrt.f32 %v10995_v50  ;;  %v4284_v59 = vand.u32 2147483648, %v10995_v50  ;;  %v4057_v12 = vsub.f32 %v3607_v63, %v4025_v44 }
 0x3ac   :  { %v7060_v40 = vpop.eup %7059  ;;  %v4598_v28 = vadd.f32 1.0, %v7058_v22  ;;  %v4449_v24 = vmul.f32 1.442695, %v4392_v61  ;;  %7075 = vrsqrt.f32 %v10997_v51  ;;  %v11021_v56 = vmax.f32 %v4074_v7, 0.0  ;;  %v11044_v61 = vpop.f32.mrb[62].mxu1 }
 0x3ad   :  { %v7062_v8 = vpop.eup %7061  ;;  %v4485_v1 = vsub.f32 0.5, %v7060_v40  ;;  %v4041_v19 = vmul.f32 2.0, %v10881_v30  ;;  %vm4281_vm11 = vcmp.eq.f32.partialorder %v10995_v50, inf  ;;  %vm4283_vm12 = vcmp.eq.f32.partialorder %v10995_v50, 0.0 }
 0x3ae   :  { %v7064_v26 = vpop.eup %7063  ;;  %7077 = vrcp.f32 %v4598_v28  ;;  %v4168_v43 = vmul.f32 %v7062_v8, %v10971_v58  ;;  %vm4190_vm13 = vcmp.eq.f32.partialorder %v10997_v51, inf  ;;  %v3623_v30 = vadd.f32 %v10492_v55, %v11850_v6  ;;  %v11851_v28 = vld [vmem:[#allocation52_spill] sm:$0xff] }
 0x3af   :  { %v4787_v4 = vmul.f32 %v7064_v26, %v11849_v60  ;;  %v4818_v21 = vadd.f32 %v7064_v26, %v10955_v46  ;;  %v4517_v31 = vmul.f32 5.0, %v4485_v1  ;;  %7079 = vpow2.f32 %v4449_v24 }
 0x3b0   :  { %v4170_v5 = vsel %vm4169_vm9, %v10971_v58, %v4168_v43  ;;  %7081 = vrsqrt.f32 %v11021_v56  ;;  %vm4192_vm14 = vcmp.eq.f32.partialorder %v10997_v51, 0.0  ;;  %v11042_v44 = vmax.f32 %v4057_v12, 0.0 }
 0x3b1   :  { %v7066_v18 = vpop.eup %7065  ;;  %v4860_v46 = vadd.f32 %v10964_v42, %v4787_v4  ;;  %v11036_v48 = vadd.f32 %v7054_v39, %v4818_v21  ;;  %v4571_v49 = vmul.f32 1.442695, %v4517_v31  ;;  %v4173_v57 = vsel %vm4171_vm10, %v4172_v17, %v4170_v5 }
 0x3b2   :  { %v7068_v11 = vpop.eup %7067  ;;  %v4707_v27 = vmul.f32 %v7066_v18, %v11769_v45  ;;  %v4343_v2 = vsub.f32 0.0, %v4173_v57  ;;  %v4073_v42 = vsub.f32 %v3623_v30, %v4041_v19  ;;  %v4193_v40 = vand.u32 2147483648, %v10997_v51 }
 0x3b3   :  { %v7070_v23 = vpop.eup %7069  ;;  %v4614_v33 = vadd.f32 1.0, %v7068_v11  ;;  %v11046_v22 = vadd.f32 %v4860_v46, %v4788_v34  ;;  %7083 = vpow2.f32 %v4571_v49  ;;  %v11052_v24 = vadd.f32 %v10469_v54, %v11851_v28 }
 0x3b4   :  { %v7072_v39 = vpop.eup %7071  ;;  %v4759_v38 = vmul.f32 1.442695, %v4707_v27  ;;  %v4597_v58 = vadd.f32 1.0, %v7070_v23  ;;  %v4375_v13 = vmul.f32 50.0, %v4343_v2  ;;  %7085 = vrsqrt.f32 %v11042_v44 }
 0x3b5   :  { %v7074_v45 = vpop.eup %7073  ;;  %7087 = vrcp.f32 %v4614_v33  ;;  %v4472_v63 = vsub.f32 0.5, %v7072_v39  ;;  %vm4302_vm15 = vcmp.eq.f32.partialorder %v11021_v56, inf  ;;  %v11057_v12 = vmax.f32 %v4073_v42, 0.0  ;;  %v11852_v42 = vld [vmem:[#allocation53_spill] sm:$0xff] }
 0x3b6   :  { %v7076_v7 = vpop.eup %7075  ;;  %7089 = vpow2.f32 %v4759_v38  ;;  %v4415_v34 = vmul.f32 1.442695, %v4375_v13  ;;  %v4280_v8 = vmul.f32 %v7074_v45, %v10995_v50  ;;  %vm4304_vm0 = vcmp.eq.f32.partialorder %v11021_v56, 0.0 }
 0x3b7   :  { %7091 = vrcp.f32 %v4597_v58  ;;  %v4504_v1 = vmul.f32 5.0, %v4472_v63  ;;  %v4189_v17 = vmul.f32 %v7076_v7, %v10997_v51  ;;  %v4305_v19 = vand.u32 2147483648, %v11021_v56 }
 0x3b8   :  { %v7078_v26 = vpop.eup %7077  ;;  %7093 = vpow2.f32 %v4415_v34  ;;  %v4282_v43 = vsel %vm4281_vm11, %v10995_v50, %v4280_v8  ;;  %vm4183_vm1 = vcmp.eq.f32.partialorder %v11042_v44, inf  ;;  %vm4185_vm2 = vcmp.eq.f32.partialorder %v11042_v44, 0.0 }
 0x3b9   :  { %v7080_v60 = vpop.eup %7079  ;;  %v4694_v4 = vmul.f32 %v7078_v26, %v11770_v3  ;;  %v4545_v21 = vmul.f32 1.442695, %v4504_v1  ;;  %v4285_v31 = vsel %vm4283_vm12, %v4284_v59, %v4282_v43  ;;  %v4191_v5 = vsel %vm4190_vm13, %v10997_v51, %v4189_v17  ;;  %v11076_v59 = vpop.f32.mrb[63].mxu0 }
 0x3ba   :  { %v7082_v6 = vpop.eup %7081  ;;  %v4488_v30 = vsub.f32 0.5, %v7080_v60  ;;  %v4359_v18 = vsub.f32 0.0, %v4285_v31  ;;  %v4194_v46 = vsel %vm4192_vm14, %v4193_v40, %v4191_v5  ;;  %7095 = vrsqrt.f32 %v11057_v12  ;;  %v11853_v31 = vld [vmem:[#allocation74_spill] sm:$0xff] }
 0x3bb   :  { %v4733_v49 = vmul.f32 1.442695, %v4694_v4  ;;  %7097 = vpow2.f32 %v4545_v21  ;;  %v4346_v3 = vsub.f32 0.0, %v4194_v46  ;;  %v4301_v50 = vmul.f32 %v7082_v6, %v11021_v56 }
 0x3bc   :  { %v4520_v57 = vmul.f32 5.0, %v4488_v30  ;;  %v4391_v11 = vmul.f32 50.0, %v4359_v18  ;;  %v4186_v27 = vand.u32 2147483648, %v11042_v44  ;;  %v4028_v2 = vmul.f32 2.0, %v10915_v36 }
 0x3bd   :  { %v7084_v23 = vpop.eup %7083  ;;  %7099 = vpow2.f32 %v4733_v49  ;;  %v4378_v51 = vmul.f32 50.0, %v4346_v3  ;;  %v4303_v33 = vsel %vm4302_vm15, %v11021_v56, %v4301_v50  ;;  %v3626_v39 = vadd.f32 %v10492_v55, %v11852_v42 }
 0x3be   :  { %v7086_v38 = vpop.eup %7085  ;;  %v4613_v58 = vadd.f32 1.0, %v7084_v23  ;;  %v4577_v13 = vmul.f32 1.442695, %v4520_v57  ;;  %v4447_v45 = vmul.f32 1.442695, %v4391_v11  ;;  %v4306_v63 = vsel %vm4304_vm0, %v4305_v19, %v4303_v33 }
 0x3bf   :  { %vm4295_vm3 = vcmp.eq.f32.partialorder %v11057_v12, inf  ;;  %v7088_v36 = vpop.eup %7087  ;;  %v4421_v40 = vmul.f32 1.442695, %v4378_v51  ;;  %v4362_v28 = vsub.f32 0.0, %v4306_v63  ;;  %v4182_v7 = vmul.f32 %v7086_v38, %v11042_v44  ;;  %v11855_v63 = vld [vmem:[#allocation75_spill] sm:$0xff] }
 0x3c0   :  { %vm4297_vm4 = vcmp.eq.f32.partialorder %v11057_v12, 0.0  ;;  %v4298_v34 = vand.u32 2147483648, %v11057_v12  ;;  %v7090_v8 = vpop.eup %7089  ;;  %v4710_v1 = vmul.f32 %v7088_v36, %v11771_v25  ;;  %7101 = vrcp.f32 %v4613_v58 }
 0x3c1   :  { %v4060_v17 = vsub.f32 %v11052_v24, %v4028_v2  ;;  %v4044_v56 = vmul.f32 2.0, %v10952_v47  ;;  %v7092_v26 = vpop.eup %7091  ;;  %v4803_v43 = vmul.f32 %v7090_v8, %v11775_v53  ;;  %v4839_v19 = vadd.f32 %v7090_v8, %v10959_v15 }
 0x3c2   :  { %7103 = vpow2.f32 %v4577_v13  ;;  %v4394_v60 = vmul.f32 50.0, %v4362_v28  ;;  %v7094_v4 = vpop.eup %7093  ;;  %v4765_v21 = vmul.f32 1.442695, %v4710_v1  ;;  %v4693_v5 = vmul.f32 %v7092_v26, %v11853_v31 }
 0x3c3   :  { %7105 = vpow2.f32 %v4447_v45  ;;  %v4184_v25 = vsel %vm4183_vm1, %v11042_v44, %v4182_v7  ;;  %v4881_v24 = vadd.f32 %v10967_v10, %v4803_v43  ;;  %v11102_v47 = vadd.f32 %v11002_v16, %v4839_v19 }
 0x3c4   :  { %v4471_v6 = vsub.f32 0.5, %v7094_v4  ;;  %7107 = vpow2.f32 %v4421_v40  ;;  %v7096_v53 = vpop.eup %7095  ;;  %v4731_v15 = vmul.f32 1.442695, %v4693_v5  ;;  %v4453_v30 = vmul.f32 1.442695, %v4394_v60  ;;  %v11857_v4 = vld [vmem:[#allocation101_spill] sm:$0xff] }
 0x3c5   :  { %7109 = vpow2.f32 %v4765_v21  ;;  %v4187_v18 = vsel %vm4185_vm2, %v4186_v27, %v4184_v25  ;;  %v7098_v46 = vpop.eup %7097  ;;  %v11107_v49 = vadd.f32 %v4881_v24, %v11009_v62  ;;  %v4294_v10 = vmul.f32 %v7096_v53, %v11057_v12  ;;  %v11854_v27 = vld [vmem:[#allocation100_spill] sm:$0xff]  ;;  %v11858_v5 = vld [vmem:[#allocation50_spill] sm:$0xff] }
 0x3c6   :  { %v4503_v3 = vmul.f32 5.0, %v4471_v6  ;;  %v4345_v50 = vsub.f32 0.0, %v4187_v18  ;;  %7111 = vpow2.f32 %v4731_v15  ;;  %v4600_v16 = vadd.f32 1.0, %v7098_v46 }
 0x3c7   :  { %v11110_v57 = vmax.f32 %v4060_v17, 0.0  ;;  %v4076_v11 = vsub.f32 %v3626_v39, %v4044_v56  ;;  %v7100_v2 = vpop.eup %7099  ;;  %7113 = vpow2.f32 %v4453_v30  ;;  %v4296_v44 = vsel %vm4295_vm3, %v11057_v12, %v4294_v10  ;;  %v11856_v12 = vld [vmem:[#allocation3_spill] sm:$0xff] }
 0x3c8   :  { %v4543_v23 = vmul.f32 1.442695, %v4503_v3  ;;  %v4377_v51 = vmul.f32 50.0, %v4345_v50  ;;  %v4790_v62 = vmul.f32 %v7100_v2, %v11854_v27  ;;  %7115 = vrcp.f32 %v4600_v16 }
 0x3c9   :  { %v4299_v33 = vsel %vm4297_vm4, %v4298_v34, %v4296_v44  ;;  %v11119_v39 = vmax.f32 %v4076_v11, 0.0  ;;  %v4027_v13 = vmul.f32 2.0, %v10961_v32  ;;  %v3609_v34 = vadd.f32 %v10469_v54, %v11856_v12 }
 0x3ca   :  { %7117 = vpow2.f32 %v4543_v23  ;;  %v4419_v42 = vmul.f32 1.442695, %v4377_v51  ;;  %v4361_v38 = vsub.f32 0.0, %v4299_v33  ;;  %v7102_v58 = vpop.eup %7101  ;;  %v4207_v26 = vand.u32 2147483648, %v11110_v57  ;;  %v11860_v51 = vld [vmem:[#allocation76_spill] sm:$0xff] }
 0x3cb   :  { %7119 = vrsqrt.f32 %v11110_v57  ;;  %v4709_v36 = vmul.f32 %v7102_v58, %v11855_v63  ;;  %vm4204_vm5 = vcmp.eq.f32.partialorder %v11110_v57, inf  ;;  %v4059_v19 = vsub.f32 %v3609_v34, %v4027_v13 }
 0x3cc   :  { %v7104_v45 = vpop.eup %7103  ;;  %7121 = vpow2.f32 %v4419_v42  ;;  %v4393_v40 = vmul.f32 50.0, %v4361_v38  ;;  %v4043_v60 = vmul.f32 2.0, %v10985_v9  ;;  %vm4206_vm6 = vcmp.eq.f32.partialorder %v11110_v57, 0.0  ;;  %v11859_v9 = vld [vmem:[#allocation102_spill] sm:$0xff] }
 0x3cd   :  { %v7106_v28 = vpop.eup %7105  ;;  %v4616_v7 = vadd.f32 1.0, %v7104_v45  ;;  %7123 = vrsqrt.f32 %v11119_v39  ;;  %v4763_v1 = vmul.f32 1.442695, %v4709_v36  ;;  %v3625_v25 = vadd.f32 %v10492_v55, %v11858_v5  ;;  %v11861_v36 = vld [vmem:[#allocation57_spill] sm:$0xff] }
 0x3ce   :  { %v7108_v8 = vpop.eup %7107  ;;  %v4487_v17 = vsub.f32 0.5, %v7106_v28  ;;  %v4451_v56 = vmul.f32 1.442695, %v4393_v40  ;;  %vm4316_vm7 = vcmp.eq.f32.partialorder %v11119_v39, inf  ;;  %v11139_v53 = vmax.f32 %v4059_v19, 0.0 }
 0x3cf   :  { %v11127_v43 = vpop.eup %7109  ;;  %7125 = vrcp.f32 %v4616_v7  ;;  %v4474_v32 = vsub.f32 0.5, %v7108_v8  ;;  %vm4318_vm8 = vcmp.eq.f32.partialorder %v11119_v39, 0.0  ;;  %v4075_v16 = vsub.f32 %v3625_v25, %v4043_v60 }
 0x3d0   :  { %v11133_v21 = vmul.f32 %v11127_v43, %v11857_v4  ;;  %7127 = vpow2.f32 %v4763_v1  ;;  %v4519_v31 = vmul.f32 5.0, %v4487_v17  ;;  %v7112_v24 = vpop.eup %7111  ;;  %v4319_v38 = vand.u32 2147483648, %v11119_v39 }
 0x3d1   :  { %v4506_v6 = vmul.f32 5.0, %v4474_v32  ;;  %7129 = vpow2.f32 %v4451_v56  ;;  %v7114_v15 = vpop.eup %7113  ;;  %v4789_v30 = vmul.f32 %v7112_v24, %v11859_v9  ;;  %v4820_v18 = vadd.f32 %v7112_v24, %v11036_v48  ;;  %v11862_v32 = vld [vmem:[#allocation77_spill] sm:$0xff] }
 0x3d2   :  { %v4575_v46 = vmul.f32 1.442695, %v4519_v31  ;;  %v7116_v3 = vpop.eup %7115  ;;  %v4490_v10 = vsub.f32 0.5, %v7114_v15  ;;  %7131 = vrsqrt.f32 %v11139_v53  ;;  %v11155_v7 = vmax.f32 %v4075_v16, 0.0 }
 0x3d3   :  { %v4549_v50 = vmul.f32 1.442695, %v4506_v6  ;;  %v4862_v23 = vadd.f32 %v11046_v22, %v4789_v30  ;;  %v4696_v44 = vmul.f32 %v7116_v3, %v11860_v51  ;;  %v11147_v27 = vadd.f32 %v7100_v2, %v4820_v18 }
 0x3d4   :  { %v7118_v11 = vpop.eup %7117  ;;  %7133 = vpow2.f32 %v4575_v46  ;;  %v4522_v48 = vmul.f32 5.0, %v4490_v10  ;;  %v3612_v22 = vadd.f32 %v10469_v54, %v11861_v36  ;;  %vm4197_vm9 = vcmp.eq.f32.partialorder %v11139_v53, inf }
 0x3d5   :  { %v7120_v33 = vpop.eup %7119  ;;  %v4599_v42 = vadd.f32 1.0, %v7118_v11  ;;  %7135 = vpow2.f32 %v4549_v50  ;;  %v4737_v13 = vmul.f32 1.442695, %v4696_v44  ;;  %v11150_v45 = vadd.f32 %v4862_v23, %v4790_v62 }
 0x3d6   :  { %v7122_v58 = vpop.eup %7121  ;;  %v4203_v63 = vmul.f32 %v7120_v33, %v11110_v57  ;;  %v4581_v2 = vmul.f32 1.442695, %v4522_v48  ;;  %v4030_v62 = vmul.f32 2.0, %v11015_v0  ;;  %v11863_v0 = vld [vmem:[#allocation103_spill] sm:$0xff]  ;;  %v4200_v44 = vand.u32 2147483648, %v11139_v53 }
 0x3d7   :  { %v7124_v40 = vpop.eup %7123  ;;  %7137 = vrcp.f32 %v4599_v42  ;;  %v4473_v28 = vsub.f32 0.5, %v7122_v58  ;;  %vm4199_vm10 = vcmp.eq.f32.partialorder %v11139_v53, 0.0  ;;  %v11864_v58 = vld [vmem:[#allocation78_spill] sm:$0xff]  ;;  %v4046_v36 = vmul.f32 2.0, %v11044_v61 }
 0x3d8   :  { %7139 = vpow2.f32 %v4737_v13  ;;  %v4205_v12 = vsel %vm4204_vm5, %v11110_v57, %v4203_v63  ;;  %v4315_v34 = vmul.f32 %v7124_v40, %v11119_v39  ;;  %v4062_v3 = vsub.f32 %v3612_v22, %v4030_v62  ;;  %v4006_v22 = vpop.f32.mrb[63].mxu1 }
 0x3d9   :  { %v7126_v8 = vpop.eup %7125  ;;  %7141 = vpow2.f32 %v4581_v2  ;;  %v4505_v1 = vmul.f32 5.0, %v4473_v28  ;;  %v4208_v17 = vsel %vm4206_vm6, %v4207_v26, %v4205_v12  ;;  %v11865_v2 = vld [vmem:[#allocation104_spill] sm:$0xff]  ;;  %vm4309_vm11 = vcmp.eq.f32.partialorder %v11155_v7, inf }
 0x3da   :  { %v7128_v56 = vpop.eup %7127  ;;  %v4712_v19 = vmul.f32 %v7126_v8, %v11862_v32  ;;  %v4348_v60 = vsub.f32 0.0, %v4208_v17  ;;  %v4317_v4 = vsel %vm4316_vm7, %v11119_v39, %v4315_v34  ;;  %7143 = vrsqrt.f32 %v11155_v7  ;;  %v11866_v8 = vld [vmem:[#allocation19_spill] sm:$0xff] }
 0x3db   :  { %v7130_v31 = vpop.eup %7129  ;;  %v4805_v5 = vmul.f32 %v7128_v56, %v11863_v0  ;;  %v4841_v25 = vadd.f32 %v7128_v56, %v11102_v47  ;;  %v4547_v24 = vmul.f32 1.442695, %v4505_v1  ;;  %v4320_v57 = vsel %vm4318_vm8, %v4319_v38, %v4317_v4 }
 0x3dc   :  { %v4769_v26 = vmul.f32 1.442695, %v4712_v19  ;;  %v4489_v6 = vsub.f32 0.5, %v7130_v31  ;;  %v4380_v15 = vmul.f32 50.0, %v4348_v60  ;;  %v4364_v9 = vsub.f32 0.0, %v4320_v57  ;;  %v7132_v30 = vpop.eup %7131  ;;  %v11867_v19 = vld [vmem:[#allocation55_spill] sm:$0xff] }
 0x3dd   :  { %v4883_v18 = vadd.f32 %v11107_v49, %v4805_v5  ;;  %v11176_v46 = vadd.f32 %v11127_v43, %v4841_v25  ;;  %7145 = vpow2.f32 %v4547_v24  ;;  %v4196_v51 = vmul.f32 %v7132_v30, %v11139_v53 }
 0x3de   :  { %v7134_v50 = vpop.eup %7133  ;;  %7147 = vpow2.f32 %v4769_v26  ;;  %v4521_v10 = vmul.f32 5.0, %v4489_v6  ;;  %v4425_v47 = vmul.f32 1.442695, %v4380_v15  ;;  %v4396_v16 = vmul.f32 50.0, %v4364_v9  ;;  %v11868_v15 = vld [vmem:[#allocation105_spill] sm:$0xff] }
 0x3df   :  { %v7136_v11 = vpop.eup %7135  ;;  %v4615_v39 = vadd.f32 1.0, %v7134_v50  ;;  %v11179_v23 = vadd.f32 %v4883_v18, %v11133_v21  ;;  %v4198_v48 = vsel %vm4197_vm9, %v11139_v53, %v4196_v51  ;;  %v11187_v38 = vmax.f32 %v4062_v3, 0.0 }
 0x3e0   :  { %v4602_v49 = vadd.f32 1.0, %v7136_v11  ;;  %v4579_v33 = vmul.f32 1.442695, %v4521_v10  ;;  %7149 = vpow2.f32 %v4425_v47  ;;  %v4457_v43 = vmul.f32 1.442695, %v4396_v16  ;;  %v11869_v10 = vld [vmem:[#allocation79_spill] sm:$0xff] }
 0x3e1   :  { %v7138_v42 = vpop.eup %7137  ;;  %7151 = vrcp.f32 %v4615_v39  ;;  %v4201_v63 = vsel %vm4199_vm10, %v4200_v44, %v4198_v48  ;;  %v3628_v1 = vadd.f32 %v10492_v55, %v11866_v8  ;;  %v4312_v56 = vand.u32 2147483648, %v11155_v7  ;;  %v11870_v39 = vld [vmem:[#allocation80_spill] sm:$0xff] }
 0x3e2   :  { %v11189_v21 = vpop.eup %7139  ;;  %v4695_v13 = vmul.f32 %v7138_v42, %v11864_v58  ;;  %7153 = vrcp.f32 %v4602_v49  ;;  %v4347_v12 = vsub.f32 0.0, %v4201_v63  ;;  %v3611_v60 = vadd.f32 %v10469_v54, %v11867_v19  ;;  %v11871_v58 = vld [vmem:[#allocation56_spill] sm:$0xff] }
 0x3e3   :  { %v7142_v40 = vpop.eup %7141  ;;  %v11195_v28 = vmul.f32 %v11189_v21, %v11865_v2  ;;  %7155 = vpow2.f32 %v4579_v33  ;;  %v4078_v32 = vsub.f32 %v3628_v1, %v4046_v36  ;;  %v4029_v4 = vmul.f32 2.0, %v11076_v59 }
 0x3e4   :  { %v7144_v53 = vpop.eup %7143  ;;  %v4735_v34 = vmul.f32 1.442695, %v4695_v13  ;;  %v4618_v62 = vadd.f32 1.0, %v7142_v40  ;;  %7157 = vpow2.f32 %v4457_v43  ;;  %v4379_v17 = vmul.f32 50.0, %v4347_v12 }
 0x3e5   :  { %v4308_v61 = vmul.f32 %v7144_v53, %v11155_v7  ;;  %7159 = vrsqrt.f32 %v11187_v38  ;;  %vm4311_vm12 = vcmp.eq.f32.partialorder %v11155_v7, 0.0  ;;  %v11212_v26 = vmax.f32 %v4078_v32, 0.0 }
 0x3e6   :  { %7161 = vpow2.f32 %v4735_v34  ;;  %v4423_v0 = vmul.f32 1.442695, %v4379_v17  ;;  %v4061_v6 = vsub.f32 %v3611_v60, %v4029_v4  ;;  %vm4218_vm13 = vcmp.eq.f32.partialorder %v11187_v38, inf }
 0x3e7   :  { %v7146_v31 = vpop.eup %7145  ;;  %7163 = vrcp.f32 %v4618_v62  ;;  %v4310_v5 = vsel %vm4309_vm11, %v11155_v7, %v4308_v61  ;;  %vm4220_vm14 = vcmp.eq.f32.partialorder %v11187_v38, 0.0  ;;  %v4045_v16 = vmul.f32 2.0, %v4006_v22  ;;  %v11872_v62 = vld [vmem:[#allocation106_spill] sm:$0xff] }
 0x3e8   :  { %v11210_v25 = vpop.eup %7147  ;;  %v4601_v24 = vadd.f32 1.0, %v7146_v31  ;;  %v4313_v57 = vsel %vm4311_vm12, %v4312_v56, %v4310_v5  ;;  %7165 = vpow2.f32 %v4423_v0  ;;  %v11219_v7 = vmax.f32 %v4061_v6, 0.0  ;;  %v11874_v6 = vld [vmem:[#allocation82_spill] sm:$0xff] }
 0x3e9   :  { %v11216_v54 = vmul.f32 %v11210_v25, %v11868_v15  ;;  %v4363_v59 = vsub.f32 0.0, %v4313_v57  ;;  %v4221_v48 = vand.u32 2147483648, %v11187_v38  ;;  %v3627_v13 = vadd.f32 %v10492_v55, %v11871_v58  ;;  %v11873_v55 = vld [vmem:[#allocation81_spill] sm:$0xff] }
 0x3ea   :  { %v7150_v9 = vpop.eup %7149  ;;  %7167 = vrcp.f32 %v4601_v24  ;;  %vm4330_vm15 = vcmp.eq.f32.partialorder %v11212_v26, inf  ;;  %vm4332_vm0 = vcmp.eq.f32.partialorder %v11212_v26, 0.0  ;;  %vm4211_vm1 = vcmp.eq.f32.partialorder %v11219_v7, inf }
 0x3eb   :  { %v7152_v30 = vpop.eup %7151  ;;  %v4476_v18 = vsub.f32 0.5, %v7150_v9  ;;  %v4395_v3 = vmul.f32 50.0, %v4363_v59  ;;  %7169 = vrsqrt.f32 %v11212_v26  ;;  %v4077_v53 = vsub.f32 %v3627_v13, %v4045_v16 }
 0x3ec   :  { %v7154_v50 = vpop.eup %7153  ;;  %v4711_v47 = vmul.f32 %v7152_v30, %v11869_v10  ;;  %7171 = vrsqrt.f32 %v11219_v7  ;;  %vm4213_vm2 = vcmp.eq.f32.partialorder %v11219_v7, 0.0  ;;  %vm4916_vm5 = vcmask 1041408  }
 0x3ed   :  { %v7156_v11 = vpop.eup %7155  ;;  %v4698_v51 = vmul.f32 %v7154_v50, %v11870_v39  ;;  %v4508_v44 = vmul.f32 5.0, %v4476_v18  ;;  %v4455_v49 = vmul.f32 1.442695, %v4395_v3  ;;  %v11237_v32 = vmax.f32 %v4077_v53, 0.0 }
 0x3ee   :  { %v7158_v33 = vpop.eup %7157  ;;  %v4767_v43 = vmul.f32 1.442695, %v4711_v47  ;;  %v4617_v42 = vadd.f32 1.0, %v7156_v11  ;;  %v4333_v3 = vand.u32 2147483648, %v11212_v26  ;;  %v4214_v39 = vand.u32 2147483648, %v11219_v7 }
 0x3ef   :  { %v7160_v63 = vpop.eup %7159  ;;  %v4741_v36 = vmul.f32 1.442695, %v4698_v51  ;;  %v4553_v40 = vmul.f32 1.442695, %v4508_v44  ;;  %v4492_v2 = vsub.f32 0.5, %v7158_v33  ;;  %7173 = vpow2.f32 %v4455_v49 }
 0x3f0   :  { %v7162_v22 = vpop.eup %7161  ;;  %7175 = vpow2.f32 %v4767_v43  ;;  %v4217_v12 = vmul.f32 %v7160_v63, %v11187_v38  ;;  %v11876_v63 = vld [vmem:[#allocation108_spill] sm:$0xff]  ;;  %vm4323_vm3 = vcmp.eq.f32.partialorder %v11237_v32, inf  ;;  %vm4325_vm4 = vcmp.eq.f32.partialorder %v11237_v32, 0.0 }
 0x3f1   :  { %v7164_v34 = vpop.eup %7163  ;;  %v4791_v8 = vmul.f32 %v7162_v22, %v11872_v62  ;;  %v4822_v1 = vadd.f32 %v7162_v22, %v11147_v27  ;;  %7177 = vpow2.f32 %v4741_v36  ;;  %v4524_v17 = vmul.f32 5.0, %v4492_v2 }
 0x3f2   :  { %v4714_v61 = vmul.f32 %v7164_v34, %v11873_v55  ;;  %7179 = vrcp.f32 %v4617_v42  ;;  %v4219_v56 = vsel %vm4218_vm13, %v11187_v38, %v4217_v12  ;;  %v7166_v19 = vpop.eup %7165  ;;  %v11875_v42 = vld [vmem:[#allocation107_spill] sm:$0xff] }
 0x3f3   :  { %v4864_v60 = vadd.f32 %v11150_v45, %v4791_v8  ;;  %v11241_v4 = vadd.f32 %v11189_v21, %v4822_v1  ;;  %7181 = vpow2.f32 %v4553_v40  ;;  %v4585_v31 = vmul.f32 1.442695, %v4524_v17  ;;  %v11877_v34 = vld [vmem:[#allocation83_spill] sm:$0xff] }
 0x3f4   :  { %v7168_v27 = vpop.eup %7167  ;;  %v4773_v0 = vmul.f32 1.442695, %v4714_v61  ;;  %v4475_v5 = vsub.f32 0.5, %v7166_v19  ;;  %v4222_v24 = vsel %vm4220_vm14, %v4221_v48, %v4219_v56  ;;  %7183 = vrsqrt.f32 %v11237_v32 }
 0x3f5   :  { %v7170_v57 = vpop.eup %7169  ;;  %v4697_v15 = vmul.f32 %v7168_v27, %v11874_v6  ;;  %v11248_v59 = vadd.f32 %v4864_v60, %v11195_v28  ;;  %7185 = vpow2.f32 %v4585_v31  ;;  %v4350_v45 = vsub.f32 0.0, %v4222_v24  ;;  %v11878_v27 = vld [vmem:[#allocation109_spill] sm:$0xff] }
 0x3f6   :  { %7187 = vpow2.f32 %v4773_v0  ;;  %v4507_v21 = vmul.f32 5.0, %v4475_v5  ;;  %v4329_v9 = vmul.f32 %v7170_v57, %v11212_v26  ;;  %v7172_v30 = vpop.eup %7171 }
 0x3f7   :  { %v4739_v18 = vmul.f32 1.442695, %v4697_v15  ;;  %v4382_v38 = vmul.f32 50.0, %v4350_v45  ;;  %v4210_v10 = vmul.f32 %v7172_v30, %v11219_v7  ;;  %v11879_v45 = vld [vmem:[#allocation110_spill] sm:$0xff] }
 0x3f8   :  { %v4551_v50 = vmul.f32 1.442695, %v4507_v21  ;;  %v4331_v28 = vsel %vm4330_vm15, %v11212_v26, %v4329_v9 }
 0x3f9   :  { %v7174_v47 = vpop.eup %7173  ;;  %7189 = vpow2.f32 %v4739_v18  ;;  %v4429_v16 = vmul.f32 1.442695, %v4382_v38  ;;  %v4334_v11 = vsel %vm4332_vm0, %v4333_v3, %v4331_v28  ;;  %v4212_v33 = vsel %vm4211_vm1, %v11219_v7, %v4210_v10 }
 0x3fa   :  { %v7176_v51 = vpop.eup %7175  ;;  %7191 = vpow2.f32 %v4551_v50  ;;  %v4491_v44 = vsub.f32 0.5, %v7174_v47  ;;  %v4366_v49 = vsub.f32 0.0, %v4334_v11  ;;  %v4215_v58 = vsel %vm4213_vm2, %v4214_v39, %v4212_v33 }
 0x3fb   :  { %v7178_v43 = vpop.eup %7177  ;;  %v4807_v48 = vmul.f32 %v7176_v51, %v11875_v42  ;;  %v4843_v26 = vadd.f32 %v7176_v51, %v11176_v46  ;;  %7193 = vpow2.f32 %v4429_v16  ;;  %v4349_v22 = vsub.f32 0.0, %v4215_v58  ;;  %v11880_v51 = vld [vmem:[#allocation84_spill] sm:$0xff] }
 0x3fc   :  { %v7180_v13 = vpop.eup %7179  ;;  %v4794_v36 = vmul.f32 %v7178_v43, %v11876_v63  ;;  %v4523_v40 = vmul.f32 5.0, %v4491_v44  ;;  %v4398_v2 = vmul.f32 50.0, %v4366_v49 }
 0x3fd   :  { %v7182_v12 = vpop.eup %7181  ;;  %v4885_v53 = vadd.f32 %v11179_v23, %v4807_v48  ;;  %v4713_v62 = vmul.f32 %v7180_v13, %v11877_v34  ;;  %v4844_v7 = vadd.f32 %v11210_v25, %v4843_v26  ;;  %v4381_v17 = vmul.f32 50.0, %v4349_v22 }
 0x3fe   :  { %v7184_v8 = vpop.eup %7183  ;;  %v4604_v1 = vadd.f32 1.0, %v7182_v12  ;;  %v4583_v56 = vmul.f32 1.442695, %v4523_v40  ;;  %v4461_v31 = vmul.f32 1.442695, %v4398_v2  ;;  %v4326_v25 = vand.u32 2147483648, %v11237_v32 }
 0x3ff   :  { %v7186_v46 = vpop.eup %7185  ;;  %v4771_v55 = vmul.f32 1.442695, %v4713_v62  ;;  %v4886_v61 = vadd.f32 %v4885_v53, %v11216_v54  ;;  %v4322_v19 = vmul.f32 %v7184_v8, %v11237_v32  ;;  %v4427_v5 = vmul.f32 1.442695, %v4381_v17 }
 0x400   :  { %v7188_v60 = vpop.eup %7187  ;;  %7195 = vrcp.f32 %v4604_v1  ;;  %v4620_v23 = vadd.f32 1.0, %v7186_v46 }
 0x401   :  { %v4810_v0 = vmul.f32 %v7188_v60, %v11878_v27  ;;  %7197 = vpow2.f32 %v4771_v55  ;;  %v4324_v24 = vsel %vm4323_vm3, %v11237_v32, %v4322_v19 }
 0x402   :  { %7199 = vrcp.f32 %v4620_v23  ;;  %v4327_v57 = vsel %vm4325_vm4, %v4326_v25, %v4324_v24  ;;  %v11882_v25 = vld [vmem:[#allocation87_spill] sm:$0xff] }
 0x403   :  { %v7190_v54 = vpop.eup %7189  ;;  %7201 = vpow2.f32 %v4583_v56  ;;  %v4365_v6 = vsub.f32 0.0, %v4327_v57 }
 0x404   :  { %v7192_v15 = vpop.eup %7191  ;;  %v4793_v21 = vmul.f32 %v7190_v54, %v11879_v45  ;;  %v4824_v9 = vadd.f32 %v7190_v54, %v11241_v4  ;;  %7203 = vpow2.f32 %v4461_v31  ;;  %v11884_v45 = vld [vmem:[#allocation114_spill] sm:$0xff] }
 0x405   :  { %v7194_v30 = vpop.eup %7193  ;;  %v4603_v18 = vadd.f32 1.0, %v7192_v15  ;;  %7205 = vpow2.f32 %v4427_v5  ;;  %v4397_v38 = vmul.f32 50.0, %v4365_v6 }
 0x406   :  { %v4866_v3 = vadd.f32 %v11248_v59, %v4793_v21  ;;  %v4825_v50 = vadd.f32 %v7178_v43, %v4824_v9  ;;  %v4478_v28 = vsub.f32 0.5, %v7194_v30  ;;  %v11881_v59 = vld [vmem:[#allocation85_spill] sm:$0xff] }
 0x407   :  { %7207 = vrcp.f32 %v4603_v18  ;;  %v4459_v32 = vmul.f32 1.442695, %v4397_v38 }
 0x408   :  { %v4867_v10 = vadd.f32 %v4866_v3, %v4794_v36  ;;  %v4510_v47 = vmul.f32 5.0, %v4478_v28  ;;  %v11885_v28 = vld [vmem:[#allocation88_spill] sm:$0xff] }
 0x409   :  { %7209 = vpow2.f32 %v4459_v32 }
 0x40a   :  { %v7196_v16 = vpop.eup %7195  ;;  %v4557_v11 = vmul.f32 1.442695, %v4510_v47 }
 0x40b   :  { %v7198_v39 = vpop.eup %7197  ;;  %v4700_v44 = vmul.f32 %v7196_v16, %v11880_v51  ;;  %v11886_v51 = vld [vmem:[#allocation115_spill] sm:$0xff] }
 0x40c   :  { %v7200_v4 = vpop.eup %7199  ;;  %v4809_v49 = vmul.f32 %v7198_v39, %v11807_v41  ;;  %v4845_v33 = vadd.f32 %v7198_v39, %v4844_v7  ;;  %7211 = vpow2.f32 %v4557_v11 }
 0x40d   :  { %v7202_v42 = vpop.eup %7201  ;;  %v4745_v48 = vmul.f32 1.442695, %v4700_v44  ;;  %v4716_v43 = vmul.f32 %v7200_v4, %v11881_v59 }
 0x40e   :  { %v7204_v26 = vpop.eup %7203  ;;  %v4887_v58 = vadd.f32 %v4886_v61, %v4809_v49  ;;  %v4619_v13 = vadd.f32 1.0, %v7202_v42  ;;  %v4846_v63 = vadd.f32 %v7188_v60, %v4845_v33  ;;  %v11887_v42 = vld [vmem:[#allocation89_spill] sm:$0xff] }
 0x40f   :  { %v7206_v36 = vpop.eup %7205  ;;  %7213 = vpow2.f32 %v4745_v48  ;;  %v4777_v40 = vmul.f32 1.442695, %v4716_v43  ;;  %v4494_v2 = vsub.f32 0.5, %v7204_v26  ;;  %v11888_v26 = vld [vmem:[#allocation90_spill] sm:$0xff] }
 0x410   :  { %7215 = vrcp.f32 %v4619_v13  ;;  %v4888_v22 = vadd.f32 %v4887_v58, %v4810_v0  ;;  %v4477_v12 = vsub.f32 0.5, %v7206_v36  ;;  %v11883_v0 = vld [vmem:[#allocation113_spill] sm:$0xff] }
 0x411   :  { %v7208_v53 = vpop.eup %7207  ;;  %7217 = vpow2.f32 %v4777_v40  ;;  %v4526_v41 = vmul.f32 5.0, %v4494_v2 }
 0x412   :  { %v4699_v34 = vmul.f32 %v7208_v53, %v11808_v29  ;;  %v4509_v62 = vmul.f32 5.0, %v4477_v12  ;;  %v11889_v12 = vld [vmem:[#allocation116_spill] sm:$0xff] }
 0x413   :  { %v7210_v7 = vpop.eup %7209  ;;  %v4589_v8 = vmul.f32 1.442695, %v4526_v41  ;;  %v11890_v41 = vld [vmem:[#allocation118_spill] sm:$0xff] }
 0x414   :  { %v4743_v1 = vmul.f32 1.442695, %v4699_v34  ;;  %v4555_v17 = vmul.f32 1.442695, %v4509_v62  ;;  %v4493_v46 = vsub.f32 0.5, %v7210_v7  ;;  %v11891_v7 = vld [vmem:[#allocation119_spill] sm:$0xff] }
 0x415   :  { %7219 = vpow2.f32 %v4589_v8 }
 0x416   :  { %v7212_v55 = vpop.eup %7211  ;;  %7221 = vpow2.f32 %v4743_v1  ;;  %v4525_v61 = vmul.f32 5.0, %v4493_v46 }
 0x417   :  { %v4606_v56 = vadd.f32 1.0, %v7212_v55  ;;  %7223 = vpow2.f32 %v4555_v17 }
 0x418   :  { %v4587_v19 = vmul.f32 1.442695, %v4525_v61 }
 0x419   :  { %v7214_v60 = vpop.eup %7213  ;;  %7225 = vrcp.f32 %v4606_v56 }
 0x41a   :  { %v7216_v23 = vpop.eup %7215  ;;  %v4796_v31 = vmul.f32 %v7214_v60, %v11810_v20  ;;  %7227 = vpow2.f32 %v4587_v19 }
 0x41b   :  { %v7218_v29 = vpop.eup %7217  ;;  %v4715_v27 = vmul.f32 %v7216_v23, %v11882_v25 }
 0x41c   :  { %v4812_v5 = vmul.f32 %v7218_v29, %v11883_v0 }
 0x41d   :  { %v4775_v24 = vmul.f32 1.442695, %v4715_v27 }
 0x41f   :  { %v7220_v57 = vpop.eup %7219  ;;  %7229 = vpow2.f32 %v4775_v24 }
 0x420   :  { %v7222_v54 = vpop.eup %7221  ;;  %v4622_v6 = vadd.f32 1.0, %v7220_v57 }
 0x421   :  { %v7224_v15 = vpop.eup %7223  ;;  %v4795_v21 = vmul.f32 %v7222_v54, %v11884_v45  ;;  %v4826_v9 = vadd.f32 %v7222_v54, %v4825_v50 }
 0x422   :  { %7231 = vrcp.f32 %v4622_v6  ;;  %v4605_v30 = vadd.f32 1.0, %v7224_v15 }
 0x423   :  { %v7226_v18 = vpop.eup %7225  ;;  %v4868_v38 = vadd.f32 %v4867_v10, %v4795_v21  ;;  %v4827_v20 = vadd.f32 %v7214_v60, %v4826_v9 }
 0x424   :  { %v7228_v3 = vpop.eup %7227  ;;  %v4702_v32 = vmul.f32 %v7226_v18, %v11885_v28  ;;  %7233 = vrcp.f32 %v4605_v30 }
 0x425   :  { %v4869_v47 = vadd.f32 %v4868_v38, %v4796_v31  ;;  %v4621_v16 = vadd.f32 1.0, %v7228_v3 }
 0x426   :  { %v4749_v11 = vmul.f32 1.442695, %v4702_v32 }
 0x427   :  { %7235 = vrcp.f32 %v4621_v16 }
 0x428   :  { %7237 = vpow2.f32 %v4749_v11 }
 0x429   :  { %v7230_v39 = vpop.eup %7229 }
 0x42a   :  { %v4811_v44 = vmul.f32 %v7230_v39, %v11886_v51  ;;  %v4847_v4 = vadd.f32 %v7230_v39, %v4846_v63 }
 0x42c   :  { %v7232_v49 = vpop.eup %7231  ;;  %v4889_v50 = vadd.f32 %v4888_v22, %v4811_v44  ;;  %v4848_v33 = vadd.f32 %v7218_v29, %v4847_v4 }
 0x42d   :  { %v4718_v48 = vmul.f32 %v7232_v49, %v11887_v42 }
 0x42e   :  { %v7234_v10 = vpop.eup %7233  ;;  %v4890_v59 = vadd.f32 %v4889_v50, %v4812_v5 }
 0x42f   :  { %v4781_v43 = vmul.f32 1.442695, %v4718_v48  ;;  %v4701_v58 = vmul.f32 %v7234_v10, %v11888_v26 }
 0x431   :  { %v7236_v13 = vpop.eup %7235  ;;  %7239 = vpow2.f32 %v4781_v43  ;;  %v4747_v36 = vmul.f32 1.442695, %v4701_v58 }
 0x432   :  { %v7238_v40 = vpop.eup %7237  ;;  %v4717_v2 = vmul.f32 %v7236_v13, %v11826_v37 }
 0x433   :  { %v4798_v53 = vmul.f32 %v7238_v40, %v11889_v12  ;;  %7241 = vpow2.f32 %v4747_v36 }
 0x434   :  { %v4779_v63 = vmul.f32 1.442695, %v4717_v2 }
 0x436   :  { %7243 = vpow2.f32 %v4779_v63 }
 0x43b   :  { %v7240_v22 = vpop.eup %7239 }
 0x43c   :  { %v4814_v34 = vmul.f32 %v7240_v22, %v11890_v41 }
 0x43d   :  { %v7242_v62 = vpop.eup %7241 }
 0x43e   :  { %v4797_v8 = vmul.f32 %v7242_v62, %v11891_v7  ;;  %v4828_v1 = vadd.f32 %v7242_v62, %v4827_v20 }
 0x440   :  { %v7244_v17 = vpop.eup %7243  ;;  %v4829_v46 = vadd.f32 %v7238_v40, %v4828_v1  ;;  %v4870_v55 = vadd.f32 %v4869_v47, %v4797_v8 }
 0x441   :  { %v4813_v61 = vmul.f32 %v7244_v17, %v11829_v52  ;;  %v4849_v56 = vadd.f32 %v7244_v17, %v4848_v33 }
 0x442   :  { %v4830_v19 = vrot.slane %v4829_v46, 4  ;;  %v4871_v37 = vadd.f32 %v4870_v55, %v4798_v53 }
 0x443   :  { %v4850_v60 = vadd.f32 %v7240_v22, %v4849_v56  ;;  %v4891_v23 = vadd.f32 %v4890_v59, %v4813_v61 }
 0x444   :  { %v4831_v31 = vadd.f32 %v4830_v19, %v4829_v46  ;;  %v4872_v29 = vrot.slane %v4871_v37, 4 }
 0x445   :  { %v4851_v25 = vrot.slane %v4850_v60, 4  ;;  %v4892_v27 = vadd.f32 %v4891_v23, %v4814_v34 }
 0x446   :  { %v4832_v0 = vrot.slane %v4831_v31, 2  ;;  %v4873_v5 = vadd.f32 %v4872_v29, %v4871_v37 }
 0x447   :  { %v4852_v24 = vadd.f32 %v4851_v25, %v4850_v60  ;;  %v4893_v57 = vrot.slane %v4892_v27, 4 }
 0x448   :  { %v4833_v54 = vadd.f32 %v4832_v0, %v4831_v31  ;;  %v4874_v6 = vrot.slane %v4873_v5, 2 }
 0x449   :  { %v4853_v15 = vrot.slane %v4852_v24, 2  ;;  %v4894_v45 = vadd.f32 %v4893_v57, %v4892_v27 }
 0x44a   :  { %v4834_v21 = vrot.slane %v4833_v54, 1  ;;  %v4875_v9 = vadd.f32 %v4874_v6, %v4873_v5 }
 0x44b   :  { %v4854_v52 = vadd.f32 %v4853_v15, %v4852_v24  ;;  %v4895_v30 = vrot.slane %v4894_v45, 2 }
 0x44c   :  { %v4835_v18 = vadd.f32 %v4834_v21, %v4833_v54  ;;  %v4876_v38 = vrot.slane %v4875_v9, 1 }
 0x44d   :  { %v4855_v20 = vrot.slane %v4854_v52, 1  ;;  %v4896_v3 = vadd.f32 %v4895_v30, %v4894_v45 }
 0x44e   :  { %v4877_v28 = vadd.f32 %v4876_v38, %v4875_v9  ;;  %v4899_v32 = vadd.f32 1.0, %v4835_v18 }
 0x44f   :  { %v4856_v47 = vadd.f32 %v4855_v20, %v4854_v52  ;;  %v4897_v16 = vrot.slane %v4896_v3, 1 }
 0x450   :  { %7245 = vlog2.f32 %v4899_v32  ;;  %v4905_v11 = vadd.f32 1.0, %v4877_v28 }
 0x451   :  { %v4898_v39 = vadd.f32 %v4897_v16, %v4896_v3  ;;  %v4900_v51 = vadd.f32 1.0, %v4856_v47 }
 0x452   :  { %7247 = vlog2.f32 %v4905_v11 }
 0x453   :  { %7249 = vlog2.f32 %v4900_v51  ;;  %v4906_v44 = vadd.f32 1.0, %v4898_v39 }
 0x455   :  { %7251 = vlog2.f32 %v4906_v44 }
 0x45a   :  { %v7246_v4 = vpop.eup %7245 }
 0x45b   :  { %v4902_v33 = vmul.f32 0.6931472, %v7246_v4 }
 0x45c   :  { %v7248_v49 = vpop.eup %7247 }
 0x45d   :  { %v7250_v50 = vpop.eup %7249  ;;  %v4908_v42 = vmul.f32 0.6931472, %v7248_v49 }
 0x45e   :  { %v4904_v59 = vmul.f32 0.6931472, %v7250_v50 }
 0x45f   :  { %v7252_v48 = vpop.eup %7251  ;;  %v4911_v10 = vadd.f32 %v4908_v42, %v4902_v33 }
 0x460   :  { %v4910_v43 = vmul.f32 0.6931472, %v7252_v48 }
 0x461   :  { %v4917_v26 = vsel %vm4916_vm5, %v10845_v14, %v4911_v10 }
 0x462   :  { %4919 = vst [vmem:[%s11308_s4] sm:$0x7] %v4917_v26  ;;  %v4912_v58 = vadd.f32 %v4910_v43, %v4904_v59 }
 0x464   :  { %v4918_v13 = vsel %vm4916_vm5, %v10892_v35, %v4912_v58 }
 0x465   :  { %4920 = vst [vmem:[%s11308_s4 + $0x4] sm:$0x7] %v4918_v13 }

</bundles_post_ra>
